<compile_context>
chip_gen: v5e
topology: v5e:2x2
jax: 0.10.0
libtpu: 0.0.40
codegen_flags: <defaults>
</compile_context>

<pallas_src>
from functools import partial

import numpy as np
import jax
import jax.numpy as jnp
from jax.experimental import pallas as pl
from jax.experimental.pallas import tpu as pltpu

BASECOEFF = np.array(
    [-0.00463495665, -0.00363442646, 3.84904063e-18, 0.00576678319,
     0.0108358664, 0.010198079, -9.31747402e-18, -0.0175033181,
     -0.0317660068, -0.0284531643, 1.85181518e-17, 0.0442450253,
     0.0771733386, 0.067055491, -2.85299239e-17, -0.101548683,
     -0.178708388, -0.160004642, 3.61741232e-17, 0.287940558,
     0.625431459, 0.8970676, 1.00107877, 0.8970676, 0.625431459,
     0.287940558, 3.61741232e-17, -0.160004642, -0.178708388,
     -0.101548683, -2.85299239e-17, 0.067055491, 0.0771733386,
     0.0442450253, 1.85181518e-17, -0.0284531643, -0.0317660068,
     -0.0175033181, -9.31747402e-18, 0.010198079, 0.0108358664,
     0.00576678319, 3.84904063e-18, -0.00363442646, -0.00463495665],
    dtype=np.float32)  # 45 taps, stride=4, padding=21, output_padding=1


def _round_up(x, m):
    return (x + m - 1) // m * m


def _pick_row_tile(H, Wp):
    """Rows per chunk t:  t | H,  (t*Wp) % 8 == 0,  t*Wp <= 256 (vreg budget)."""
    cands = [t for t in range(1, H + 1) if H % t == 0 and (t * Wp) % 8 == 0]
    if not cands:
        return H
    good = [t for t in cands if t * Wp <= 256]
    return max(good) if good else min(cands)


# ----------------------------------------------------------------------------
# Kernel 1: depthwise ConvTranspose2d(stride=4, pad=21, out_pad=1, K=45)
# as a separable matmul pair; grid over the batch dimension.
# ----------------------------------------------------------------------------
def _upsample_kernel(x_ref, uh_ref, uwt_ref, o_ref):
    _, a, h, w = x_ref.shape
    Ho = uh_ref.shape[0]
    Wo = uwt_ref.shape[1]
    # W-pass: one matmul (a*h, w) @ (w, Wo)
    x = x_ref[...].reshape(a * h, w)
    g = jnp.dot(x, uwt_ref[...], preferred_element_type=jnp.float32)   # (a*h, Wo)
    g = g.reshape(a, h, Wo)
    # H-pass: batched over the a channels only, (Ho, h) @ (h, Wo)
    uh_b = jnp.broadcast_to(uh_ref[...][None, :, :], (a, Ho, h))
    out = jax.lax.dot_general(uh_b, g, (((2,), (1,)), ((0,), (0,))),
                              preferred_element_type=jnp.float32)      # (a, Ho, Wo)
    o_ref[...] = out.reshape(1, a, Ho, Wo)


def build_upsample_matrix(n_in):
    """U[j, i] = basecoeff[j + 21 - 4*i]  (matches ConvTranspose2d indexing)."""
    n_out = 4 * n_in
    U = np.zeros((n_out, n_in), np.float32)
    for j in range(n_out):
        for i in range(n_in):
            k = j + 21 - 4 * i
            if 0 <= k < 45:
                U[j, i] = BASECOEFF[k]
    return jnp.asarray(U)


def upsample4(HSI, uh, uwT):
    N, a, h, w = HSI.shape
    Ho, Wo = 4 * h, 4 * w
    return pl.pallas_call(
        _upsample_kernel,
        out_shape=jax.ShapeDtypeStruct((N, a, Ho, Wo), jnp.float32),
        grid=(N,),
        in_specs=[pl.BlockSpec((1, a, h, w), lambda n: (n, 0, 0, 0)),
                  pl.BlockSpec((Ho, h), lambda n: (0, 0)),
                  pl.BlockSpec((w, Wo), lambda n: (0, 0))],
        out_specs=pl.BlockSpec((1, a, Ho, Wo), lambda n: (n, 0, 0, 0)),
        compiler_params=pltpu.CompilerParams(dimension_semantics=("parallel",)),
    )(HSI, uh, uwT)


# ----------------------------------------------------------------------------
# Padded-flat layout helpers.
#   Buffer (PA, C):  row TOP + y*(W+2) + x == pixel (y, x); everything else 0.
#   A 3x3 tap (dy, dx) is then a contiguous sublane-shifted window of the
#   SAME buffer.
# ----------------------------------------------------------------------------
def to_padded_flat(x_nchw, TOP, PA):
    N, C, H, W = x_nchw.shape
    Wp = W + 2
    x = jnp.transpose(x_nchw, (0, 2, 3, 1))                 # NHWC
    x = jnp.pad(x, ((0, 0), (0, 0), (0, 2), (0, 0)))        # width -> W+2
    x = x.reshape(N, H * Wp, C)
    return jnp.pad(x, ((0, 0), (TOP, PA - TOP - H * Wp), (0, 0)))


def fuse_weight(w_hwio, cin_pad, b_msi, cout_pad, dot_dtype):
    """HWIO conv weight -> fused (9, cin_pad, cout_pad) weight.

    Columns [0, Cout) are the conv; columns [Cout, Cout+b_msi) hold a
    centre-tap identity that forwards the last b_msi *real* input channels
    (the MSI lanes) into the spare output lanes.
    """
    _, _, cin, cout = w_hwio.shape
    wf = jnp.zeros((9, cin_pad, cout_pad), jnp.float32)
    wf = wf.at[:, :cin, :cout].set(w_hwio.reshape(9, cin, cout).astype(jnp.float32))
    wf = wf.at[4, cin - b_msi:cin, cout:cout + b_msi].set(
        jnp.eye(b_msi, dtype=jnp.float32))
    return wf.astype(dot_dtype)


# ----------------------------------------------------------------------------
# Kernel 2: 3x3 conv (+bias, +lane-masked LeakyReLU) on padded-flat input,
# single fused 128-wide weight, row-chunked f32 accumulator, padded-flat out.
# ----------------------------------------------------------------------------
def _conv_layer_kernel(x_ref, w_ref, b_ref, out_ref, *,
                       H, W, TOP, CH, c_conv, apply_lrelu, dot_dtype):
    Wp = W + 2
    DATA = H * Wp
    n_chunks = DATA // CH
    PA = out_ref.shape[1]
    Cout = out_ref.shape[2]
    base_rd = TOP - Wp - 1                       # >= 0 because TOP >= W + 3

    # Zero the top / bottom margins once: they are the next layer's zero pad.
    out_ref[0, pl.ds(0, TOP), :] = jnp.zeros((TOP, Cout), out_ref.dtype)
    bot = PA - TOP - DATA
    out_ref[0, pl.ds(TOP + DATA, bot), :] = jnp.zeros((bot, Cout), out_ref.dtype)

    # Valid-column mask (identical for every chunk since CH % Wp == 0).
    col = jax.lax.broadcasted_iota(jnp.int32, (CH, 1), 0) % Wp
    valid = col < W

    bias = b_ref[...].astype(jnp.float32)        # (1, Cout)
    if apply_lrelu:
        lane = jax.lax.broadcasted_iota(jnp.int32, (1, Cout), 1)
        slope = jnp.where(lane < c_conv, jnp.float32(0.2), jnp.float32(1.0))

    def chunk_body(r, carry):
        acc = jnp.zeros((CH, Cout), jnp.float32)
        for dy in range(3):
            for dx in range(3):
                t = dy * 3 + dx
                rd = base_rd + r * CH + dy * Wp + dx
                p = x_ref[0, pl.ds(rd, CH), :].astype(dot_dtype)
                acc = acc + jnp.dot(p, w_ref[t],
                                    preferred_element_type=jnp.float32)
        acc = acc + bias
        if apply_lrelu:
            acc = jnp.where(acc >= 0, acc, slope * acc)   # MSI lanes: slope 1.0
        acc = jnp.where(valid, acc, 0.0)                  # keep halo columns zero
        ob = TOP + r * CH
        if CH % 8 == 0:
            ob = pl.multiple_of(ob, 8)
        out_ref[0, pl.ds(ob, CH), :] = acc.astype(out_ref.dtype)
        return carry

    jax.lax.fori_loop(0, n_chunks, chunk_body, 0)


def conv_layer(x_pf, w_f, bias, *, H, W, TOP, PA, CH, c_conv, apply_lrelu,
               dot_dtype):
    N, _, Cin = x_pf.shape
    Cout = w_f.shape[2]
    kern = partial(_conv_layer_kernel, H=H, W=W, TOP=TOP, CH=CH, c_conv=c_conv,
                   apply_lrelu=apply_lrelu, dot_dtype=dot_dtype)
    return pl.pallas_call(
        kern,
        out_shape=jax.ShapeDtypeStruct((N, PA, Cout), jnp.float32),
        grid=(N,),
        in_specs=[pl.BlockSpec((1, PA, Cin), lambda n: (n, 0, 0)),
                  pl.BlockSpec((9, Cin, Cout), lambda n: (0, 0, 0)),
                  pl.BlockSpec((1, Cout), lambda n: (0, 0))],
        out_specs=pl.BlockSpec((1, PA, Cout), lambda n: (n, 0, 0)),
        compiler_params=pltpu.CompilerParams(
            dimension_semantics=("parallel",),
            vmem_limit_bytes=32 * 1024 * 1024),
    )(x_pf, w_f, bias.reshape(1, -1))


# ----------------------------------------------------------------------------
# Kernel 3: final 3x3 conv + residual add of x1 + spectral projection with U22.
# The residual x1 is read from lanes [0, a) of the layer-1 input buffer.
# ----------------------------------------------------------------------------
def _conv_final_kernel(x_ref, x1_ref, w_ref, b_ref, u22t_ref,
                       out1_ref, xre_ref, *, H, W, TOP, CH, dot_dtype):
    Wp = W + 2
    DATA = H * Wp
    n_chunks = DATA // CH
    Cout = out1_ref.shape[2]
    base_rd = TOP - Wp - 1

    bias = b_ref[...].astype(jnp.float32)
    u22t = u22t_ref[...]

    def chunk_body(r, carry):
        acc = jnp.zeros((CH, Cout), jnp.float32)
        for dy in range(3):
            for dx in range(3):
                t = dy * 3 + dx
                rd = base_rd + r * CH + dy * Wp + dx
                p = x_ref[0, pl.ds(rd, CH), :].astype(dot_dtype)
                acc = acc + jnp.dot(p, w_ref[t],
                                    preferred_element_type=jnp.float32)
        xb = TOP + r * CH
        ob = r * CH
        if CH % 8 == 0:
            xb = pl.multiple_of(xb, 8)
            ob = pl.multiple_of(ob, 8)
        x1c = x1_ref[0, pl.ds(xb, CH), :][:, :Cout]           # x1, f32
        y = acc + bias + x1c                                  # x3 + x1
        out1_ref[0, pl.ds(ob, CH), :] = y
        xre_ref[0, pl.ds(ob, CH), :] = jnp.dot(y, u22t,
                                               preferred_element_type=jnp.float32)
        return carry

    jax.lax.fori_loop(0, n_chunks, chunk_body, 0)


def conv_final(x_pf, x1_pf, w4, bias, u22t, *, H, W, TOP, PA, CH, dot_dtype):
    N, _, Cin = x_pf.shape
    C1 = x1_pf.shape[2]
    Cout = w4.shape[2]
    L = u22t.shape[1]
    DATA = H * (W + 2)
    kern = partial(_conv_final_kernel, H=H, W=W, TOP=TOP, CH=CH,
                   dot_dtype=dot_dtype)
    return pl.pallas_call(
        kern,
        out_shape=(jax.ShapeDtypeStruct((N, DATA, Cout), jnp.float32),
                   jax.ShapeDtypeStruct((N, DATA, L), jnp.float32)),
        grid=(N,),
        in_specs=[pl.BlockSpec((1, PA, Cin), lambda n: (n, 0, 0)),
                  pl.BlockSpec((1, PA, C1), lambda n: (n, 0, 0)),
                  pl.BlockSpec((9, Cin, Cout), lambda n: (0, 0, 0)),
                  pl.BlockSpec((1, Cout), lambda n: (0, 0)),
                  pl.BlockSpec((Cout, L), lambda n: (0, 0))],
        out_specs=(pl.BlockSpec((1, DATA, Cout), lambda n: (n, 0, 0)),
                   pl.BlockSpec((1, DATA, L), lambda n: (n, 0, 0))),
        compiler_params=pltpu.CompilerParams(
            dimension_semantics=("parallel",),
            vmem_limit_bytes=32 * 1024 * 1024),
    )(x_pf, x1_pf, w4, bias.reshape(1, -1), u22t)


# ----------------------------------------------------------------------------
# Full forward (inputs / outputs are NCHW, matching the PyTorch module).
# ----------------------------------------------------------------------------
def zsl_cnn_forward(params, HSI, MSI, U22, *, dot_dtype=jnp.bfloat16):
    N, a, h, w = HSI.shape
    b = MSI.shape[1]
    L = U22.shape[0]
    H, W = 4 * h, 4 * w
    Wp = W + 2
    TOP = _round_up(W + 3, 8)
    DATA = H * Wp
    PA = _round_up(TOP + DATA + W + 3, 8)
    CH = _pick_row_tile(H, Wp) * Wp
    C1 = _round_up(a + b, 8)          # layer-1 input width: [x1 | MSI | 0-pad]
    CMID = 128                        # fused activation width (124 conv + b MSI)
    c_conv = CMID - b                 # lanes < c_conv get LeakyReLU
    geo = dict(H=H, W=W, TOP=TOP, PA=PA, CH=CH, dot_dtype=dot_dtype)

    # 1) separable upsample (grid over N), NCHW output
    x1 = upsample4(HSI, params["uh"], jnp.transpose(params["uw"]))   # (N,a,H,W)

    # 2) layer-1 input in padded-flat channel-last layout, built once.
    #    Also serves as the f32 residual source (lanes [0, a)) for conv_final.
    parts = [x1, MSI]
    if C1 > a + b:
        parts.append(jnp.zeros((N, C1 - a - b, H, W), jnp.float32))
    x12_pf = to_padded_flat(jnp.concatenate(parts, axis=1), TOP, PA)  # (N,PA,C1)
    # TODO(synk): fuse this relayout into the upsample kernel so x1 never
    # round-trips HBM in NCHW (requires an in-kernel C<->spatial transpose).

    # 3) fused weights: conv in columns [0,124), MSI pass-through identity on
    #    the centre tap in columns [124,128).  Biases padded with zeros.
    w1f = fuse_weight(params["w1"], C1, b, CMID, dot_dtype)
    w2f = fuse_weight(params["w2"], CMID, b, CMID, dot_dtype)
    w3f = fuse_weight(params["w3"], CMID, b, CMID, dot_dtype)
    w4 = params["w4"].reshape(9, CMID, a).astype(dot_dtype)
    zb = jnp.zeros((b,), jnp.float32)
    b1f = jnp.concatenate([params["b1"], zb])
    b2f = jnp.concatenate([params["b2"], zb])
    b3f = jnp.concatenate([params["b3"], zb])

    act = conv_layer(x12_pf, w1f, b1f, c_conv=c_conv, apply_lrelu=True, **geo)
    act = conv_layer(act, w2f, b2f, c_conv=c_conv, apply_lrelu=True, **geo)
    act = conv_layer(act, w3f, b3f, c_conv=c_conv, apply_lrelu=True, **geo)

    u22t = jnp.transpose(U22).astype(jnp.float32)                     # (a, L)
    out1_flat, xre_flat = conv_final(act, x12_pf, w4, params["b4"], u22t, **geo)

    # Strip the two padding columns and go back to NCHW (tiny glue ops).
    out1 = out1_flat.reshape(N, H, Wp, a)[:, :, :W, :].transpose(0, 3, 1, 2)
    xre = xre_flat.reshape(N, H, Wp, L)[:, :, :W, :].transpose(0, 3, 1, 2)
    return out1, xre


# ----------------------------------------------------------------------------
# Pure-JAX (XLA conv) reference at HIGHEST precision, mirroring the torch code.
# ----------------------------------------------------------------------------
def reference_forward(params, HSI, MSI, U22):
    a = HSI.shape[1]
    hp = jax.lax.Precision.HIGHEST
    coeff = np.outer(BASECOEFF, BASECOEFF)
    w_up = jnp.asarray(np.tile(coeff[None, None], (a, 1, 1, 1)))   # (a,1,45,45)
    x1 = jax.lax.conv_general_dilated(
        HSI, jnp.flip(w_up, (2, 3)), window_strides=(1, 1),
        padding=((23, 24), (23, 24)), lhs_dilation=(4, 4),
        dimension_numbers=("NCHW", "OIHW", "NCHW"), feature_group_count=a,
        precision=hp)

    def conv(x, w_hwio, bb):
        w = jnp.transpose(w_hwio, (3, 2, 0, 1))                    # OIHW
        y = jax.lax.conv_general_dilated(
            x, w, (1, 1), ((1, 1), (1, 1)),
            dimension_numbers=("NCHW", "OIHW", "NCHW"), precision=hp)
        return y + bb[None, :, None, None]

    def lrelu(x):
        return jnp.where(x >= 0, x, 0.2 * x)

    x2 = jnp.concatenate([x1, MSI], 1)
    x2 = jnp.concatenate([lrelu(conv(x2, params["w1"], params["b1"])), MSI], 1)
    x2 = jnp.concatenate([lrelu(conv(x2, params["w2"], params["b2"])), MSI], 1)
    x2 = jnp.concatenate([lrelu(conv(x2, params["w3"], params["b3"])), MSI], 1)
    x3 = conv(x2, params["w4"], params["b4"])
    output = x3 + x1
    fuse1 = jnp.tensordot(U22, output, axes=([1], [1]), precision=hp)
    xre = jnp.transpose(fuse1, (1, 0, 2, 3))
    return output, xre


def init_params(key, a, b, h, w):
    ks = jax.random.split(key, 8)

    def conv_w(k, cin, cout):
        return jax.random.normal(k, (3, 3, cin, cout), jnp.float32) / np.sqrt(9.0 * cin)

    return {
        "w1": conv_w(ks[0], a + b, 128 - b),
        "b1": 0.01 * jax.random.normal(ks[1], (128 - b,), jnp.float32),
        "w2": conv_w(ks[2], 128, 128 - b),
        "b2": 0.01 * jax.random.normal(ks[3], (128 - b,), jnp.float32),
        "w3": conv_w(ks[4], 128, 128 - b),
        "b3": 0.01 * jax.random.normal(ks[5], (128 - b,), jnp.float32),
        "w4": conv_w(ks[6], 128, a),
        "b4": 0.01 * jax.random.normal(ks[7], (a,), jnp.float32),
        "uh": build_upsample_matrix(h),
        "uw": build_upsample_matrix(w),
    }


if __name__ == "__main__":
    # args.p = args.hsi_channel = a = 8, args.msi_channel = b = 4
    a, b, L = 8, 4, 16
    N, h, w = 2, 8, 8
    H, W = 4 * h, 4 * w

    key = jax.random.PRNGKey(0)
    kp, khsi, kmsi, ku = jax.random.split(key, 4)
    params = init_params(kp, a, b, h, w)

    HSI = jax.random.normal(khsi, (N, a, h, w), jnp.float32)
    MSI = jax.random.normal(kmsi, (N, b, H, W), jnp.float32)
    U22 = jax.random.normal(ku, (L, a), jnp.float32)

    fwd_f32 = jax.jit(partial(zsl_cnn_forward, dot_dtype=jnp.float32))
    fwd_bf16 = jax.jit(partial(zsl_cnn_forward, dot_dtype=jnp.bfloat16))

    out1_f32, xre_f32 = jax.block_until_ready(fwd_f32(params, HSI, MSI, U22))
    out1_bf, xre_bf = jax.block_until_ready(fwd_bf16(params, HSI, MSI, U22))

    ref1, ref2 = jax.jit(reference_forward)(params, HSI, MSI, U22)
    ref1 = np.asarray(jax.block_until_ready(ref1))
    ref2 = np.asarray(ref2)

    # f32 path: tight check (validates the upsample boundary taps, padded-flat
    # conv indexing, MSI pass-through lanes and the residual/projection fusion).
    np.testing.assert_allclose(np.asarray(out1_f32), ref1, rtol=2e-3, atol=2e-3)
    np.testing.assert_allclose(np.asarray(xre_f32), ref2, rtol=2e-3, atol=2e-3)

    # bf16 fast path: aggregate relative-error sanity check.
    def rel_l2(x, y):
        return float(np.linalg.norm(np.asarray(x, np.float32) - y) / np.linalg.norm(y))

    assert rel_l2(out1_bf, ref1) < 2e-2
    assert rel_l2(xre_bf, ref2) < 2e-2

    print("KERNEL_OK")
</pallas_src>

<mosaic_0001>
module attributes {stable_mosaic.version = 11 : i64} {
  func.func @_upsample_kernel(%arg0: i32, %arg1: memref<1x8x8x8xf32, #tpu.memory_space<vmem>>, %arg2: memref<32x8xf32, #tpu.memory_space<vmem>>, %arg3: memref<8x32xf32, #tpu.memory_space<vmem>>, %arg4: memref<1x8x32x32xf32, #tpu.memory_space<vmem>>) attributes {dimension_semantics = [#tpu.dimension_semantics<parallel>], iteration_bounds = array<i64: 2>, scalar_prefetch = 0 : i64, scratch_operands = 0 : i64, tpu.core_type = #tpu.core_type<tc>, window_params = [{transform_indices = @transform_0, window_bounds = array<i64: 1, 8, 8, 8>}, {pipeline_mode = #tpu.pipeline_mode<synchronous>, transform_indices = @transform_1, window_bounds = array<i64: 32, 8>}, {pipeline_mode = #tpu.pipeline_mode<synchronous>, transform_indices = @transform_2, window_bounds = array<i64: 8, 32>}, {transform_indices = @transform_3, window_bounds = array<i64: 1, 8, 32, 32>}]} {
    %c0 = arith.constant 0 : index
    %c0_0 = arith.constant 0 : index
    %c0_1 = arith.constant 0 : index
    %c0_2 = arith.constant 0 : index
    %0 = vector.load %arg1[%c0, %c0_0, %c0_1, %c0_2] : memref<1x8x8x8xf32, #tpu.memory_space<vmem>>, vector<1x8x8x8xf32>
    %1 = vector.shape_cast %0 : vector<1x8x8x8xf32> to vector<64x8xf32>
    %c0_3 = arith.constant 0 : index
    %c0_4 = arith.constant 0 : index
    %2 = vector.load %arg3[%c0_3, %c0_4] : memref<8x32xf32, #tpu.memory_space<vmem>>, vector<8x32xf32>
    %cst = arith.constant dense<0.000000e+00> : vector<64x32xf32>
    %3 = tpu.matmul %1, %2, %cst {dimension_numbers = #tpu.dot_dimension_numbers<[1], [0], [0], [1], [0, 0, 1, 1], [], []>} : vector<64x8xf32>, vector<8x32xf32>, vector<64x32xf32> -> vector<64x32xf32>
    %4 = vector.shape_cast %3 : vector<64x32xf32> to vector<8x8x32xf32>
    %c0_5 = arith.constant 0 : index
    %c0_6 = arith.constant 0 : index
    %5 = vector.load %arg2[%c0_5, %c0_6] : memref<32x8xf32, #tpu.memory_space<vmem>>, vector<32x8xf32>
    %6 = vector.shape_cast %5 : vector<32x8xf32> to vector<1x32x8xf32>
    %7 = vector.shape_cast %6 : vector<1x32x8xf32> to vector<1x32x8xf32>
    %8 = vector.broadcast %7 : vector<1x32x8xf32> to vector<8x32x8xf32>
    %cst_7 = arith.constant dense<0.000000e+00> : vector<8x32x32xf32>
    %9 = tpu.matmul %8, %4, %cst_7 {dimension_numbers = #tpu.dot_dimension_numbers<[2], [1], [1], [2], [0, 0, 0, 1, 1, 2], [0], [0]>} : vector<8x32x8xf32>, vector<8x8x32xf32>, vector<8x32x32xf32> -> vector<8x32x32xf32>
    %10 = vector.shape_cast %9 : vector<8x32x32xf32> to vector<1x8x32x32xf32>
    %c0_8 = arith.constant 0 : index
    %c0_9 = arith.constant 0 : index
    %c0_10 = arith.constant 0 : index
    %c0_11 = arith.constant 0 : index
    %11 = vector.load %arg4[%c0_8, %c0_9, %c0_10, %c0_11] : memref<1x8x32x32xf32, #tpu.memory_space<vmem>>, vector<1x8x32x32xf32>
    tpu.vector_store %arg4[%c0_8, %c0_9, %c0_10, %c0_11], %10 {strides = array<i32>} : memref<1x8x32x32xf32, #tpu.memory_space<vmem>>, vector<1x8x32x32xf32>,
    return
  }
  func.func @transform_0(%arg0: i32) -> (i32, i32, i32, i32) {
    %c0_i32 = arith.constant 0 : i32
    %c0_i32_0 = arith.constant 0 : i32
    %c0_i32_1 = arith.constant 0 : i32
    %c0_i32_2 = arith.constant 0 : i32
    return %arg0, %c0_i32, %c0_i32_0, %c0_i32_1 : i32, i32, i32, i32
  }
  func.func @transform_1(%arg0: i32) -> (i32, i32) {
    %c0_i32 = arith.constant 0 : i32
    %c0_i32_0 = arith.constant 0 : i32
    %c0_i32_1 = arith.constant 0 : i32
    return %c0_i32, %c0_i32_0 : i32, i32
  }
  func.func @transform_2(%arg0: i32) -> (i32, i32) {
    %c0_i32 = arith.constant 0 : i32
    %c0_i32_0 = arith.constant 0 : i32
    %c0_i32_1 = arith.constant 0 : i32
    return %c0_i32, %c0_i32_0 : i32, i32
  }
  func.func @transform_3(%arg0: i32) -> (i32, i32, i32, i32) {
    %c0_i32 = arith.constant 0 : i32
    %c0_i32_0 = arith.constant 0 : i32
    %c0_i32_1 = arith.constant 0 : i32
    %c0_i32_2 = arith.constant 0 : i32
    return %arg0, %c0_i32, %c0_i32_0, %c0_i32_1 : i32, i32, i32, i32
  }
}

module attributes {stable_mosaic.version = 11 : i64} {
  func.func @_conv_layer_kernel(%arg0: i32, %arg1: memref<1x1168x16xf32, #tpu.memory_space<vmem>>, %arg2: memref<9x16x128xf32, #tpu.memory_space<vmem>>, %arg3: memref<1x128xf32, #tpu.memory_space<vmem>>, %arg4: memref<1x1168x128xf32, #tpu.memory_space<vmem>>) attributes {dimension_semantics = [#tpu.dimension_semantics<parallel>], iteration_bounds = array<i64: 2>, scalar_prefetch = 0 : i64, scratch_operands = 0 : i64, tpu.core_type = #tpu.core_type<tc>, window_params = [{transform_indices = @transform_0, window_bounds = array<i64: 1, 1168, 16>}, {pipeline_mode = #tpu.pipeline_mode<synchronous>, transform_indices = @transform_1, window_bounds = array<i64: 9, 16, 128>}, {pipeline_mode = #tpu.pipeline_mode<synchronous>, transform_indices = @transform_2, window_bounds = array<i64: 1, 128>}, {transform_indices = @transform_3, window_bounds = array<i64: 1, 1168, 128>}]} {
    %cst = arith.constant 0.000000e+00 : f32
    %0 = vector.broadcast %cst : f32 to vector<40x128xf32>
    %c0 = arith.constant 0 : index
    %c0_0 = arith.constant 0 : index
    %c0_1 = arith.constant 0 : index
    %1 = vector.load %arg4[%c0, %c0_0, %c0_1] : memref<1x1168x128xf32, #tpu.memory_space<vmem>>, vector<1x40x128xf32>
    %2 = vector.shape_cast %1 : vector<1x40x128xf32> to vector<40x128xf32>
    %3 = vector.shape_cast %0 : vector<40x128xf32> to vector<1x40x128xf32>
    tpu.vector_store %arg4[%c0, %c0_0, %c0_1], %3 {strides = array<i32>} : memref<1x1168x128xf32, #tpu.memory_space<vmem>>, vector<1x40x128xf32>,
    %cst_2 = arith.constant 0.000000e+00 : f32
    %4 = vector.broadcast %cst_2 : f32 to vector<40x128xf32>
    %c0_3 = arith.constant 0 : index
    %c1128 = arith.constant 1128 : index
    %c0_4 = arith.constant 0 : index
    %5 = vector.load %arg4[%c0_3, %c1128, %c0_4] : memref<1x1168x128xf32, #tpu.memory_space<vmem>>, vector<1x40x128xf32>
    %6 = vector.shape_cast %5 : vector<1x40x128xf32> to vector<40x128xf32>
    %7 = vector.shape_cast %4 : vector<40x128xf32> to vector<1x40x128xf32>
    tpu.vector_store %arg4[%c0_3, %c1128, %c0_4], %7 {strides = array<i32>} : memref<1x1168x128xf32, #tpu.memory_space<vmem>>, vector<1x40x128xf32>,
    %8 = tpu.iota {dimensions = array<i32: 0>} : vector<136x1xi32>
    %c34_i32 = arith.constant 34 : i32
    %c0_i32 = arith.constant 0 : i32
    %9 = arith.cmpi eq, %c34_i32, %c0_i32 : i32
    %c1_i32 = arith.constant 1 : i32
    %10 = arith.select %9, %c1_i32, %c34_i32 : i32
    %11 = vector.broadcast %10 : i32 to vector<136x1xi32>
    %12 = arith.remsi %8, %11 : vector<136x1xi32>
    %c0_i32_5 = arith.constant 0 : i32
    %13 = vector.broadcast %c0_i32_5 : i32 to vector<136x1xi32>
    %14 = arith.cmpi ne, %12, %13 : vector<136x1xi32>
    %c0_i32_6 = arith.constant 0 : i32
    %15 = vector.broadcast %c0_i32_6 : i32 to vector<136x1xi32>
    %16 = arith.cmpi slt, %12, %15 : vector<136x1xi32>
    %c0_i32_7 = arith.constant 0 : i32
    %17 = arith.cmpi slt, %10, %c0_i32_7 : i32
    %18 = vector.broadcast %17 : i1 to vector<136x1xi1>
    %19 = vector.broadcast %18 : vector<136x1xi1> to vector<136x1xi1>
    %20 = arith.xori %16, %19 : vector<136x1xi1>
    %21 = arith.andi %20, %14 : vector<136x1xi1>
    %22 = vector.broadcast %10 : i32 to vector<136x1xi32>
    %23 = arith.addi %12, %22 : vector<136x1xi32>
    %24 = arith.select %21, %23, %12 : vector<136x1xi1>, vector<136x1xi32>
    %c32_i32 = arith.constant 32 : i32
    %25 = vector.broadcast %c32_i32 : i32 to vector<136x1xi32>
    %26 = arith.cmpi slt, %24, %25 : vector<136x1xi32>
    %c0_8 = arith.constant 0 : index
    %c0_9 = arith.constant 0 : index
    %27 = vector.load %arg3[%c0_8, %c0_9] : memref<1x128xf32, #tpu.memory_space<vmem>>, vector<1x128xf32>
    %28 = tpu.iota {dimensions = array<i32: 1>} : vector<1x128xi32>
    %c124_i32 = arith.constant 124 : i32
    %29 = vector.broadcast %c124_i32 : i32 to vector<1x128xi32>
    %30 = arith.cmpi slt, %28, %29 : vector<1x128xi32>
    %cst_10 = arith.constant 2.000000e-01 : f32
    %cst_11 = arith.constant 1.000000e+00 : f32
    %31 = vector.broadcast %cst_10 : f32 to vector<1x128xf32>
    %32 = vector.broadcast %cst_11 : f32 to vector<1x128xf32>
    %33 = arith.select %30, %31, %32 : vector<1x128xi1>, vector<1x128xf32>
    %c0_i32_12 = arith.constant 0 : i32
    %c8_i32 = arith.constant 8 : i32
    %34 = arith.addi %c0_i32_12, %c8_i32 : i32
    %c1_i32_13 = arith.constant 1 : i32
    scf.for %arg5 = %c0_i32_12 to %34 step %c1_i32_13  : i32 {
      %cst_15 = arith.constant 0.000000e+00 : f32
      %35 = vector.broadcast %cst_15 : f32 to vector<136x128xf32>
      %c136_i32 = arith.constant 136 : i32
      %36 = arith.muli %arg5, %c136_i32 : i32
      %c5_i32 = arith.constant 5 : i32
      %37 = arith.addi %c5_i32, %36 : i32
      %c0_i32_16 = arith.constant 0 : i32
      %38 = arith.addi %37, %c0_i32_16 : i32
      %c0_i32_17 = arith.constant 0 : i32
      %39 = arith.addi %38, %c0_i32_17 : i32
      %c0_18 = arith.constant 0 : index
      %40 = arith.index_cast %39 : i32 to index
      %c0_19 = arith.constant 0 : index
      %41 = vector.load %arg1[%c0_18, %40, %c0_19] : memref<1x1168x16xf32, #tpu.memory_space<vmem>>, vector<1x136x16xf32>
      %42 = vector.shape_cast %41 : vector<1x136x16xf32> to vector<136x16xf32>
      %c0_20 = arith.constant 0 : index
      %c0_21 = arith.constant 0 : index
      %c0_22 = arith.constant 0 : index
      %43 = vector.load %arg2[%c0_20, %c0_21, %c0_22] : memref<9x16x128xf32, #tpu.memory_space<vmem>>, vector<1x16x128xf32>
      %44 = vector.shape_cast %43 : vector<1x16x128xf32> to vector<16x128xf32>
      %cst_23 = arith.constant dense<0.000000e+00> : vector<136x128xf32>
      %45 = tpu.matmul %42, %44, %cst_23 {dimension_numbers = #tpu.dot_dimension_numbers<[1], [0], [0], [1], [0, 0, 1, 1], [], []>} : vector<136x16xf32>, vector<16x128xf32>, vector<136x128xf32> -> vector<136x128xf32>
      %46 = arith.addf %35, %45 : vector<136x128xf32>
      %c136_i32_24 = arith.constant 136 : i32
      %47 = arith.muli %arg5, %c136_i32_24 : i32
      %c5_i32_25 = arith.constant 5 : i32
      %48 = arith.addi %c5_i32_25, %47 : i32
      %c0_i32_26 = arith.constant 0 : i32
      %49 = arith.addi %48, %c0_i32_26 : i32
      %c1_i32_27 = arith.constant 1 : i32
      %50 = arith.addi %49, %c1_i32_27 : i32
      %c0_28 = arith.constant 0 : index
      %51 = arith.index_cast %50 : i32 to index
      %c0_29 = arith.constant 0 : index
      %52 = vector.load %arg1[%c0_28, %51, %c0_29] : memref<1x1168x16xf32, #tpu.memory_space<vmem>>, vector<1x136x16xf32>
      %53 = vector.shape_cast %52 : vector<1x136x16xf32> to vector<136x16xf32>
      %c1 = arith.constant 1 : index
      %c0_30 = arith.constant 0 : index
      %c0_31 = arith.constant 0 : index
      %54 = vector.load %arg2[%c1, %c0_30, %c0_31] : memref<9x16x128xf32, #tpu.memory_space<vmem>>, vector<1x16x128xf32>
      %55 = vector.shape_cast %54 : vector<1x16x128xf32> to vector<16x128xf32>
      %cst_32 = arith.constant dense<0.000000e+00> : vector<136x128xf32>
      %56 = tpu.matmul %53, %55, %cst_32 {dimension_numbers = #tpu.dot_dimension_numbers<[1], [0], [0], [1], [0, 0, 1, 1], [], []>} : vector<136x16xf32>, vector<16x128xf32>, vector<136x128xf32> -> vector<136x128xf32>
      %57 = arith.addf %46, %56 : vector<136x128xf32>
      %c136_i32_33 = arith.constant 136 : i32
      %58 = arith.muli %arg5, %c136_i32_33 : i32
      %c5_i32_34 = arith.constant 5 : i32
      %59 = arith.addi %c5_i32_34, %58 : i32
      %c0_i32_35 = arith.constant 0 : i32
      %60 = arith.addi %59, %c0_i32_35 : i32
      %c2_i32 = arith.constant 2 : i32
      %61 = arith.addi %60, %c2_i32 : i32
      %c0_36 = arith.constant 0 : index
      %62 = arith.index_cast %61 : i32 to index
      %c0_37 = arith.constant 0 : index
      %63 = vector.load %arg1[%c0_36, %62, %c0_37] : memref<1x1168x16xf32, #tpu.memory_space<vmem>>, vector<1x136x16xf32>
      %64 = vector.shape_cast %63 : vector<1x136x16xf32> to vector<136x16xf32>
      %c2 = arith.constant 2 : index
      %c0_38 = arith.constant 0 : index
      %c0_39 = arith.constant 0 : index
      %65 = vector.load %arg2[%c2, %c0_38, %c0_39] : memref<9x16x128xf32, #tpu.memory_space<vmem>>, vector<1x16x128xf32>
      %66 = vector.shape_cast %65 : vector<1x16x128xf32> to vector<16x128xf32>
      %cst_40 = arith.constant dense<0.000000e+00> : vector<136x128xf32>
      %67 = tpu.matmul %64, %66, %cst_40 {dimension_numbers = #tpu.dot_dimension_numbers<[1], [0], [0], [1], [0, 0, 1, 1], [], []>} : vector<136x16xf32>, vector<16x128xf32>, vector<136x128xf32> -> vector<136x128xf32>
      %68 = arith.addf %57, %67 : vector<136x128xf32>
      %c136_i32_41 = arith.constant 136 : i32
      %69 = arith.muli %arg5, %c136_i32_41 : i32
      %c5_i32_42 = arith.constant 5 : i32
      %70 = arith.addi %c5_i32_42, %69 : i32
      %c34_i32_43 = arith.constant 34 : i32
      %71 = arith.addi %70, %c34_i32_43 : i32
      %c0_i32_44 = arith.constant 0 : i32
      %72 = arith.addi %71, %c0_i32_44 : i32
      %c0_45 = arith.constant 0 : index
      %73 = arith.index_cast %72 : i32 to index
      %c0_46 = arith.constant 0 : index
      %74 = vector.load %arg1[%c0_45, %73, %c0_46] : memref<1x1168x16xf32, #tpu.memory_space<vmem>>, vector<1x136x16xf32>
      %75 = vector.shape_cast %74 : vector<1x136x16xf32> to vector<136x16xf32>
      %c3 = arith.constant 3 : index
      %c0_47 = arith.constant 0 : index
      %c0_48 = arith.constant 0 : index
      %76 = vector.load %arg2[%c3, %c0_47, %c0_48] : memref<9x16x128xf32, #tpu.memory_space<vmem>>, vector<1x16x128xf32>
      %77 = vector.shape_cast %76 : vector<1x16x128xf32> to vector<16x128xf32>
      %cst_49 = arith.constant dense<0.000000e+00> : vector<136x128xf32>
      %78 = tpu.matmul %75, %77, %cst_49 {dimension_numbers = #tpu.dot_dimension_numbers<[1], [0], [0], [1], [0, 0, 1, 1], [], []>} : vector<136x16xf32>, vector<16x128xf32>, vector<136x128xf32> -> vector<136x128xf32>
      %79 = arith.addf %68, %78 : vector<136x128xf32>
      %c136_i32_50 = arith.constant 136 : i32
      %80 = arith.muli %arg5, %c136_i32_50 : i32
      %c5_i32_51 = arith.constant 5 : i32
      %81 = arith.addi %c5_i32_51, %80 : i32
      %c34_i32_52 = arith.constant 34 : i32
      %82 = arith.addi %81, %c34_i32_52 : i32
      %c1_i32_53 = arith.constant 1 : i32
      %83 = arith.addi %82, %c1_i32_53 : i32
      %c0_54 = arith.constant 0 : index
      %84 = arith.index_cast %83 : i32 to index
      %c0_55 = arith.constant 0 : index
      %85 = vector.load %arg1[%c0_54, %84, %c0_55] : memref<1x1168x16xf32, #tpu.memory_space<vmem>>, vector<1x136x16xf32>
      %86 = vector.shape_cast %85 : vector<1x136x16xf32> to vector<136x16xf32>
      %c4 = arith.constant 4 : index
      %c0_56 = arith.constant 0 : index
      %c0_57 = arith.constant 0 : index
      %87 = vector.load %arg2[%c4, %c0_56, %c0_57] : memref<9x16x128xf32, #tpu.memory_space<vmem>>, vector<1x16x128xf32>
      %88 = vector.shape_cast %87 : vector<1x16x128xf32> to vector<16x128xf32>
      %cst_58 = arith.constant dense<0.000000e+00> : vector<136x128xf32>
      %89 = tpu.matmul %86, %88, %cst_58 {dimension_numbers = #tpu.dot_dimension_numbers<[1], [0], [0], [1], [0, 0, 1, 1], [], []>} : vector<136x16xf32>, vector<16x128xf32>, vector<136x128xf32> -> vector<136x128xf32>
      %90 = arith.addf %79, %89 : vector<136x128xf32>
      %c136_i32_59 = arith.constant 136 : i32
      %91 = arith.muli %arg5, %c136_i32_59 : i32
      %c5_i32_60 = arith.constant 5 : i32
      %92 = arith.addi %c5_i32_60, %91 : i32
      %c34_i32_61 = arith.constant 34 : i32
      %93 = arith.addi %92, %c34_i32_61 : i32
      %c2_i32_62 = arith.constant 2 : i32
      %94 = arith.addi %93, %c2_i32_62 : i32
      %c0_63 = arith.constant 0 : index
      %95 = arith.index_cast %94 : i32 to index
      %c0_64 = arith.constant 0 : index
      %96 = vector.load %arg1[%c0_63, %95, %c0_64] : memref<1x1168x16xf32, #tpu.memory_space<vmem>>, vector<1x136x16xf32>
      %97 = vector.shape_cast %96 : vector<1x136x16xf32> to vector<136x16xf32>
      %c5 = arith.constant 5 : index
      %c0_65 = arith.constant 0 : index
      %c0_66 = arith.constant 0 : index
      %98 = vector.load %arg2[%c5, %c0_65, %c0_66] : memref<9x16x128xf32, #tpu.memory_space<vmem>>, vector<1x16x128xf32>
      %99 = vector.shape_cast %98 : vector<1x16x128xf32> to vector<16x128xf32>
      %cst_67 = arith.constant dense<0.000000e+00> : vector<136x128xf32>
      %100 = tpu.matmul %97, %99, %cst_67 {dimension_numbers = #tpu.dot_dimension_numbers<[1], [0], [0], [1], [0, 0, 1, 1], [], []>} : vector<136x16xf32>, vector<16x128xf32>, vector<136x128xf32> -> vector<136x128xf32>
      %101 = arith.addf %90, %100 : vector<136x128xf32>
      %c136_i32_68 = arith.constant 136 : i32
      %102 = arith.muli %arg5, %c136_i32_68 : i32
      %c5_i32_69 = arith.constant 5 : i32
      %103 = arith.addi %c5_i32_69, %102 : i32
      %c68_i32 = arith.constant 68 : i32
      %104 = arith.addi %103, %c68_i32 : i32
      %c0_i32_70 = arith.constant 0 : i32
      %105 = arith.addi %104, %c0_i32_70 : i32
      %c0_71 = arith.constant 0 : index
      %106 = arith.index_cast %105 : i32 to index
      %c0_72 = arith.constant 0 : index
      %107 = vector.load %arg1[%c0_71, %106, %c0_72] : memref<1x1168x16xf32, #tpu.memory_space<vmem>>, vector<1x136x16xf32>
      %108 = vector.shape_cast %107 : vector<1x136x16xf32> to vector<136x16xf32>
      %c6 = arith.constant 6 : index
      %c0_73 = arith.constant 0 : index
      %c0_74 = arith.constant 0 : index
      %109 = vector.load %arg2[%c6, %c0_73, %c0_74] : memref<9x16x128xf32, #tpu.memory_space<vmem>>, vector<1x16x128xf32>
      %110 = vector.shape_cast %109 : vector<1x16x128xf32> to vector<16x128xf32>
      %cst_75 = arith.constant dense<0.000000e+00> : vector<136x128xf32>
      %111 = tpu.matmul %108, %110, %cst_75 {dimension_numbers = #tpu.dot_dimension_numbers<[1], [0], [0], [1], [0, 0, 1, 1], [], []>} : vector<136x16xf32>, vector<16x128xf32>, vector<136x128xf32> -> vector<136x128xf32>
      %112 = arith.addf %101, %111 : vector<136x128xf32>
      %c136_i32_76 = arith.constant 136 : i32
      %113 = arith.muli %arg5, %c136_i32_76 : i32
      %c5_i32_77 = arith.constant 5 : i32
      %114 = arith.addi %c5_i32_77, %113 : i32
      %c68_i32_78 = arith.constant 68 : i32
      %115 = arith.addi %114, %c68_i32_78 : i32
      %c1_i32_79 = arith.constant 1 : i32
      %116 = arith.addi %115, %c1_i32_79 : i32
      %c0_80 = arith.constant 0 : index
      %117 = arith.index_cast %116 : i32 to index
      %c0_81 = arith.constant 0 : index
      %118 = vector.load %arg1[%c0_80, %117, %c0_81] : memref<1x1168x16xf32, #tpu.memory_space<vmem>>, vector<1x136x16xf32>
      %119 = vector.shape_cast %118 : vector<1x136x16xf32> to vector<136x16xf32>
      %c7 = arith.constant 7 : index
      %c0_82 = arith.constant 0 : index
      %c0_83 = arith.constant 0 : index
      %120 = vector.load %arg2[%c7, %c0_82, %c0_83] : memref<9x16x128xf32, #tpu.memory_space<vmem>>, vector<1x16x128xf32>
      %121 = vector.shape_cast %120 : vector<1x16x128xf32> to vector<16x128xf32>
      %cst_84 = arith.constant dense<0.000000e+00> : vector<136x128xf32>
      %122 = tpu.matmul %119, %121, %cst_84 {dimension_numbers = #tpu.dot_dimension_numbers<[1], [0], [0], [1], [0, 0, 1, 1], [], []>} : vector<136x16xf32>, vector<16x128xf32>, vector<136x128xf32> -> vector<136x128xf32>
      %123 = arith.addf %112, %122 : vector<136x128xf32>
      %c136_i32_85 = arith.constant 136 : i32
      %124 = arith.muli %arg5, %c136_i32_85 : i32
      %c5_i32_86 = arith.constant 5 : i32
      %125 = arith.addi %c5_i32_86, %124 : i32
      %c68_i32_87 = arith.constant 68 : i32
      %126 = arith.addi %125, %c68_i32_87 : i32
      %c2_i32_88 = arith.constant 2 : i32
      %127 = arith.addi %126, %c2_i32_88 : i32
      %c0_89 = arith.constant 0 : index
      %128 = arith.index_cast %127 : i32 to index
      %c0_90 = arith.constant 0 : index
      %129 = vector.load %arg1[%c0_89, %128, %c0_90] : memref<1x1168x16xf32, #tpu.memory_space<vmem>>, vector<1x136x16xf32>
      %130 = vector.shape_cast %129 : vector<1x136x16xf32> to vector<136x16xf32>
      %c8 = arith.constant 8 : index
      %c0_91 = arith.constant 0 : index
      %c0_92 = arith.constant 0 : index
      %131 = vector.load %arg2[%c8, %c0_91, %c0_92] : memref<9x16x128xf32, #tpu.memory_space<vmem>>, vector<1x16x128xf32>
      %132 = vector.shape_cast %131 : vector<1x16x128xf32> to vector<16x128xf32>
      %cst_93 = arith.constant dense<0.000000e+00> : vector<136x128xf32>
      %133 = tpu.matmul %130, %132, %cst_93 {dimension_numbers = #tpu.dot_dimension_numbers<[1], [0], [0], [1], [0, 0, 1, 1], [], []>} : vector<136x16xf32>, vector<16x128xf32>, vector<136x128xf32> -> vector<136x128xf32>
      %134 = arith.addf %123, %133 : vector<136x128xf32>
      %135 = vector.broadcast %27 : vector<1x128xf32> to vector<136x128xf32>
      %136 = arith.addf %134, %135 : vector<136x128xf32>
      %cst_94 = arith.constant 0.000000e+00 : f32
      %137 = vector.broadcast %cst_94 : f32 to vector<136x128xf32>
      %138 = arith.cmpf oge, %136, %137 : vector<136x128xf32>
      %139 = vector.broadcast %33 : vector<1x128xf32> to vector<136x128xf32>
      %140 = arith.mulf %139, %136 : vector<136x128xf32>
      %141 = arith.select %138, %136, %140 : vector<136x128xi1>, vector<136x128xf32>
      %cst_95 = arith.constant 0.000000e+00 : f32
      %142 = vector.shape_cast %26 : vector<136x1xi1> to vector<136x1xi1>
      %143 = vector.broadcast %142 : vector<136x1xi1> to vector<136x128xi1>
      %144 = vector.broadcast %cst_95 : f32 to vector<136x128xf32>
      %145 = arith.select %143, %141, %144 : vector<136x128xi1>, vector<136x128xf32>
      %c136_i32_96 = arith.constant 136 : i32
      %146 = arith.muli %arg5, %c136_i32_96 : i32
      %c40_i32 = arith.constant 40 : i32
      %147 = arith.addi %c40_i32, %146 : i32
      %148 = tpu.assume_multiple %147, 8 : i32
      %c0_97 = arith.constant 0 : index
      %149 = arith.index_cast %148 : i32 to index
      %c0_98 = arith.constant 0 : index
      %150 = vector.load %arg4[%c0_97, %149, %c0_98] : memref<1x1168x128xf32, #tpu.memory_space<vmem>>, vector<1x136x128xf32>
      %151 = vector.shape_cast %150 : vector<1x136x128xf32> to vector<136x128xf32>
      %152 = vector.shape_cast %145 : vector<136x128xf32> to vector<1x136x128xf32>
      tpu.vector_store %arg4[%c0_97, %149, %c0_98], %152 {strides = array<i32>} : memref<1x1168x128xf32, #tpu.memory_space<vmem>>, vector<1x136x128xf32>,
    }
    %c8_i32_14 = arith.constant 8 : i32
    return
  }
  func.func @transform_0(%arg0: i32) -> (i32, i32, i32) {
    %c0_i32 = arith.constant 0 : i32
    %c0_i32_0 = arith.constant 0 : i32
    %c0_i32_1 = arith.constant 0 : i32
    return %arg0, %c0_i32, %c0_i32_0 : i32, i32, i32
  }
  func.func @transform_1(%arg0: i32) -> (i32, i32, i32) {
    %c0_i32 = arith.constant 0 : i32
    %c0_i32_0 = arith.constant 0 : i32
    %c0_i32_1 = arith.constant 0 : i32
    %c0_i32_2 = arith.constant 0 : i32
    return %c0_i32, %c0_i32_0, %c0_i32_1 : i32, i32, i32
  }
  func.func @transform_2(%arg0: i32) -> (i32, i32) {
    %c0_i32 = arith.constant 0 : i32
    %c0_i32_0 = arith.constant 0 : i32
    %c0_i32_1 = arith.constant 0 : i32
    return %c0_i32, %c0_i32_0 : i32, i32
  }
  func.func @transform_3(%arg0: i32) -> (i32, i32, i32) {
    %c0_i32 = arith.constant 0 : i32
    %c0_i32_0 = arith.constant 0 : i32
    %c0_i32_1 = arith.constant 0 : i32
    return %arg0, %c0_i32, %c0_i32_0 : i32, i32, i32
  }
}

module attributes {stable_mosaic.version = 11 : i64} {
  func.func @_conv_layer_kernel(%arg0: i32, %arg1: memref<1x1168x128xf32, #tpu.memory_space<vmem>>, %arg2: memref<9x128x128xf32, #tpu.memory_space<vmem>>, %arg3: memref<1x128xf32, #tpu.memory_space<vmem>>, %arg4: memref<1x1168x128xf32, #tpu.memory_space<vmem>>) attributes {dimension_semantics = [#tpu.dimension_semantics<parallel>], iteration_bounds = array<i64: 2>, scalar_prefetch = 0 : i64, scratch_operands = 0 : i64, tpu.core_type = #tpu.core_type<tc>, window_params = [{transform_indices = @transform_0, window_bounds = array<i64: 1, 1168, 128>}, {pipeline_mode = #tpu.pipeline_mode<synchronous>, transform_indices = @transform_1, window_bounds = array<i64: 9, 128, 128>}, {pipeline_mode = #tpu.pipeline_mode<synchronous>, transform_indices = @transform_2, window_bounds = array<i64: 1, 128>}, {transform_indices = @transform_3, window_bounds = array<i64: 1, 1168, 128>}]} {
    %cst = arith.constant 0.000000e+00 : f32
    %0 = vector.broadcast %cst : f32 to vector<40x128xf32>
    %c0 = arith.constant 0 : index
    %c0_0 = arith.constant 0 : index
    %c0_1 = arith.constant 0 : index
    %1 = vector.load %arg4[%c0, %c0_0, %c0_1] : memref<1x1168x128xf32, #tpu.memory_space<vmem>>, vector<1x40x128xf32>
    %2 = vector.shape_cast %1 : vector<1x40x128xf32> to vector<40x128xf32>
    %3 = vector.shape_cast %0 : vector<40x128xf32> to vector<1x40x128xf32>
    tpu.vector_store %arg4[%c0, %c0_0, %c0_1], %3 {strides = array<i32>} : memref<1x1168x128xf32, #tpu.memory_space<vmem>>, vector<1x40x128xf32>,
    %cst_2 = arith.constant 0.000000e+00 : f32
    %4 = vector.broadcast %cst_2 : f32 to vector<40x128xf32>
    %c0_3 = arith.constant 0 : index
    %c1128 = arith.constant 1128 : index
    %c0_4 = arith.constant 0 : index
    %5 = vector.load %arg4[%c0_3, %c1128, %c0_4] : memref<1x1168x128xf32, #tpu.memory_space<vmem>>, vector<1x40x128xf32>
    %6 = vector.shape_cast %5 : vector<1x40x128xf32> to vector<40x128xf32>
    %7 = vector.shape_cast %4 : vector<40x128xf32> to vector<1x40x128xf32>
    tpu.vector_store %arg4[%c0_3, %c1128, %c0_4], %7 {strides = array<i32>} : memref<1x1168x128xf32, #tpu.memory_space<vmem>>, vector<1x40x128xf32>,
    %8 = tpu.iota {dimensions = array<i32: 0>} : vector<136x1xi32>
    %c34_i32 = arith.constant 34 : i32
    %c0_i32 = arith.constant 0 : i32
    %9 = arith.cmpi eq, %c34_i32, %c0_i32 : i32
    %c1_i32 = arith.constant 1 : i32
    %10 = arith.select %9, %c1_i32, %c34_i32 : i32
    %11 = vector.broadcast %10 : i32 to vector<136x1xi32>
    %12 = arith.remsi %8, %11 : vector<136x1xi32>
    %c0_i32_5 = arith.constant 0 : i32
    %13 = vector.broadcast %c0_i32_5 : i32 to vector<136x1xi32>
    %14 = arith.cmpi ne, %12, %13 : vector<136x1xi32>
    %c0_i32_6 = arith.constant 0 : i32
    %15 = vector.broadcast %c0_i32_6 : i32 to vector<136x1xi32>
    %16 = arith.cmpi slt, %12, %15 : vector<136x1xi32>
    %c0_i32_7 = arith.constant 0 : i32
    %17 = arith.cmpi slt, %10, %c0_i32_7 : i32
    %18 = vector.broadcast %17 : i1 to vector<136x1xi1>
    %19 = vector.broadcast %18 : vector<136x1xi1> to vector<136x1xi1>
    %20 = arith.xori %16, %19 : vector<136x1xi1>
    %21 = arith.andi %20, %14 : vector<136x1xi1>
    %22 = vector.broadcast %10 : i32 to vector<136x1xi32>
    %23 = arith.addi %12, %22 : vector<136x1xi32>
    %24 = arith.select %21, %23, %12 : vector<136x1xi1>, vector<136x1xi32>
    %c32_i32 = arith.constant 32 : i32
    %25 = vector.broadcast %c32_i32 : i32 to vector<136x1xi32>
    %26 = arith.cmpi slt, %24, %25 : vector<136x1xi32>
    %c0_8 = arith.constant 0 : index
    %c0_9 = arith.constant 0 : index
    %27 = vector.load %arg3[%c0_8, %c0_9] : memref<1x128xf32, #tpu.memory_space<vmem>>, vector<1x128xf32>
    %28 = tpu.iota {dimensions = array<i32: 1>} : vector<1x128xi32>
    %c124_i32 = arith.constant 124 : i32
    %29 = vector.broadcast %c124_i32 : i32 to vector<1x128xi32>
    %30 = arith.cmpi slt, %28, %29 : vector<1x128xi32>
    %cst_10 = arith.constant 2.000000e-01 : f32
    %cst_11 = arith.constant 1.000000e+00 : f32
    %31 = vector.broadcast %cst_10 : f32 to vector<1x128xf32>
    %32 = vector.broadcast %cst_11 : f32 to vector<1x128xf32>
    %33 = arith.select %30, %31, %32 : vector<1x128xi1>, vector<1x128xf32>
    %c0_i32_12 = arith.constant 0 : i32
    %c8_i32 = arith.constant 8 : i32
    %34 = arith.addi %c0_i32_12, %c8_i32 : i32
    %c1_i32_13 = arith.constant 1 : i32
    scf.for %arg5 = %c0_i32_12 to %34 step %c1_i32_13  : i32 {
      %cst_15 = arith.constant 0.000000e+00 : f32
      %35 = vector.broadcast %cst_15 : f32 to vector<136x128xf32>
      %c136_i32 = arith.constant 136 : i32
      %36 = arith.muli %arg5, %c136_i32 : i32
      %c5_i32 = arith.constant 5 : i32
      %37 = arith.addi %c5_i32, %36 : i32
      %c0_i32_16 = arith.constant 0 : i32
      %38 = arith.addi %37, %c0_i32_16 : i32
      %c0_i32_17 = arith.constant 0 : i32
      %39 = arith.addi %38, %c0_i32_17 : i32
      %c0_18 = arith.constant 0 : index
      %40 = arith.index_cast %39 : i32 to index
      %c0_19 = arith.constant 0 : index
      %41 = vector.load %arg1[%c0_18, %40, %c0_19] : memref<1x1168x128xf32, #tpu.memory_space<vmem>>, vector<1x136x128xf32>
      %42 = vector.shape_cast %41 : vector<1x136x128xf32> to vector<136x128xf32>
      %c0_20 = arith.constant 0 : index
      %c0_21 = arith.constant 0 : index
      %c0_22 = arith.constant 0 : index
      %43 = vector.load %arg2[%c0_20, %c0_21, %c0_22] : memref<9x128x128xf32, #tpu.memory_space<vmem>>, vector<1x128x128xf32>
      %44 = vector.shape_cast %43 : vector<1x128x128xf32> to vector<128x128xf32>
      %cst_23 = arith.constant dense<0.000000e+00> : vector<136x128xf32>
      %45 = tpu.matmul %42, %44, %cst_23 {dimension_numbers = #tpu.dot_dimension_numbers<[1], [0], [0], [1], [0, 0, 1, 1], [], []>} : vector<136x128xf32>, vector<128x128xf32>, vector<136x128xf32> -> vector<136x128xf32>
      %46 = arith.addf %35, %45 : vector<136x128xf32>
      %c136_i32_24 = arith.constant 136 : i32
      %47 = arith.muli %arg5, %c136_i32_24 : i32
      %c5_i32_25 = arith.constant 5 : i32
      %48 = arith.addi %c5_i32_25, %47 : i32
      %c0_i32_26 = arith.constant 0 : i32
      %49 = arith.addi %48, %c0_i32_26 : i32
      %c1_i32_27 = arith.constant 1 : i32
      %50 = arith.addi %49, %c1_i32_27 : i32
      %c0_28 = arith.constant 0 : index
      %51 = arith.index_cast %50 : i32 to index
      %c0_29 = arith.constant 0 : index
      %52 = vector.load %arg1[%c0_28, %51, %c0_29] : memref<1x1168x128xf32, #tpu.memory_space<vmem>>, vector<1x136x128xf32>
      %53 = vector.shape_cast %52 : vector<1x136x128xf32> to vector<136x128xf32>
      %c1 = arith.constant 1 : index
      %c0_30 = arith.constant 0 : index
      %c0_31 = arith.constant 0 : index
      %54 = vector.load %arg2[%c1, %c0_30, %c0_31] : memref<9x128x128xf32, #tpu.memory_space<vmem>>, vector<1x128x128xf32>
      %55 = vector.shape_cast %54 : vector<1x128x128xf32> to vector<128x128xf32>
      %cst_32 = arith.constant dense<0.000000e+00> : vector<136x128xf32>
      %56 = tpu.matmul %53, %55, %cst_32 {dimension_numbers = #tpu.dot_dimension_numbers<[1], [0], [0], [1], [0, 0, 1, 1], [], []>} : vector<136x128xf32>, vector<128x128xf32>, vector<136x128xf32> -> vector<136x128xf32>
      %57 = arith.addf %46, %56 : vector<136x128xf32>
      %c136_i32_33 = arith.constant 136 : i32
      %58 = arith.muli %arg5, %c136_i32_33 : i32
      %c5_i32_34 = arith.constant 5 : i32
      %59 = arith.addi %c5_i32_34, %58 : i32
      %c0_i32_35 = arith.constant 0 : i32
      %60 = arith.addi %59, %c0_i32_35 : i32
      %c2_i32 = arith.constant 2 : i32
      %61 = arith.addi %60, %c2_i32 : i32
      %c0_36 = arith.constant 0 : index
      %62 = arith.index_cast %61 : i32 to index
      %c0_37 = arith.constant 0 : index
      %63 = vector.load %arg1[%c0_36, %62, %c0_37] : memref<1x1168x128xf32, #tpu.memory_space<vmem>>, vector<1x136x128xf32>
      %64 = vector.shape_cast %63 : vector<1x136x128xf32> to vector<136x128xf32>
      %c2 = arith.constant 2 : index
      %c0_38 = arith.constant 0 : index
      %c0_39 = arith.constant 0 : index
      %65 = vector.load %arg2[%c2, %c0_38, %c0_39] : memref<9x128x128xf32, #tpu.memory_space<vmem>>, vector<1x128x128xf32>
      %66 = vector.shape_cast %65 : vector<1x128x128xf32> to vector<128x128xf32>
      %cst_40 = arith.constant dense<0.000000e+00> : vector<136x128xf32>
      %67 = tpu.matmul %64, %66, %cst_40 {dimension_numbers = #tpu.dot_dimension_numbers<[1], [0], [0], [1], [0, 0, 1, 1], [], []>} : vector<136x128xf32>, vector<128x128xf32>, vector<136x128xf32> -> vector<136x128xf32>
      %68 = arith.addf %57, %67 : vector<136x128xf32>
      %c136_i32_41 = arith.constant 136 : i32
      %69 = arith.muli %arg5, %c136_i32_41 : i32
      %c5_i32_42 = arith.constant 5 : i32
      %70 = arith.addi %c5_i32_42, %69 : i32
      %c34_i32_43 = arith.constant 34 : i32
      %71 = arith.addi %70, %c34_i32_43 : i32
      %c0_i32_44 = arith.constant 0 : i32
      %72 = arith.addi %71, %c0_i32_44 : i32
      %c0_45 = arith.constant 0 : index
      %73 = arith.index_cast %72 : i32 to index
      %c0_46 = arith.constant 0 : index
      %74 = vector.load %arg1[%c0_45, %73, %c0_46] : memref<1x1168x128xf32, #tpu.memory_space<vmem>>, vector<1x136x128xf32>
      %75 = vector.shape_cast %74 : vector<1x136x128xf32> to vector<136x128xf32>
      %c3 = arith.constant 3 : index
      %c0_47 = arith.constant 0 : index
      %c0_48 = arith.constant 0 : index
      %76 = vector.load %arg2[%c3, %c0_47, %c0_48] : memref<9x128x128xf32, #tpu.memory_space<vmem>>, vector<1x128x128xf32>
      %77 = vector.shape_cast %76 : vector<1x128x128xf32> to vector<128x128xf32>
      %cst_49 = arith.constant dense<0.000000e+00> : vector<136x128xf32>
      %78 = tpu.matmul %75, %77, %cst_49 {dimension_numbers = #tpu.dot_dimension_numbers<[1], [0], [0], [1], [0, 0, 1, 1], [], []>} : vector<136x128xf32>, vector<128x128xf32>, vector<136x128xf32> -> vector<136x128xf32>
      %79 = arith.addf %68, %78 : vector<136x128xf32>
      %c136_i32_50 = arith.constant 136 : i32
      %80 = arith.muli %arg5, %c136_i32_50 : i32
      %c5_i32_51 = arith.constant 5 : i32
      %81 = arith.addi %c5_i32_51, %80 : i32
      %c34_i32_52 = arith.constant 34 : i32
      %82 = arith.addi %81, %c34_i32_52 : i32
      %c1_i32_53 = arith.constant 1 : i32
      %83 = arith.addi %82, %c1_i32_53 : i32
      %c0_54 = arith.constant 0 : index
      %84 = arith.index_cast %83 : i32 to index
      %c0_55 = arith.constant 0 : index
      %85 = vector.load %arg1[%c0_54, %84, %c0_55] : memref<1x1168x128xf32, #tpu.memory_space<vmem>>, vector<1x136x128xf32>
      %86 = vector.shape_cast %85 : vector<1x136x128xf32> to vector<136x128xf32>
      %c4 = arith.constant 4 : index
      %c0_56 = arith.constant 0 : index
      %c0_57 = arith.constant 0 : index
      %87 = vector.load %arg2[%c4, %c0_56, %c0_57] : memref<9x128x128xf32, #tpu.memory_space<vmem>>, vector<1x128x128xf32>
      %88 = vector.shape_cast %87 : vector<1x128x128xf32> to vector<128x128xf32>
      %cst_58 = arith.constant dense<0.000000e+00> : vector<136x128xf32>
      %89 = tpu.matmul %86, %88, %cst_58 {dimension_numbers = #tpu.dot_dimension_numbers<[1], [0], [0], [1], [0, 0, 1, 1], [], []>} : vector<136x128xf32>, vector<128x128xf32>, vector<136x128xf32> -> vector<136x128xf32>
      %90 = arith.addf %79, %89 : vector<136x128xf32>
      %c136_i32_59 = arith.constant 136 : i32
      %91 = arith.muli %arg5, %c136_i32_59 : i32
      %c5_i32_60 = arith.constant 5 : i32
      %92 = arith.addi %c5_i32_60, %91 : i32
      %c34_i32_61 = arith.constant 34 : i32
      %93 = arith.addi %92, %c34_i32_61 : i32
      %c2_i32_62 = arith.constant 2 : i32
      %94 = arith.addi %93, %c2_i32_62 : i32
      %c0_63 = arith.constant 0 : index
      %95 = arith.index_cast %94 : i32 to index
      %c0_64 = arith.constant 0 : index
      %96 = vector.load %arg1[%c0_63, %95, %c0_64] : memref<1x1168x128xf32, #tpu.memory_space<vmem>>, vector<1x136x128xf32>
      %97 = vector.shape_cast %96 : vector<1x136x128xf32> to vector<136x128xf32>
      %c5 = arith.constant 5 : index
      %c0_65 = arith.constant 0 : index
      %c0_66 = arith.constant 0 : index
      %98 = vector.load %arg2[%c5, %c0_65, %c0_66] : memref<9x128x128xf32, #tpu.memory_space<vmem>>, vector<1x128x128xf32>
      %99 = vector.shape_cast %98 : vector<1x128x128xf32> to vector<128x128xf32>
      %cst_67 = arith.constant dense<0.000000e+00> : vector<136x128xf32>
      %100 = tpu.matmul %97, %99, %cst_67 {dimension_numbers = #tpu.dot_dimension_numbers<[1], [0], [0], [1], [0, 0, 1, 1], [], []>} : vector<136x128xf32>, vector<128x128xf32>, vector<136x128xf32> -> vector<136x128xf32>
      %101 = arith.addf %90, %100 : vector<136x128xf32>
      %c136_i32_68 = arith.constant 136 : i32
      %102 = arith.muli %arg5, %c136_i32_68 : i32
      %c5_i32_69 = arith.constant 5 : i32
      %103 = arith.addi %c5_i32_69, %102 : i32
      %c68_i32 = arith.constant 68 : i32
      %104 = arith.addi %103, %c68_i32 : i32
      %c0_i32_70 = arith.constant 0 : i32
      %105 = arith.addi %104, %c0_i32_70 : i32
      %c0_71 = arith.constant 0 : index
      %106 = arith.index_cast %105 : i32 to index
      %c0_72 = arith.constant 0 : index
      %107 = vector.load %arg1[%c0_71, %106, %c0_72] : memref<1x1168x128xf32, #tpu.memory_space<vmem>>, vector<1x136x128xf32>
      %108 = vector.shape_cast %107 : vector<1x136x128xf32> to vector<136x128xf32>
      %c6 = arith.constant 6 : index
      %c0_73 = arith.constant 0 : index
      %c0_74 = arith.constant 0 : index
      %109 = vector.load %arg2[%c6, %c0_73, %c0_74] : memref<9x128x128xf32, #tpu.memory_space<vmem>>, vector<1x128x128xf32>
      %110 = vector.shape_cast %109 : vector<1x128x128xf32> to vector<128x128xf32>
      %cst_75 = arith.constant dense<0.000000e+00> : vector<136x128xf32>
      %111 = tpu.matmul %108, %110, %cst_75 {dimension_numbers = #tpu.dot_dimension_numbers<[1], [0], [0], [1], [0, 0, 1, 1], [], []>} : vector<136x128xf32>, vector<128x128xf32>, vector<136x128xf32> -> vector<136x128xf32>
      %112 = arith.addf %101, %111 : vector<136x128xf32>
      %c136_i32_76 = arith.constant 136 : i32
      %113 = arith.muli %arg5, %c136_i32_76 : i32
      %c5_i32_77 = arith.constant 5 : i32
      %114 = arith.addi %c5_i32_77, %113 : i32
      %c68_i32_78 = arith.constant 68 : i32
      %115 = arith.addi %114, %c68_i32_78 : i32
      %c1_i32_79 = arith.constant 1 : i32
      %116 = arith.addi %115, %c1_i32_79 : i32
      %c0_80 = arith.constant 0 : index
      %117 = arith.index_cast %116 : i32 to index
      %c0_81 = arith.constant 0 : index
      %118 = vector.load %arg1[%c0_80, %117, %c0_81] : memref<1x1168x128xf32, #tpu.memory_space<vmem>>, vector<1x136x128xf32>
      %119 = vector.shape_cast %118 : vector<1x136x128xf32> to vector<136x128xf32>
      %c7 = arith.constant 7 : index
      %c0_82 = arith.constant 0 : index
      %c0_83 = arith.constant 0 : index
      %120 = vector.load %arg2[%c7, %c0_82, %c0_83] : memref<9x128x128xf32, #tpu.memory_space<vmem>>, vector<1x128x128xf32>
      %121 = vector.shape_cast %120 : vector<1x128x128xf32> to vector<128x128xf32>
      %cst_84 = arith.constant dense<0.000000e+00> : vector<136x128xf32>
      %122 = tpu.matmul %119, %121, %cst_84 {dimension_numbers = #tpu.dot_dimension_numbers<[1], [0], [0], [1], [0, 0, 1, 1], [], []>} : vector<136x128xf32>, vector<128x128xf32>, vector<136x128xf32> -> vector<136x128xf32>
      %123 = arith.addf %112, %122 : vector<136x128xf32>
      %c136_i32_85 = arith.constant 136 : i32
      %124 = arith.muli %arg5, %c136_i32_85 : i32
      %c5_i32_86 = arith.constant 5 : i32
      %125 = arith.addi %c5_i32_86, %124 : i32
      %c68_i32_87 = arith.constant 68 : i32
      %126 = arith.addi %125, %c68_i32_87 : i32
      %c2_i32_88 = arith.constant 2 : i32
      %127 = arith.addi %126, %c2_i32_88 : i32
      %c0_89 = arith.constant 0 : index
      %128 = arith.index_cast %127 : i32 to index
      %c0_90 = arith.constant 0 : index
      %129 = vector.load %arg1[%c0_89, %128, %c0_90] : memref<1x1168x128xf32, #tpu.memory_space<vmem>>, vector<1x136x128xf32>
      %130 = vector.shape_cast %129 : vector<1x136x128xf32> to vector<136x128xf32>
      %c8 = arith.constant 8 : index
      %c0_91 = arith.constant 0 : index
      %c0_92 = arith.constant 0 : index
      %131 = vector.load %arg2[%c8, %c0_91, %c0_92] : memref<9x128x128xf32, #tpu.memory_space<vmem>>, vector<1x128x128xf32>
      %132 = vector.shape_cast %131 : vector<1x128x128xf32> to vector<128x128xf32>
      %cst_93 = arith.constant dense<0.000000e+00> : vector<136x128xf32>
      %133 = tpu.matmul %130, %132, %cst_93 {dimension_numbers = #tpu.dot_dimension_numbers<[1], [0], [0], [1], [0, 0, 1, 1], [], []>} : vector<136x128xf32>, vector<128x128xf32>, vector<136x128xf32> -> vector<136x128xf32>
      %134 = arith.addf %123, %133 : vector<136x128xf32>
      %135 = vector.broadcast %27 : vector<1x128xf32> to vector<136x128xf32>
      %136 = arith.addf %134, %135 : vector<136x128xf32>
      %cst_94 = arith.constant 0.000000e+00 : f32
      %137 = vector.broadcast %cst_94 : f32 to vector<136x128xf32>
      %138 = arith.cmpf oge, %136, %137 : vector<136x128xf32>
      %139 = vector.broadcast %33 : vector<1x128xf32> to vector<136x128xf32>
      %140 = arith.mulf %139, %136 : vector<136x128xf32>
      %141 = arith.select %138, %136, %140 : vector<136x128xi1>, vector<136x128xf32>
      %cst_95 = arith.constant 0.000000e+00 : f32
      %142 = vector.shape_cast %26 : vector<136x1xi1> to vector<136x1xi1>
      %143 = vector.broadcast %142 : vector<136x1xi1> to vector<136x128xi1>
      %144 = vector.broadcast %cst_95 : f32 to vector<136x128xf32>
      %145 = arith.select %143, %141, %144 : vector<136x128xi1>, vector<136x128xf32>
      %c136_i32_96 = arith.constant 136 : i32
      %146 = arith.muli %arg5, %c136_i32_96 : i32
      %c40_i32 = arith.constant 40 : i32
      %147 = arith.addi %c40_i32, %146 : i32
      %148 = tpu.assume_multiple %147, 8 : i32
      %c0_97 = arith.constant 0 : index
      %149 = arith.index_cast %148 : i32 to index
      %c0_98 = arith.constant 0 : index
      %150 = vector.load %arg4[%c0_97, %149, %c0_98] : memref<1x1168x128xf32, #tpu.memory_space<vmem>>, vector<1x136x128xf32>
      %151 = vector.shape_cast %150 : vector<1x136x128xf32> to vector<136x128xf32>
      %152 = vector.shape_cast %145 : vector<136x128xf32> to vector<1x136x128xf32>
      tpu.vector_store %arg4[%c0_97, %149, %c0_98], %152 {strides = array<i32>} : memref<1x1168x128xf32, #tpu.memory_space<vmem>>, vector<1x136x128xf32>,
    }
    %c8_i32_14 = arith.constant 8 : i32
    return
  }
  func.func @transform_0(%arg0: i32) -> (i32, i32, i32) {
    %c0_i32 = arith.constant 0 : i32
    %c0_i32_0 = arith.constant 0 : i32
    %c0_i32_1 = arith.constant 0 : i32
    return %arg0, %c0_i32, %c0_i32_0 : i32, i32, i32
  }
  func.func @transform_1(%arg0: i32) -> (i32, i32, i32) {
    %c0_i32 = arith.constant 0 : i32
    %c0_i32_0 = arith.constant 0 : i32
    %c0_i32_1 = arith.constant 0 : i32
    %c0_i32_2 = arith.constant 0 : i32
    return %c0_i32, %c0_i32_0, %c0_i32_1 : i32, i32, i32
  }
  func.func @transform_2(%arg0: i32) -> (i32, i32) {
    %c0_i32 = arith.constant 0 : i32
    %c0_i32_0 = arith.constant 0 : i32
    %c0_i32_1 = arith.constant 0 : i32
    return %c0_i32, %c0_i32_0 : i32, i32
  }
  func.func @transform_3(%arg0: i32) -> (i32, i32, i32) {
    %c0_i32 = arith.constant 0 : i32
    %c0_i32_0 = arith.constant 0 : i32
    %c0_i32_1 = arith.constant 0 : i32
    return %arg0, %c0_i32, %c0_i32_0 : i32, i32, i32
  }
}

module attributes {stable_mosaic.version = 11 : i64} {
  func.func @_conv_final_kernel(%arg0: i32, %arg1: memref<1x1168x128xf32, #tpu.memory_space<vmem>>, %arg2: memref<1x1168x16xf32, #tpu.memory_space<vmem>>, %arg3: memref<9x128x8xf32, #tpu.memory_space<vmem>>, %arg4: memref<1x8xf32, #tpu.memory_space<vmem>>, %arg5: memref<8x16xf32, #tpu.memory_space<vmem>>, %arg6: memref<1x1088x8xf32, #tpu.memory_space<vmem>>, %arg7: memref<1x1088x16xf32, #tpu.memory_space<vmem>>) attributes {dimension_semantics = [#tpu.dimension_semantics<parallel>], iteration_bounds = array<i64: 2>, scalar_prefetch = 0 : i64, scratch_operands = 0 : i64, tpu.core_type = #tpu.core_type<tc>, window_params = [{transform_indices = @transform_0, window_bounds = array<i64: 1, 1168, 128>}, {transform_indices = @transform_1, window_bounds = array<i64: 1, 1168, 16>}, {pipeline_mode = #tpu.pipeline_mode<synchronous>, transform_indices = @transform_2, window_bounds = array<i64: 9, 128, 8>}, {pipeline_mode = #tpu.pipeline_mode<synchronous>, transform_indices = @transform_3, window_bounds = array<i64: 1, 8>}, {pipeline_mode = #tpu.pipeline_mode<synchronous>, transform_indices = @transform_4, window_bounds = array<i64: 8, 16>}, {transform_indices = @transform_5, window_bounds = array<i64: 1, 1088, 8>}, {transform_indices = @transform_6, window_bounds = array<i64: 1, 1088, 16>}]} {
    %c0 = arith.constant 0 : index
    %c0_0 = arith.constant 0 : index
    %0 = vector.load %arg4[%c0, %c0_0] : memref<1x8xf32, #tpu.memory_space<vmem>>, vector<1x8xf32>
    %c0_1 = arith.constant 0 : index
    %c0_2 = arith.constant 0 : index
    %1 = vector.load %arg5[%c0_1, %c0_2] : memref<8x16xf32, #tpu.memory_space<vmem>>, vector<8x16xf32>
    %c0_i32 = arith.constant 0 : i32
    %c8_i32 = arith.constant 8 : i32
    %2 = arith.addi %c0_i32, %c8_i32 : i32
    %c1_i32 = arith.constant 1 : i32
    scf.for %arg8 = %c0_i32 to %2 step %c1_i32  : i32 {
      %cst = arith.constant 0.000000e+00 : f32
      %3 = vector.broadcast %cst : f32 to vector<136x8xf32>
      %c136_i32 = arith.constant 136 : i32
      %4 = arith.muli %arg8, %c136_i32 : i32
      %c5_i32 = arith.constant 5 : i32
      %5 = arith.addi %c5_i32, %4 : i32
      %c0_i32_4 = arith.constant 0 : i32
      %6 = arith.addi %5, %c0_i32_4 : i32
      %c0_i32_5 = arith.constant 0 : i32
      %7 = arith.addi %6, %c0_i32_5 : i32
      %c0_6 = arith.constant 0 : index
      %8 = arith.index_cast %7 : i32 to index
      %c0_7 = arith.constant 0 : index
      %9 = vector.load %arg1[%c0_6, %8, %c0_7] : memref<1x1168x128xf32, #tpu.memory_space<vmem>>, vector<1x136x128xf32>
      %10 = vector.shape_cast %9 : vector<1x136x128xf32> to vector<136x128xf32>
      %c0_8 = arith.constant 0 : index
      %c0_9 = arith.constant 0 : index
      %c0_10 = arith.constant 0 : index
      %11 = vector.load %arg3[%c0_8, %c0_9, %c0_10] : memref<9x128x8xf32, #tpu.memory_space<vmem>>, vector<1x128x8xf32>
      %12 = vector.shape_cast %11 : vector<1x128x8xf32> to vector<128x8xf32>
      %cst_11 = arith.constant dense<0.000000e+00> : vector<136x8xf32>
      %13 = tpu.matmul %10, %12, %cst_11 {dimension_numbers = #tpu.dot_dimension_numbers<[1], [0], [0], [1], [0, 0, 1, 1], [], []>} : vector<136x128xf32>, vector<128x8xf32>, vector<136x8xf32> -> vector<136x8xf32>
      %14 = arith.addf %3, %13 : vector<136x8xf32>
      %c136_i32_12 = arith.constant 136 : i32
      %15 = arith.muli %arg8, %c136_i32_12 : i32
      %c5_i32_13 = arith.constant 5 : i32
      %16 = arith.addi %c5_i32_13, %15 : i32
      %c0_i32_14 = arith.constant 0 : i32
      %17 = arith.addi %16, %c0_i32_14 : i32
      %c1_i32_15 = arith.constant 1 : i32
      %18 = arith.addi %17, %c1_i32_15 : i32
      %c0_16 = arith.constant 0 : index
      %19 = arith.index_cast %18 : i32 to index
      %c0_17 = arith.constant 0 : index
      %20 = vector.load %arg1[%c0_16, %19, %c0_17] : memref<1x1168x128xf32, #tpu.memory_space<vmem>>, vector<1x136x128xf32>
      %21 = vector.shape_cast %20 : vector<1x136x128xf32> to vector<136x128xf32>
      %c1 = arith.constant 1 : index
      %c0_18 = arith.constant 0 : index
      %c0_19 = arith.constant 0 : index
      %22 = vector.load %arg3[%c1, %c0_18, %c0_19] : memref<9x128x8xf32, #tpu.memory_space<vmem>>, vector<1x128x8xf32>
      %23 = vector.shape_cast %22 : vector<1x128x8xf32> to vector<128x8xf32>
      %cst_20 = arith.constant dense<0.000000e+00> : vector<136x8xf32>
      %24 = tpu.matmul %21, %23, %cst_20 {dimension_numbers = #tpu.dot_dimension_numbers<[1], [0], [0], [1], [0, 0, 1, 1], [], []>} : vector<136x128xf32>, vector<128x8xf32>, vector<136x8xf32> -> vector<136x8xf32>
      %25 = arith.addf %14, %24 : vector<136x8xf32>
      %c136_i32_21 = arith.constant 136 : i32
      %26 = arith.muli %arg8, %c136_i32_21 : i32
      %c5_i32_22 = arith.constant 5 : i32
      %27 = arith.addi %c5_i32_22, %26 : i32
      %c0_i32_23 = arith.constant 0 : i32
      %28 = arith.addi %27, %c0_i32_23 : i32
      %c2_i32 = arith.constant 2 : i32
      %29 = arith.addi %28, %c2_i32 : i32
      %c0_24 = arith.constant 0 : index
      %30 = arith.index_cast %29 : i32 to index
      %c0_25 = arith.constant 0 : index
      %31 = vector.load %arg1[%c0_24, %30, %c0_25] : memref<1x1168x128xf32, #tpu.memory_space<vmem>>, vector<1x136x128xf32>
      %32 = vector.shape_cast %31 : vector<1x136x128xf32> to vector<136x128xf32>
      %c2 = arith.constant 2 : index
      %c0_26 = arith.constant 0 : index
      %c0_27 = arith.constant 0 : index
      %33 = vector.load %arg3[%c2, %c0_26, %c0_27] : memref<9x128x8xf32, #tpu.memory_space<vmem>>, vector<1x128x8xf32>
      %34 = vector.shape_cast %33 : vector<1x128x8xf32> to vector<128x8xf32>
      %cst_28 = arith.constant dense<0.000000e+00> : vector<136x8xf32>
      %35 = tpu.matmul %32, %34, %cst_28 {dimension_numbers = #tpu.dot_dimension_numbers<[1], [0], [0], [1], [0, 0, 1, 1], [], []>} : vector<136x128xf32>, vector<128x8xf32>, vector<136x8xf32> -> vector<136x8xf32>
      %36 = arith.addf %25, %35 : vector<136x8xf32>
      %c136_i32_29 = arith.constant 136 : i32
      %37 = arith.muli %arg8, %c136_i32_29 : i32
      %c5_i32_30 = arith.constant 5 : i32
      %38 = arith.addi %c5_i32_30, %37 : i32
      %c34_i32 = arith.constant 34 : i32
      %39 = arith.addi %38, %c34_i32 : i32
      %c0_i32_31 = arith.constant 0 : i32
      %40 = arith.addi %39, %c0_i32_31 : i32
      %c0_32 = arith.constant 0 : index
      %41 = arith.index_cast %40 : i32 to index
      %c0_33 = arith.constant 0 : index
      %42 = vector.load %arg1[%c0_32, %41, %c0_33] : memref<1x1168x128xf32, #tpu.memory_space<vmem>>, vector<1x136x128xf32>
      %43 = vector.shape_cast %42 : vector<1x136x128xf32> to vector<136x128xf32>
      %c3 = arith.constant 3 : index
      %c0_34 = arith.constant 0 : index
      %c0_35 = arith.constant 0 : index
      %44 = vector.load %arg3[%c3, %c0_34, %c0_35] : memref<9x128x8xf32, #tpu.memory_space<vmem>>, vector<1x128x8xf32>
      %45 = vector.shape_cast %44 : vector<1x128x8xf32> to vector<128x8xf32>
      %cst_36 = arith.constant dense<0.000000e+00> : vector<136x8xf32>
      %46 = tpu.matmul %43, %45, %cst_36 {dimension_numbers = #tpu.dot_dimension_numbers<[1], [0], [0], [1], [0, 0, 1, 1], [], []>} : vector<136x128xf32>, vector<128x8xf32>, vector<136x8xf32> -> vector<136x8xf32>
      %47 = arith.addf %36, %46 : vector<136x8xf32>
      %c136_i32_37 = arith.constant 136 : i32
      %48 = arith.muli %arg8, %c136_i32_37 : i32
      %c5_i32_38 = arith.constant 5 : i32
      %49 = arith.addi %c5_i32_38, %48 : i32
      %c34_i32_39 = arith.constant 34 : i32
      %50 = arith.addi %49, %c34_i32_39 : i32
      %c1_i32_40 = arith.constant 1 : i32
      %51 = arith.addi %50, %c1_i32_40 : i32
      %c0_41 = arith.constant 0 : index
      %52 = arith.index_cast %51 : i32 to index
      %c0_42 = arith.constant 0 : index
      %53 = vector.load %arg1[%c0_41, %52, %c0_42] : memref<1x1168x128xf32, #tpu.memory_space<vmem>>, vector<1x136x128xf32>
      %54 = vector.shape_cast %53 : vector<1x136x128xf32> to vector<136x128xf32>
      %c4 = arith.constant 4 : index
      %c0_43 = arith.constant 0 : index
      %c0_44 = arith.constant 0 : index
      %55 = vector.load %arg3[%c4, %c0_43, %c0_44] : memref<9x128x8xf32, #tpu.memory_space<vmem>>, vector<1x128x8xf32>
      %56 = vector.shape_cast %55 : vector<1x128x8xf32> to vector<128x8xf32>
      %cst_45 = arith.constant dense<0.000000e+00> : vector<136x8xf32>
      %57 = tpu.matmul %54, %56, %cst_45 {dimension_numbers = #tpu.dot_dimension_numbers<[1], [0], [0], [1], [0, 0, 1, 1], [], []>} : vector<136x128xf32>, vector<128x8xf32>, vector<136x8xf32> -> vector<136x8xf32>
      %58 = arith.addf %47, %57 : vector<136x8xf32>
      %c136_i32_46 = arith.constant 136 : i32
      %59 = arith.muli %arg8, %c136_i32_46 : i32
      %c5_i32_47 = arith.constant 5 : i32
      %60 = arith.addi %c5_i32_47, %59 : i32
      %c34_i32_48 = arith.constant 34 : i32
      %61 = arith.addi %60, %c34_i32_48 : i32
      %c2_i32_49 = arith.constant 2 : i32
      %62 = arith.addi %61, %c2_i32_49 : i32
      %c0_50 = arith.constant 0 : index
      %63 = arith.index_cast %62 : i32 to index
      %c0_51 = arith.constant 0 : index
      %64 = vector.load %arg1[%c0_50, %63, %c0_51] : memref<1x1168x128xf32, #tpu.memory_space<vmem>>, vector<1x136x128xf32>
      %65 = vector.shape_cast %64 : vector<1x136x128xf32> to vector<136x128xf32>
      %c5 = arith.constant 5 : index
      %c0_52 = arith.constant 0 : index
      %c0_53 = arith.constant 0 : index
      %66 = vector.load %arg3[%c5, %c0_52, %c0_53] : memref<9x128x8xf32, #tpu.memory_space<vmem>>, vector<1x128x8xf32>
      %67 = vector.shape_cast %66 : vector<1x128x8xf32> to vector<128x8xf32>
      %cst_54 = arith.constant dense<0.000000e+00> : vector<136x8xf32>
      %68 = tpu.matmul %65, %67, %cst_54 {dimension_numbers = #tpu.dot_dimension_numbers<[1], [0], [0], [1], [0, 0, 1, 1], [], []>} : vector<136x128xf32>, vector<128x8xf32>, vector<136x8xf32> -> vector<136x8xf32>
      %69 = arith.addf %58, %68 : vector<136x8xf32>
      %c136_i32_55 = arith.constant 136 : i32
      %70 = arith.muli %arg8, %c136_i32_55 : i32
      %c5_i32_56 = arith.constant 5 : i32
      %71 = arith.addi %c5_i32_56, %70 : i32
      %c68_i32 = arith.constant 68 : i32
      %72 = arith.addi %71, %c68_i32 : i32
      %c0_i32_57 = arith.constant 0 : i32
      %73 = arith.addi %72, %c0_i32_57 : i32
      %c0_58 = arith.constant 0 : index
      %74 = arith.index_cast %73 : i32 to index
      %c0_59 = arith.constant 0 : index
      %75 = vector.load %arg1[%c0_58, %74, %c0_59] : memref<1x1168x128xf32, #tpu.memory_space<vmem>>, vector<1x136x128xf32>
      %76 = vector.shape_cast %75 : vector<1x136x128xf32> to vector<136x128xf32>
      %c6 = arith.constant 6 : index
      %c0_60 = arith.constant 0 : index
      %c0_61 = arith.constant 0 : index
      %77 = vector.load %arg3[%c6, %c0_60, %c0_61] : memref<9x128x8xf32, #tpu.memory_space<vmem>>, vector<1x128x8xf32>
      %78 = vector.shape_cast %77 : vector<1x128x8xf32> to vector<128x8xf32>
      %cst_62 = arith.constant dense<0.000000e+00> : vector<136x8xf32>
      %79 = tpu.matmul %76, %78, %cst_62 {dimension_numbers = #tpu.dot_dimension_numbers<[1], [0], [0], [1], [0, 0, 1, 1], [], []>} : vector<136x128xf32>, vector<128x8xf32>, vector<136x8xf32> -> vector<136x8xf32>
      %80 = arith.addf %69, %79 : vector<136x8xf32>
      %c136_i32_63 = arith.constant 136 : i32
      %81 = arith.muli %arg8, %c136_i32_63 : i32
      %c5_i32_64 = arith.constant 5 : i32
      %82 = arith.addi %c5_i32_64, %81 : i32
      %c68_i32_65 = arith.constant 68 : i32
      %83 = arith.addi %82, %c68_i32_65 : i32
      %c1_i32_66 = arith.constant 1 : i32
      %84 = arith.addi %83, %c1_i32_66 : i32
      %c0_67 = arith.constant 0 : index
      %85 = arith.index_cast %84 : i32 to index
      %c0_68 = arith.constant 0 : index
      %86 = vector.load %arg1[%c0_67, %85, %c0_68] : memref<1x1168x128xf32, #tpu.memory_space<vmem>>, vector<1x136x128xf32>
      %87 = vector.shape_cast %86 : vector<1x136x128xf32> to vector<136x128xf32>
      %c7 = arith.constant 7 : index
      %c0_69 = arith.constant 0 : index
      %c0_70 = arith.constant 0 : index
      %88 = vector.load %arg3[%c7, %c0_69, %c0_70] : memref<9x128x8xf32, #tpu.memory_space<vmem>>, vector<1x128x8xf32>
      %89 = vector.shape_cast %88 : vector<1x128x8xf32> to vector<128x8xf32>
      %cst_71 = arith.constant dense<0.000000e+00> : vector<136x8xf32>
      %90 = tpu.matmul %87, %89, %cst_71 {dimension_numbers = #tpu.dot_dimension_numbers<[1], [0], [0], [1], [0, 0, 1, 1], [], []>} : vector<136x128xf32>, vector<128x8xf32>, vector<136x8xf32> -> vector<136x8xf32>
      %91 = arith.addf %80, %90 : vector<136x8xf32>
      %c136_i32_72 = arith.constant 136 : i32
      %92 = arith.muli %arg8, %c136_i32_72 : i32
      %c5_i32_73 = arith.constant 5 : i32
      %93 = arith.addi %c5_i32_73, %92 : i32
      %c68_i32_74 = arith.constant 68 : i32
      %94 = arith.addi %93, %c68_i32_74 : i32
      %c2_i32_75 = arith.constant 2 : i32
      %95 = arith.addi %94, %c2_i32_75 : i32
      %c0_76 = arith.constant 0 : index
      %96 = arith.index_cast %95 : i32 to index
      %c0_77 = arith.constant 0 : index
      %97 = vector.load %arg1[%c0_76, %96, %c0_77] : memref<1x1168x128xf32, #tpu.memory_space<vmem>>, vector<1x136x128xf32>
      %98 = vector.shape_cast %97 : vector<1x136x128xf32> to vector<136x128xf32>
      %c8 = arith.constant 8 : index
      %c0_78 = arith.constant 0 : index
      %c0_79 = arith.constant 0 : index
      %99 = vector.load %arg3[%c8, %c0_78, %c0_79] : memref<9x128x8xf32, #tpu.memory_space<vmem>>, vector<1x128x8xf32>
      %100 = vector.shape_cast %99 : vector<1x128x8xf32> to vector<128x8xf32>
      %cst_80 = arith.constant dense<0.000000e+00> : vector<136x8xf32>
      %101 = tpu.matmul %98, %100, %cst_80 {dimension_numbers = #tpu.dot_dimension_numbers<[1], [0], [0], [1], [0, 0, 1, 1], [], []>} : vector<136x128xf32>, vector<128x8xf32>, vector<136x8xf32> -> vector<136x8xf32>
      %102 = arith.addf %91, %101 : vector<136x8xf32>
      %c136_i32_81 = arith.constant 136 : i32
      %103 = arith.muli %arg8, %c136_i32_81 : i32
      %c40_i32 = arith.constant 40 : i32
      %104 = arith.addi %c40_i32, %103 : i32
      %c136_i32_82 = arith.constant 136 : i32
      %105 = arith.muli %arg8, %c136_i32_82 : i32
      %106 = tpu.assume_multiple %104, 8 : i32
      %107 = tpu.assume_multiple %105, 8 : i32
      %c0_83 = arith.constant 0 : index
      %108 = arith.index_cast %106 : i32 to index
      %c0_84 = arith.constant 0 : index
      %109 = vector.load %arg2[%c0_83, %108, %c0_84] : memref<1x1168x16xf32, #tpu.memory_space<vmem>>, vector<1x136x16xf32>
      %110 = vector.shape_cast %109 : vector<1x136x16xf32> to vector<136x16xf32>
      %111 = vector.extract_strided_slice %110 {offsets = [0, 0], sizes = [136, 8], strides = [1, 1]} : vector<136x16xf32> to vector<136x8xf32>
      %112 = vector.broadcast %0 : vector<1x8xf32> to vector<136x8xf32>
      %113 = arith.addf %102, %112 : vector<136x8xf32>
      %114 = arith.addf %113, %111 : vector<136x8xf32>
      %c0_85 = arith.constant 0 : index
      %115 = arith.index_cast %107 : i32 to index
      %c0_86 = arith.constant 0 : index
      %116 = vector.load %arg6[%c0_85, %115, %c0_86] : memref<1x1088x8xf32, #tpu.memory_space<vmem>>, vector<1x136x8xf32>
      %117 = vector.shape_cast %116 : vector<1x136x8xf32> to vector<136x8xf32>
      %118 = vector.shape_cast %114 : vector<136x8xf32> to vector<1x136x8xf32>
      tpu.vector_store %arg6[%c0_85, %115, %c0_86], %118 {strides = array<i32>} : memref<1x1088x8xf32, #tpu.memory_space<vmem>>, vector<1x136x8xf32>,
      %cst_87 = arith.constant dense<0.000000e+00> : vector<136x16xf32>
      %119 = tpu.matmul %114, %1, %cst_87 {dimension_numbers = #tpu.dot_dimension_numbers<[1], [0], [0], [1], [0, 0, 1, 1], [], []>} : vector<136x8xf32>, vector<8x16xf32>, vector<136x16xf32> -> vector<136x16xf32>
      %c0_88 = arith.constant 0 : index
      %120 = arith.index_cast %107 : i32 to index
      %c0_89 = arith.constant 0 : index
      %121 = vector.load %arg7[%c0_88, %120, %c0_89] : memref<1x1088x16xf32, #tpu.memory_space<vmem>>, vector<1x136x16xf32>
      %122 = vector.shape_cast %121 : vector<1x136x16xf32> to vector<136x16xf32>
      %123 = vector.shape_cast %119 : vector<136x16xf32> to vector<1x136x16xf32>
      tpu.vector_store %arg7[%c0_88, %120, %c0_89], %123 {strides = array<i32>} : memref<1x1088x16xf32, #tpu.memory_space<vmem>>, vector<1x136x16xf32>,
    }
    %c8_i32_3 = arith.constant 8 : i32
    return
  }
  func.func @transform_0(%arg0: i32) -> (i32, i32, i32) {
    %c0_i32 = arith.constant 0 : i32
    %c0_i32_0 = arith.constant 0 : i32
    %c0_i32_1 = arith.constant 0 : i32
    return %arg0, %c0_i32, %c0_i32_0 : i32, i32, i32
  }
  func.func @transform_1(%arg0: i32) -> (i32, i32, i32) {
    %c0_i32 = arith.constant 0 : i32
    %c0_i32_0 = arith.constant 0 : i32
    %c0_i32_1 = arith.constant 0 : i32
    return %arg0, %c0_i32, %c0_i32_0 : i32, i32, i32
  }
  func.func @transform_2(%arg0: i32) -> (i32, i32, i32) {
    %c0_i32 = arith.constant 0 : i32
    %c0_i32_0 = arith.constant 0 : i32
    %c0_i32_1 = arith.constant 0 : i32
    %c0_i32_2 = arith.constant 0 : i32
    return %c0_i32, %c0_i32_0, %c0_i32_1 : i32, i32, i32
  }
  func.func @transform_3(%arg0: i32) -> (i32, i32) {
    %c0_i32 = arith.constant 0 : i32
    %c0_i32_0 = arith.constant 0 : i32
    %c0_i32_1 = arith.constant 0 : i32
    return %c0_i32, %c0_i32_0 : i32, i32
  }
  func.func @transform_4(%arg0: i32) -> (i32, i32) {
    %c0_i32 = arith.constant 0 : i32
    %c0_i32_0 = arith.constant 0 : i32
    %c0_i32_1 = arith.constant 0 : i32
    return %c0_i32, %c0_i32_0 : i32, i32
  }
  func.func @transform_5(%arg0: i32) -> (i32, i32, i32) {
    %c0_i32 = arith.constant 0 : i32
    %c0_i32_0 = arith.constant 0 : i32
    %c0_i32_1 = arith.constant 0 : i32
    return %arg0, %c0_i32, %c0_i32_0 : i32, i32, i32
  }
  func.func @transform_6(%arg0: i32) -> (i32, i32, i32) {
    %c0_i32 = arith.constant 0 : i32
    %c0_i32_0 = arith.constant 0 : i32
    %c0_i32_1 = arith.constant 0 : i32
    return %arg0, %c0_i32, %c0_i32_0 : i32, i32, i32
  }
}

</mosaic_0001>

<bundles_post_ra>
// kernel: zsl_cnn_forward.5
= control target key start
LH: loop header
LB: loop body
LE: loop exit
PB: predicated region body
PF: predicated region fallthrough
CT: control target
= control target key end

     0   :  { %8 = vsyncpa [#allocation3], 0  ;;  %s1101_s0 = inlined_call_operand.hbm [shape: f32[2,8,8,8], index: 0, kind: input, shape index: {}]   ;;  %s1102_s1 = inlined_call_operand.vmem [shape: f32[32,8], index: 1, kind: input, shape index: {}]   ;;  %s1103_s2 = inlined_call_operand.hbm [shape: f32[8,32], index: 2, kind: input, shape index: {}]   ;;  %s1104_s3 = inlined_call_operand.vmem [shape: f32[2,8,32,32], index: 3, kind: output, shape index: {}]  }
   0x1   :  { %10 = vsyncpa [#allocation3 + $0x1], 0 }
   0x2   :  { %11 = vsyncpa [#allocation5], 0  ;;  %s874_s12 = smov 0   ;;  %s876_s13 = smov 0  }
   0x3   :  { %s878_s14 = smov 0   ;;  %s880_s15 = smov 0  }
   0x4 LB: > { %s893_s16 = sadd.s32 4294967295, %s849_s15   ;;  %s896_s17 = sadd.s32 1, %s849_s15   ;;  %s849_s15 = sphi %s880_s15, %s1112_s15   ;;  %s845_s14 = sphi %s878_s14, %s1111_s14   ;;  %s841_s13 = sphi %s876_s13, %s1110_s13   ;;  %s837_s12 = sphi %s874_s12, %s1109_s12  }
   0x5   : > { %s21_s18 = ssub.s32 %s849_s15, %s896_s17  ;;  %s24_s19 = sadd.s32 1, %s845_s14 }
   0x6   : > { %p22_p0 = scmp.eq.s32.totalorder %s21_s18, 0  ;;  %p31_p1 = scmp.ne.s32.totalorder %s845_s14, %s841_s13 }
   0x7   : > { %p32_p2 = scmp.eq.s32.totalorder %s849_s15, 0  ;;  %p37_p3 = scmp.ne.s32.totalorder %s841_s13, %s837_s12 }
   0x8   : > { %s906_s20 = scalar_select %p22_p0, %s845_s14, %s24_s19  }
   0x9   : > { %p908_p4 = por %p32_p2, %p31_p1  ;;  %p38_p5 = scmp.eq.s32.totalorder %s893_s16, 0 }
   0xa   : > { %p642_p6 = scmp.ge.s32.totalorder %s849_s15, 1  ;;  %p116_p7 = scmp.lt.s32.totalorder %s849_s15, 3 }
   0xb   : > { %p917_p8 = por %p38_p5, %p37_p3  ;;  %s131_s26 = sshll.u32 %s1103_s2, 4  ;;  %s132_s26 = int_to_ptr.hbm [resolvable:$true] %s131_s26 }
   0xc   : > { %p921_p9 = pnand %p642_p6, %p116_p7  ;;  %s851_s27 = smov [#allocation4]  }
   0xd   : > { %s133_s28 = sshll.u32 %s851_s27, 4  ;;  %p714_p12 = scmp.lt.s32.totalorder %s849_s15, 2  ;;  %s134_s28 = int_to_ptr.vmem [resolvable:$true] %s133_s28 }
   0xe   : > { %p705_p10 = pneg %p921_p9  ;;  %s144_s29 = sand.u32 1, %s845_s14  }
   0xf   : > { %s695_s30 = sshll.u32 %s849_s15, 6  ;;  %p937_p13 = pnand %p714_p12, %p908_p4 }
  0x10   : > { %p706_p11 = pnand %p705_p10, %p38_p5  ;;  %s645_s5 = sshll.u32 %s144_s29, 6 }
  0x11   : > { %s153_s8 = scalar_lea.hbm %s1101_s0, %s695_s30  ;;  %s148_s10 = scalar_lea.vmem [#allocation2], %s645_s5 }
  0x12   : > { %708 = dma.hbm_to_vmem [thread:$0]  (!%p706_p11), %s132_s26, 128, %s134_s28, [#allocation5]  }
  0x13   : > { %s154_s9 = sshll.u32 %s153_s8, 4  ;;  %s156_s11 = sshll.u32 %s148_s10, 4  ;;  %s155_s9 = int_to_ptr.hbm [resolvable:$true] %s154_s9  ;;  %s157_s11 = int_to_ptr.vmem [resolvable:$true] %s156_s11 }
  0x14   : > { %s145_s12 = scalar_lea.sflag [#allocation3], %s144_s29  ;;  %s781_s18 = sshra.s32 %s155_s9, 4  ;;  %s782_s18 = int_to_ptr.hbm [resolvable:$true] %s781_s18 }
  0x15   : > { %s783_s15 = scalar_lea.hbm %s782_s18, 64  ;;  %p785_p1 = pneg %p937_p13 }
  0x16   : > { %p784_p0 = scmp.ne.s32.totalorder %s782_s18, %s783_s15  ;;  %s788_s24 = scalar_lea.hbm %s1101_s0, 128 }
  0x17   : > { %p789_p4 = scmp.lt.s32.totalorder %s782_s18, %s1101_s0  ;;  %p790_p6 = scmp.lt.s32.totalorder %s788_s24, %s783_s15 }
  0x18   : > { %p786_p2 = pnand %p785_p1, %p784_p0 }
  0x19   : > { %p791_p7 = por %p790_p6, %p789_p4 }
  0x1a   : > { %p787_p3 = pneg %p786_p2 }
  0x1c   : > { %p792_p10 = pnand %p791_p7, %p787_p3 }
  0x1e   : > { %795 = shalt.err (!%p792_p10)
}
  0x1f   : > { %s852_s27 = smov 128   ;;  %s853_s28 = smov 8  }
  0x20   : > { %712 = dma.hbm_to_vmem [thread:$0]  (!%p937_p13), %s155_s9, 1024, %s157_s11, %s145_s12, %s852_s27, %s852_s27, %s853_s28  }
  0x21   : > { %168 = sbr.rel (%p921_p9) target bundleno = 377 (0x179), region = 32  ;;  %s170_s29 = sand.u32 (!%p921_p9), 1, %s841_s13  }
  0x22   : > { %s649_s30 = sshll.u32 (!%p921_p9), %s170_s29, 6  ;;  %s171_s5 = scalar_lea.sflag (!%p921_p9), [#allocation3], %s170_s29 }
  0x23   : > { %s174_s6 = scalar_lea.vmem (!%p921_p9), [#allocation2], %s649_s30 }
  0x26   : > { %828 = dma.done.wait (%p917_p8), %s171_s5, 1024  }
  0x27   : > { %830 = vsyncadd (%p917_p8), %s171_s5, 4294966272 }
  0x28   : > { %832 = dma.done.wait (%p38_p5), [#allocation5], 128  }
  0x29   : > { %834 = vsyncadd (%p38_p5), [#allocation5], 4294967168  ;;  %vm217_vm0 = vcmask 64512   ;;  %v216_v0 = vld [vmem:[#allocation4] sm:$0xff]  ;;  %v214_v2 = vld [vmem:[%s174_s6 + $0x30] sm:$0xff]  ;;  %p203_p5 = scmp.lt.s32.totalorder %s893_s16, 1 }
  0x2a   : > { %v208_v1 = vld [vmem:[%s174_s6] sm:$0xff]  ;;  %257 = vmatpush.msra.mxu0 %v216_v0  ;;  %697 = vmatpush.msra.mxu2 %v216_v0  ;;  %v209_v3 = vld [vmem:[%s174_s6 + $0x8] sm:$0xff]  ;;  %v215_v4 = vld [vmem:[%s174_s6 + $0x38] sm:$0xff]  ;;  %vm531_vm1 = vcmask 261120  }
  0x2b   : > { %653 = vmatmul.msk.f32.vlgmr.msra.gmra.mxu0 %vm217_vm0, %v208_v1  ;;  %659 = vmatmul.msk.f32.vlgmr.msra.gmra.mxu2 %vm217_vm0, %v214_v2  ;;  %v210_v5 = vld [vmem:[%s174_s6 + $0x10] sm:$0xff]  ;;  %v211_v6 = vld [vmem:[%s174_s6 + $0x18] sm:$0xff]  ;;  %v212_v7 = vld [vmem:[%s174_s6 + $0x20] sm:$0xff]  ;;  %s1114_s16 = smov (!%p203_p5, %s893_s16), 1 }
  0x2c   : > { %v213_v8 = vld [vmem:[%s174_s6 + $0x28] sm:$0xff]  ;;  %v285_v9 = vld [vmem:[%s1102_s1 + $0x10] sm:$0xff]  ;;  %v283_v10 = vld [vmem:[%s1102_s1] sm:$0xff]  ;;  %s696_s12 = sshll.u32 %s1114_s16, 8 }
  0x2d   : > { %v286_v13 = vld [vmem:[%s1102_s1 + $0x18] sm:$0xff]  ;;  %v284_v14 = vld [vmem:[%s1102_s1 + $0x8] sm:$0xff]  ;;  %s1022_s19 = scalar_lea.vmem %s1104_s3, %s696_s12 }
  0x33   : > { %654 = vmatmul.msk.f32.gmra.mxu0 %vm217_vm0, %v209_v3  ;;  %660 = vmatmul.msk.f32.gmra.mxu2 %vm217_vm0, %v215_v4 }
  0x3b   : > { %655 = vmatmul.msk.f32.gmra.mxu0 %vm217_vm0, %v210_v5 }
  0x43   : > { %656 = vmatmul.msk.f32.gmra.mxu0 %vm217_vm0, %v211_v6 }
  0x4b   : > { %657 = vmatmul.msk.f32.gmra.mxu0 %vm217_vm0, %v212_v7 }
  0x53   : > { %658 = vmatmul.msk.f32.gmra.mxu0 %vm217_vm0, %v213_v8 }
  0xa8   : > { %v259_v11 = vpop.f32.mrf.mxu0 }
  0xa9   : > { %314 = vmatpush.msra.mxu1 %v259_v11  ;;  %698 = vmatpush.msra.mxu3 %v259_v11 }
  0xaa   : > { %663 = vmatmul.msk.f32.vlgmr.msra.gmra.mxu3 %vm217_vm0, %v285_v9  ;;  %661 = vmatmul.msk.f32.vlgmr.msra.gmra.mxu1 %vm217_vm0, %v283_v10 }
  0xae   : > { %v277_v12 = vpop.f32.mrf.mxu2 }
  0xaf   : > { %488 = vmatpush.msrb.mxu0 %v277_v12 }
  0xb0   : > { %v262_v15 = vpop.f32.mrf.mxu0  ;;  %685 = vmatmul.msk.f32.vlgmr.msrb.gmra.mxu0 %vm217_vm0, %v283_v10 }
  0xb1   : > { %343 = vmatpush.msrb.mxu2 %v262_v15 }
  0xb2   : > { %664 = vmatmul.msk.f32.gmra.mxu3 %vm217_vm0, %v286_v13  ;;  %662 = vmatmul.msk.f32.gmra.mxu1 %vm217_vm0, %v284_v14 }
  0xb3   : > { %665 = vmatmul.msk.f32.vlgmr.msrb.gmra.mxu2 %vm217_vm0, %v283_v10 }
  0xb6   : > { %v280_v18 = vpop.f32.mrf.mxu2 }
  0xb8   : > { %v265_v16 = vpop.f32.mrf.mxu0  ;;  %686 = vmatmul.msk.f32.gmra.mxu0 %vm217_vm0, %v284_v14 }
  0xb9   : > { %372 = vmatpush.msrb.mxu3 %v265_v16 }
  0xba   : > { %669 = vmatmul.msk.f32.vlgmr.msrb.gmra.mxu3 %vm217_vm0, %v283_v10 }
  0xbb   : > { %666 = vmatmul.msk.f32.gmra.mxu2 %vm217_vm0, %v284_v14 }
  0xc0   : > { %v268_v17 = vpop.f32.mrf.mxu0  ;;  %687 = vmatmul.msk.f32.gmra.mxu0 %vm217_vm0, %v285_v9 }
  0xc1   : > { %401 = vmatpush.msrb.mxu1 %v268_v17 }
  0xc2   : > { %673 = vmatmul.msk.f32.vlgmr.msrb.gmra.mxu1 %vm217_vm0, %v283_v10  ;;  %670 = vmatmul.msk.f32.gmra.mxu3 %vm217_vm0, %v284_v14 }
  0xc3   : > { %517 = vmatpush.msra.mxu1 %v280_v18  ;;  %667 = vmatmul.msk.f32.gmra.mxu2 %vm217_vm0, %v285_v9 }
  0xc8   : > { %v271_v19 = vpop.f32.mrf.mxu0  ;;  %688 = vmatmul.msk.f32.gmra.mxu0 %vm217_vm0, %v286_v13 }
  0xc9   : > { %430 = vmatpush.msra.mxu2 %v271_v19 }
  0xca   : > { %674 = vmatmul.msk.f32.gmra.mxu1 %vm217_vm0, %v284_v14  ;;  %671 = vmatmul.msk.f32.gmra.mxu3 %vm217_vm0, %v285_v9 }
  0xcb   : > { %668 = vmatmul.msk.f32.gmra.mxu2 %vm217_vm0, %v286_v13 }
  0xd0   : > { %v274_v20 = vpop.f32.mrf.mxu0 }
  0xd1   : > { %459 = vmatpush.msra.mxu3 %v274_v20 }
  0xd2   : > { %675 = vmatmul.msk.f32.gmra.mxu1 %vm217_vm0, %v285_v9  ;;  %672 = vmatmul.msk.f32.gmra.mxu3 %vm217_vm0, %v286_v13 }
  0xd3   : > { %677 = vmatmul.msk.f32.vlgmr.msra.gmra.mxu2 %vm217_vm0, %v283_v10 }
  0xda   : > { %676 = vmatmul.msk.f32.gmra.mxu1 %vm217_vm0, %v286_v13  ;;  %681 = vmatmul.msk.f32.vlgmr.msra.gmra.mxu3 %vm217_vm0, %v283_v10 }
  0xdb   : > { %678 = vmatmul.msk.f32.gmra.mxu2 %vm217_vm0, %v284_v14 }
  0xe2   : > { %689 = vmatmul.msk.f32.vlgmr.msra.gmra.mxu1 %vm217_vm0, %v283_v10  ;;  %682 = vmatmul.msk.f32.gmra.mxu3 %vm217_vm0, %v284_v14 }
  0xe3   : > { %679 = vmatmul.msk.f32.gmra.mxu2 %vm217_vm0, %v285_v9 }
  0xea   : > { %690 = vmatmul.msk.f32.gmra.mxu1 %vm217_vm0, %v284_v14  ;;  %683 = vmatmul.msk.f32.gmra.mxu3 %vm217_vm0, %v285_v9 }
  0xeb   : > { %680 = vmatmul.msk.f32.gmra.mxu2 %vm217_vm0, %v286_v13 }
  0xf2   : > { %691 = vmatmul.msk.f32.gmra.mxu1 %vm217_vm0, %v285_v9  ;;  %684 = vmatmul.msk.f32.gmra.mxu3 %vm217_vm0, %v286_v13 }
  0xfa   : > { %692 = vmatmul.msk.f32.gmra.mxu1 %vm217_vm0, %v286_v13 }
 0x127   : > { %v316_v21 = vpop.f32.mrf.mxu1 }
 0x128   : > { %532 = vst.msk [vmem:[%s1022_s19] sm:$0xff] %vm531_vm1, %v316_v21 }
 0x12d   : > { %v322_v22 = vpop.f32.mrf.mxu3  ;;  %v490_v28 = vpop.f32.mrf.mxu0 }
 0x12e   : > { %534 = vst.msk [vmem:[%s1022_s19 + $0x10] sm:$0xff] %vm531_vm1, %v322_v22 }
 0x12f   : > { %v319_v23 = vpop.f32.mrf.mxu1  ;;  %556 = vst.msk [vmem:[%s1022_s19 + $0xc0] sm:$0xff] %vm531_vm1, %v490_v28 }
 0x130   : > { %533 = vst.msk [vmem:[%s1022_s19 + $0x8] sm:$0xff] %vm531_vm1, %v319_v23 }
 0x135   : > { %v325_v24 = vpop.f32.mrf.mxu3  ;;  %v493_v32 = vpop.f32.mrf.mxu0 }
 0x136   : > { %535 = vst.msk [vmem:[%s1022_s19 + $0x18] sm:$0xff] %vm531_vm1, %v325_v24  ;;  %v345_v25 = vpop.f32.mrf.mxu2 }
 0x137   : > { %536 = vst.msk [vmem:[%s1022_s19 + $0x20] sm:$0xff] %vm531_vm1, %v345_v25 }
 0x138   : > { %557 = vst.msk [vmem:[%s1022_s19 + $0xc8] sm:$0xff] %vm531_vm1, %v493_v32 }
 0x13d   : > { %v374_v26 = vpop.f32.mrf.mxu3  ;;  %v496_v36 = vpop.f32.mrf.mxu0 }
 0x13e   : > { %540 = vst.msk [vmem:[%s1022_s19 + $0x40] sm:$0xff] %vm531_vm1, %v374_v26  ;;  %v348_v27 = vpop.f32.mrf.mxu2 }
 0x13f   : > { %v403_v29 = vpop.f32.mrf.mxu1  ;;  %537 = vst.msk [vmem:[%s1022_s19 + $0x28] sm:$0xff] %vm531_vm1, %v348_v27 }
 0x140   : > { %544 = vst.msk [vmem:[%s1022_s19 + $0x60] sm:$0xff] %vm531_vm1, %v403_v29 }
 0x141   : > { %558 = vst.msk [vmem:[%s1022_s19 + $0xd0] sm:$0xff] %vm531_vm1, %v496_v36 }
 0x145   : > { %v377_v30 = vpop.f32.mrf.mxu3  ;;  %v499_v40 = vpop.f32.mrf.mxu0 }
 0x146   : > { %541 = vst.msk [vmem:[%s1022_s19 + $0x48] sm:$0xff] %vm531_vm1, %v377_v30  ;;  %v351_v31 = vpop.f32.mrf.mxu2 }
 0x147   : > { %v406_v33 = vpop.f32.mrf.mxu1  ;;  %538 = vst.msk [vmem:[%s1022_s19 + $0x30] sm:$0xff] %vm531_vm1, %v351_v31 }
 0x148   : > { %545 = vst.msk [vmem:[%s1022_s19 + $0x68] sm:$0xff] %vm531_vm1, %v406_v33 }
 0x149   : > { %559 = vst.msk [vmem:[%s1022_s19 + $0xd8] sm:$0xff] %vm531_vm1, %v499_v40 }
 0x14d   : > { %v380_v34 = vpop.f32.mrf.mxu3 }
 0x14e   : > { %542 = vst.msk [vmem:[%s1022_s19 + $0x50] sm:$0xff] %vm531_vm1, %v380_v34  ;;  %v354_v35 = vpop.f32.mrf.mxu2 }
 0x14f   : > { %v409_v37 = vpop.f32.mrf.mxu1  ;;  %539 = vst.msk [vmem:[%s1022_s19 + $0x38] sm:$0xff] %vm531_vm1, %v354_v35 }
 0x150   : > { %546 = vst.msk [vmem:[%s1022_s19 + $0x70] sm:$0xff] %vm531_vm1, %v409_v37 }
 0x155   : > { %v383_v38 = vpop.f32.mrf.mxu3 }
 0x156   : > { %543 = vst.msk [vmem:[%s1022_s19 + $0x58] sm:$0xff] %vm531_vm1, %v383_v38  ;;  %v432_v39 = vpop.f32.mrf.mxu2 }
 0x157   : > { %v412_v41 = vpop.f32.mrf.mxu1  ;;  %548 = vst.msk [vmem:[%s1022_s19 + $0x80] sm:$0xff] %vm531_vm1, %v432_v39 }
 0x158   : > { %547 = vst.msk [vmem:[%s1022_s19 + $0x78] sm:$0xff] %vm531_vm1, %v412_v41 }
 0x15d   : > { %v461_v42 = vpop.f32.mrf.mxu3 }
 0x15e   : > { %552 = vst.msk [vmem:[%s1022_s19 + $0xa0] sm:$0xff] %vm531_vm1, %v461_v42  ;;  %v435_v43 = vpop.f32.mrf.mxu2 }
 0x15f   : > { %v519_v44 = vpop.f32.mrf.mxu1  ;;  %549 = vst.msk [vmem:[%s1022_s19 + $0x88] sm:$0xff] %vm531_vm1, %v435_v43 }
 0x160   : > { %560 = vst.msk [vmem:[%s1022_s19 + $0xe0] sm:$0xff] %vm531_vm1, %v519_v44 }
 0x165   : > { %v464_v45 = vpop.f32.mrf.mxu3 }
 0x166   : > { %553 = vst.msk [vmem:[%s1022_s19 + $0xa8] sm:$0xff] %vm531_vm1, %v464_v45  ;;  %v438_v46 = vpop.f32.mrf.mxu2 }
 0x167   : > { %v522_v47 = vpop.f32.mrf.mxu1  ;;  %550 = vst.msk [vmem:[%s1022_s19 + $0x90] sm:$0xff] %vm531_vm1, %v438_v46 }
 0x168   : > { %561 = vst.msk [vmem:[%s1022_s19 + $0xe8] sm:$0xff] %vm531_vm1, %v522_v47 }
 0x16d   : > { %v467_v48 = vpop.f32.mrf.mxu3 }
 0x16e   : > { %554 = vst.msk [vmem:[%s1022_s19 + $0xb0] sm:$0xff] %vm531_vm1, %v467_v48  ;;  %v441_v49 = vpop.f32.mrf.mxu2 }
 0x16f   : > { %v525_v50 = vpop.f32.mrf.mxu1  ;;  %551 = vst.msk [vmem:[%s1022_s19 + $0x98] sm:$0xff] %vm531_vm1, %v441_v49 }
 0x170   : > { %562 = vst.msk [vmem:[%s1022_s19 + $0xf0] sm:$0xff] %vm531_vm1, %v525_v50 }
 0x175   : > { %v470_v51 = vpop.f32.mrf.mxu3 }
 0x176   : > { %555 = vst.msk [vmem:[%s1022_s19 + $0xb8] sm:$0xff] %vm531_vm1, %v470_v51 }
 0x177   : > { %v528_v52 = vpop.f32.mrf.mxu1 }
 0x178   : > { %563 = vst.msk [vmem:[%s1022_s19 + $0xf8] sm:$0xff] %vm531_vm1, %v528_v52 }
 0x179 PF: > { %p14_p8 = scmp.ge.s32.totalorder %s896_s17, 4   ;;  %s1109_s12 = smov %s841_s13 }
 0x17a   : > { %s1110_s13 = smov %s845_s14  ;;  %s1111_s14 = smov %s906_s20 }
 0x17b   : > { %s1112_s15 = smov %s896_s17  ;;  %16 = sbr.rel (!%p14_p8) target bundleno = 4 (0x4), region = 76 }
 0x180   :  { %585 = vsyncpa [#allocation3], 1 }
 0x181   :  { %587 = vsyncpa [#allocation3 + $0x1], 1 }
 0x182   :  { %588 = vsyncpa [#allocation5], 1 }

// kernel: zsl_cnn_forward.6
= control target key start
LH: loop header
LB: loop body
LE: loop exit
PB: predicated region body
PF: predicated region fallthrough
CT: control target
= control target key end

     0   :  { %s2837_s12 = smov 0   ;;  %s3922_s0 = inlined_call_operand.vmem [shape: f32[2,1168,16], index: 0, kind: input, shape index: {}]   ;;  %s3923_s1 = inlined_call_operand.vmem [shape: f32[9,16,128], index: 1, kind: input, shape index: {}]   ;;  %s3924_s2 = inlined_call_operand.vmem [shape: f32[1,128], index: 2, kind: input, shape index: {}]   ;;  %s3925_s3 = inlined_call_operand.vmem [shape: f32[2,1168,128], index: 3, kind: output, shape index: {}]  }
   0x1 LB: > { %s2424_s13 = sadd.s32 4294967295, %s2808_s12   ;;  %p2428_p0 = scmp.ge.s32.totalorder %s2808_s12, 1  ;;  %s2808_s12 = sphi %s2837_s12, %s13_s12  }
   0x2   : > { %p137_p1 = scmp.lt.s32.totalorder %s2808_s12, 3 }
   0x4   : > { %p138_p2 = pnand %p2428_p0, %p137_p1 }
   0x5   : > { %p161_p3 = scmp.lt.s32.totalorder (!%p138_p2), %s2424_s13, 1  ;;  %s3323_s23 = smov (!%p138_p2), 0  }
   0x6   : > { %141 = sbr.rel (%p138_p2) target bundleno = 594 (0x252), region = 32 }
   0xb   : > { %v181_v0 = vlaneseq  ;;  %s4015_s13 = smov (!%p161_p3, %s2424_s13), 1  ;;  %v2814_v10 = vmov 0.0   ;;  %v2815_v42 = vmov 0  }
   0xc   : > { %s2778_s14 = smul.u32 1168, %s4015_s13 }
   0xd   : > { %v2846_v1 = vshrl.u32 %v181_v0, 7 }
   0xe   : > { %s2863_s17 = scalar_lea.vmem %s3922_s0, %s2778_s14  ;;  %s2868_s20 = scalar_lea.vmem %s3925_s3, %s2778_s14 }
   0xf   : > { %v2849_v2 = vadd.s32 8, %v2846_v1  ;;  %v2852_v3 = vadd.s32 16, %v2846_v1  ;;  %v2855_v4 = vadd.s32 24, %v2846_v1  ;;  %v2858_v5 = vadd.s32 32, %v2846_v1  ;;  %171 = vst [vmem:[%s2868_s20] sm:$0xff] %v2814_v10 }
  0x10   : > { %v2871_v6 = vadd.s32 40, %v2846_v1  ;;  %v2874_v7 = vadd.s32 48, %v2846_v1  ;;  %v2877_v8 = vadd.s32 56, %v2846_v1  ;;  %v2880_v9 = vadd.s32 64, %v2846_v1  ;;  %172 = vst [vmem:[%s2868_s20 + $0x8] sm:$0xff] %v2814_v10 }
  0x11   : > { %v2884_v11 = vadd.s32 72, %v2846_v1  ;;  %v2887_v12 = vadd.s32 80, %v2846_v1  ;;  %v2890_v13 = vadd.s32 88, %v2846_v1  ;;  %v2893_v14 = vadd.s32 96, %v2846_v1  ;;  %173 = vst [vmem:[%s2868_s20 + $0x10] sm:$0xff] %v2814_v10 }
  0x12   : > { %v202_v15 = vand.u32 65535, %v2846_v1  ;;  %v203_v16 = vshrl.u32 %v2846_v1, 16  ;;  %v231_v17 = vand.u32 65535, %v2849_v2  ;;  %v232_v18 = vshrl.u32 %v2849_v2, 16  ;;  %174 = vst [vmem:[%s2868_s20 + $0x18] sm:$0xff] %v2814_v10 }
  0x13   : > { %v2902_v19 = vadd.s32 104, %v2846_v1  ;;  %v260_v20 = vand.u32 65535, %v2852_v3  ;;  %v261_v21 = vshrl.u32 %v2852_v3, 16  ;;  %v289_v22 = vand.u32 65535, %v2855_v4  ;;  %175 = vst [vmem:[%s2868_s20 + $0x20] sm:$0xff] %v2814_v10 }
  0x14   : > { %v205_v23 = vmul.u32 61681, %v202_v15  ;;  %v206_v24 = vmul.u32 61680, %v202_v15  ;;  %v207_v25 = vmul.u32 61681, %v203_v16  ;;  %v290_v26 = vshrl.u32 %v2855_v4, 16  ;;  %176 = vst [vmem:[%s2868_s20 + $0x468] sm:$0xff] %v2814_v10 }
  0x15   : > { %v208_v27 = vmul.u32 61680, %v203_v16  ;;  %v234_v28 = vmul.u32 61681, %v231_v17  ;;  %v235_v29 = vmul.u32 61680, %v231_v17  ;;  %v236_v30 = vmul.u32 61681, %v232_v18  ;;  %177 = vst [vmem:[%s2868_s20 + $0x470] sm:$0xff] %v2814_v10 }
  0x16   : > { %v209_v31 = vshll.u32 %v206_v24, 16  ;;  %v210_v32 = vshrl.u32 %v206_v24, 16  ;;  %v211_v33 = vshll.u32 %v207_v25, 16  ;;  %v237_v34 = vmul.u32 61680, %v232_v18  ;;  %178 = vst [vmem:[%s2868_s20 + $0x478] sm:$0xff] %v2814_v10 }
  0x17   : > { %v212_v35 = vshrl.u32 %v207_v25, 16  ;;  %v238_v36 = vshll.u32 %v235_v29, 16  ;;  %v239_v37 = vshrl.u32 %v235_v29, 16  ;;  %v240_v38 = vshll.u32 %v236_v30, 16  ;;  %179 = vst [vmem:[%s2868_s20 + $0x480] sm:$0xff] %v2814_v10 }
  0x18   : > { %vm213_vm0 = vc.u32 %v205_v23, %v209_v31  ;;  %v215_v39 = vadd.s32 %v209_v31, %v205_v23  ;;  %v263_v40 = vmul.u32 61681, %v260_v20  ;;  %v264_v41 = vmul.u32 61680, %v260_v20  ;;  %180 = vst [vmem:[%s2868_s20 + $0x488] sm:$0xff] %v2814_v10 }
  0x19   : > { %v214_v43 = vsel %vm213_vm0, 1, %v2815_v42  ;;  %vm242_vm1 = vc.u32 %v234_v28, %v238_v36  ;;  %v244_v44 = vadd.s32 %v238_v36, %v234_v28  ;;  %v265_v45 = vmul.u32 61681, %v261_v21 }
  0x1a   : > { %v216_v46 = vadd.s32 %v214_v43, %v208_v27  ;;  %vm217_vm2 = vc.u32 %v215_v39, %v211_v33  ;;  %v243_v47 = vsel %vm242_vm1, 1, %v2815_v42  ;;  %v266_v48 = vmul.u32 61680, %v261_v21 }
  0x1b   : > { %v218_v49 = vsel %vm217_vm2, 1, %v2815_v42  ;;  %v245_v50 = vadd.s32 %v243_v47, %v237_v34  ;;  %vm246_vm3 = vc.u32 %v244_v44, %v240_v38  ;;  %v267_v51 = vshll.u32 %v264_v41, 16 }
  0x1c   : > { %v220_v52 = vadd.s32 %v218_v49, %v216_v46  ;;  %v241_v53 = vshrl.u32 %v236_v30, 16  ;;  %v247_v54 = vsel %vm246_vm3, 1, %v2815_v42  ;;  %v269_v55 = vshll.u32 %v265_v45, 16 }
  0x1d   : > { %v249_v56 = vadd.s32 %v247_v54, %v245_v50  ;;  %v268_v57 = vshrl.u32 %v264_v41, 16  ;;  %vm271_vm4 = vc.u32 %v263_v40, %v267_v51  ;;  %v273_v58 = vadd.s32 %v267_v51, %v263_v40 }
  0x1e   : > { %v221_v59 = vadd.s32 %v220_v52, %v210_v32  ;;  %v272_v60 = vsel %vm271_vm4, 1, %v2815_v42  ;;  %v292_v61 = vmul.u32 61681, %v289_v22  ;;  %v293_v62 = vmul.u32 61680, %v289_v22 }
  0x1f   : > { %v250_v63 = vadd.s32 %v249_v56, %v239_v37  ;;  %v274_v10 = vadd.s32 %v272_v60, %v266_v48  ;;  %vm275_vm5 = vc.u32 %v273_v58, %v269_v55  ;;  %v294_v15 = vmul.u32 61681, %v290_v26 }
  0x20   : > { %v222_v16 = vadd.s32 %v221_v59, %v212_v35  ;;  %v276_v17 = vsel %vm275_vm5, 1, %v2815_v42  ;;  %v295_v18 = vmul.u32 61680, %v290_v26  ;;  %v296_v20 = vshll.u32 %v293_v62, 16 }
  0x21   : > { %v251_v21 = vadd.s32 %v250_v63, %v241_v53  ;;  %v270_v23 = vshrl.u32 %v265_v45, 16  ;;  %v278_v24 = vadd.s32 %v276_v17, %v274_v10  ;;  %v298_v25 = vshll.u32 %v294_v15, 16 }
  0x22   : > { %v2922_v27 = vadd.s32 112, %v2846_v1  ;;  %v223_v28 = vshrl.u32 %v222_v16, 5  ;;  %vm300_vm6 = vc.u32 %v292_v61, %v296_v20  ;;  %v302_v29 = vadd.s32 %v296_v20, %v292_v61 }
  0x23   : > { %v252_v22 = vshrl.u32 %v251_v21, 5  ;;  %v279_v30 = vadd.s32 %v278_v24, %v268_v57  ;;  %v301_v31 = vsel %vm300_vm6, 1, %v2815_v42  ;;  %v318_v32 = vand.u32 65535, %v2858_v5 }
  0x24   : > { %v297_v33 = vshrl.u32 %v293_v62, 16  ;;  %v303_v34 = vadd.s32 %v301_v31, %v295_v18  ;;  %vm304_vm7 = vc.u32 %v302_v29, %v298_v25  ;;  %v319_v26 = vshrl.u32 %v2858_v5, 16 }
  0x25   : > { %v224_v35 = vmul.u32 34, %v223_v28  ;;  %v280_v36 = vadd.s32 %v279_v30, %v270_v23  ;;  %v299_v37 = vshrl.u32 %v294_v15, 16  ;;  %v305_v38 = vsel %vm304_vm7, 1, %v2815_v42 }
  0x26   : > { %v307_v39 = vadd.s32 %v305_v38, %v303_v34  ;;  %v321_v40 = vmul.u32 61681, %v318_v32  ;;  %v322_v41 = vmul.u32 61680, %v318_v32  ;;  %v323_v43 = vmul.u32 61681, %v319_v26 }
  0x27   : > { %v2929_v44 = vadd.s32 120, %v2846_v1  ;;  %v2932_v45 = vadd.s32 128, %v2846_v1  ;;  %v253_v46 = vmul.u32 34, %v252_v22  ;;  %v347_v47 = vand.u32 65535, %v2871_v6 }
  0x28   : > { %v308_v48 = vadd.s32 %v307_v39, %v297_v33  ;;  %v324_v49 = vmul.u32 61680, %v319_v26  ;;  %v325_v50 = vshll.u32 %v322_v41, 16  ;;  %v327_v51 = vshll.u32 %v323_v43, 16 }
  0x29   : > { %v2936_v52 = vsub.s32 %v2846_v1, %v224_v35  ;;  %v281_v53 = vshrl.u32 %v280_v36, 5  ;;  %v348_v54 = vshrl.u32 %v2871_v6, 16  ;;  %v350_v55 = vmul.u32 61681, %v347_v47 }
  0x2a   : > { %v309_v56 = vadd.s32 %v308_v48, %v299_v37  ;;  %vm329_vm8 = vc.u32 %v321_v40, %v325_v50  ;;  %v331_v57 = vadd.s32 %v325_v50, %v321_v40  ;;  %v351_v58 = vmul.u32 61680, %v347_v47 }
  0x2b   : > { %v2940_v59 = vsub.s32 %v2849_v2, %v253_v46  ;;  %v326_v60 = vshrl.u32 %v322_v41, 16  ;;  %v330_v61 = vsel %vm329_vm8, 1, %v2815_v42  ;;  %v352_v62 = vmul.u32 61681, %v348_v54 }
  0x2c   : > { %v332_v63 = vadd.s32 %v330_v61, %v324_v49  ;;  %vm333_vm9 = vc.u32 %v331_v57, %v327_v51  ;;  %v353_v10 = vmul.u32 61680, %v348_v54  ;;  %v354_v1 = vshll.u32 %v351_v58, 16 }
  0x2d   : > { %v282_v15 = vmul.u32 34, %v281_v53  ;;  %v328_v16 = vshrl.u32 %v323_v43, 16  ;;  %v334_v17 = vsel %vm333_vm9, 1, %v2815_v42  ;;  %v356_v18 = vshll.u32 %v352_v62, 16 }
  0x2e   : > { %v310_v20 = vshrl.u32 %v309_v56, 5  ;;  %v336_v21 = vadd.s32 %v334_v17, %v332_v63  ;;  %vm358_vm10 = vc.u32 %v350_v55, %v354_v1  ;;  %v360_v23 = vadd.s32 %v354_v1, %v350_v55 }
  0x2f   : > { %v355_v24 = vshrl.u32 %v351_v58, 16  ;;  %v359_v2 = vsel %vm358_vm10, 1, %v2815_v42  ;;  %v376_v25 = vand.u32 65535, %v2874_v7  ;;  %v377_v28 = vshrl.u32 %v2874_v7, 16 }
  0x30   : > { %v337_v29 = vadd.s32 %v336_v21, %v326_v60  ;;  %v361_v22 = vadd.s32 %v359_v2, %v353_v10  ;;  %vm362_vm11 = vc.u32 %v360_v23, %v356_v18  ;;  %v405_v30 = vand.u32 65535, %v2877_v8 }
  0x31   : > { %v363_v31 = vsel %vm362_vm11, 1, %v2815_v42  ;;  %v379_v32 = vmul.u32 61681, %v376_v25  ;;  %v380_v33 = vmul.u32 61680, %v376_v25  ;;  %v381_v34 = vmul.u32 61681, %v377_v28 }
  0x32   : > { %v338_v26 = vadd.s32 %v337_v29, %v328_v16  ;;  %v357_v35 = vshrl.u32 %v352_v62, 16  ;;  %v365_v36 = vadd.s32 %v363_v31, %v361_v22  ;;  %v406_v37 = vshrl.u32 %v2877_v8, 16 }
  0x33   : > { %v2951_v38 = vsub.s32 %v2852_v3, %v282_v15  ;;  %v382_v39 = vmul.u32 61680, %v377_v28  ;;  %v383_v40 = vshll.u32 %v380_v33, 16  ;;  %v385_v41 = vshll.u32 %v381_v34, 16 }
  0x34   : > { %v311_v43 = vmul.u32 34, %v310_v20  ;;  %v339_v46 = vshrl.u32 %v338_v26, 5  ;;  %v366_v47 = vadd.s32 %v365_v36, %v355_v24  ;;  %v409_v48 = vmul.u32 61680, %v405_v30 }
  0x35   : > { %vm387_vm12 = vc.u32 %v379_v32, %v383_v40  ;;  %v389_v49 = vadd.s32 %v383_v40, %v379_v32  ;;  %v408_v50 = vmul.u32 61681, %v405_v30  ;;  %v410_v51 = vmul.u32 61681, %v406_v37 }
  0x36   : > { %v367_v53 = vadd.s32 %v366_v47, %v357_v35  ;;  %v384_v54 = vshrl.u32 %v380_v33, 16  ;;  %v388_v55 = vsel %vm387_vm12, 1, %v2815_v42  ;;  %v412_v56 = vshll.u32 %v409_v48, 16 }
  0x37   : > { %v390_v57 = vadd.s32 %v388_v55, %v382_v39  ;;  %vm391_vm13 = vc.u32 %v389_v49, %v385_v41  ;;  %v411_v3 = vmul.u32 61680, %v406_v37  ;;  %v414_v58 = vshll.u32 %v410_v51, 16 }
  0x38   : > { %v2955_v60 = vsub.s32 %v2855_v4, %v311_v43  ;;  %v340_v61 = vmul.u32 34, %v339_v46  ;;  %v386_v62 = vshrl.u32 %v381_v34, 16  ;;  %v392_v63 = vsel %vm391_vm13, 1, %v2815_v42 }
  0x39   : > { %v394_v10 = vadd.s32 %v392_v63, %v390_v57  ;;  %vm416_vm14 = vc.u32 %v408_v50, %v412_v56  ;;  %v418_v1 = vadd.s32 %v412_v56, %v408_v50  ;;  %v434_v15 = vand.u32 65535, %v2880_v9 }
  0x3a   : > { %v368_v16 = vshrl.u32 %v367_v53, 5  ;;  %v413_v17 = vshrl.u32 %v409_v48, 16  ;;  %v417_v18 = vsel %vm416_vm14, 1, %v2815_v42  ;;  %v435_v20 = vshrl.u32 %v2880_v9, 16 }
  0x3b   : > { %v395_v21 = vadd.s32 %v394_v10, %v384_v54  ;;  %v419_v23 = vadd.s32 %v417_v18, %v411_v3  ;;  %vm420_vm15 = vc.u32 %v418_v1, %v414_v58  ;;  %v463_v4 = vand.u32 65535, %v2884_v11 }
  0x3c   : > { %v421_v24 = vsel %vm420_vm15, 1, %v2815_v42  ;;  %v437_v2 = vmul.u32 61681, %v434_v15  ;;  %v438_v25 = vmul.u32 61680, %v434_v15  ;;  %v439_v28 = vmul.u32 61681, %v435_v20 }
  0x3d   : > { %v396_v29 = vadd.s32 %v395_v21, %v386_v62  ;;  %v415_v22 = vshrl.u32 %v410_v51, 16  ;;  %v423_v30 = vadd.s32 %v421_v24, %v419_v23  ;;  %v464_v31 = vshrl.u32 %v2884_v11, 16 }
  0x3e   : > { %v2965_v32 = vsub.s32 %v2858_v5, %v340_v61  ;;  %v440_v33 = vmul.u32 61680, %v435_v20  ;;  %v441_v34 = vshll.u32 %v438_v25, 16  ;;  %v443_v26 = vshll.u32 %v439_v28, 16 }
  0x3f   : > { %v369_v35 = vmul.u32 34, %v368_v16  ;;  %v397_v36 = vshrl.u32 %v396_v29, 5  ;;  %v424_v37 = vadd.s32 %v423_v30, %v413_v17  ;;  %v467_v39 = vmul.u32 61680, %v463_v4 }
  0x40   : > { %vm445_vm0 = vc.u32 %v437_v2, %v441_v34  ;;  %v447_v40 = vadd.s32 %v441_v34, %v437_v2  ;;  %v466_v41 = vmul.u32 61681, %v463_v4  ;;  %v468_v43 = vmul.u32 61681, %v464_v31 }
  0x41   : > { %v425_v46 = vadd.s32 %v424_v37, %v415_v22  ;;  %v442_v47 = vshrl.u32 %v438_v25, 16  ;;  %v446_v48 = vsel %vm445_vm0, 1, %v2815_v42  ;;  %v470_v49 = vshll.u32 %v467_v39, 16 }
  0x42   : > { %v448_v50 = vadd.s32 %v446_v48, %v440_v33  ;;  %vm449_vm1 = vc.u32 %v447_v40, %v443_v26  ;;  %v469_v5 = vmul.u32 61680, %v464_v31  ;;  %v472_v51 = vshll.u32 %v468_v43, 16 }
  0x43   : > { %v2969_v53 = vsub.s32 %v2871_v6, %v369_v35  ;;  %v398_v54 = vmul.u32 34, %v397_v36  ;;  %v444_v55 = vshrl.u32 %v439_v28, 16  ;;  %v450_v56 = vsel %vm449_vm1, 1, %v2815_v42 }
  0x44   : > { %v452_v57 = vadd.s32 %v450_v56, %v448_v50  ;;  %vm474_vm2 = vc.u32 %v466_v41, %v470_v49  ;;  %v476_v3 = vadd.s32 %v470_v49, %v466_v41  ;;  %v492_v58 = vand.u32 65535, %v2887_v12 }
  0x45   : > { %v426_v61 = vshrl.u32 %v425_v46, 5  ;;  %v471_v62 = vshrl.u32 %v467_v39, 16  ;;  %v475_v63 = vsel %vm474_vm2, 1, %v2815_v42  ;;  %v493_v10 = vshrl.u32 %v2887_v12, 16 }
  0x46   : > { %v453_v1 = vadd.s32 %v452_v57, %v442_v47  ;;  %v477_v15 = vadd.s32 %v475_v63, %v469_v5  ;;  %vm478_vm3 = vc.u32 %v476_v3, %v472_v51  ;;  %v521_v6 = vand.u32 65535, %v2890_v13 }
  0x47   : > { %v479_v16 = vsel %vm478_vm3, 1, %v2815_v42  ;;  %v495_v17 = vmul.u32 61681, %v492_v58  ;;  %v496_v18 = vmul.u32 61680, %v492_v58  ;;  %v497_v20 = vmul.u32 61681, %v493_v10 }
  0x48   : > { %v454_v21 = vadd.s32 %v453_v1, %v444_v55  ;;  %v473_v23 = vshrl.u32 %v468_v43, 16  ;;  %v481_v4 = vadd.s32 %v479_v16, %v477_v15  ;;  %v522_v24 = vshrl.u32 %v2890_v13, 16 }
  0x49   : > { %v2979_v2 = vsub.s32 %v2874_v7, %v398_v54  ;;  %v498_v25 = vmul.u32 61680, %v493_v10  ;;  %v499_v28 = vshll.u32 %v496_v18, 16  ;;  %v501_v29 = vshll.u32 %v497_v20, 16 }
  0x4a   : > { %v427_v22 = vmul.u32 34, %v426_v61  ;;  %v455_v30 = vshrl.u32 %v454_v21, 5  ;;  %v482_v31 = vadd.s32 %v481_v4, %v471_v62  ;;  %v525_v33 = vmul.u32 61680, %v521_v6 }
  0x4b   : > { %vm503_vm4 = vc.u32 %v495_v17, %v499_v28  ;;  %v505_v34 = vadd.s32 %v499_v28, %v495_v17  ;;  %v524_v26 = vmul.u32 61681, %v521_v6  ;;  %v526_v35 = vmul.u32 61681, %v522_v24 }
  0x4c   : > { %v483_v36 = vadd.s32 %v482_v31, %v473_v23  ;;  %v500_v37 = vshrl.u32 %v496_v18, 16  ;;  %v504_v39 = vsel %vm503_vm4, 1, %v2815_v42  ;;  %v528_v40 = vshll.u32 %v525_v33, 16 }
  0x4d   : > { %v506_v41 = vadd.s32 %v504_v39, %v498_v25  ;;  %vm507_vm5 = vc.u32 %v505_v34, %v501_v29  ;;  %v527_v7 = vmul.u32 61680, %v522_v24  ;;  %v530_v43 = vshll.u32 %v526_v35, 16 }
  0x4e   : > { %v2983_v46 = vsub.s32 %v2877_v8, %v427_v22  ;;  %v456_v47 = vmul.u32 34, %v455_v30  ;;  %v502_v48 = vshrl.u32 %v497_v20, 16  ;;  %v508_v49 = vsel %vm507_vm5, 1, %v2815_v42 }
  0x4f   : > { %v510_v50 = vadd.s32 %v508_v49, %v506_v41  ;;  %vm532_vm6 = vc.u32 %v524_v26, %v528_v40  ;;  %v534_v5 = vadd.s32 %v528_v40, %v524_v26  ;;  %v550_v51 = vand.u32 65535, %v2893_v14 }
  0x50   : > { %v484_v54 = vshrl.u32 %v483_v36, 5  ;;  %v529_v55 = vshrl.u32 %v525_v33, 16  ;;  %v533_v56 = vsel %vm532_vm6, 1, %v2815_v42  ;;  %v551_v57 = vshrl.u32 %v2893_v14, 16 }
  0x51   : > { %v511_v3 = vadd.s32 %v510_v50, %v500_v37  ;;  %v535_v58 = vadd.s32 %v533_v56, %v527_v7  ;;  %vm536_vm7 = vc.u32 %v534_v5, %v530_v43  ;;  %v579_v8 = vand.u32 65535, %v2902_v19 }
  0x52   : > { %v537_v61 = vsel %vm536_vm7, 1, %v2815_v42  ;;  %v553_v62 = vmul.u32 61681, %v550_v51  ;;  %v554_v63 = vmul.u32 61680, %v550_v51  ;;  %v555_v10 = vmul.u32 61681, %v551_v57 }
  0x53   : > { %v512_v1 = vadd.s32 %v511_v3, %v502_v48  ;;  %v531_v15 = vshrl.u32 %v526_v35, 16  ;;  %v539_v6 = vadd.s32 %v537_v61, %v535_v58  ;;  %v580_v16 = vshrl.u32 %v2902_v19, 16 }
  0x54   : > { %v2993_v17 = vsub.s32 %v2880_v9, %v456_v47  ;;  %v556_v18 = vmul.u32 61680, %v551_v57  ;;  %v557_v20 = vshll.u32 %v554_v63, 16  ;;  %v559_v21 = vshll.u32 %v555_v10, 16 }
  0x55   : > { %v485_v23 = vmul.u32 34, %v484_v54  ;;  %v513_v4 = vshrl.u32 %v512_v1, 5  ;;  %v540_v24 = vadd.s32 %v539_v6, %v529_v55  ;;  %v583_v25 = vmul.u32 61680, %v579_v8 }
  0x56   : > { %vm561_vm8 = vc.u32 %v553_v62, %v557_v20  ;;  %v563_v28 = vadd.s32 %v557_v20, %v553_v62  ;;  %v582_v29 = vmul.u32 61681, %v579_v8  ;;  %v584_v22 = vmul.u32 61681, %v580_v16 }
  0x57   : > { %v541_v30 = vadd.s32 %v540_v24, %v531_v15  ;;  %v558_v31 = vshrl.u32 %v554_v63, 16  ;;  %v562_v33 = vsel %vm561_vm8, 1, %v2815_v42  ;;  %v586_v34 = vshll.u32 %v583_v25, 16 }
  0x58   : > { %v564_v26 = vadd.s32 %v562_v33, %v556_v18  ;;  %vm565_vm9 = vc.u32 %v563_v28, %v559_v21  ;;  %v585_v9 = vmul.u32 61680, %v580_v16  ;;  %v588_v35 = vshll.u32 %v584_v22, 16 }
  0x59   : > { %v2997_v36 = vsub.s32 %v2884_v11, %v485_v23  ;;  %v514_v37 = vmul.u32 34, %v513_v4  ;;  %v560_v39 = vshrl.u32 %v555_v10, 16  ;;  %v566_v40 = vsel %vm565_vm9, 1, %v2815_v42 }
  0x5a   : > { %v568_v41 = vadd.s32 %v566_v40, %v564_v26  ;;  %vm590_vm10 = vc.u32 %v582_v29, %v586_v34  ;;  %v592_v7 = vadd.s32 %v586_v34, %v582_v29  ;;  %v608_v43 = vand.u32 65535, %v2922_v27  ;;  %v3014_v26 = vld [vmem:[%s3924_s2] sm:$0x1] }
  0x5b   : > { %v542_v47 = vshrl.u32 %v541_v30, 5  ;;  %v587_v48 = vshrl.u32 %v583_v25, 16  ;;  %v591_v49 = vsel %vm590_vm10, 1, %v2815_v42  ;;  %v609_v50 = vshrl.u32 %v2922_v27, 16 }
  0x5c   : > { %v569_v5 = vadd.s32 %v568_v41, %v558_v31  ;;  %v593_v51 = vadd.s32 %v591_v49, %v585_v9  ;;  %vm594_vm11 = vc.u32 %v592_v7, %v588_v35  ;;  %v637_v11 = vand.u32 65535, %v2929_v44 }
  0x5d   : > { %v595_v54 = vsel %vm594_vm11, 1, %v2815_v42  ;;  %v611_v55 = vmul.u32 61681, %v608_v43  ;;  %v612_v56 = vmul.u32 61680, %v608_v43  ;;  %v613_v57 = vmul.u32 61681, %v609_v50 }
  0x5e   : > { %v570_v3 = vadd.s32 %v569_v5, %v560_v39  ;;  %v589_v58 = vshrl.u32 %v584_v22, 16  ;;  %v597_v8 = vadd.s32 %v595_v54, %v593_v51  ;;  %v638_v61 = vshrl.u32 %v2929_v44, 16 }
  0x5f   : > { %v3007_v62 = vsub.s32 %v2887_v12, %v514_v37  ;;  %v614_v63 = vmul.u32 61680, %v609_v50  ;;  %v615_v10 = vshll.u32 %v612_v56, 16  ;;  %v617_v1 = vshll.u32 %v613_v57, 16 }
  0x60   : > { %v543_v15 = vmul.u32 34, %v542_v47  ;;  %v571_v6 = vshrl.u32 %v570_v3, 5  ;;  %v598_v16 = vadd.s32 %v597_v8, %v587_v48  ;;  %v641_v18 = vmul.u32 61680, %v637_v11 }
  0x61   : > { %vm619_vm12 = vc.u32 %v611_v55, %v615_v10  ;;  %v621_v20 = vadd.s32 %v615_v10, %v611_v55  ;;  %v640_v21 = vmul.u32 61681, %v637_v11  ;;  %v642_v23 = vmul.u32 61681, %v638_v61 }
  0x62   : > { %v599_v4 = vadd.s32 %v598_v16, %v589_v58  ;;  %v616_v24 = vshrl.u32 %v612_v56, 16  ;;  %v620_v25 = vsel %vm619_vm12, 1, %v2815_v42  ;;  %v644_v28 = vshll.u32 %v641_v18, 16 }
  0x63   : > { %v622_v29 = vadd.s32 %v620_v25, %v614_v63  ;;  %vm623_vm13 = vc.u32 %v621_v20, %v617_v1  ;;  %v643_v12 = vmul.u32 61680, %v638_v61  ;;  %v646_v22 = vshll.u32 %v642_v23, 16 }
  0x64   : > { %v572_v30 = vmul.u32 34, %v571_v6  ;;  %v600_v31 = vshrl.u32 %v599_v4, 5  ;;  %v618_v33 = vshrl.u32 %v613_v57, 16  ;;  %v624_v34 = vsel %vm623_vm13, 1, %v2815_v42 }
  0x65   : > { %v626_v9 = vadd.s32 %v624_v34, %v622_v29  ;;  %vm648_vm14 = vc.u32 %v640_v21, %v644_v28  ;;  %v650_v35 = vadd.s32 %v644_v28, %v640_v21  ;;  %v666_v37 = vand.u32 65535, %v2932_v45 }
  0x66   : > { %v3018_v39 = vsub.s32 %v2890_v13, %v543_v15  ;;  %v645_v40 = vshrl.u32 %v641_v18, 16  ;;  %v649_v41 = vsel %vm648_vm14, 1, %v2815_v42  ;;  %v667_v7 = vshrl.u32 %v2932_v45, 16 }
  0x67   : > { %v601_v43 = vmul.u32 34, %v600_v31  ;;  %v627_v47 = vadd.s32 %v626_v9, %v616_v24  ;;  %v651_v48 = vadd.s32 %v649_v41, %v643_v12  ;;  %vm652_vm15 = vc.u32 %v650_v35, %v646_v22 }
  0x68   : > { %v653_v49 = vsel %vm652_vm15, 1, %v2815_v42  ;;  %v669_v50 = vmul.u32 61681, %v666_v37  ;;  %v670_v5 = vmul.u32 61680, %v666_v37  ;;  %v671_v51 = vmul.u32 61681, %v667_v7 }
  0x69   : > { %v3024_v11 = vsub.s32 %v2893_v14, %v572_v30  ;;  %v628_v54 = vadd.s32 %v627_v47, %v618_v33  ;;  %v647_v13 = vshrl.u32 %v642_v23, 16  ;;  %v655_v55 = vadd.s32 %v653_v49, %v651_v48 }
  0x6a   : > { %v672_v56 = vmul.u32 61680, %v667_v7  ;;  %v673_v57 = vshll.u32 %v670_v5, 16  ;;  %v675_v3 = vshll.u32 %v671_v51, 16  ;;  %vm692_vm0 = vcmp.ne.s32.totalorder %v2936_v52, 0 }
  0x6b   : > { %v3028_v58 = vsub.s32 %v2902_v19, %v601_v43  ;;  %v629_v8 = vshrl.u32 %v628_v54, 5  ;;  %v656_v61 = vadd.s32 %v655_v55, %v645_v40  ;;  %vm693_vm1 = vcmp.ne.s32.totalorder %v2940_v59, 0 }
  0x6c   : > { %v674_v63 = vshrl.u32 %v670_v5, 16  ;;  %v676_v10 = vshrl.u32 %v671_v51, 16  ;;  %vm677_vm2 = vc.u32 %v669_v50, %v673_v57  ;;  %v679_v14 = vadd.s32 %v673_v57, %v669_v50 }
  0x6d   : > { %v630_v1 = vmul.u32 34, %v629_v8  ;;  %v657_v15 = vadd.s32 %v656_v61, %v647_v13  ;;  %v678_v6 = vsel %vm677_vm2, 1, %v2815_v42  ;;  %vm694_vm3 = vcmp.ne.s32.totalorder %v2951_v38, 0 }
  0x6e   : > { %v680_v16 = vadd.s32 %v678_v6, %v672_v56  ;;  %vm681_vm4 = vc.u32 %v679_v14, %v675_v3  ;;  %vm695_vm5 = vcmp.ne.s32.totalorder %v2955_v60, 0  ;;  %vm696_vm6 = vcmp.ne.s32.totalorder %v2965_v32, 0 }
  0x6f   : > { %v658_v19 = vshrl.u32 %v657_v15, 5  ;;  %v682_v18 = vsel %vm681_vm4, 1, %v2815_v42  ;;  %v3039_v20 = vsub.s32 %v2922_v27, %v630_v1  ;;  %vm709_vm13 = vcmp.lt.s32.totalorder %v2936_v52, 0 }
  0x70   : > { %v684_v21 = vadd.s32 %v682_v18, %v680_v16  ;;  %vm710_vm15 = vcmp.lt.s32.totalorder %v2940_v59, 0  ;;  %vm711_vm2 = vcmp.lt.s32.totalorder %v2951_v38, 0  ;;  %vm712_vm4 = vcmp.lt.s32.totalorder %v2955_v60, 0  ;;  %vm3052_vm9 = vmand %vm709_vm13, %vm692_vm0 }
  0x71   : > { %v659_v23 = vmul.u32 34, %v658_v19  ;;  %vm713_vm11 = vcmp.lt.s32.totalorder %v2965_v32, 0  ;;  %vm3064_vm10 = vmand %vm710_vm15, %vm693_vm1  ;;  %vm716_vm8 = vcmp.lt.s32.totalorder %v2983_v46, 0  ;;  %vm718_vm15 = vcmp.lt.s32.totalorder %v2997_v36, 0 }
  0x72   : > { %v685_v42 = vadd.s32 %v684_v21, %v674_v63  ;;  %vm3074_vm12 = vmand %vm711_vm2, %vm694_vm3  ;;  %v743_v30 = vadd.s32 34, %v2936_v52  ;;  %v744_v31 = vadd.s32 34, %v2940_v59  ;;  %v745_v33 = vadd.s32 34, %v2951_v38 }
  0x73   : > { %v3057_v4 = vsub.s32 %v2929_v44, %v659_v23  ;;  %vm3087_vm7 = vmand %vm712_vm4, %vm695_vm5  ;;  %vm3936_vm5 = vcmp.ne.s32.totalorder %v2969_v53, 0  ;;  %vm3937_vm4 = vcmp.lt.s32.totalorder %v2969_v53, 0  ;;  %v746_v34 = vadd.s32 34, %v2955_v60 }
  0x74   : > { %v686_v25 = vadd.s32 %v685_v42, %v676_v10  ;;  %vm3099_vm13 = vmand %vm713_vm11, %vm696_vm6  ;;  %vm3940_vm6 = vcmp.ne.s32.totalorder %v2979_v2, 0  ;;  %vm3941_vm11 = vcmp.lt.s32.totalorder %v2979_v2, 0  ;;  %v747_v37 = vadd.s32 34, %v2965_v32 }
  0x75   : > { %vm3107_vm0 = vmand %vm3937_vm4, %vm3936_vm5  ;;  %v748_v40 = vadd.s32 34, %v2969_v53  ;;  %v749_v41 = vadd.s32 34, %v2979_v2  ;;  %vm3944_vm5 = vcmp.ne.s32.totalorder %v2983_v46, 0  ;;  %v750_v43 = vadd.s32 34, %v2983_v46 }
  0x76   : > { %v687_v29 = vshrl.u32 %v686_v25, 5  ;;  %vm3119_vm14 = vmand %vm3941_vm11, %vm3940_vm6  ;;  %v751_v47 = vadd.s32 34, %v2993_v17  ;;  %v752_v48 = vadd.s32 34, %v2997_v36  ;;  %v753_v49 = vadd.s32 34, %v3007_v62 }
  0x77   : > { %vm3130_vm4 = vmand %vm716_vm8, %vm3944_vm5  ;;  %vm3947_vm6 = vcmp.ne.s32.totalorder %v2993_v17, 0  ;;  %vm3948_vm11 = vcmp.lt.s32.totalorder %v2993_v17, 0  ;;  %v754_v51 = vadd.s32 34, %v3018_v39  ;;  %v755_v54 = vadd.s32 34, %v3024_v11 }
  0x78   : > { %v688_v9 = vmul.u32 34, %v687_v29  ;;  %vm3143_vm3 = vmand %vm3948_vm11, %vm3947_vm6  ;;  %v756_v13 = vadd.s32 34, %v3028_v58  ;;  %vm3951_vm8 = vcmp.ne.s32.totalorder %v2997_v36, 0  ;;  %v757_v55 = vadd.s32 34, %v3039_v20 }
  0x79   : > { %vm3154_vm5 = vmand %vm718_vm15, %vm3951_vm8  ;;  %v758_v56 = vadd.s32 34, %v3057_v4  ;;  %v760_v57 = vsel %vm3052_vm9, %v743_v30, %v2936_v52  ;;  %v761_v3 = vsel %vm3064_vm10, %v744_v31, %v2940_v59  ;;  %vm3954_vm1 = vcmp.ne.s32.totalorder %v3007_v62, 0 }
  0x7a   : > { %v689_v50 = vsub.s32 %v2932_v45, %v688_v9  ;;  %vm3955_vm15 = vcmp.lt.s32.totalorder %v3007_v62, 0  ;;  %v762_v63 = vsel %vm3074_vm12, %v745_v33, %v2951_v38  ;;  %vm3958_vm9 = vcmp.ne.s32.totalorder %v3018_v39, 0 }
  0x7b   : > { %vm3170_vm8 = vmand %vm3955_vm15, %vm3954_vm1  ;;  %vm3959_vm2 = vcmp.lt.s32.totalorder %v3018_v39, 0  ;;  %v763_v59 = vsel %vm3087_vm7, %v746_v34, %v2955_v60  ;;  %v764_v10 = vsel %vm3099_vm13, %v747_v37, %v2965_v32  ;;  %v765_v38 = vsel %vm3107_vm0, %v748_v40, %v2969_v53 }
  0x7c   : > { %vm708_vm6 = vcmp.ne.s32.totalorder %v689_v50, 0  ;;  %vm725_vm11 = vcmp.lt.s32.totalorder %v689_v50, 0  ;;  %v759_v61 = vadd.s32 34, %v689_v50  ;;  %vm3181_vm10 = vmand %vm3959_vm2, %vm3958_vm9  ;;  %v766_v14 = vsel %vm3119_vm14, %v749_v41, %v2979_v2 }
  0x7d   : > { %vm3962_vm12 = vcmp.ne.s32.totalorder %v3024_v11, 0  ;;  %vm3963_vm1 = vcmp.lt.s32.totalorder %v3024_v11, 0  ;;  %v767_v60 = vsel %vm3130_vm4, %v750_v43, %v2983_v46  ;;  %v768_v32 = vsel %vm3143_vm3, %v751_v47, %v2993_v17 }
  0x7e   : > { %vm3201_vm2 = vmand %vm3963_vm1, %vm3962_vm12  ;;  %v769_v53 = vsel %vm3154_vm5, %v752_v48, %v2997_v36  ;;  %v770_v2 = vsel %vm3170_vm8, %v753_v49, %v3007_v62  ;;  %vm3966_vm7 = vcmp.ne.s32.totalorder %v3028_v58, 0  ;;  %vm3967_vm14 = vcmp.lt.s32.totalorder %v3028_v58, 0 }
  0x7f   : > { %vm3221_vm0 = vmand %vm3967_vm14, %vm3966_vm7  ;;  %v771_v46 = vsel %vm3181_vm10, %v754_v51, %v3018_v39  ;;  %v772_v17 = vsel %vm3201_vm2, %v755_v54, %v3024_v11  ;;  %vm3231_vm13 = vcmp.lt.s32.totalorder %v760_v57, 32  ;;  %vm3235_vm3 = vcmp.lt.s32.totalorder %v761_v3, 32 }
  0x80   : > { %vm3974_vm4 = vcmp.ne.s32.totalorder %v3039_v20, 0  ;;  %vm3975_vm5 = vcmp.lt.s32.totalorder %v3039_v20, 0  ;;  %v773_v39 = vsel %vm3221_vm0, %v756_v13, %v3028_v58  ;;  %vm3250_vm8 = vcmp.lt.s32.totalorder %v762_v63, 32 }
  0x81   : > { %vm3243_vm15 = vmand %vm3975_vm5, %vm3974_vm4  ;;  %vm3254_vm9 = vcmp.lt.s32.totalorder %v763_v59, 32  ;;  %vm3258_vm10 = vcmp.lt.s32.totalorder %v764_v10, 32  ;;  %vm3984_vm12 = vcmp.ne.s32.totalorder %v3057_v4, 0  ;;  %vm3985_vm1 = vcmp.lt.s32.totalorder %v3057_v4, 0 }
  0x82   : > { %vm741_vm2 = vmand %vm3985_vm1, %vm3984_vm12  ;;  %v774_v58 = vsel %vm3243_vm15, %v757_v55, %v3039_v20  ;;  %vm3269_vm7 = vcmp.lt.s32.totalorder %v765_v38, 32  ;;  %vm3273_vm14 = vcmp.lt.s32.totalorder %v766_v14, 32  ;;  %vm3277_vm0 = vcmp.lt.s32.totalorder %v767_v60, 32 }
  0x83   : > { %v3990_v23 = vmov 0  ;;  %vm742_vm4 = vmand %vm725_vm11, %vm708_vm6  ;;  %v775_v42 = vsel %vm741_vm2, %v758_v56, %v3057_v4  ;;  %vm3284_vm5 = vcmp.lt.s32.totalorder %v768_v32, 32  ;;  %vm3288_vm15 = vcmp.lt.s32.totalorder %v769_v53, 32 }
  0x84   : > { %v3991_v23 = vsel %vm3277_vm0, 4294967295, %v3990_v23  ;;  %v3994_v20 = vmov 0  ;;  %vm3292_vm12 = vcmp.lt.s32.totalorder %v770_v2, 32  ;;  %v776_v25 = vsel %vm742_vm4, %v759_v61, %v689_v50 }
  0x85   : > { %v3995_v20 = vsel %vm3288_vm15, 4294967295, %v3994_v20  ;;  %vm3296_vm1 = vcmp.lt.s32.totalorder %v771_v46, 32  ;;  %v3998_v44 = vmov 0  ;;  %vm3300_vm6 = vcmp.lt.s32.totalorder %v772_v17, 32 }
  0x86   : > { %v3999_v44 = vsel %vm3296_vm1, 4294967295, %v3998_v44  ;;  %vm3304_vm11 = vcmp.lt.s32.totalorder %v773_v39, 32  ;;  %vm3308_vm2 = vcmp.lt.s32.totalorder %v774_v58, 32  ;;  %vm3312_vm15 = vcmp.lt.s32.totalorder %v775_v42, 32 }
  0x87   : > { %vm3316_vm4 = vcmp.lt.s32.totalorder %v776_v25, 32  ;;  %v4008_v22 = vmov 0  ;;  %v796_v30 = vand.u32 127, %v181_v0  ;;  %v2816_v31 = vmov 1.0  }
  0x88   : > { %v4009_v22 = vsel %vm3316_vm4, 4294967295, %v4008_v22 }
  0x89   : > { %vm797_vm1 = vcmp.lt.s32.totalorder %v796_v30, 124 }
  0x8a   : > { %v3321_v33 = vsel %vm797_vm1, 0.2, %v2816_v31 }
  0x8b LB: >> { %v2466_v34 = vld [vmem:[%s3923_s1 + $0x18] sm:$0xff]  ;;  %v2465_v0 = vld [vmem:[%s3923_s1 + $0x10] sm:$0xff]  ;;  %v2519_v9 = vld [vmem:[%s3923_s1 + $0x28] sm:$0xff]  ;;  %s2365_s5 = smul.u32 136, %s2812_s23  ;;  %vm849_vm1 = vcmask 130048   ;;  %vm4010_vm0 = vnez %v3991_v23  ;;  %s804_s23 = sadd.s32 1, %s2812_s23   ;;  %s2812_s23 = sphi %s3323_s23, %s804_s23  }
  0x8c   : >> { %2772 = vmatpush.msra.mxu1 %v2466_v34  ;;  %2773 = vmatpush.msra.mxu2 %v2466_v34  ;;  %v826_v35 = vld [vmem:[%s3923_s1 + $0x8] sm:$0xff]  ;;  %v2518_v40 = vld [vmem:[%s3923_s1 + $0x20] sm:$0xff]  ;;  %v2555_v48 = vld [vmem:[%s3923_s1 + $0x38] sm:$0xff]  ;;  %p801_p4 = scmp.ge.s32.totalorder %s804_s23, 8  }
  0x8d   : >> { %915 = vmatpush.msra.mxu0 %v2466_v34  ;;  %2774 = vmatpush.msra.mxu3 %v2466_v34  ;;  %s3344_s6 = scalar_lea.vmem %s2863_s17, %s2365_s5  ;;  %v2591_v37 = vld [vmem:[%s3923_s1 + $0x48] sm:$0xff]  ;;  %v825_v43 = vld [vmem:[%s3923_s1] sm:$0xff]  ;;  %v2554_v5 = vld [vmem:[%s3923_s1 + $0x30] sm:$0xff] }
  0x8e   : >> { %2775 = vmatpush.msra.mxu1 %v2465_v0  ;;  %2776 = vmatpush.msra.mxu2 %v2465_v0  ;;  %v2453_v41 = vld [vmem:[%s3344_s6 + $0x2e] sm:$0xff]  ;;  %v2458_v7 = vld [vmem:[%s3344_s6 + $0x56] sm:$0xff]  ;;  %v2448_v47 = vld [vmem:[%s3344_s6 + $0x6] sm:$0xff] }
  0x8f   : >> { %916 = vmatpush.msra.mxu0 %v2465_v0  ;;  %2777 = vmatpush.msra.mxu3 %v2465_v0  ;;  %v2590_v49 = vld [vmem:[%s3923_s1 + $0x40] sm:$0xff]  ;;  %v2454_v51 = vld [vmem:[%s3344_s6 + $0x36] sm:$0xff]  ;;  %v2449_v13 = vld [vmem:[%s3344_s6 + $0xe] sm:$0xff] }
  0x90   : >> { %1175 = vmatpush.msrb.mxu2 %v2519_v9  ;;  %1034 = vmatpush.msrb.mxu1 %v826_v35  ;;  %v2463_v50 = vld [vmem:[%s3344_s6 + $0x7e] sm:$0xff]  ;;  %v2464_v45 = vld [vmem:[%s3344_s6 + $0x86] sm:$0xff]  ;;  %v2450_v61 = vld [vmem:[%s3344_s6 + $0x16] sm:$0xff] }
  0x91   : >> { %2472 = vmatmul.msk.f32.vlgmr.msra.gmra.mxu1 %vm849_vm1, %v2453_v41  ;;  %2477 = vmatmul.msk.f32.vlgmr.msra.gmra.mxu2 %vm849_vm1, %v2458_v7  ;;  %v2459_v54 = vld [vmem:[%s3344_s6 + $0x5e] sm:$0xff]  ;;  %v2663_v55 = vld [vmem:[%s3923_s1 + $0x68] sm:$0xff]  ;;  %v2462_v60 = vld [vmem:[%s3344_s6 + $0x76] sm:$0xff] }
  0x92   : >> { %2467 = vmatmul.msk.f32.vlgmr.msra.gmra.mxu0 %vm849_vm1, %v2448_v47  ;;  %1176 = vmatpush.msrb.mxu2 %v2518_v40  ;;  %v2699_v56 = vld [vmem:[%s3923_s1 + $0x78] sm:$0xff]  ;;  %v2460_v8 = vld [vmem:[%s3344_s6 + $0x66] sm:$0xff]  ;;  %v2461_v10 = vld [vmem:[%s3344_s6 + $0x6e] sm:$0xff] }
  0x93   : >> { %1491 = vmatpush.msrb.mxu0 %v2591_v37  ;;  %1035 = vmatpush.msrb.mxu1 %v825_v43  ;;  %v2627_v57 = vld [vmem:[%s3923_s1 + $0x58] sm:$0xff]  ;;  %v2537_v63 = vld [vmem:[%s3344_s6 + $0x27] sm:$0xff]  ;;  %v2538_v14 = vld [vmem:[%s3344_s6 + $0x2f] sm:$0xff] }
  0x94   : >> { %2482 = vmatmul.msk.f32.vlgmr.msra.gmra.mxu3 %vm849_vm1, %v2463_v50  ;;  %1807 = vmatpush.msra.mxu2 %v2663_v55  ;;  %v2455_v3 = vld [vmem:[%s3344_s6 + $0x3e] sm:$0xff]  ;;  %v2735_v52 = vld [vmem:[%s3923_s1 + $0x88] sm:$0xff]  ;;  %v2574_v58 = vld [vmem:[%s3344_s6 + $0x30] sm:$0xff] }
  0x95   : >> { %1333 = vmatpush.msrb.mxu3 %v2555_v48  ;;  %1492 = vmatpush.msrb.mxu0 %v2590_v49  ;;  %v2456_v59 = vld [vmem:[%s3344_s6 + $0x46] sm:$0xff]  ;;  %v2451_v38 = vld [vmem:[%s3344_s6 + $0x1e] sm:$0xff]  ;;  %v2457_v1 = vld [vmem:[%s3344_s6 + $0x4e] sm:$0xff] }
  0x96   : >> { %1649 = vmatpush.msra.mxu1 %v2627_v57  ;;  %v2452_v32 = vld [vmem:[%s3344_s6 + $0x26] sm:$0xff]  ;;  %v2539_v53 = vld [vmem:[%s3344_s6 + $0x37] sm:$0xff]  ;;  %v2502_v39 = vld [vmem:[%s3344_s6 + $0xf] sm:$0xff] }
  0x97   : >> { %1334 = vmatpush.msrb.mxu3 %v2554_v5  ;;  %2123 = vmatpush.msra.mxu0 %v2735_v52  ;;  %v2431_v2 = vld [vmem:[%s3344_s6 + $0x5] sm:$0xff]  ;;  %v2432_v6 = vld [vmem:[%s3344_s6 + $0xd] sm:$0xff]  ;;  %v2433_v25 = vld [vmem:[%s3344_s6 + $0x15] sm:$0xff] }
  0x98   : >> { %v2501_v15 = vld [vmem:[%s3344_s6 + $0x7] sm:$0xff]  ;;  %v2540_v17 = vld [vmem:[%s3344_s6 + $0x3f] sm:$0xff]  ;;  %v2503_v30 = vld [vmem:[%s3344_s6 + $0x17] sm:$0xff] }
  0x99   : >> { %2473 = vmatmul.msk.f32.gmra.mxu1 %vm849_vm1, %v2454_v51  ;;  %2478 = vmatmul.msk.f32.gmra.mxu2 %vm849_vm1, %v2459_v54  ;;  %v2573_v46 = vld [vmem:[%s3344_s6 + $0x28] sm:$0xff]  ;;  %v2575_v31 = vld [vmem:[%s3344_s6 + $0x38] sm:$0xff]  ;;  %v2576_v35 = vld [vmem:[%s3344_s6 + $0x40] sm:$0xff] }
  0x9a   : >> { %2468 = vmatmul.msk.f32.gmra.mxu0 %vm849_vm1, %v2449_v13  ;;  %1965 = vmatpush.msra.mxu3 %v2699_v56  ;;  %v2541_v42 = vld [vmem:[%s3344_s6 + $0x47] sm:$0xff]  ;;  %v2542_v34 = vld [vmem:[%s3344_s6 + $0x4f] sm:$0xff]  ;;  %v2434_v0 = vld [vmem:[%s3344_s6 + $0x1d] sm:$0xff] }
  0x9b   : >> { %v2504_v9 = vld [vmem:[%s3344_s6 + $0x1f] sm:$0xff]  ;;  %v2543_v37 = vld [vmem:[%s3344_s6 + $0x57] sm:$0xff]  ;;  %v2577_v41 = vld [vmem:[%s3344_s6 + $0x48] sm:$0xff] }
  0x9c   : >> { %2483 = vmatmul.msk.f32.gmra.mxu3 %vm849_vm1, %v2464_v45  ;;  %v2435_v40 = vld [vmem:[%s3344_s6 + $0x25] sm:$0xff]  ;;  %v2698_v47 = vld [vmem:[%s3923_s1 + $0x70] sm:$0xff]  ;;  %v2579_v13 = vld [vmem:[%s3344_s6 + $0x58] sm:$0xff] }
  0x9d   : >> { %v2544_v7 = vld [vmem:[%s3344_s6 + $0x5f] sm:$0xff]  ;;  %1966 = vmatpush.msra.mxu3 %v2698_v47  ;;  %v2436_v48 = vld [vmem:[%s3344_s6 + $0x2d] sm:$0xff]  ;;  %v2437_v54 = vld [vmem:[%s3344_s6 + $0x35] sm:$0xff] }
  0x9e   : >> { %v2662_v43 = vld [vmem:[%s3923_s1 + $0x60] sm:$0xff]  ;;  %v2578_v49 = vld [vmem:[%s3344_s6 + $0x50] sm:$0xff] }
  0x9f   : >> { %1808 = vmatpush.msra.mxu2 %v2662_v43  ;;  %v2545_v50 = vld [vmem:[%s3344_s6 + $0x67] sm:$0xff]  ;;  %v2626_v5 = vld [vmem:[%s3923_s1 + $0x50] sm:$0xff]  ;;  %v2438_v55 = vld [vmem:[%s3344_s6 + $0x3d] sm:$0xff] }
  0xa0   : >> { %1650 = vmatpush.msra.mxu1 %v2626_v5  ;;  %v2734_v51 = vld [vmem:[%s3923_s1 + $0x80] sm:$0xff]  ;;  %v2546_v45 = vld [vmem:[%s3344_s6 + $0x6f] sm:$0xff]  ;;  %v2547_v57 = vld [vmem:[%s3344_s6 + $0x77] sm:$0xff] }
  0xa1   : >> { %2474 = vmatmul.msk.f32.gmra.mxu1 %vm849_vm1, %v2455_v3  ;;  %2479 = vmatmul.msk.f32.gmra.mxu2 %vm849_vm1, %v2460_v8  ;;  %v2580_v56 = vld [vmem:[%s3344_s6 + $0x60] sm:$0xff]  ;;  %v2581_v8 = vld [vmem:[%s3344_s6 + $0x68] sm:$0xff]  ;;  %v2582_v52 = vld [vmem:[%s3344_s6 + $0x70] sm:$0xff] }
  0xa2   : >> { %2469 = vmatmul.msk.f32.gmra.mxu0 %vm849_vm1, %v2450_v61  ;;  %v2439_v3 = vld [vmem:[%s3344_s6 + $0x45] sm:$0xff]  ;;  %v2587_v43 = vld [vmem:[%s3344_s6 + $0x98] sm:$0xff] }
  0xa3   : >> { %2124 = vmatpush.msra.mxu0 %v2734_v51  ;;  %v3493_v61 = vld [vmem:[%s3344_s6 + $0x7f] sm:$0xff] }
  0xa4   : >> { %2556 = vmatmul.msk.f32.vlgmr.msrb.gmra.mxu3 %vm849_vm1, %v2537_v63  ;;  %v2446_v5 = vld [vmem:[%s3344_s6 + $0x7d] sm:$0xff] }
  0xa9   : >> { %2475 = vmatmul.msk.f32.gmra.mxu1 %vm849_vm1, %v2456_v59  ;;  %2480 = vmatmul.msk.f32.gmra.mxu2 %vm849_vm1, %v2461_v10  ;;  %v3503_v59 = vld [vmem:[%s3344_s6 + $0x87] sm:$0xff]  ;;  %v2441_v10 = vld [vmem:[%s3344_s6 + $0x55] sm:$0xff] }
  0xaa   : >> { %2470 = vmatmul.msk.f32.gmra.mxu0 %vm849_vm1, %v2451_v38  ;;  %v2583_v38 = vld [vmem:[%s3344_s6 + $0x78] sm:$0xff] }
  0xac   : >> { %2557 = vmatmul.msk.f32.gmra.mxu3 %vm849_vm1, %v2538_v14 }
  0xb1   : >> { %2476 = vmatmul.msk.f32.gmra.mxu1 %vm849_vm1, %v2457_v1  ;;  %2481 = vmatmul.msk.f32.gmra.mxu2 %vm849_vm1, %v2462_v60  ;;  %v2442_v60 = vld [vmem:[%s3344_s6 + $0x5d] sm:$0xff] }
  0xb2   : >> { %2471 = vmatmul.msk.f32.gmra.mxu0 %vm849_vm1, %v2452_v32 }
  0xb4   : >> { %2558 = vmatmul.msk.f32.gmra.mxu3 %vm849_vm1, %v2539_v53 }
  0xb9   : >> { %2484 = vmatmul.msk.f32.vlgmr.msrb.gmra.mxu1 %vm849_vm1, %v2431_v2  ;;  %2520 = vmatmul.msk.f32.vlgmr.msrb.gmra.mxu2 %vm849_vm1, %v2501_v15  ;;  %v2551_v2 = vld [vmem:[%s3344_s6 + $0x97] sm:$0xff] }
  0xba   : >> { %2592 = vmatmul.msk.f32.vlgmr.msrb.gmra.mxu0 %vm849_vm1, %v2573_v46 }
  0xbc   : >> { %2559 = vmatmul.msk.f32.gmra.mxu3 %vm849_vm1, %v2540_v17 }
  0xc1   : >> { %2485 = vmatmul.msk.f32.gmra.mxu1 %vm849_vm1, %v2432_v6  ;;  %2521 = vmatmul.msk.f32.gmra.mxu2 %vm849_vm1, %v2502_v39  ;;  %v2585_v39 = vld [vmem:[%s3344_s6 + $0x88] sm:$0xff] }
  0xc2   : >> { %2593 = vmatmul.msk.f32.gmra.mxu0 %vm849_vm1, %v2574_v58 }
  0xc4   : >> { %2560 = vmatmul.msk.f32.gmra.mxu3 %vm849_vm1, %v2541_v42 }
  0xc9   : >> { %2486 = vmatmul.msk.f32.gmra.mxu1 %vm849_vm1, %v2433_v25  ;;  %2522 = vmatmul.msk.f32.gmra.mxu2 %vm849_vm1, %v2503_v30 }
  0xca   : >> { %2594 = vmatmul.msk.f32.gmra.mxu0 %vm849_vm1, %v2575_v31  ;;  %v2444_v31 = vld [vmem:[%s3344_s6 + $0x6d] sm:$0xff] }
  0xcc   : >> { %2561 = vmatmul.msk.f32.gmra.mxu3 %vm849_vm1, %v2542_v34 }
  0xd1   : >> { %2487 = vmatmul.msk.f32.gmra.mxu1 %vm849_vm1, %v2434_v0  ;;  %2523 = vmatmul.msk.f32.gmra.mxu2 %vm849_vm1, %v2504_v9  ;;  %v2586_v0 = vld [vmem:[%s3344_s6 + $0x90] sm:$0xff] }
  0xd2   : >> { %2595 = vmatmul.msk.f32.gmra.mxu0 %vm849_vm1, %v2576_v35  ;;  %v2553_v35 = vld [vmem:[%s3344_s6 + $0xa7] sm:$0xff] }
  0xd4   : >> { %2562 = vmatmul.msk.f32.gmra.mxu3 %vm849_vm1, %v2543_v37 }
  0xd9   : >> { %2488 = vmatmul.msk.f32.gmra.mxu1 %vm849_vm1, %v2435_v40  ;;  %2524 = vmatmul.msk.f32.gmra.mxu2 %vm849_vm1, %v2537_v63  ;;  %v2440_v63 = vld [vmem:[%s3344_s6 + $0x4d] sm:$0xff] }
  0xda   : >> { %2596 = vmatmul.msk.f32.gmra.mxu0 %vm849_vm1, %v2577_v41  ;;  %v2445_v41 = vld [vmem:[%s3344_s6 + $0x75] sm:$0xff] }
  0xdc   : >> { %2563 = vmatmul.msk.f32.gmra.mxu3 %vm849_vm1, %v2544_v7 }
  0xe1   : >> { %2489 = vmatmul.msk.f32.gmra.mxu1 %vm849_vm1, %v2436_v48  ;;  %2525 = vmatmul.msk.f32.gmra.mxu2 %vm849_vm1, %v2538_v14  ;;  %v2550_v14 = vld [vmem:[%s3344_s6 + $0x8f] sm:$0xff] }
  0xe2   : >> { %2597 = vmatmul.msk.f32.gmra.mxu0 %vm849_vm1, %v2578_v49  ;;  %v2681_v48 = vld [vmem:[%s3344_s6 + $0x4a] sm:$0xff] }
  0xe4   : >> { %2564 = vmatmul.msk.f32.gmra.mxu3 %vm849_vm1, %v2545_v50 }
  0xe9   : >> { %2490 = vmatmul.msk.f32.gmra.mxu1 %vm849_vm1, %v2437_v54  ;;  %2526 = vmatmul.msk.f32.gmra.mxu2 %vm849_vm1, %v2539_v53  ;;  %v2584_v53 = vld [vmem:[%s3344_s6 + $0x80] sm:$0xff] }
  0xea   : >> { %2598 = vmatmul.msk.f32.gmra.mxu0 %vm849_vm1, %v2579_v13  ;;  %v2588_v54 = vld [vmem:[%s3344_s6 + $0xa0] sm:$0xff] }
  0xec   : >> { %2565 = vmatmul.msk.f32.gmra.mxu3 %vm849_vm1, %v2546_v45 }
  0xf1   : >> { %2491 = vmatmul.msk.f32.gmra.mxu1 %vm849_vm1, %v2438_v55  ;;  %2527 = vmatmul.msk.f32.gmra.mxu2 %vm849_vm1, %v2540_v17  ;;  %v2443_v17 = vld [vmem:[%s3344_s6 + $0x65] sm:$0xff] }
  0xf2   : >> { %2599 = vmatmul.msk.f32.gmra.mxu0 %vm849_vm1, %v2580_v56 }
  0xf4   : >> { %2566 = vmatmul.msk.f32.gmra.mxu3 %vm849_vm1, %v2547_v57 }
  0xf9   : >> { %2492 = vmatmul.msk.f32.gmra.mxu1 %vm849_vm1, %v2439_v3  ;;  %2528 = vmatmul.msk.f32.gmra.mxu2 %vm849_vm1, %v2541_v42  ;;  %v2552_v42 = vld [vmem:[%s3344_s6 + $0x9f] sm:$0xff] }
  0xfa   : >> { %2600 = vmatmul.msk.f32.gmra.mxu0 %vm849_vm1, %v2581_v8  ;;  %v2589_v8 = vld [vmem:[%s3344_s6 + $0xa8] sm:$0xff] }
  0xfc   : >> { %2567 = vmatmul.msk.f32.gmra.mxu3 %vm849_vm1, %v3493_v61 }
 0x101   : >> { %2493 = vmatmul.msk.f32.gmra.mxu1 %vm849_vm1, %v2440_v63  ;;  %2529 = vmatmul.msk.f32.gmra.mxu2 %vm849_vm1, %v2542_v34 }
 0x102   : >> { %2601 = vmatmul.msk.f32.gmra.mxu0 %vm849_vm1, %v2582_v52 }
 0x104   : >> { %2568 = vmatmul.msk.f32.gmra.mxu3 %vm849_vm1, %v3503_v59 }
 0x109   : >> { %2494 = vmatmul.msk.f32.gmra.mxu1 %vm849_vm1, %v2441_v10  ;;  %2530 = vmatmul.msk.f32.gmra.mxu2 %vm849_vm1, %v2543_v37 }
 0x10a   : >> { %2602 = vmatmul.msk.f32.gmra.mxu0 %vm849_vm1, %v2583_v38 }
 0x10c   : >> { %2569 = vmatmul.msk.f32.gmra.mxu3 %vm849_vm1, %v2550_v14 }
 0x10e   : >> { %v3515_v1 = vpop.f32.mrf.mxu1 }
 0x10f   : >> { %v918_v32 = vpop.f32.mrf.mxu0 }
 0x111   : >> { %2495 = vmatmul.msk.f32.gmra.mxu1 %vm849_vm1, %v2442_v60  ;;  %2531 = vmatmul.msk.f32.gmra.mxu2 %vm849_vm1, %v2544_v7  ;;  %v2609_v60 = vld [vmem:[%s3344_s6 + $0x29] sm:$0xff] }
 0x112   : >> { %2603 = vmatmul.msk.f32.gmra.mxu0 %vm849_vm1, %v2584_v53  ;;  %v3593_v53 = vld [vmem:[%s3344_s6 + $0x49] sm:$0xff] }
 0x114   : >> { %v3523_v15 = vpop.f32.mrf.mxu2  ;;  %2570 = vmatmul.msk.f32.gmra.mxu3 %vm849_vm1, %v2551_v2 }
 0x116   : >> { %v3526_v46 = vpop.f32.mrf.mxu1 }
 0x117   : >> { %v3529_v6 = vpop.f32.mrf.mxu0  ;;  %v3532_v58 = vpop.f32.mrf.mxu3 }
 0x119   : >> { %2496 = vmatmul.msk.f32.gmra.mxu1 %vm849_vm1, %v2443_v17  ;;  %2532 = vmatmul.msk.f32.gmra.mxu2 %vm849_vm1, %v2545_v50 }
 0x11a   : >> { %2604 = vmatmul.msk.f32.gmra.mxu0 %vm849_vm1, %v2585_v39  ;;  %v2717_v39 = vld [vmem:[%s3344_s6 + $0x4b] sm:$0xff] }
 0x11c   : >> { %v3538_v25 = vpop.f32.mrf.mxu2  ;;  %2571 = vmatmul.msk.f32.gmra.mxu3 %vm849_vm1, %v2552_v42 }
 0x11e   : >> { %v3541_v30 = vpop.f32.mrf.mxu1 }
 0x11f   : >> { %v3544_v34 = vpop.f32.mrf.mxu0  ;;  %v3547_v9 = vpop.f32.mrf.mxu3 }
 0x121   : >> { %2497 = vmatmul.msk.f32.gmra.mxu1 %vm849_vm1, %v2444_v31  ;;  %2533 = vmatmul.msk.f32.gmra.mxu2 %vm849_vm1, %v2546_v45  ;;  %v2682_v45 = vld [vmem:[%s3344_s6 + $0x52] sm:$0xff] }
 0x122   : >> { %2605 = vmatmul.msk.f32.gmra.mxu0 %vm849_vm1, %v2586_v0 }
 0x124   : >> { %v3553_v37 = vpop.f32.mrf.mxu2  ;;  %2572 = vmatmul.msk.f32.gmra.mxu3 %vm849_vm1, %v2553_v35 }
 0x126   : >> { %v3556_v40 = vpop.f32.mrf.mxu1 }
 0x127   : >> { %v3559_v7 = vpop.f32.mrf.mxu0  ;;  %v1336_v47 = vpop.f32.mrf.mxu3 }
 0x129   : >> { %2498 = vmatmul.msk.f32.gmra.mxu1 %vm849_vm1, %v2445_v41  ;;  %2534 = vmatmul.msk.f32.gmra.mxu2 %vm849_vm1, %v2547_v57  ;;  %v2447_v57 = vld [vmem:[%s3344_s6 + $0x85] sm:$0xff] }
 0x12a   : >> { %2606 = vmatmul.msk.f32.gmra.mxu0 %vm849_vm1, %v2587_v43  ;;  %v2610_v43 = vld [vmem:[%s3344_s6 + $0x31] sm:$0xff] }
 0x12c   : >> { %v3566_v49 = vpop.f32.mrf.mxu2  ;;  %2700 = vmatmul.msk.f32.vlgmr.msra.gmra.mxu3 %vm849_vm1, %v2681_v48 }
 0x12e   : >> { %v3569_v50 = vpop.f32.mrf.mxu1 }
 0x12f   : >> { %v3572_v51 = vpop.f32.mrf.mxu0  ;;  %v1339_v13 = vpop.f32.mrf.mxu3 }
 0x131   : >> { %2499 = vmatmul.msk.f32.gmra.mxu1 %vm849_vm1, %v2446_v5  ;;  %2535 = vmatmul.msk.f32.gmra.mxu2 %vm849_vm1, %v3493_v61  ;;  %v2683_v61 = vld [vmem:[%s3344_s6 + $0x5a] sm:$0xff] }
 0x132   : >> { %2607 = vmatmul.msk.f32.gmra.mxu0 %vm849_vm1, %v2588_v54  ;;  %v2718_v54 = vld [vmem:[%s3344_s6 + $0x53] sm:$0xff] }
 0x134   : >> { %v3580_v55 = vpop.f32.mrf.mxu2  ;;  %2701 = vmatmul.msk.f32.gmra.mxu3 %vm849_vm1, %v2682_v45 }
 0x136   : >> { %v1037_v56 = vpop.f32.mrf.mxu1 }
 0x137   : >> { %v1494_v3 = vpop.f32.mrf.mxu0  ;;  %v1342_v63 = vpop.f32.mrf.mxu3  ;;  %v1038_v52 = vadd.f32 %v1037_v56, %v918_v32  ;;  %v2684_v32 = vld [vmem:[%s3344_s6 + $0x62] sm:$0xff] }
 0x139   : >> { %2500 = vmatmul.msk.f32.gmra.mxu1 %vm849_vm1, %v2447_v57  ;;  %2536 = vmatmul.msk.f32.gmra.mxu2 %vm849_vm1, %v3503_v59 }
 0x13a   : >> { %2608 = vmatmul.msk.f32.gmra.mxu0 %vm849_vm1, %v2589_v8 }
 0x13c   : >> { %v1178_v10 = vpop.f32.mrf.mxu2  ;;  %2702 = vmatmul.msk.f32.gmra.mxu3 %vm849_vm1, %v2683_v61  ;;  %v2611_v61 = vld [vmem:[%s3344_s6 + $0x39] sm:$0xff] }
 0x13d   : >> { %v1229_v38 = vadd.f32 %v1178_v10, %v1038_v52  ;;  %v3621_v52 = vld [vmem:[%s3344_s6 + $0x59] sm:$0xff] }
 0x13e   : >> { %v1040_v14 = vpop.f32.mrf.mxu1 }
 0x13f   : >> { %v1387_v2 = vadd.f32 %v1336_v47, %v1229_v38  ;;  %v1497_v17 = vpop.f32.mrf.mxu0  ;;  %v1345_v59 = vpop.f32.mrf.mxu3  ;;  %v1041_v31 = vadd.f32 %v1040_v14, %v3529_v6  ;;  %v3607_v47 = vld [vmem:[%s3344_s6 + $0x51] sm:$0xff]  ;;  %v2719_v14 = vld [vmem:[%s3344_s6 + $0x5b] sm:$0xff] }
 0x140   : >> { %v2685_v6 = vld [vmem:[%s3344_s6 + $0x6a] sm:$0xff] }
 0x141   : >> { %v3596_v42 = vadd.f32 %v1494_v3, %v1387_v2  ;;  %2628 = vmatmul.msk.f32.vlgmr.msra.gmra.mxu1 %vm849_vm1, %v2609_v60  ;;  %2664 = vmatmul.msk.f32.vlgmr.msra.gmra.mxu2 %vm849_vm1, %v3593_v53 }
 0x142   : >> { %2736 = vmatmul.msk.f32.vlgmr.msra.gmra.mxu0 %vm849_vm1, %v2717_v39 }
 0x144   : >> { %v1181_v0 = vpop.f32.mrf.mxu2  ;;  %2703 = vmatmul.msk.f32.gmra.mxu3 %vm849_vm1, %v2684_v32 }
 0x145   : >> { %v1230_v35 = vadd.f32 %v1181_v0, %v1041_v31  ;;  %v2612_v31 = vld [vmem:[%s3344_s6 + $0x41] sm:$0xff] }
 0x146   : >> { %v1043_v41 = vpop.f32.mrf.mxu1  ;;  %v3635_v0 = vld [vmem:[%s3344_s6 + $0x61] sm:$0xff] }
 0x147   : >> { %v1388_v48 = vadd.f32 %v1339_v13, %v1230_v35  ;;  %v1500_v5 = vpop.f32.mrf.mxu0  ;;  %v1348_v45 = vpop.f32.mrf.mxu3  ;;  %v1044_v57 = vadd.f32 %v1043_v41, %v3544_v34  ;;  %v2686_v34 = vld [vmem:[%s3344_s6 + $0x72] sm:$0xff] }
 0x149   : >> { %v3610_v56 = vadd.f32 %v1497_v17, %v1388_v48  ;;  %2629 = vmatmul.msk.f32.gmra.mxu1 %vm849_vm1, %v2610_v43  ;;  %2665 = vmatmul.msk.f32.gmra.mxu2 %vm849_vm1, %v3607_v47  ;;  %v2720_v43 = vld [vmem:[%s3344_s6 + $0x63] sm:$0xff] }
 0x14a   : >> { %2737 = vmatmul.msk.f32.gmra.mxu0 %vm849_vm1, %v2718_v54 }
 0x14c   : >> { %v1184_v3 = vpop.f32.mrf.mxu2  ;;  %2704 = vmatmul.msk.f32.gmra.mxu3 %vm849_vm1, %v2685_v6 }
 0x14d   : >> { %v1231_v13 = vadd.f32 %v1184_v3, %v1044_v57  ;;  %v3648_v3 = vld [vmem:[%s3344_s6 + $0x69] sm:$0xff] }
 0x14e   : >> { %v1046_v8 = vpop.f32.mrf.mxu1 }
 0x14f   : >> { %v1389_v10 = vadd.f32 %v1342_v63, %v1231_v13  ;;  %v1503_v38 = vpop.f32.mrf.mxu0  ;;  %v1351_v60 = vpop.f32.mrf.mxu3  ;;  %v1047_v17 = vadd.f32 %v1046_v8, %v3559_v7  ;;  %v2687_v7 = vld [vmem:[%s3344_s6 + $0x7a] sm:$0xff] }
 0x151   : >> { %v3624_v2 = vadd.f32 %v1500_v5, %v1389_v10  ;;  %2630 = vmatmul.msk.f32.gmra.mxu1 %vm849_vm1, %v2611_v61  ;;  %2666 = vmatmul.msk.f32.gmra.mxu2 %vm849_vm1, %v3621_v52  ;;  %v2721_v61 = vld [vmem:[%s3344_s6 + $0x6b] sm:$0xff] }
 0x152   : >> { %2738 = vmatmul.msk.f32.gmra.mxu0 %vm849_vm1, %v2719_v14 }
 0x154   : >> { %v1187_v39 = vpop.f32.mrf.mxu2  ;;  %2705 = vmatmul.msk.f32.gmra.mxu3 %vm849_vm1, %v2686_v34 }
 0x155   : >> { %v1232_v63 = vadd.f32 %v1187_v39, %v1047_v17  ;;  %v3662_v39 = vld [vmem:[%s3344_s6 + $0x71] sm:$0xff] }
 0x156   : >> { %v1049_v32 = vpop.f32.mrf.mxu1 }
 0x157   : >> { %v1390_v35 = vadd.f32 %v1345_v59, %v1232_v63  ;;  %v1506_v41 = vpop.f32.mrf.mxu0  ;;  %v1354_v48 = vpop.f32.mrf.mxu3  ;;  %v1050_v54 = vadd.f32 %v1049_v32, %v3572_v51  ;;  %v2688_v51 = vld [vmem:[%s3344_s6 + $0x82] sm:$0xff] }
 0x159   : >> { %v3638_v5 = vadd.f32 %v1503_v38, %v1390_v35  ;;  %2631 = vmatmul.msk.f32.gmra.mxu1 %vm849_vm1, %v2612_v31  ;;  %2667 = vmatmul.msk.f32.gmra.mxu2 %vm849_vm1, %v3635_v0 }
 0x15a   : >> { %2739 = vmatmul.msk.f32.gmra.mxu0 %vm849_vm1, %v2720_v43 }
 0x15c   : >> { %v1190_v6 = vpop.f32.mrf.mxu2  ;;  %2706 = vmatmul.msk.f32.gmra.mxu3 %vm849_vm1, %v2687_v7 }
 0x15d   : >> { %v1233_v59 = vadd.f32 %v1190_v6, %v1050_v54  ;;  %v3676_v54 = vld [vmem:[%s3344_s6 + $0x79] sm:$0xff] }
 0x15e   : >> { %v1052_v57 = vpop.f32.mrf.mxu1 }
 0x15f   : >> { %v1391_v13 = vadd.f32 %v1348_v45, %v1233_v59  ;;  %v1509_v8 = vpop.f32.mrf.mxu0  ;;  %v1357_v10 = vpop.f32.mrf.mxu3  ;;  %v1053_v14 = vadd.f32 %v1052_v57, %v3515_v1  ;;  %v2689_v1 = vld [vmem:[%s3344_s6 + $0x8a] sm:$0xff] }
 0x161   : >> { %v3651_v38 = vadd.f32 %v1506_v41, %v1391_v13  ;;  %2632 = vmatmul.msk.f32.gmra.mxu1 %vm849_vm1, %v3593_v53  ;;  %2668 = vmatmul.msk.f32.gmra.mxu2 %vm849_vm1, %v3648_v3  ;;  %v2722_v53 = vld [vmem:[%s3344_s6 + $0x73] sm:$0xff] }
 0x162   : >> { %2740 = vmatmul.msk.f32.gmra.mxu0 %vm849_vm1, %v2721_v61 }
 0x164   : >> { %v1193_v34 = vpop.f32.mrf.mxu2  ;;  %2707 = vmatmul.msk.f32.gmra.mxu3 %vm849_vm1, %v2688_v51 }
 0x165   : >> { %v1234_v45 = vadd.f32 %v1193_v34, %v1053_v14  ;;  %v3690_v14 = vld [vmem:[%s3344_s6 + $0x81] sm:$0xff] }
 0x166   : >> { %v1055_v17 = vpop.f32.mrf.mxu1 }
 0x167   : >> { %v1392_v63 = vadd.f32 %v1351_v60, %v1234_v45  ;;  %v1512_v32 = vpop.f32.mrf.mxu0  ;;  %v1360_v31 = vpop.f32.mrf.mxu3  ;;  %v1056_v41 = vadd.f32 %v1055_v17, %v3526_v46  ;;  %v2690_v46 = vld [vmem:[%s3344_s6 + $0x92] sm:$0xff] }
 0x169   : >> { %v3665_v35 = vadd.f32 %v1509_v8, %v1392_v63  ;;  %2633 = vmatmul.msk.f32.gmra.mxu1 %vm849_vm1, %v3607_v47  ;;  %2669 = vmatmul.msk.f32.gmra.mxu2 %vm849_vm1, %v3662_v39  ;;  %v2723_v47 = vld [vmem:[%s3344_s6 + $0x7b] sm:$0xff] }
 0x16a   : >> { %2741 = vmatmul.msk.f32.gmra.mxu0 %vm849_vm1, %v2722_v53 }
 0x16c   : >> { %v1196_v43 = vpop.f32.mrf.mxu2  ;;  %2708 = vmatmul.msk.f32.gmra.mxu3 %vm849_vm1, %v2689_v1 }
 0x16d   : >> { %v1235_v60 = vadd.f32 %v1196_v43, %v1056_v41  ;;  %v3704_v41 = vld [vmem:[%s3344_s6 + $0x89] sm:$0xff] }
 0x16e   : >> { %v1058_v7 = vpop.f32.mrf.mxu1 }
 0x16f   : >> { %v1393_v6 = vadd.f32 %v1354_v48, %v1235_v60  ;;  %v1515_v59 = vpop.f32.mrf.mxu0  ;;  %v1363_v57 = vpop.f32.mrf.mxu3  ;;  %v1059_v8 = vadd.f32 %v1058_v7, %v3541_v30  ;;  %v2691_v30 = vld [vmem:[%s3344_s6 + $0x9a] sm:$0xff] }
 0x171   : >> { %v3679_v13 = vadd.f32 %v1512_v32, %v1393_v6  ;;  %2634 = vmatmul.msk.f32.gmra.mxu1 %vm849_vm1, %v3621_v52  ;;  %2670 = vmatmul.msk.f32.gmra.mxu2 %vm849_vm1, %v3676_v54  ;;  %v2724_v52 = vld [vmem:[%s3344_s6 + $0x83] sm:$0xff] }
 0x172   : >> { %2742 = vmatmul.msk.f32.gmra.mxu0 %vm849_vm1, %v2723_v47 }
 0x174   : >> { %v1199_v61 = vpop.f32.mrf.mxu2  ;;  %2709 = vmatmul.msk.f32.gmra.mxu3 %vm849_vm1, %v2690_v46 }
 0x175   : >> { %v1236_v48 = vadd.f32 %v1199_v61, %v1059_v8  ;;  %v3718_v8 = vld [vmem:[%s3344_s6 + $0x91] sm:$0xff] }
 0x176   : >> { %v1061_v51 = vpop.f32.mrf.mxu1 }
 0x177   : >> { %v1394_v34 = vadd.f32 %v1357_v10, %v1236_v48  ;;  %v1518_v45 = vpop.f32.mrf.mxu0  ;;  %v1366_v17 = vpop.f32.mrf.mxu3  ;;  %v1062_v32 = vadd.f32 %v1061_v51, %v3556_v40  ;;  %v2692_v40 = vld [vmem:[%s3344_s6 + $0xa2] sm:$0xff] }
 0x179   : >> { %v3693_v63 = vadd.f32 %v1515_v59, %v1394_v34  ;;  %2635 = vmatmul.msk.f32.gmra.mxu1 %vm849_vm1, %v3635_v0  ;;  %2671 = vmatmul.msk.f32.gmra.mxu2 %vm849_vm1, %v3690_v14  ;;  %v2725_v0 = vld [vmem:[%s3344_s6 + $0x8b] sm:$0xff] }
 0x17a   : >> { %2743 = vmatmul.msk.f32.gmra.mxu0 %vm849_vm1, %v2724_v52 }
 0x17c   : >> { %v1202_v53 = vpop.f32.mrf.mxu2  ;;  %2710 = vmatmul.msk.f32.gmra.mxu3 %vm849_vm1, %v2691_v30 }
 0x17d   : >> { %v1237_v10 = vadd.f32 %v1202_v53, %v1062_v32  ;;  %v3732_v32 = vld [vmem:[%s3344_s6 + $0x99] sm:$0xff] }
 0x17e   : >> { %v1064_v1 = vpop.f32.mrf.mxu1 }
 0x17f   : >> { %v1395_v43 = vadd.f32 %v1360_v31, %v1237_v10  ;;  %v1521_v60 = vpop.f32.mrf.mxu0  ;;  %v1369_v7 = vpop.f32.mrf.mxu3  ;;  %v1065_v59 = vadd.f32 %v1064_v1, %v3569_v50  ;;  %v2693_v50 = vld [vmem:[%s3344_s6 + $0xaa] sm:$0xff] }
 0x181   : >> { %v3707_v6 = vadd.f32 %v1518_v45, %v1395_v43  ;;  %2636 = vmatmul.msk.f32.gmra.mxu1 %vm849_vm1, %v3648_v3  ;;  %2672 = vmatmul.msk.f32.gmra.mxu2 %vm849_vm1, %v3704_v41  ;;  %v2726_v3 = vld [vmem:[%s3344_s6 + $0x93] sm:$0xff] }
 0x182   : >> { %2744 = vmatmul.msk.f32.gmra.mxu0 %vm849_vm1, %v2725_v0 }
 0x184   : >> { %v1205_v47 = vpop.f32.mrf.mxu2  ;;  %2711 = vmatmul.msk.f32.gmra.mxu3 %vm849_vm1, %v2692_v40 }
 0x185   : >> { %v1238_v31 = vadd.f32 %v1205_v47, %v1065_v59  ;;  %v3746_v59 = vld [vmem:[%s3344_s6 + $0xa1] sm:$0xff] }
 0x186   : >> { %v1067_v46 = vpop.f32.mrf.mxu1 }
 0x187   : >> { %v1396_v61 = vadd.f32 %v1363_v57, %v1238_v31  ;;  %v1524_v48 = vpop.f32.mrf.mxu0  ;;  %v1372_v51 = vpop.f32.mrf.mxu3  ;;  %v1068_v45 = vadd.f32 %v1067_v46, %v3523_v15  ;;  %v2694_v15 = vld [vmem:[%s3344_s6 + $0xb2] sm:$0xff] }
 0x189   : >> { %v3721_v34 = vadd.f32 %v1521_v60, %v1396_v61  ;;  %2637 = vmatmul.msk.f32.gmra.mxu1 %vm849_vm1, %v3662_v39  ;;  %2673 = vmatmul.msk.f32.gmra.mxu2 %vm849_vm1, %v3718_v8  ;;  %v2727_v39 = vld [vmem:[%s3344_s6 + $0x9b] sm:$0xff] }
 0x18a   : >> { %2745 = vmatmul.msk.f32.gmra.mxu0 %vm849_vm1, %v2726_v3 }
 0x18c   : >> { %v1208_v52 = vpop.f32.mrf.mxu2  ;;  %2712 = vmatmul.msk.f32.gmra.mxu3 %vm849_vm1, %v2693_v50 }
 0x18d   : >> { %v1239_v57 = vadd.f32 %v1208_v52, %v1068_v45  ;;  %v2657_v45 = vld [vmem:[%s3344_s6 + $0xa9] sm:$0xff] }
 0x18e   : >> { %v1070_v30 = vpop.f32.mrf.mxu1 }
 0x18f   : >> { %v1397_v53 = vadd.f32 %v1366_v17, %v1239_v57  ;;  %v1527_v10 = vpop.f32.mrf.mxu0  ;;  %v1375_v1 = vpop.f32.mrf.mxu3  ;;  %v1071_v60 = vadd.f32 %v1070_v30, %v3538_v25  ;;  %v2695_v25 = vld [vmem:[%s3344_s6 + $0xba] sm:$0xff] }
 0x191   : >> { %v3735_v43 = vadd.f32 %v1524_v48, %v1397_v53  ;;  %2638 = vmatmul.msk.f32.gmra.mxu1 %vm849_vm1, %v3676_v54  ;;  %2674 = vmatmul.msk.f32.gmra.mxu2 %vm849_vm1, %v3732_v32  ;;  %v2728_v54 = vld [vmem:[%s3344_s6 + $0xa3] sm:$0xff] }
 0x192   : >> { %2746 = vmatmul.msk.f32.gmra.mxu0 %vm849_vm1, %v2727_v39 }
 0x194   : >> { %v1211_v0 = vpop.f32.mrf.mxu2  ;;  %2713 = vmatmul.msk.f32.gmra.mxu3 %vm849_vm1, %v2694_v15 }
 0x195   : >> { %v1240_v17 = vadd.f32 %v1211_v0, %v1071_v60  ;;  %v2658_v60 = vld [vmem:[%s3344_s6 + $0xb1] sm:$0xff] }
 0x196   : >> { %v1073_v40 = vpop.f32.mrf.mxu1 }
 0x197   : >> { %v1398_v47 = vadd.f32 %v1369_v7, %v1240_v17  ;;  %v1530_v31 = vpop.f32.mrf.mxu0  ;;  %v1378_v46 = vpop.f32.mrf.mxu3  ;;  %v1074_v48 = vadd.f32 %v1073_v40, %v3553_v37  ;;  %v2696_v37 = vld [vmem:[%s3344_s6 + $0xc2] sm:$0xff]  ;;  %v2730_v40 = vld [vmem:[%s3344_s6 + $0xb3] sm:$0xff] }
 0x199   : >> { %v3749_v61 = vadd.f32 %v1527_v10, %v1398_v47  ;;  %2639 = vmatmul.msk.f32.gmra.mxu1 %vm849_vm1, %v3690_v14  ;;  %2675 = vmatmul.msk.f32.gmra.mxu2 %vm849_vm1, %v3746_v59  ;;  %v2729_v14 = vld [vmem:[%s3344_s6 + $0xab] sm:$0xff] }
 0x19a   : >> { %2747 = vmatmul.msk.f32.gmra.mxu0 %vm849_vm1, %v2728_v54 }
 0x19c   : >> { %v1214_v3 = vpop.f32.mrf.mxu2  ;;  %2714 = vmatmul.msk.f32.gmra.mxu3 %vm849_vm1, %v2695_v25 }
 0x19d   : >> { %v1241_v7 = vadd.f32 %v1214_v3, %v1074_v48  ;;  %v2659_v48 = vld [vmem:[%s3344_s6 + $0xb9] sm:$0xff] }
 0x19e   : >> { %v1076_v50 = vpop.f32.mrf.mxu1 }
 0x19f   : >> { %v1399_v52 = vadd.f32 %v1372_v51, %v1241_v7  ;;  %v1533_v57 = vpop.f32.mrf.mxu0  ;;  %v1381_v30 = vpop.f32.mrf.mxu3  ;;  %v1077_v10 = vadd.f32 %v1076_v50, %v3566_v49  ;;  %v2697_v49 = vld [vmem:[%s3344_s6 + $0xca] sm:$0xff]  ;;  %v2731_v50 = vld [vmem:[%s3344_s6 + $0xbb] sm:$0xff] }
 0x1a1   : >> { %v3761_v53 = vadd.f32 %v1530_v31, %v1399_v52  ;;  %2640 = vmatmul.msk.f32.gmra.mxu1 %vm849_vm1, %v3704_v41  ;;  %2676 = vmatmul.msk.f32.gmra.mxu2 %vm849_vm1, %v2657_v45 }
 0x1a2   : >> { %2748 = vmatmul.msk.f32.gmra.mxu0 %vm849_vm1, %v2729_v14 }
 0x1a4   : >> { %v1217_v39 = vpop.f32.mrf.mxu2  ;;  %2715 = vmatmul.msk.f32.gmra.mxu3 %vm849_vm1, %v2696_v37 }
 0x1a5   : >> { %v1242_v51 = vadd.f32 %v1217_v39, %v1077_v10  ;;  %v2660_v10 = vld [vmem:[%s3344_s6 + $0xc1] sm:$0xff] }
 0x1a6   : >> { %v1079_v15 = vpop.f32.mrf.mxu1 }
 0x1a7   : >> { %v1400_v0 = vadd.f32 %v1375_v1, %v1242_v51  ;;  %v1536_v17 = vpop.f32.mrf.mxu0  ;;  %v1384_v41 = vpop.f32.mrf.mxu3  ;;  %v1080_v31 = vadd.f32 %v1079_v15, %v3580_v55  ;;  %v2732_v51 = vld [vmem:[%s3344_s6 + $0xc3] sm:$0xff] }
 0x1a9   : >> { %v3772_v47 = vadd.f32 %v1533_v57, %v1400_v0  ;;  %2641 = vmatmul.msk.f32.gmra.mxu1 %vm849_vm1, %v3718_v8  ;;  %2677 = vmatmul.msk.f32.gmra.mxu2 %vm849_vm1, %v2658_v60 }
 0x1aa   : >> { %2749 = vmatmul.msk.f32.gmra.mxu0 %vm849_vm1, %v2730_v40  ;;  %v2661_v40 = vld [vmem:[%s3344_s6 + $0xc9] sm:$0xff] }
 0x1ac   : >> { %v1220_v54 = vpop.f32.mrf.mxu2  ;;  %2716 = vmatmul.msk.f32.gmra.mxu3 %vm849_vm1, %v2697_v49 }
 0x1ad   : >> { %v1243_v1 = vadd.f32 %v1220_v54, %v1080_v31  ;;  %v2733_v31 = vld [vmem:[%s3344_s6 + $0xcb] sm:$0xff]  ;;  %s3816_s6 = scalar_lea.vmem %s2868_s20, %s2365_s5 }
 0x1ae   : >> { %v1082_v25 = vpop.f32.mrf.mxu1 }
 0x1af   : >> { %v1401_v3 = vadd.f32 %v1378_v46, %v1243_v1  ;;  %v1539_v7 = vpop.f32.mrf.mxu0  ;;  %v1968_v52 = vpop.f32.mrf.mxu3  ;;  %v1083_v55 = vadd.f32 %v1082_v25, %v3532_v58 }
 0x1b1   : >> { %v3783_v8 = vadd.f32 %v1536_v17, %v1401_v3  ;;  %2642 = vmatmul.msk.f32.gmra.mxu1 %vm849_vm1, %v3732_v32  ;;  %2678 = vmatmul.msk.f32.gmra.mxu2 %vm849_vm1, %v2659_v48 }
 0x1b2   : >> { %2750 = vmatmul.msk.f32.gmra.mxu0 %vm849_vm1, %v2731_v50 }
 0x1b4   : >> { %v1223_v57 = vpop.f32.mrf.mxu2 }
 0x1b5   : >> { %v1244_v14 = vadd.f32 %v1223_v57, %v1083_v55 }
 0x1b6   : >> { %v1085_v37 = vpop.f32.mrf.mxu1 }
 0x1b7   : >> { %v1402_v46 = vadd.f32 %v1381_v30, %v1244_v14  ;;  %v1542_v39 = vpop.f32.mrf.mxu0  ;;  %v1971_v15 = vpop.f32.mrf.mxu3  ;;  %v1086_v58 = vadd.f32 %v1085_v37, %v3547_v9 }
 0x1b9   : >> { %v3792_v60 = vadd.f32 %v1539_v7, %v1402_v46  ;;  %2643 = vmatmul.msk.f32.gmra.mxu1 %vm849_vm1, %v3746_v59  ;;  %2679 = vmatmul.msk.f32.gmra.mxu2 %vm849_vm1, %v2660_v10 }
 0x1ba   : >> { %2751 = vmatmul.msk.f32.gmra.mxu0 %vm849_vm1, %v2732_v51 }
 0x1bc   : >> { %v1226_v32 = vpop.f32.mrf.mxu2 }
 0x1bd   : >> { %v1245_v0 = vadd.f32 %v1226_v32, %v1086_v58 }
 0x1be   : >> { %v1652_v17 = vpop.f32.mrf.mxu1 }
 0x1bf   : >> { %v1403_v49 = vadd.f32 %v1384_v41, %v1245_v0  ;;  %v2126_v30 = vpop.f32.mrf.mxu0  ;;  %v1974_v54 = vpop.f32.mrf.mxu3  ;;  %v1703_v9 = vadd.f32 %v1652_v17, %v3596_v42  ;;  %v3808_v41 = vperm.slane %v3014_v26, 0 }
 0x1c1   : >> { %v3801_v1 = vadd.f32 %v1542_v39, %v1403_v49  ;;  %2644 = vmatmul.msk.f32.gmra.mxu1 %vm849_vm1, %v2657_v45  ;;  %2680 = vmatmul.msk.f32.gmra.mxu2 %vm849_vm1, %v2661_v40 }
 0x1c2   : >> { %2752 = vmatmul.msk.f32.gmra.mxu0 %vm849_vm1, %v2733_v31 }
 0x1c4   : >> { %v1810_v59 = vpop.f32.mrf.mxu2 }
 0x1c5   : >> { %v1861_v25 = vadd.f32 %v1810_v59, %v1703_v9 }
 0x1c6   : >> { %v1655_v48 = vpop.f32.mrf.mxu1 }
 0x1c7   : >> { %v2019_v3 = vadd.f32 %v1968_v52, %v1861_v25  ;;  %v2129_v7 = vpop.f32.mrf.mxu0  ;;  %v1977_v50 = vpop.f32.mrf.mxu3  ;;  %v1704_v45 = vadd.f32 %v1655_v48, %v3610_v56 }
 0x1c9   : >> { %v2177_v55 = vadd.f32 %v2126_v30, %v2019_v3 }
 0x1cb   : >> { %v2197_v57 = vadd.f32 %v3808_v41, %v2177_v55 }
 0x1cc   : >> { %v1813_v14 = vpop.f32.mrf.mxu2 }
 0x1cd   : >> { %vm2214_vm1 = vcmp.ge.f32.partialorder %v2197_v57, 0.0  ;;  %v2231_v37 = vmul.f32 %v2197_v57, %v3321_v33  ;;  %v1862_v10 = vadd.f32 %v1813_v14, %v1704_v45 }
 0x1ce   : >> { %v1658_v42 = vpop.f32.mrf.mxu1 }
 0x1cf   : >> { %v2248_v52 = vsel %vm2214_vm1, %v2197_v57, %v2231_v37  ;;  %v2020_v46 = vadd.f32 %v1971_v15, %v1862_v10  ;;  %v2132_v39 = vpop.f32.mrf.mxu0  ;;  %v1980_v51 = vpop.f32.mrf.mxu3  ;;  %v1705_v32 = vadd.f32 %v1658_v42, %v3624_v2 }
 0x1d0   : >> { %v2299_v56 = vsel %vm3231_vm13, %v2248_v52, 0.0 }
 0x1d1   : >> { %2753 = vst [vmem:[%s3816_s6 + $0x28] sm:$0xff] %v2299_v56  ;;  %v2178_v58 = vadd.f32 %v2129_v7, %v2020_v46 }
 0x1d3   : >> { %v2198_v0 = vadd.f32 %v3808_v41, %v2178_v58 }
 0x1d4   : >> { %v1816_v17 = vpop.f32.mrf.mxu2 }
 0x1d5   : >> { %vm2215_vm4 = vcmp.ge.f32.partialorder %v2198_v0, 0.0  ;;  %v2232_v40 = vmul.f32 %v2198_v0, %v3321_v33  ;;  %v1863_v49 = vadd.f32 %v1816_v17, %v1705_v32 }
 0x1d6   : >> { %v1661_v30 = vpop.f32.mrf.mxu1 }
 0x1d7   : >> { %v2249_v31 = vsel %vm2215_vm4, %v2198_v0, %v2232_v40  ;;  %v2021_v15 = vadd.f32 %v1974_v54, %v1863_v49  ;;  %v2135_v9 = vpop.f32.mrf.mxu0  ;;  %v1983_v59 = vpop.f32.mrf.mxu3  ;;  %v1706_v2 = vadd.f32 %v1661_v30, %v3638_v5 }
 0x1d8   : >> { %v2300_v25 = vsel %vm3235_vm3, %v2249_v31, 0.0 }
 0x1d9   : >> { %2754 = vst [vmem:[%s3816_s6 + $0x30] sm:$0xff] %v2300_v25  ;;  %v2179_v48 = vadd.f32 %v2132_v39, %v2021_v15 }
 0x1db   : >> { %v2199_v3 = vadd.f32 %v3808_v41, %v2179_v48 }
 0x1dc   : >> { %v1819_v7 = vpop.f32.mrf.mxu2 }
 0x1dd   : >> { %vm2216_vm1 = vcmp.ge.f32.partialorder %v2199_v3, 0.0  ;;  %v2233_v55 = vmul.f32 %v2199_v3, %v3321_v33  ;;  %v1864_v45 = vadd.f32 %v1819_v7, %v1706_v2 }
 0x1de   : >> { %v1664_v57 = vpop.f32.mrf.mxu1 }
 0x1df   : >> { %v2250_v14 = vsel %vm2216_vm1, %v2199_v3, %v2233_v55  ;;  %v2022_v54 = vadd.f32 %v1977_v50, %v1864_v45  ;;  %v2138_v37 = vpop.f32.mrf.mxu0  ;;  %v1986_v42 = vpop.f32.mrf.mxu3  ;;  %v1707_v5 = vadd.f32 %v1664_v57, %v3651_v38 }
 0x1e0   : >> { %v2301_v10 = vsel %vm3250_vm8, %v2250_v14, 0.0 }
 0x1e1   : >> { %2755 = vst [vmem:[%s3816_s6 + $0x38] sm:$0xff] %v2301_v10  ;;  %v2180_v52 = vadd.f32 %v2135_v9, %v2022_v54 }
 0x1e3   : >> { %v2200_v46 = vadd.f32 %v3808_v41, %v2180_v52 }
 0x1e4   : >> { %v1822_v39 = vpop.f32.mrf.mxu2 }
 0x1e5   : >> { %vm2217_vm4 = vcmp.ge.f32.partialorder %v2200_v46, 0.0  ;;  %v2234_v56 = vmul.f32 %v2200_v46, %v3321_v33  ;;  %v1865_v58 = vadd.f32 %v1822_v39, %v1707_v5 }
 0x1e6   : >> { %v1667_v32 = vpop.f32.mrf.mxu1 }
 0x1e7   : >> { %v2251_v0 = vsel %vm2217_vm4, %v2200_v46, %v2234_v56  ;;  %v2023_v50 = vadd.f32 %v1980_v51, %v1865_v58  ;;  %v2141_v17 = vpop.f32.mrf.mxu0  ;;  %v1989_v30 = vpop.f32.mrf.mxu3  ;;  %v1708_v38 = vadd.f32 %v1667_v32, %v3665_v35 }
 0x1e8   : >> { %v2302_v40 = vsel %vm3254_vm9, %v2251_v0, 0.0 }
 0x1e9   : >> { %2756 = vst [vmem:[%s3816_s6 + $0x40] sm:$0xff] %v2302_v40  ;;  %v2181_v49 = vadd.f32 %v2138_v37, %v2023_v50 }
 0x1eb   : >> { %v2201_v31 = vadd.f32 %v3808_v41, %v2181_v49 }
 0x1ec   : >> { %v1825_v15 = vpop.f32.mrf.mxu2 }
 0x1ed   : >> { %vm2218_vm1 = vcmp.ge.f32.partialorder %v2201_v31, 0.0  ;;  %v2235_v9 = vmul.f32 %v2201_v31, %v3321_v33  ;;  %v1866_v25 = vadd.f32 %v1825_v15, %v1708_v38 }
 0x1ee   : >> { %v1670_v48 = vpop.f32.mrf.mxu1 }
 0x1ef   : >> { %v2252_v2 = vsel %vm2218_vm1, %v2201_v31, %v2235_v9  ;;  %v2024_v51 = vadd.f32 %v1983_v59, %v1866_v25  ;;  %v2144_v3 = vpop.f32.mrf.mxu0  ;;  %v1709_v45 = vadd.f32 %v1670_v48, %v3679_v13  ;;  %v1992_v14 = vpop.f32.mrf.mxu3 }
 0x1f0   : >> { %v2303_v7 = vsel %vm3258_vm10, %v2252_v2, 0.0 }
 0x1f1   : >> { %2757 = vst [vmem:[%s3816_s6 + $0x48] sm:$0xff] %v2303_v7  ;;  %v2182_v55 = vadd.f32 %v2141_v17, %v2024_v51 }
 0x1f3   : >> { %v2202_v35 = vadd.f32 %v3808_v41, %v2182_v55 }
 0x1f4   : >> { %v1828_v57 = vpop.f32.mrf.mxu2 }
 0x1f5   : >> { %vm2219_vm4 = vcmp.ge.f32.partialorder %v2202_v35, 0.0  ;;  %v2236_v54 = vmul.f32 %v2202_v35, %v3321_v33  ;;  %v1867_v37 = vadd.f32 %v1828_v57, %v1709_v45 }
 0x1f6   : >> { %v1673_v10 = vpop.f32.mrf.mxu1 }
 0x1f7   : >> { %v2253_v52 = vsel %vm2219_vm4, %v2202_v35, %v2236_v54  ;;  %v2025_v59 = vadd.f32 %v1986_v42, %v1867_v37  ;;  %v2147_v5 = vpop.f32.mrf.mxu0  ;;  %v1710_v13 = vadd.f32 %v1673_v10, %v3693_v63  ;;  %v1995_v17 = vpop.f32.mrf.mxu3 }
 0x1f8   : >> { %v2304_v46 = vsel %vm3269_vm7, %v2253_v52, 0.0 }
 0x1f9   : >> { %2758 = vst [vmem:[%s3816_s6 + $0x50] sm:$0xff] %v2304_v46  ;;  %v2183_v39 = vadd.f32 %v2144_v3, %v2025_v59 }
 0x1fb   : >> { %v2203_v56 = vadd.f32 %v3808_v41, %v2183_v39 }
 0x1fc   : >> { %v1831_v58 = vpop.f32.mrf.mxu2 }
 0x1fd   : >> { %vm2220_vm1 = vcmp.ge.f32.partialorder %v2203_v56, 0.0  ;;  %v2237_v32 = vmul.f32 %v2203_v56, %v3321_v33  ;;  %v1868_v0 = vadd.f32 %v1831_v58, %v1710_v13 }
 0x1fe   : >> { %v1676_v50 = vpop.f32.mrf.mxu1 }
 0x1ff   : >> { %v2254_v40 = vsel %vm2220_vm1, %v2203_v56, %v2237_v32  ;;  %v2026_v42 = vadd.f32 %v1989_v30, %v1868_v0  ;;  %v2150_v49 = vpop.f32.mrf.mxu0  ;;  %v1711_v63 = vadd.f32 %v1676_v50, %v3707_v6  ;;  %v1998_v55 = vpop.f32.mrf.mxu3 }
 0x200   : >> { %v2305_v38 = vsel %vm3273_vm14, %v2254_v40, 0.0 }
 0x201   : >> { %2759 = vst [vmem:[%s3816_s6 + $0x58] sm:$0xff] %v2305_v38  ;;  %v2184_v31 = vadd.f32 %v2147_v5, %v2026_v42 }
 0x203   : >> { %v2204_v15 = vadd.f32 %v3808_v41, %v2184_v31 }
 0x204   : >> { %v1834_v9 = vpop.f32.mrf.mxu2 }
 0x205   : >> { %vm2221_vm4 = vcmp.ge.f32.partialorder %v2204_v15, 0.0  ;;  %v2238_v25 = vmul.f32 %v2204_v15, %v3321_v33  ;;  %v1869_v48 = vadd.f32 %v1834_v9, %v1711_v63 }
 0x206   : >> { %v1679_v2 = vpop.f32.mrf.mxu1 }
 0x207   : >> { %v2255_v51 = vsel %vm2221_vm4, %v2204_v15, %v2238_v25  ;;  %v2027_v3 = vadd.f32 %v1992_v14, %v1869_v48  ;;  %v2153_v30 = vpop.f32.mrf.mxu0  ;;  %v1712_v6 = vadd.f32 %v1679_v2, %v3721_v34  ;;  %v2001_v39 = vpop.f32.mrf.mxu3 }
 0x208   : >> { %v2306_v7 = vsel %vm4010_vm0, %v2255_v51, 0.0 }
 0x209   : >> { %2760 = vst [vmem:[%s3816_s6 + $0x60] sm:$0xff] %v2306_v7  ;;  %v2185_v45 = vadd.f32 %v2150_v49, %v2027_v3 }
 0x20b   : >> { %v2205_v35 = vadd.f32 %v3808_v41, %v2185_v45 }
 0x20c   : >> { %v1837_v57 = vpop.f32.mrf.mxu2 }
 0x20d   : >> { %vm2222_vm1 = vcmp.ge.f32.partialorder %v2205_v35, 0.0  ;;  %v2239_v54 = vmul.f32 %v2205_v35, %v3321_v33  ;;  %v1870_v37 = vadd.f32 %v1837_v57, %v1712_v6 }
 0x20e   : >> { %v1682_v10 = vpop.f32.mrf.mxu1 }
 0x20f   : >> { %v2256_v52 = vsel %vm2222_vm1, %v2205_v35, %v2239_v54  ;;  %v2028_v14 = vadd.f32 %v1995_v17, %v1870_v37  ;;  %v2156_v59 = vpop.f32.mrf.mxu0  ;;  %v1713_v34 = vadd.f32 %v1682_v10, %v3735_v43  ;;  %vm4011_vm1 = vnez %v3995_v20  ;;  %v2004_v63 = vpop.f32.mrf.mxu3 }
 0x210   : >> { %v2307_v5 = vsel %vm3284_vm5, %v2256_v52, 0.0 }
 0x211   : >> { %2761 = vst [vmem:[%s3816_s6 + $0x68] sm:$0xff] %v2307_v5  ;;  %v2186_v46 = vadd.f32 %v2153_v30, %v2028_v14 }
 0x213   : >> { %v2206_v13 = vadd.f32 %v3808_v41, %v2186_v46 }
 0x214   : >> { %v1840_v56 = vpop.f32.mrf.mxu2 }
 0x215   : >> { %vm2223_vm4 = vcmp.ge.f32.partialorder %v2206_v13, 0.0  ;;  %v2240_v58 = vmul.f32 %v2206_v13, %v3321_v33  ;;  %v1871_v32 = vadd.f32 %v1840_v56, %v1713_v34 }
 0x216   : >> { %v1685_v0 = vpop.f32.mrf.mxu1 }
 0x217   : >> { %v2257_v50 = vsel %vm2223_vm4, %v2206_v13, %v2240_v58  ;;  %v2029_v17 = vadd.f32 %v1998_v55, %v1871_v32  ;;  %v2159_v40 = vpop.f32.mrf.mxu0  ;;  %v1714_v38 = vadd.f32 %v1685_v0, %v3749_v61  ;;  %v2007_v57 = vpop.f32.mrf.mxu3 }
 0x218   : >> { %v2308_v42 = vsel %vm4011_vm1, %v2257_v50, 0.0 }
 0x219   : >> { %2762 = vst [vmem:[%s3816_s6 + $0x70] sm:$0xff] %v2308_v42  ;;  %v2187_v49 = vadd.f32 %v2156_v59, %v2029_v17 }
 0x21b   : >> { %v2207_v43 = vadd.f32 %v3808_v41, %v2187_v49 }
 0x21c   : >> { %v1843_v31 = vpop.f32.mrf.mxu2 }
 0x21d   : >> { %vm2224_vm0 = vcmp.ge.f32.partialorder %v2207_v43, 0.0  ;;  %v2241_v15 = vmul.f32 %v2207_v43, %v3321_v33  ;;  %v1872_v9 = vadd.f32 %v1843_v31, %v1714_v38 }
 0x21e   : >> { %v1688_v25 = vpop.f32.mrf.mxu1 }
 0x21f   : >> { %v2258_v48 = vsel %vm2224_vm0, %v2207_v43, %v2241_v15  ;;  %v2030_v2 = vadd.f32 %v2001_v39, %v1872_v9  ;;  %v2162_v51 = vpop.f32.mrf.mxu0  ;;  %v1715_v61 = vadd.f32 %v1688_v25, %v3761_v53  ;;  %vm4012_vm0 = vnez %v3999_v44  ;;  %v2010_v32 = vpop.f32.mrf.mxu3 }
 0x220   : >> { %v2309_v3 = vsel %vm3292_vm12, %v2258_v48, 0.0 }
 0x221   : >> { %2763 = vst [vmem:[%s3816_s6 + $0x78] sm:$0xff] %v2309_v3  ;;  %v2188_v30 = vadd.f32 %v2159_v40, %v2030_v2 }
 0x223   : >> { %v2208_v7 = vadd.f32 %v3808_v41, %v2188_v30 }
 0x224   : >> { %v1846_v55 = vpop.f32.mrf.mxu2 }
 0x225   : >> { %vm2225_vm4 = vcmp.ge.f32.partialorder %v2208_v7, 0.0  ;;  %v2242_v45 = vmul.f32 %v2208_v7, %v3321_v33  ;;  %v1873_v6 = vadd.f32 %v1846_v55, %v1715_v61 }
 0x226   : >> { %v1691_v35 = vpop.f32.mrf.mxu1 }
 0x227   : >> { %v2259_v54 = vsel %vm2225_vm4, %v2208_v7, %v2242_v45  ;;  %v2031_v37 = vadd.f32 %v2004_v63, %v1873_v6  ;;  %v2165_v52 = vpop.f32.mrf.mxu0  ;;  %v1716_v53 = vadd.f32 %v1691_v35, %v3772_v47  ;;  %v2013_v9 = vpop.f32.mrf.mxu3 }
 0x228   : >> { %v2310_v10 = vsel %vm4012_vm0, %v2259_v54, 0.0 }
 0x229   : >> { %2764 = vst [vmem:[%s3816_s6 + $0x80] sm:$0xff] %v2310_v10  ;;  %v2189_v14 = vadd.f32 %v2162_v51, %v2031_v37 }
 0x22b   : >> { %v2209_v59 = vadd.f32 %v3808_v41, %v2189_v14 }
 0x22c   : >> { %v1849_v5 = vpop.f32.mrf.mxu2 }
 0x22d   : >> { %vm2226_vm1 = vcmp.ge.f32.partialorder %v2209_v59, 0.0  ;;  %v2243_v46 = vmul.f32 %v2209_v59, %v3321_v33  ;;  %v1874_v39 = vadd.f32 %v1849_v5, %v1716_v53 }
 0x22e   : >> { %v1694_v34 = vpop.f32.mrf.mxu1 }
 0x22f   : >> { %v2260_v13 = vsel %vm2226_vm1, %v2209_v59, %v2243_v46  ;;  %v2032_v56 = vadd.f32 %v2007_v57, %v1874_v39  ;;  %v2168_v50 = vpop.f32.mrf.mxu0  ;;  %v1717_v47 = vadd.f32 %v1694_v34, %v3783_v8  ;;  %v2016_v57 = vpop.f32.mrf.mxu3 }
 0x230   : >> { %v2311_v58 = vsel %vm3300_vm6, %v2260_v13, 0.0 }
 0x231   : >> { %2765 = vst [vmem:[%s3816_s6 + $0x88] sm:$0xff] %v2311_v58  ;;  %v2190_v0 = vadd.f32 %v2165_v52, %v2032_v56 }
 0x233   : >> { %v2210_v17 = vadd.f32 %v3808_v41, %v2190_v0 }
 0x234   : >> { %v1852_v40 = vpop.f32.mrf.mxu2 }
 0x235   : >> { %vm2227_vm4 = vcmp.ge.f32.partialorder %v2210_v17, 0.0  ;;  %v2244_v42 = vmul.f32 %v2210_v17, %v3321_v33  ;;  %v1875_v49 = vadd.f32 %v1852_v40, %v1717_v47 }
 0x236   : >> { %v1697_v38 = vpop.f32.mrf.mxu1 }
 0x237   : >> { %v2261_v43 = vsel %vm2227_vm4, %v2210_v17, %v2244_v42  ;;  %v2033_v31 = vadd.f32 %v2010_v32, %v1875_v49  ;;  %v1718_v25 = vadd.f32 %v1697_v38, %v3792_v60  ;;  %v2171_v2 = vpop.f32.mrf.mxu0 }
 0x238   : >> { %v2312_v63 = vsel %vm3304_vm11, %v2261_v43, 0.0 }
 0x239   : >> { %2766 = vst [vmem:[%s3816_s6 + $0x90] sm:$0xff] %v2312_v63  ;;  %v2191_v15 = vadd.f32 %v2168_v50, %v2033_v31 }
 0x23b   : >> { %v2211_v8 = vadd.f32 %v3808_v41, %v2191_v15 }
 0x23c   : >> { %v1855_v48 = vpop.f32.mrf.mxu2 }
 0x23d   : >> { %vm2228_vm0 = vcmp.ge.f32.partialorder %v2211_v8, 0.0  ;;  %v2245_v51 = vmul.f32 %v2211_v8, %v3321_v33  ;;  %v1876_v3 = vadd.f32 %v1855_v48, %v1718_v25 }
 0x23e   : >> { %v1700_v55 = vpop.f32.mrf.mxu1 }
 0x23f   : >> { %v2262_v30 = vsel %vm2228_vm0, %v2211_v8, %v2245_v51  ;;  %v2034_v61 = vadd.f32 %v2013_v9, %v1876_v3  ;;  %v1719_v6 = vadd.f32 %v1700_v55, %v3801_v1  ;;  %v2174_v10 = vpop.f32.mrf.mxu0  ;;  %vm4013_vm0 = vnez %v4009_v22 }
 0x240   : >> { %v2313_v7 = vsel %vm3308_vm2, %v2262_v30, 0.0 }
 0x241   : >> { %2767 = vst [vmem:[%s3816_s6 + $0x98] sm:$0xff] %v2313_v7  ;;  %v2192_v45 = vadd.f32 %v2171_v2, %v2034_v61 }
 0x243   : >> { %v2212_v60 = vadd.f32 %v3808_v41, %v2192_v45 }
 0x244   : >> { %v1858_v35 = vpop.f32.mrf.mxu2 }
 0x245   : >> { %vm2229_vm1 = vcmp.ge.f32.partialorder %v2212_v60, 0.0  ;;  %v2246_v54 = vmul.f32 %v2212_v60, %v3321_v33  ;;  %v1877_v37 = vadd.f32 %v1858_v35, %v1719_v6 }
 0x247   : >> { %v2263_v52 = vsel %vm2229_vm1, %v2212_v60, %v2246_v54  ;;  %v2035_v14 = vadd.f32 %v2016_v57, %v1877_v37 }
 0x248   : >> { %v2314_v53 = vsel %vm3312_vm15, %v2263_v52, 0.0 }
 0x249   : >> { %2768 = vst [vmem:[%s3816_s6 + $0xa0] sm:$0xff] %v2314_v53  ;;  %v2193_v59 = vadd.f32 %v2174_v10, %v2035_v14 }
 0x24b   : >> { %v2213_v5 = vadd.f32 %v3808_v41, %v2193_v59 }
 0x24d   : >> { %vm2230_vm4 = vcmp.ge.f32.partialorder %v2213_v5, 0.0  ;;  %v2247_v1 = vmul.f32 %v2213_v5, %v3321_v33  ;;  %803 = sbr.rel (!%p801_p4) target bundleno = 139 (0x8b), region = 87 }
 0x24f   : >> { %v2264_v46 = vsel %vm2230_vm4, %v2213_v5, %v2247_v1 }
 0x250   : >> { %v2315_v39 = vsel %vm4013_vm0, %v2264_v46, 0.0 }
 0x251   : >> { %2769 = vst [vmem:[%s3816_s6 + $0xa8] sm:$0xff] %v2315_v39 }
 0x252 PF: > { %s13_s12 = sadd.s32 1, %s2808_s12  }
 0x253   : > { %p10_p5 = scmp.ge.s32.totalorder %s13_s12, 4  }
 0x255   :  { %12 = sbr.rel (!%p10_p5) target bundleno = 1 (0x1), region = 98 }

// kernel: zsl_cnn_forward.7
= control target key start
LH: loop header
LB: loop body
LE: loop exit
PB: predicated region body
PF: predicated region fallthrough
CT: control target
= control target key end

     0   :  { %s2504_s12 = smov 0   ;;  %s3850_s0 = inlined_call_operand.vmem [shape: f32[2,1168,128], index: 0, kind: input, shape index: {}]   ;;  %s3851_s1 = inlined_call_operand.vmem [shape: f32[9,128,128], index: 1, kind: input, shape index: {}]   ;;  %s3852_s2 = inlined_call_operand.vmem [shape: f32[1,128], index: 2, kind: input, shape index: {}]   ;;  %s3853_s3 = inlined_call_operand.vmem [shape: f32[2,1168,128], index: 3, kind: output, shape index: {}]  }
   0x1 LB: > { %s2090_s13 = sadd.s32 4294967295, %s2475_s12   ;;  %p2094_p0 = scmp.ge.s32.totalorder %s2475_s12, 1  ;;  %s2475_s12 = sphi %s2504_s12, %s13_s12  }
   0x2   : > { %p137_p1 = scmp.lt.s32.totalorder %s2475_s12, 3 }
   0x4   : > { %p138_p2 = pnand %p2094_p0, %p137_p1 }
   0x5   : > { %p161_p3 = scmp.lt.s32.totalorder (!%p138_p2), %s2090_s13, 1  ;;  %s2990_s23 = smov (!%p138_p2), 0  }
   0x6   : > { %141 = sbr.rel (%p138_p2) target bundleno = 619 (0x26b), region = 32 }
   0xb   : > { %v181_v0 = vlaneseq  ;;  %s3946_s13 = smov (!%p161_p3, %s2090_s13), 1  ;;  %v2481_v10 = vmov 0.0   ;;  %v2482_v42 = vmov 0  }
   0xc   : > { %s2445_s14 = smul.u32 1168, %s3946_s13 }
   0xd   : > { %v2513_v1 = vshrl.u32 %v181_v0, 7 }
   0xe   : > { %s2530_s17 = scalar_lea.vmem %s3850_s0, %s2445_s14  ;;  %s2535_s20 = scalar_lea.vmem %s3853_s3, %s2445_s14 }
   0xf   : > { %v2516_v2 = vadd.s32 8, %v2513_v1  ;;  %v2519_v3 = vadd.s32 16, %v2513_v1  ;;  %v2522_v4 = vadd.s32 24, %v2513_v1  ;;  %v2525_v5 = vadd.s32 32, %v2513_v1  ;;  %171 = vst [vmem:[%s2535_s20] sm:$0xff] %v2481_v10 }
  0x10   : > { %v2538_v6 = vadd.s32 40, %v2513_v1  ;;  %v2541_v7 = vadd.s32 48, %v2513_v1  ;;  %v2544_v8 = vadd.s32 56, %v2513_v1  ;;  %v2547_v9 = vadd.s32 64, %v2513_v1  ;;  %172 = vst [vmem:[%s2535_s20 + $0x8] sm:$0xff] %v2481_v10 }
  0x11   : > { %v2551_v11 = vadd.s32 72, %v2513_v1  ;;  %v2554_v12 = vadd.s32 80, %v2513_v1  ;;  %v2557_v13 = vadd.s32 88, %v2513_v1  ;;  %v2560_v14 = vadd.s32 96, %v2513_v1  ;;  %173 = vst [vmem:[%s2535_s20 + $0x10] sm:$0xff] %v2481_v10 }
  0x12   : > { %v202_v15 = vand.u32 65535, %v2513_v1  ;;  %v203_v16 = vshrl.u32 %v2513_v1, 16  ;;  %v231_v17 = vand.u32 65535, %v2516_v2  ;;  %v232_v18 = vshrl.u32 %v2516_v2, 16  ;;  %174 = vst [vmem:[%s2535_s20 + $0x18] sm:$0xff] %v2481_v10 }
  0x13   : > { %v2569_v19 = vadd.s32 104, %v2513_v1  ;;  %v260_v20 = vand.u32 65535, %v2519_v3  ;;  %v261_v21 = vshrl.u32 %v2519_v3, 16  ;;  %v289_v22 = vand.u32 65535, %v2522_v4  ;;  %175 = vst [vmem:[%s2535_s20 + $0x20] sm:$0xff] %v2481_v10 }
  0x14   : > { %v205_v23 = vmul.u32 61681, %v202_v15  ;;  %v206_v24 = vmul.u32 61680, %v202_v15  ;;  %v207_v25 = vmul.u32 61681, %v203_v16  ;;  %v290_v26 = vshrl.u32 %v2522_v4, 16  ;;  %176 = vst [vmem:[%s2535_s20 + $0x468] sm:$0xff] %v2481_v10 }
  0x15   : > { %v208_v27 = vmul.u32 61680, %v203_v16  ;;  %v234_v28 = vmul.u32 61681, %v231_v17  ;;  %v235_v29 = vmul.u32 61680, %v231_v17  ;;  %v236_v30 = vmul.u32 61681, %v232_v18  ;;  %177 = vst [vmem:[%s2535_s20 + $0x470] sm:$0xff] %v2481_v10 }
  0x16   : > { %v209_v31 = vshll.u32 %v206_v24, 16  ;;  %v210_v32 = vshrl.u32 %v206_v24, 16  ;;  %v211_v33 = vshll.u32 %v207_v25, 16  ;;  %v237_v34 = vmul.u32 61680, %v232_v18  ;;  %178 = vst [vmem:[%s2535_s20 + $0x478] sm:$0xff] %v2481_v10 }
  0x17   : > { %v212_v35 = vshrl.u32 %v207_v25, 16  ;;  %v238_v36 = vshll.u32 %v235_v29, 16  ;;  %v239_v37 = vshrl.u32 %v235_v29, 16  ;;  %v240_v38 = vshll.u32 %v236_v30, 16  ;;  %179 = vst [vmem:[%s2535_s20 + $0x480] sm:$0xff] %v2481_v10 }
  0x18   : > { %vm213_vm0 = vc.u32 %v205_v23, %v209_v31  ;;  %v215_v39 = vadd.s32 %v209_v31, %v205_v23  ;;  %v263_v40 = vmul.u32 61681, %v260_v20  ;;  %v264_v41 = vmul.u32 61680, %v260_v20  ;;  %180 = vst [vmem:[%s2535_s20 + $0x488] sm:$0xff] %v2481_v10 }
  0x19   : > { %v214_v43 = vsel %vm213_vm0, 1, %v2482_v42  ;;  %vm242_vm1 = vc.u32 %v234_v28, %v238_v36  ;;  %v244_v44 = vadd.s32 %v238_v36, %v234_v28  ;;  %v265_v45 = vmul.u32 61681, %v261_v21 }
  0x1a   : > { %v216_v46 = vadd.s32 %v214_v43, %v208_v27  ;;  %vm217_vm2 = vc.u32 %v215_v39, %v211_v33  ;;  %v243_v47 = vsel %vm242_vm1, 1, %v2482_v42  ;;  %v266_v48 = vmul.u32 61680, %v261_v21 }
  0x1b   : > { %v218_v49 = vsel %vm217_vm2, 1, %v2482_v42  ;;  %v245_v50 = vadd.s32 %v243_v47, %v237_v34  ;;  %vm246_vm3 = vc.u32 %v244_v44, %v240_v38  ;;  %v267_v51 = vshll.u32 %v264_v41, 16 }
  0x1c   : > { %v220_v52 = vadd.s32 %v218_v49, %v216_v46  ;;  %v241_v53 = vshrl.u32 %v236_v30, 16  ;;  %v247_v54 = vsel %vm246_vm3, 1, %v2482_v42  ;;  %v269_v55 = vshll.u32 %v265_v45, 16 }
  0x1d   : > { %v249_v56 = vadd.s32 %v247_v54, %v245_v50  ;;  %v268_v57 = vshrl.u32 %v264_v41, 16  ;;  %vm271_vm4 = vc.u32 %v263_v40, %v267_v51  ;;  %v273_v58 = vadd.s32 %v267_v51, %v263_v40 }
  0x1e   : > { %v221_v59 = vadd.s32 %v220_v52, %v210_v32  ;;  %v272_v60 = vsel %vm271_vm4, 1, %v2482_v42  ;;  %v292_v61 = vmul.u32 61681, %v289_v22  ;;  %v293_v62 = vmul.u32 61680, %v289_v22 }
  0x1f   : > { %v250_v63 = vadd.s32 %v249_v56, %v239_v37  ;;  %v274_v10 = vadd.s32 %v272_v60, %v266_v48  ;;  %vm275_vm5 = vc.u32 %v273_v58, %v269_v55  ;;  %v294_v15 = vmul.u32 61681, %v290_v26 }
  0x20   : > { %v222_v16 = vadd.s32 %v221_v59, %v212_v35  ;;  %v276_v17 = vsel %vm275_vm5, 1, %v2482_v42  ;;  %v295_v18 = vmul.u32 61680, %v290_v26  ;;  %v296_v20 = vshll.u32 %v293_v62, 16 }
  0x21   : > { %v251_v21 = vadd.s32 %v250_v63, %v241_v53  ;;  %v270_v23 = vshrl.u32 %v265_v45, 16  ;;  %v278_v24 = vadd.s32 %v276_v17, %v274_v10  ;;  %v298_v25 = vshll.u32 %v294_v15, 16 }
  0x22   : > { %v2589_v27 = vadd.s32 112, %v2513_v1  ;;  %v223_v28 = vshrl.u32 %v222_v16, 5  ;;  %vm300_vm6 = vc.u32 %v292_v61, %v296_v20  ;;  %v302_v29 = vadd.s32 %v296_v20, %v292_v61 }
  0x23   : > { %v252_v22 = vshrl.u32 %v251_v21, 5  ;;  %v279_v30 = vadd.s32 %v278_v24, %v268_v57  ;;  %v301_v31 = vsel %vm300_vm6, 1, %v2482_v42  ;;  %v318_v32 = vand.u32 65535, %v2525_v5 }
  0x24   : > { %v297_v33 = vshrl.u32 %v293_v62, 16  ;;  %v303_v34 = vadd.s32 %v301_v31, %v295_v18  ;;  %vm304_vm7 = vc.u32 %v302_v29, %v298_v25  ;;  %v319_v26 = vshrl.u32 %v2525_v5, 16 }
  0x25   : > { %v224_v35 = vmul.u32 34, %v223_v28  ;;  %v280_v36 = vadd.s32 %v279_v30, %v270_v23  ;;  %v299_v37 = vshrl.u32 %v294_v15, 16  ;;  %v305_v38 = vsel %vm304_vm7, 1, %v2482_v42 }
  0x26   : > { %v307_v39 = vadd.s32 %v305_v38, %v303_v34  ;;  %v321_v40 = vmul.u32 61681, %v318_v32  ;;  %v322_v41 = vmul.u32 61680, %v318_v32  ;;  %v323_v43 = vmul.u32 61681, %v319_v26 }
  0x27   : > { %v2596_v44 = vadd.s32 120, %v2513_v1  ;;  %v2599_v45 = vadd.s32 128, %v2513_v1  ;;  %v253_v46 = vmul.u32 34, %v252_v22  ;;  %v347_v47 = vand.u32 65535, %v2538_v6 }
  0x28   : > { %v308_v48 = vadd.s32 %v307_v39, %v297_v33  ;;  %v324_v49 = vmul.u32 61680, %v319_v26  ;;  %v325_v50 = vshll.u32 %v322_v41, 16  ;;  %v327_v51 = vshll.u32 %v323_v43, 16 }
  0x29   : > { %v2603_v52 = vsub.s32 %v2513_v1, %v224_v35  ;;  %v281_v53 = vshrl.u32 %v280_v36, 5  ;;  %v348_v54 = vshrl.u32 %v2538_v6, 16  ;;  %v350_v55 = vmul.u32 61681, %v347_v47 }
  0x2a   : > { %v309_v56 = vadd.s32 %v308_v48, %v299_v37  ;;  %vm329_vm8 = vc.u32 %v321_v40, %v325_v50  ;;  %v331_v57 = vadd.s32 %v325_v50, %v321_v40  ;;  %v351_v58 = vmul.u32 61680, %v347_v47 }
  0x2b   : > { %v2607_v59 = vsub.s32 %v2516_v2, %v253_v46  ;;  %v326_v60 = vshrl.u32 %v322_v41, 16  ;;  %v330_v61 = vsel %vm329_vm8, 1, %v2482_v42  ;;  %v352_v62 = vmul.u32 61681, %v348_v54 }
  0x2c   : > { %v332_v63 = vadd.s32 %v330_v61, %v324_v49  ;;  %vm333_vm9 = vc.u32 %v331_v57, %v327_v51  ;;  %v353_v10 = vmul.u32 61680, %v348_v54  ;;  %v354_v1 = vshll.u32 %v351_v58, 16 }
  0x2d   : > { %v282_v15 = vmul.u32 34, %v281_v53  ;;  %v328_v16 = vshrl.u32 %v323_v43, 16  ;;  %v334_v17 = vsel %vm333_vm9, 1, %v2482_v42  ;;  %v356_v18 = vshll.u32 %v352_v62, 16 }
  0x2e   : > { %v310_v20 = vshrl.u32 %v309_v56, 5  ;;  %v336_v21 = vadd.s32 %v334_v17, %v332_v63  ;;  %vm358_vm10 = vc.u32 %v350_v55, %v354_v1  ;;  %v360_v23 = vadd.s32 %v354_v1, %v350_v55 }
  0x2f   : > { %v355_v24 = vshrl.u32 %v351_v58, 16  ;;  %v359_v2 = vsel %vm358_vm10, 1, %v2482_v42  ;;  %v376_v25 = vand.u32 65535, %v2541_v7  ;;  %v377_v28 = vshrl.u32 %v2541_v7, 16 }
  0x30   : > { %v337_v29 = vadd.s32 %v336_v21, %v326_v60  ;;  %v361_v22 = vadd.s32 %v359_v2, %v353_v10  ;;  %vm362_vm11 = vc.u32 %v360_v23, %v356_v18  ;;  %v405_v30 = vand.u32 65535, %v2544_v8 }
  0x31   : > { %v363_v31 = vsel %vm362_vm11, 1, %v2482_v42  ;;  %v379_v32 = vmul.u32 61681, %v376_v25  ;;  %v380_v33 = vmul.u32 61680, %v376_v25  ;;  %v381_v34 = vmul.u32 61681, %v377_v28 }
  0x32   : > { %v338_v26 = vadd.s32 %v337_v29, %v328_v16  ;;  %v357_v35 = vshrl.u32 %v352_v62, 16  ;;  %v365_v36 = vadd.s32 %v363_v31, %v361_v22  ;;  %v406_v37 = vshrl.u32 %v2544_v8, 16 }
  0x33   : > { %v2618_v38 = vsub.s32 %v2519_v3, %v282_v15  ;;  %v382_v39 = vmul.u32 61680, %v377_v28  ;;  %v383_v40 = vshll.u32 %v380_v33, 16  ;;  %v385_v41 = vshll.u32 %v381_v34, 16 }
  0x34   : > { %v311_v43 = vmul.u32 34, %v310_v20  ;;  %v339_v46 = vshrl.u32 %v338_v26, 5  ;;  %v366_v47 = vadd.s32 %v365_v36, %v355_v24  ;;  %v409_v48 = vmul.u32 61680, %v405_v30 }
  0x35   : > { %vm387_vm12 = vc.u32 %v379_v32, %v383_v40  ;;  %v389_v49 = vadd.s32 %v383_v40, %v379_v32  ;;  %v408_v50 = vmul.u32 61681, %v405_v30  ;;  %v410_v51 = vmul.u32 61681, %v406_v37 }
  0x36   : > { %v367_v53 = vadd.s32 %v366_v47, %v357_v35  ;;  %v384_v54 = vshrl.u32 %v380_v33, 16  ;;  %v388_v55 = vsel %vm387_vm12, 1, %v2482_v42  ;;  %v412_v56 = vshll.u32 %v409_v48, 16 }
  0x37   : > { %v390_v57 = vadd.s32 %v388_v55, %v382_v39  ;;  %vm391_vm13 = vc.u32 %v389_v49, %v385_v41  ;;  %v411_v3 = vmul.u32 61680, %v406_v37  ;;  %v414_v58 = vshll.u32 %v410_v51, 16 }
  0x38   : > { %v2622_v60 = vsub.s32 %v2522_v4, %v311_v43  ;;  %v340_v61 = vmul.u32 34, %v339_v46  ;;  %v386_v62 = vshrl.u32 %v381_v34, 16  ;;  %v392_v63 = vsel %vm391_vm13, 1, %v2482_v42 }
  0x39   : > { %v394_v10 = vadd.s32 %v392_v63, %v390_v57  ;;  %vm416_vm14 = vc.u32 %v408_v50, %v412_v56  ;;  %v418_v1 = vadd.s32 %v412_v56, %v408_v50  ;;  %v434_v15 = vand.u32 65535, %v2547_v9 }
  0x3a   : > { %v368_v16 = vshrl.u32 %v367_v53, 5  ;;  %v413_v17 = vshrl.u32 %v409_v48, 16  ;;  %v417_v18 = vsel %vm416_vm14, 1, %v2482_v42  ;;  %v435_v20 = vshrl.u32 %v2547_v9, 16 }
  0x3b   : > { %v395_v21 = vadd.s32 %v394_v10, %v384_v54  ;;  %v419_v23 = vadd.s32 %v417_v18, %v411_v3  ;;  %vm420_vm15 = vc.u32 %v418_v1, %v414_v58  ;;  %v463_v4 = vand.u32 65535, %v2551_v11 }
  0x3c   : > { %v421_v24 = vsel %vm420_vm15, 1, %v2482_v42  ;;  %v437_v2 = vmul.u32 61681, %v434_v15  ;;  %v438_v25 = vmul.u32 61680, %v434_v15  ;;  %v439_v28 = vmul.u32 61681, %v435_v20 }
  0x3d   : > { %v396_v29 = vadd.s32 %v395_v21, %v386_v62  ;;  %v415_v22 = vshrl.u32 %v410_v51, 16  ;;  %v423_v30 = vadd.s32 %v421_v24, %v419_v23  ;;  %v464_v31 = vshrl.u32 %v2551_v11, 16 }
  0x3e   : > { %v2632_v32 = vsub.s32 %v2525_v5, %v340_v61  ;;  %v440_v33 = vmul.u32 61680, %v435_v20  ;;  %v441_v34 = vshll.u32 %v438_v25, 16  ;;  %v443_v26 = vshll.u32 %v439_v28, 16 }
  0x3f   : > { %v369_v35 = vmul.u32 34, %v368_v16  ;;  %v397_v36 = vshrl.u32 %v396_v29, 5  ;;  %v424_v37 = vadd.s32 %v423_v30, %v413_v17  ;;  %v467_v39 = vmul.u32 61680, %v463_v4 }
  0x40   : > { %vm445_vm0 = vc.u32 %v437_v2, %v441_v34  ;;  %v447_v40 = vadd.s32 %v441_v34, %v437_v2  ;;  %v466_v41 = vmul.u32 61681, %v463_v4  ;;  %v468_v43 = vmul.u32 61681, %v464_v31 }
  0x41   : > { %v425_v46 = vadd.s32 %v424_v37, %v415_v22  ;;  %v442_v47 = vshrl.u32 %v438_v25, 16  ;;  %v446_v48 = vsel %vm445_vm0, 1, %v2482_v42  ;;  %v470_v49 = vshll.u32 %v467_v39, 16 }
  0x42   : > { %v448_v50 = vadd.s32 %v446_v48, %v440_v33  ;;  %vm449_vm1 = vc.u32 %v447_v40, %v443_v26  ;;  %v469_v5 = vmul.u32 61680, %v464_v31  ;;  %v472_v51 = vshll.u32 %v468_v43, 16 }
  0x43   : > { %v2636_v53 = vsub.s32 %v2538_v6, %v369_v35  ;;  %v398_v54 = vmul.u32 34, %v397_v36  ;;  %v444_v55 = vshrl.u32 %v439_v28, 16  ;;  %v450_v56 = vsel %vm449_vm1, 1, %v2482_v42 }
  0x44   : > { %v452_v57 = vadd.s32 %v450_v56, %v448_v50  ;;  %vm474_vm2 = vc.u32 %v466_v41, %v470_v49  ;;  %v476_v3 = vadd.s32 %v470_v49, %v466_v41  ;;  %v492_v58 = vand.u32 65535, %v2554_v12 }
  0x45   : > { %v426_v61 = vshrl.u32 %v425_v46, 5  ;;  %v471_v62 = vshrl.u32 %v467_v39, 16  ;;  %v475_v63 = vsel %vm474_vm2, 1, %v2482_v42  ;;  %v493_v10 = vshrl.u32 %v2554_v12, 16 }
  0x46   : > { %v453_v1 = vadd.s32 %v452_v57, %v442_v47  ;;  %v477_v15 = vadd.s32 %v475_v63, %v469_v5  ;;  %vm478_vm3 = vc.u32 %v476_v3, %v472_v51  ;;  %v521_v6 = vand.u32 65535, %v2557_v13 }
  0x47   : > { %v479_v16 = vsel %vm478_vm3, 1, %v2482_v42  ;;  %v495_v17 = vmul.u32 61681, %v492_v58  ;;  %v496_v18 = vmul.u32 61680, %v492_v58  ;;  %v497_v20 = vmul.u32 61681, %v493_v10 }
  0x48   : > { %v454_v21 = vadd.s32 %v453_v1, %v444_v55  ;;  %v473_v23 = vshrl.u32 %v468_v43, 16  ;;  %v481_v4 = vadd.s32 %v479_v16, %v477_v15  ;;  %v522_v24 = vshrl.u32 %v2557_v13, 16 }
  0x49   : > { %v2646_v2 = vsub.s32 %v2541_v7, %v398_v54  ;;  %v498_v25 = vmul.u32 61680, %v493_v10  ;;  %v499_v28 = vshll.u32 %v496_v18, 16  ;;  %v501_v29 = vshll.u32 %v497_v20, 16 }
  0x4a   : > { %v427_v22 = vmul.u32 34, %v426_v61  ;;  %v455_v30 = vshrl.u32 %v454_v21, 5  ;;  %v482_v31 = vadd.s32 %v481_v4, %v471_v62  ;;  %v525_v33 = vmul.u32 61680, %v521_v6 }
  0x4b   : > { %vm503_vm4 = vc.u32 %v495_v17, %v499_v28  ;;  %v505_v34 = vadd.s32 %v499_v28, %v495_v17  ;;  %v524_v26 = vmul.u32 61681, %v521_v6  ;;  %v526_v35 = vmul.u32 61681, %v522_v24 }
  0x4c   : > { %v483_v36 = vadd.s32 %v482_v31, %v473_v23  ;;  %v500_v37 = vshrl.u32 %v496_v18, 16  ;;  %v504_v39 = vsel %vm503_vm4, 1, %v2482_v42  ;;  %v528_v40 = vshll.u32 %v525_v33, 16 }
  0x4d   : > { %v506_v41 = vadd.s32 %v504_v39, %v498_v25  ;;  %vm507_vm5 = vc.u32 %v505_v34, %v501_v29  ;;  %v527_v7 = vmul.u32 61680, %v522_v24  ;;  %v530_v43 = vshll.u32 %v526_v35, 16 }
  0x4e   : > { %v2650_v46 = vsub.s32 %v2544_v8, %v427_v22  ;;  %v456_v47 = vmul.u32 34, %v455_v30  ;;  %v502_v48 = vshrl.u32 %v497_v20, 16  ;;  %v508_v49 = vsel %vm507_vm5, 1, %v2482_v42 }
  0x4f   : > { %v510_v50 = vadd.s32 %v508_v49, %v506_v41  ;;  %vm532_vm6 = vc.u32 %v524_v26, %v528_v40  ;;  %v534_v5 = vadd.s32 %v528_v40, %v524_v26  ;;  %v550_v51 = vand.u32 65535, %v2560_v14 }
  0x50   : > { %v484_v54 = vshrl.u32 %v483_v36, 5  ;;  %v529_v55 = vshrl.u32 %v525_v33, 16  ;;  %v533_v56 = vsel %vm532_vm6, 1, %v2482_v42  ;;  %v551_v57 = vshrl.u32 %v2560_v14, 16 }
  0x51   : > { %v511_v3 = vadd.s32 %v510_v50, %v500_v37  ;;  %v535_v58 = vadd.s32 %v533_v56, %v527_v7  ;;  %vm536_vm7 = vc.u32 %v534_v5, %v530_v43  ;;  %v579_v8 = vand.u32 65535, %v2569_v19 }
  0x52   : > { %v537_v61 = vsel %vm536_vm7, 1, %v2482_v42  ;;  %v553_v62 = vmul.u32 61681, %v550_v51  ;;  %v554_v63 = vmul.u32 61680, %v550_v51  ;;  %v555_v10 = vmul.u32 61681, %v551_v57 }
  0x53   : > { %v512_v1 = vadd.s32 %v511_v3, %v502_v48  ;;  %v531_v15 = vshrl.u32 %v526_v35, 16  ;;  %v539_v6 = vadd.s32 %v537_v61, %v535_v58  ;;  %v580_v16 = vshrl.u32 %v2569_v19, 16 }
  0x54   : > { %v2660_v17 = vsub.s32 %v2547_v9, %v456_v47  ;;  %v556_v18 = vmul.u32 61680, %v551_v57  ;;  %v557_v20 = vshll.u32 %v554_v63, 16  ;;  %v559_v21 = vshll.u32 %v555_v10, 16 }
  0x55   : > { %v485_v23 = vmul.u32 34, %v484_v54  ;;  %v513_v4 = vshrl.u32 %v512_v1, 5  ;;  %v540_v24 = vadd.s32 %v539_v6, %v529_v55  ;;  %v583_v25 = vmul.u32 61680, %v579_v8 }
  0x56   : > { %vm561_vm8 = vc.u32 %v553_v62, %v557_v20  ;;  %v563_v28 = vadd.s32 %v557_v20, %v553_v62  ;;  %v582_v29 = vmul.u32 61681, %v579_v8  ;;  %v584_v22 = vmul.u32 61681, %v580_v16 }
  0x57   : > { %v541_v30 = vadd.s32 %v540_v24, %v531_v15  ;;  %v558_v31 = vshrl.u32 %v554_v63, 16  ;;  %v562_v33 = vsel %vm561_vm8, 1, %v2482_v42  ;;  %v586_v34 = vshll.u32 %v583_v25, 16 }
  0x58   : > { %v564_v26 = vadd.s32 %v562_v33, %v556_v18  ;;  %vm565_vm9 = vc.u32 %v563_v28, %v559_v21  ;;  %v585_v9 = vmul.u32 61680, %v580_v16  ;;  %v588_v35 = vshll.u32 %v584_v22, 16 }
  0x59   : > { %v2664_v36 = vsub.s32 %v2551_v11, %v485_v23  ;;  %v514_v37 = vmul.u32 34, %v513_v4  ;;  %v560_v39 = vshrl.u32 %v555_v10, 16  ;;  %v566_v40 = vsel %vm565_vm9, 1, %v2482_v42 }
  0x5a   : > { %v568_v41 = vadd.s32 %v566_v40, %v564_v26  ;;  %vm590_vm10 = vc.u32 %v582_v29, %v586_v34  ;;  %v592_v7 = vadd.s32 %v586_v34, %v582_v29  ;;  %v608_v43 = vand.u32 65535, %v2589_v27  ;;  %v2681_v26 = vld [vmem:[%s3852_s2] sm:$0x1] }
  0x5b   : > { %v542_v47 = vshrl.u32 %v541_v30, 5  ;;  %v587_v48 = vshrl.u32 %v583_v25, 16  ;;  %v591_v49 = vsel %vm590_vm10, 1, %v2482_v42  ;;  %v609_v50 = vshrl.u32 %v2589_v27, 16 }
  0x5c   : > { %v569_v5 = vadd.s32 %v568_v41, %v558_v31  ;;  %v593_v51 = vadd.s32 %v591_v49, %v585_v9  ;;  %vm594_vm11 = vc.u32 %v592_v7, %v588_v35  ;;  %v637_v11 = vand.u32 65535, %v2596_v44 }
  0x5d   : > { %v595_v54 = vsel %vm594_vm11, 1, %v2482_v42  ;;  %v611_v55 = vmul.u32 61681, %v608_v43  ;;  %v612_v56 = vmul.u32 61680, %v608_v43  ;;  %v613_v57 = vmul.u32 61681, %v609_v50 }
  0x5e   : > { %v570_v3 = vadd.s32 %v569_v5, %v560_v39  ;;  %v589_v58 = vshrl.u32 %v584_v22, 16  ;;  %v597_v8 = vadd.s32 %v595_v54, %v593_v51  ;;  %v638_v61 = vshrl.u32 %v2596_v44, 16 }
  0x5f   : > { %v2674_v62 = vsub.s32 %v2554_v12, %v514_v37  ;;  %v614_v63 = vmul.u32 61680, %v609_v50  ;;  %v615_v10 = vshll.u32 %v612_v56, 16  ;;  %v617_v1 = vshll.u32 %v613_v57, 16 }
  0x60   : > { %v543_v15 = vmul.u32 34, %v542_v47  ;;  %v571_v6 = vshrl.u32 %v570_v3, 5  ;;  %v598_v16 = vadd.s32 %v597_v8, %v587_v48  ;;  %v641_v18 = vmul.u32 61680, %v637_v11 }
  0x61   : > { %vm619_vm12 = vc.u32 %v611_v55, %v615_v10  ;;  %v621_v20 = vadd.s32 %v615_v10, %v611_v55  ;;  %v640_v21 = vmul.u32 61681, %v637_v11  ;;  %v642_v23 = vmul.u32 61681, %v638_v61 }
  0x62   : > { %v599_v4 = vadd.s32 %v598_v16, %v589_v58  ;;  %v616_v24 = vshrl.u32 %v612_v56, 16  ;;  %v620_v25 = vsel %vm619_vm12, 1, %v2482_v42  ;;  %v644_v28 = vshll.u32 %v641_v18, 16 }
  0x63   : > { %v622_v29 = vadd.s32 %v620_v25, %v614_v63  ;;  %vm623_vm13 = vc.u32 %v621_v20, %v617_v1  ;;  %v643_v12 = vmul.u32 61680, %v638_v61  ;;  %v646_v22 = vshll.u32 %v642_v23, 16 }
  0x64   : > { %v572_v30 = vmul.u32 34, %v571_v6  ;;  %v600_v31 = vshrl.u32 %v599_v4, 5  ;;  %v618_v33 = vshrl.u32 %v613_v57, 16  ;;  %v624_v34 = vsel %vm623_vm13, 1, %v2482_v42 }
  0x65   : > { %v626_v9 = vadd.s32 %v624_v34, %v622_v29  ;;  %vm648_vm14 = vc.u32 %v640_v21, %v644_v28  ;;  %v650_v35 = vadd.s32 %v644_v28, %v640_v21  ;;  %v666_v37 = vand.u32 65535, %v2599_v45 }
  0x66   : > { %v2685_v39 = vsub.s32 %v2557_v13, %v543_v15  ;;  %v645_v40 = vshrl.u32 %v641_v18, 16  ;;  %v649_v41 = vsel %vm648_vm14, 1, %v2482_v42  ;;  %v667_v7 = vshrl.u32 %v2599_v45, 16 }
  0x67   : > { %v601_v43 = vmul.u32 34, %v600_v31  ;;  %v627_v47 = vadd.s32 %v626_v9, %v616_v24  ;;  %v651_v48 = vadd.s32 %v649_v41, %v643_v12  ;;  %vm652_vm15 = vc.u32 %v650_v35, %v646_v22 }
  0x68   : > { %v653_v49 = vsel %vm652_vm15, 1, %v2482_v42  ;;  %v669_v50 = vmul.u32 61681, %v666_v37  ;;  %v670_v5 = vmul.u32 61680, %v666_v37  ;;  %v671_v51 = vmul.u32 61681, %v667_v7 }
  0x69   : > { %v2691_v11 = vsub.s32 %v2560_v14, %v572_v30  ;;  %v628_v54 = vadd.s32 %v627_v47, %v618_v33  ;;  %v647_v13 = vshrl.u32 %v642_v23, 16  ;;  %v655_v55 = vadd.s32 %v653_v49, %v651_v48 }
  0x6a   : > { %v672_v56 = vmul.u32 61680, %v667_v7  ;;  %v673_v57 = vshll.u32 %v670_v5, 16  ;;  %v675_v3 = vshll.u32 %v671_v51, 16  ;;  %vm692_vm0 = vcmp.ne.s32.totalorder %v2603_v52, 0 }
  0x6b   : > { %v2695_v58 = vsub.s32 %v2569_v19, %v601_v43  ;;  %v629_v8 = vshrl.u32 %v628_v54, 5  ;;  %v656_v61 = vadd.s32 %v655_v55, %v645_v40  ;;  %vm693_vm1 = vcmp.ne.s32.totalorder %v2607_v59, 0 }
  0x6c   : > { %v674_v63 = vshrl.u32 %v670_v5, 16  ;;  %v676_v10 = vshrl.u32 %v671_v51, 16  ;;  %vm677_vm2 = vc.u32 %v669_v50, %v673_v57  ;;  %v679_v14 = vadd.s32 %v673_v57, %v669_v50 }
  0x6d   : > { %v630_v1 = vmul.u32 34, %v629_v8  ;;  %v657_v15 = vadd.s32 %v656_v61, %v647_v13  ;;  %v678_v6 = vsel %vm677_vm2, 1, %v2482_v42  ;;  %vm694_vm3 = vcmp.ne.s32.totalorder %v2618_v38, 0 }
  0x6e   : > { %v680_v16 = vadd.s32 %v678_v6, %v672_v56  ;;  %vm681_vm4 = vc.u32 %v679_v14, %v675_v3  ;;  %vm695_vm5 = vcmp.ne.s32.totalorder %v2622_v60, 0  ;;  %vm696_vm6 = vcmp.ne.s32.totalorder %v2632_v32, 0 }
  0x6f   : > { %v658_v19 = vshrl.u32 %v657_v15, 5  ;;  %v682_v18 = vsel %vm681_vm4, 1, %v2482_v42  ;;  %v2706_v20 = vsub.s32 %v2589_v27, %v630_v1  ;;  %vm709_vm13 = vcmp.lt.s32.totalorder %v2603_v52, 0 }
  0x70   : > { %v684_v21 = vadd.s32 %v682_v18, %v680_v16  ;;  %vm710_vm15 = vcmp.lt.s32.totalorder %v2607_v59, 0  ;;  %vm711_vm2 = vcmp.lt.s32.totalorder %v2618_v38, 0  ;;  %vm712_vm4 = vcmp.lt.s32.totalorder %v2622_v60, 0  ;;  %vm2719_vm9 = vmand %vm709_vm13, %vm692_vm0 }
  0x71   : > { %v659_v23 = vmul.u32 34, %v658_v19  ;;  %vm713_vm11 = vcmp.lt.s32.totalorder %v2632_v32, 0  ;;  %vm2731_vm10 = vmand %vm710_vm15, %vm693_vm1  ;;  %vm716_vm8 = vcmp.lt.s32.totalorder %v2650_v46, 0  ;;  %vm718_vm15 = vcmp.lt.s32.totalorder %v2664_v36, 0 }
  0x72   : > { %v685_v42 = vadd.s32 %v684_v21, %v674_v63  ;;  %vm2741_vm12 = vmand %vm711_vm2, %vm694_vm3  ;;  %v743_v30 = vadd.s32 34, %v2603_v52  ;;  %v744_v31 = vadd.s32 34, %v2607_v59  ;;  %v745_v33 = vadd.s32 34, %v2618_v38 }
  0x73   : > { %v2724_v4 = vsub.s32 %v2596_v44, %v659_v23  ;;  %vm2754_vm7 = vmand %vm712_vm4, %vm695_vm5  ;;  %vm3865_vm5 = vcmp.ne.s32.totalorder %v2636_v53, 0  ;;  %vm3866_vm4 = vcmp.lt.s32.totalorder %v2636_v53, 0  ;;  %v746_v34 = vadd.s32 34, %v2622_v60 }
  0x74   : > { %v686_v25 = vadd.s32 %v685_v42, %v676_v10  ;;  %vm2766_vm13 = vmand %vm713_vm11, %vm696_vm6  ;;  %vm3869_vm6 = vcmp.ne.s32.totalorder %v2646_v2, 0  ;;  %vm3870_vm11 = vcmp.lt.s32.totalorder %v2646_v2, 0  ;;  %v747_v37 = vadd.s32 34, %v2632_v32 }
  0x75   : > { %vm2774_vm0 = vmand %vm3866_vm4, %vm3865_vm5  ;;  %v748_v40 = vadd.s32 34, %v2636_v53  ;;  %v749_v41 = vadd.s32 34, %v2646_v2  ;;  %vm3873_vm5 = vcmp.ne.s32.totalorder %v2650_v46, 0  ;;  %v750_v43 = vadd.s32 34, %v2650_v46 }
  0x76   : > { %v687_v29 = vshrl.u32 %v686_v25, 5  ;;  %vm2786_vm14 = vmand %vm3870_vm11, %vm3869_vm6  ;;  %v751_v47 = vadd.s32 34, %v2660_v17  ;;  %v752_v48 = vadd.s32 34, %v2664_v36  ;;  %v753_v49 = vadd.s32 34, %v2674_v62 }
  0x77   : > { %vm2797_vm4 = vmand %vm716_vm8, %vm3873_vm5  ;;  %vm3876_vm6 = vcmp.ne.s32.totalorder %v2660_v17, 0  ;;  %vm3877_vm11 = vcmp.lt.s32.totalorder %v2660_v17, 0  ;;  %v754_v51 = vadd.s32 34, %v2685_v39  ;;  %v755_v54 = vadd.s32 34, %v2691_v11 }
  0x78   : > { %v688_v9 = vmul.u32 34, %v687_v29  ;;  %vm2810_vm3 = vmand %vm3877_vm11, %vm3876_vm6  ;;  %v756_v13 = vadd.s32 34, %v2695_v58  ;;  %vm3880_vm8 = vcmp.ne.s32.totalorder %v2664_v36, 0  ;;  %v757_v55 = vadd.s32 34, %v2706_v20 }
  0x79   : > { %vm2821_vm5 = vmand %vm718_vm15, %vm3880_vm8  ;;  %v758_v56 = vadd.s32 34, %v2724_v4  ;;  %v760_v57 = vsel %vm2719_vm9, %v743_v30, %v2603_v52  ;;  %v761_v3 = vsel %vm2731_vm10, %v744_v31, %v2607_v59  ;;  %vm3883_vm1 = vcmp.ne.s32.totalorder %v2674_v62, 0 }
  0x7a   : > { %v689_v50 = vsub.s32 %v2599_v45, %v688_v9  ;;  %vm3884_vm15 = vcmp.lt.s32.totalorder %v2674_v62, 0  ;;  %v762_v63 = vsel %vm2741_vm12, %v745_v33, %v2618_v38  ;;  %vm3887_vm9 = vcmp.ne.s32.totalorder %v2685_v39, 0 }
  0x7b   : > { %vm2837_vm8 = vmand %vm3884_vm15, %vm3883_vm1  ;;  %vm3888_vm2 = vcmp.lt.s32.totalorder %v2685_v39, 0  ;;  %v763_v59 = vsel %vm2754_vm7, %v746_v34, %v2622_v60  ;;  %v764_v10 = vsel %vm2766_vm13, %v747_v37, %v2632_v32  ;;  %v765_v38 = vsel %vm2774_vm0, %v748_v40, %v2636_v53 }
  0x7c   : > { %vm708_vm6 = vcmp.ne.s32.totalorder %v689_v50, 0  ;;  %vm725_vm11 = vcmp.lt.s32.totalorder %v689_v50, 0  ;;  %v759_v61 = vadd.s32 34, %v689_v50  ;;  %vm2848_vm10 = vmand %vm3888_vm2, %vm3887_vm9  ;;  %v766_v14 = vsel %vm2786_vm14, %v749_v41, %v2646_v2 }
  0x7d   : > { %vm3891_vm12 = vcmp.ne.s32.totalorder %v2691_v11, 0  ;;  %vm3892_vm1 = vcmp.lt.s32.totalorder %v2691_v11, 0  ;;  %v767_v60 = vsel %vm2797_vm4, %v750_v43, %v2650_v46  ;;  %v768_v32 = vsel %vm2810_vm3, %v751_v47, %v2660_v17 }
  0x7e   : > { %vm2868_vm2 = vmand %vm3892_vm1, %vm3891_vm12  ;;  %v769_v53 = vsel %vm2821_vm5, %v752_v48, %v2664_v36  ;;  %v770_v2 = vsel %vm2837_vm8, %v753_v49, %v2674_v62  ;;  %vm3895_vm7 = vcmp.ne.s32.totalorder %v2695_v58, 0  ;;  %vm3896_vm14 = vcmp.lt.s32.totalorder %v2695_v58, 0 }
  0x7f   : > { %vm2888_vm0 = vmand %vm3896_vm14, %vm3895_vm7  ;;  %v771_v46 = vsel %vm2848_vm10, %v754_v51, %v2685_v39  ;;  %v772_v17 = vsel %vm2868_vm2, %v755_v54, %v2691_v11  ;;  %vm2898_vm13 = vcmp.lt.s32.totalorder %v760_v57, 32  ;;  %vm2902_vm3 = vcmp.lt.s32.totalorder %v761_v3, 32 }
  0x80   : > { %vm3903_vm4 = vcmp.ne.s32.totalorder %v2706_v20, 0  ;;  %vm3904_vm5 = vcmp.lt.s32.totalorder %v2706_v20, 0  ;;  %v773_v39 = vsel %vm2888_vm0, %v756_v13, %v2695_v58  ;;  %vm2917_vm8 = vcmp.lt.s32.totalorder %v762_v63, 32 }
  0x81   : > { %vm2910_vm15 = vmand %vm3904_vm5, %vm3903_vm4  ;;  %vm2921_vm9 = vcmp.lt.s32.totalorder %v763_v59, 32  ;;  %vm2925_vm10 = vcmp.lt.s32.totalorder %v764_v10, 32  ;;  %vm3913_vm12 = vcmp.ne.s32.totalorder %v2724_v4, 0  ;;  %vm3914_vm1 = vcmp.lt.s32.totalorder %v2724_v4, 0 }
  0x82   : > { %vm741_vm2 = vmand %vm3914_vm1, %vm3913_vm12  ;;  %v774_v58 = vsel %vm2910_vm15, %v757_v55, %v2706_v20  ;;  %vm2936_vm7 = vcmp.lt.s32.totalorder %v765_v38, 32  ;;  %vm2940_vm14 = vcmp.lt.s32.totalorder %v766_v14, 32  ;;  %vm2944_vm0 = vcmp.lt.s32.totalorder %v767_v60, 32 }
  0x83   : > { %v3919_v23 = vmov 0  ;;  %vm742_vm4 = vmand %vm725_vm11, %vm708_vm6  ;;  %v775_v42 = vsel %vm741_vm2, %v758_v56, %v2724_v4  ;;  %vm2951_vm5 = vcmp.lt.s32.totalorder %v768_v32, 32  ;;  %vm2955_vm15 = vcmp.lt.s32.totalorder %v769_v53, 32 }
  0x84   : > { %v3920_v23 = vsel %vm2944_vm0, 4294967295, %v3919_v23  ;;  %v3923_v20 = vmov 0  ;;  %vm2959_vm12 = vcmp.lt.s32.totalorder %v770_v2, 32  ;;  %v776_v25 = vsel %vm742_vm4, %v759_v61, %v689_v50 }
  0x85   : > { %v3924_v20 = vsel %vm2955_vm15, 4294967295, %v3923_v20  ;;  %vm2963_vm1 = vcmp.lt.s32.totalorder %v771_v46, 32  ;;  %v3927_v44 = vmov 0  ;;  %vm2967_vm6 = vcmp.lt.s32.totalorder %v772_v17, 32 }
  0x86   : > { %v3928_v44 = vsel %vm2963_vm1, 4294967295, %v3927_v44  ;;  %vm2971_vm11 = vcmp.lt.s32.totalorder %v773_v39, 32  ;;  %vm2975_vm2 = vcmp.lt.s32.totalorder %v774_v58, 32  ;;  %vm2979_vm15 = vcmp.lt.s32.totalorder %v775_v42, 32 }
  0x87   : > { %vm2983_vm4 = vcmp.lt.s32.totalorder %v776_v25, 32  ;;  %v3937_v22 = vmov 0  ;;  %v796_v30 = vand.u32 127, %v181_v0  ;;  %v2483_v31 = vmov 1.0  }
  0x88   : > { %v3938_v22 = vsel %vm2983_vm4, 4294967295, %v3937_v22 }
  0x89   : > { %3939 = vst [vmem:[#allocation2_spill] sm:$0xff] %v3938_v22  ;;  %vm797_vm1 = vcmp.lt.s32.totalorder %v796_v30, 124 }
  0x8a   : > { %v2988_v33 = vsel %vm797_vm1, 0.2, %v2483_v31 }
  0x8b LB: >> { %v2146_v34 = vld [vmem:[%s3851_s1 + $0xf8] sm:$0xff]  ;;  %v2145_v9 = vld [vmem:[%s3851_s1 + $0xf0] sm:$0xff]  ;;  %v2144_v0 = vld [vmem:[%s3851_s1 + $0xe8] sm:$0xff]  ;;  %s2031_s27 = smul.u32 136, %s2479_s23  ;;  %vm3940_vm0 = vnez %v3920_v23  ;;  %s804_s23 = sadd.s32 1, %s2479_s23   ;;  %s2479_s23 = sphi %s2990_s23, %s804_s23  }
  0x8c   : >> { %2397 = vmatpush.msra.mxu1 %v2146_v34  ;;  %2398 = vmatpush.msra.mxu2 %v2146_v34  ;;  %v2143_v35 = vld [vmem:[%s3851_s1 + $0xe0] sm:$0xff]  ;;  %v2142_v37 = vld [vmem:[%s3851_s1 + $0xd8] sm:$0xff]  ;;  %v2141_v40 = vld [vmem:[%s3851_s1 + $0xd0] sm:$0xff]  ;;  %p801_p4 = scmp.ge.s32.totalorder %s804_s23, 8  }
  0x8d   : >> { %877 = vmatpush.msra.mxu0 %v2146_v34  ;;  %2399 = vmatpush.msra.mxu3 %v2146_v34  ;;  %v2140_v41 = vld [vmem:[%s3851_s1 + $0xc8] sm:$0xff]  ;;  %v2139_v7 = vld [vmem:[%s3851_s1 + $0xc0] sm:$0xff]  ;;  %v2138_v43 = vld [vmem:[%s3851_s1 + $0xb8] sm:$0xff]  ;;  %s3044_s5 = scalar_lea.vmem %s2530_s17, %s2031_s27  ;;  %s3736_s13 = scalar_lea.vmem %s2535_s20, %s2031_s27 }
  0x8e   : >> { %2400 = vmatpush.msra.mxu1 %v2145_v9  ;;  %2401 = vmatpush.msra.mxu2 %v2145_v9  ;;  %v2137_v47 = vld [vmem:[%s3851_s1 + $0xb0] sm:$0xff]  ;;  %v2136_v48 = vld [vmem:[%s3851_s1 + $0xa8] sm:$0xff]  ;;  %v2135_v49 = vld [vmem:[%s3851_s1 + $0xa0] sm:$0xff] }
  0x8f   : >> { %878 = vmatpush.msra.mxu0 %v2145_v9  ;;  %2402 = vmatpush.msra.mxu3 %v2145_v9  ;;  %v2134_v50 = vld [vmem:[%s3851_s1 + $0x98] sm:$0xff]  ;;  %v2133_v5 = vld [vmem:[%s3851_s1 + $0x90] sm:$0xff]  ;;  %v2132_v51 = vld [vmem:[%s3851_s1 + $0x88] sm:$0xff] }
  0x90   : >> { %2403 = vmatpush.msra.mxu1 %v2144_v0  ;;  %2404 = vmatpush.msra.mxu2 %v2144_v0  ;;  %v2131_v54 = vld [vmem:[%s3851_s1 + $0x80] sm:$0xff]  ;;  %v2119_v13 = vld [vmem:[%s3044_s5 + $0x2e] sm:$0xff]  ;;  %v2124_v45 = vld [vmem:[%s3044_s5 + $0x56] sm:$0xff] }
  0x91   : >> { %879 = vmatpush.msra.mxu0 %v2144_v0  ;;  %2405 = vmatpush.msra.mxu3 %v2144_v0  ;;  %v840_v55 = vld [vmem:[%s3851_s1 + $0x78] sm:$0xff]  ;;  %v839_v57 = vld [vmem:[%s3851_s1 + $0x70] sm:$0xff]  ;;  %v2114_v3 = vld [vmem:[%s3044_s5 + $0x6] sm:$0xff] }
  0x92   : >> { %2406 = vmatpush.msra.mxu1 %v2143_v35  ;;  %2407 = vmatpush.msra.mxu2 %v2143_v35  ;;  %v2179_v56 = vld [vmem:[%s3851_s1 + $0x178] sm:$0xff]  ;;  %v2178_v8 = vld [vmem:[%s3851_s1 + $0x170] sm:$0xff]  ;;  %v838_v63 = vld [vmem:[%s3851_s1 + $0x68] sm:$0xff] }
  0x93   : >> { %880 = vmatpush.msra.mxu0 %v2143_v35  ;;  %2408 = vmatpush.msra.mxu3 %v2143_v35  ;;  %v2245_v61 = vld [vmem:[%s3851_s1 + $0x278] sm:$0xff]  ;;  %v2177_v59 = vld [vmem:[%s3851_s1 + $0x168] sm:$0xff]  ;;  %v2244_v10 = vld [vmem:[%s3851_s1 + $0x270] sm:$0xff] }
  0x94   : >> { %2409 = vmatpush.msra.mxu1 %v2142_v37  ;;  %2410 = vmatpush.msra.mxu2 %v2142_v37  ;;  %v2212_v52 = vld [vmem:[%s3851_s1 + $0x1f8] sm:$0xff]  ;;  %v837_v38 = vld [vmem:[%s3851_s1 + $0x60] sm:$0xff]  ;;  %v2211_v14 = vld [vmem:[%s3851_s1 + $0x1f0] sm:$0xff] }
  0x95   : >> { %881 = vmatpush.msra.mxu0 %v2142_v37  ;;  %2411 = vmatpush.msra.mxu3 %v2142_v37  ;;  %v2120_v1 = vld [vmem:[%s3044_s5 + $0x36] sm:$0xff]  ;;  %v2176_v60 = vld [vmem:[%s3851_s1 + $0x160] sm:$0xff]  ;;  %v2210_v53 = vld [vmem:[%s3851_s1 + $0x1e8] sm:$0xff] }
  0x96   : >> { %2412 = vmatpush.msra.mxu1 %v2141_v40  ;;  %2413 = vmatpush.msra.mxu2 %v2141_v40  ;;  %v836_v32 = vld [vmem:[%s3851_s1 + $0x58] sm:$0xff]  ;;  %v2243_v2 = vld [vmem:[%s3851_s1 + $0x268] sm:$0xff]  ;;  %v835_v17 = vld [vmem:[%s3851_s1 + $0x50] sm:$0xff] }
  0x97   : >> { %882 = vmatpush.msra.mxu0 %v2141_v40  ;;  %2414 = vmatpush.msra.mxu3 %v2141_v40  ;;  %v2125_v15 = vld [vmem:[%s3044_s5 + $0x5e] sm:$0xff]  ;;  %v2115_v39 = vld [vmem:[%s3044_s5 + $0xe] sm:$0xff]  ;;  %v2128_v58 = vld [vmem:[%s3044_s5 + $0x76] sm:$0xff] }
  0x98   : >> { %2415 = vmatpush.msra.mxu1 %v2140_v41  ;;  %2416 = vmatpush.msra.mxu2 %v2140_v41  ;;  %v2175_v46 = vld [vmem:[%s3851_s1 + $0x158] sm:$0xff]  ;;  %v2209_v6 = vld [vmem:[%s3851_s1 + $0x1e0] sm:$0xff]  ;;  %v2174_v42 = vld [vmem:[%s3851_s1 + $0x150] sm:$0xff] }
  0x99   : >> { %883 = vmatpush.msra.mxu0 %v2140_v41  ;;  %2417 = vmatpush.msra.mxu3 %v2140_v41  ;;  %v2242_v25 = vld [vmem:[%s3851_s1 + $0x260] sm:$0xff]  ;;  %v834_v30 = vld [vmem:[%s3851_s1 + $0x48] sm:$0xff]  ;;  %v2208_v31 = vld [vmem:[%s3851_s1 + $0x1d8] sm:$0xff] }
  0x9a   : >> { %2418 = vmatpush.msra.mxu1 %v2139_v7  ;;  %2419 = vmatpush.msra.mxu2 %v2139_v7  ;;  %v2173_v34 = vld [vmem:[%s3851_s1 + $0x148] sm:$0xff]  ;;  %v2121_v9 = vld [vmem:[%s3044_s5 + $0x3e] sm:$0xff]  ;;  %v2207_v35 = vld [vmem:[%s3851_s1 + $0x1d0] sm:$0xff] }
  0x9b   : >> { %884 = vmatpush.msra.mxu0 %v2139_v7  ;;  %2420 = vmatpush.msra.mxu3 %v2139_v7  ;;  %v2241_v0 = vld [vmem:[%s3851_s1 + $0x258] sm:$0xff]  ;;  %v833_v37 = vld [vmem:[%s3851_s1 + $0x40] sm:$0xff]  ;;  %v2240_v41 = vld [vmem:[%s3851_s1 + $0x250] sm:$0xff] }
  0x9c   : >> { %2421 = vmatpush.msra.mxu1 %v2138_v43  ;;  %2422 = vmatpush.msra.mxu2 %v2138_v43  ;;  %v2172_v40 = vld [vmem:[%s3851_s1 + $0x140] sm:$0xff]  ;;  %v2206_v7 = vld [vmem:[%s3851_s1 + $0x1c8] sm:$0xff] }
  0x9d   : >> { %885 = vmatpush.msra.mxu0 %v2138_v43  ;;  %2423 = vmatpush.msra.mxu3 %v2138_v43  ;;  %v2126_v43 = vld [vmem:[%s3044_s5 + $0x66] sm:$0xff] }
  0x9e   : >> { %2424 = vmatpush.msra.mxu1 %v2137_v47  ;;  %2425 = vmatpush.msra.mxu2 %v2137_v47 }
  0x9f   : >> { %886 = vmatpush.msra.mxu0 %v2137_v47  ;;  %2426 = vmatpush.msra.mxu3 %v2137_v47  ;;  %v832_v47 = vld [vmem:[%s3851_s1 + $0x38] sm:$0xff] }
  0xa0   : >> { %2427 = vmatpush.msra.mxu1 %v2136_v48  ;;  %2428 = vmatpush.msra.mxu2 %v2136_v48 }
  0xa1   : >> { %887 = vmatpush.msra.mxu0 %v2136_v48  ;;  %2429 = vmatpush.msra.mxu3 %v2136_v48  ;;  %v2171_v48 = vld [vmem:[%s3851_s1 + $0x138] sm:$0xff] }
  0xa2   : >> { %2430 = vmatpush.msra.mxu1 %v2135_v49  ;;  %2431 = vmatpush.msra.mxu2 %v2135_v49 }
  0xa3   : >> { %888 = vmatpush.msra.mxu0 %v2135_v49  ;;  %2432 = vmatpush.msra.mxu3 %v2135_v49  ;;  %v2205_v49 = vld [vmem:[%s3851_s1 + $0x1c0] sm:$0xff] }
  0xa4   : >> { %2433 = vmatpush.msra.mxu1 %v2134_v50  ;;  %2434 = vmatpush.msra.mxu2 %v2134_v50 }
  0xa5   : >> { %889 = vmatpush.msra.mxu0 %v2134_v50  ;;  %2435 = vmatpush.msra.mxu3 %v2134_v50  ;;  %v2239_v50 = vld [vmem:[%s3851_s1 + $0x248] sm:$0xff] }
  0xa6   : >> { %2436 = vmatpush.msra.mxu1 %v2133_v5  ;;  %2437 = vmatpush.msra.mxu2 %v2133_v5 }
  0xa7   : >> { %890 = vmatpush.msra.mxu0 %v2133_v5  ;;  %2438 = vmatpush.msra.mxu3 %v2133_v5  ;;  %v2116_v5 = vld [vmem:[%s3044_s5 + $0x16] sm:$0xff] }
  0xa8   : >> { %2439 = vmatpush.msra.mxu1 %v2132_v51  ;;  %2440 = vmatpush.msra.mxu2 %v2132_v51 }
  0xa9   : >> { %891 = vmatpush.msra.mxu0 %v2132_v51  ;;  %2441 = vmatpush.msra.mxu3 %v2132_v51  ;;  %v2129_v51 = vld [vmem:[%s3044_s5 + $0x7e] sm:$0xff] }
  0xaa   : >> { %2442 = vmatpush.msra.mxu1 %v2131_v54  ;;  %2443 = vmatpush.msra.mxu2 %v2131_v54 }
  0xab   : >> { %908 = vmatmul.f32.vlgmr.msra.gmra.mxu1 %v2119_v13  ;;  %923 = vmatmul.f32.vlgmr.msra.gmra.mxu2 %v2124_v45  ;;  %v831_v13 = vld [vmem:[%s3851_s1 + $0x30] sm:$0xff]  ;;  %v2204_v45 = vld [vmem:[%s3851_s1 + $0x1b8] sm:$0xff] }
  0xac   : >> { %945 = vmatpush.msrb.mxu1 %v840_v55  ;;  %1049 = vmatpush.msrb.mxu2 %v2179_v56  ;;  %v2122_v55 = vld [vmem:[%s3044_s5 + $0x46] sm:$0xff] }
  0xad   : >> { %892 = vmatpush.msra.mxu0 %v2131_v54  ;;  %2444 = vmatpush.msra.mxu3 %v2131_v54  ;;  %v2170_v54 = vld [vmem:[%s3851_s1 + $0x130] sm:$0xff]  ;;  %v2169_v56 = vld [vmem:[%s3851_s1 + $0x128] sm:$0xff] }
  0xae   : >> { %946 = vmatpush.msrb.mxu1 %v839_v57  ;;  %893 = vmatmul.f32.vlgmr.msra.gmra.mxu0 %v2114_v3  ;;  %v2238_v57 = vld [vmem:[%s3851_s1 + $0x240] sm:$0xff]  ;;  %v830_v3 = vld [vmem:[%s3851_s1 + $0x28] sm:$0xff] }
  0xaf   : >> { %1050 = vmatpush.msrb.mxu2 %v2178_v8  ;;  %1291 = vmatpush.msrb.mxu0 %v2245_v61  ;;  %v2203_v8 = vld [vmem:[%s3851_s1 + $0x1b0] sm:$0xff]  ;;  %v2168_v61 = vld [vmem:[%s3851_s1 + $0x120] sm:$0xff] }
  0xb0   : >> { %947 = vmatpush.msrb.mxu1 %v838_v63  ;;  %1170 = vmatpush.msrb.mxu3 %v2212_v52  ;;  %v2237_v63 = vld [vmem:[%s3851_s1 + $0x238] sm:$0xff]  ;;  %v2202_v52 = vld [vmem:[%s3851_s1 + $0x1a8] sm:$0xff] }
  0xb1   : >> { %1051 = vmatpush.msrb.mxu2 %v2177_v59  ;;  %1292 = vmatpush.msrb.mxu0 %v2244_v10  ;;  %v2127_v59 = vld [vmem:[%s3044_s5 + $0x6e] sm:$0xff]  ;;  %v829_v10 = vld [vmem:[%s3851_s1 + $0x20] sm:$0xff] }
  0xb2   : >> { %948 = vmatpush.msrb.mxu1 %v837_v38  ;;  %1171 = vmatpush.msrb.mxu3 %v2211_v14  ;;  %v2167_v38 = vld [vmem:[%s3851_s1 + $0x118] sm:$0xff]  ;;  %v2201_v14 = vld [vmem:[%s3851_s1 + $0x1a0] sm:$0xff] }
  0xb3   : >> { %911 = vmatmul.f32.gmra.mxu1 %v2120_v1  ;;  %1052 = vmatpush.msrb.mxu2 %v2176_v60  ;;  %v2236_v1 = vld [vmem:[%s3851_s1 + $0x230] sm:$0xff]  ;;  %v2117_v60 = vld [vmem:[%s3044_s5 + $0x1e] sm:$0xff] }
  0xb4   : >> { %949 = vmatpush.msrb.mxu1 %v836_v32  ;;  %1172 = vmatpush.msrb.mxu3 %v2210_v53  ;;  %v2130_v32 = vld [vmem:[%s3044_s5 + $0x86] sm:$0xff]  ;;  %v828_v53 = vld [vmem:[%s3851_s1 + $0x18] sm:$0xff] }
  0xb5   : >> { %1293 = vmatpush.msrb.mxu0 %v2243_v2  ;;  %926 = vmatmul.f32.gmra.mxu2 %v2125_v15  ;;  %v2166_v2 = vld [vmem:[%s3851_s1 + $0x110] sm:$0xff]  ;;  %v2200_v15 = vld [vmem:[%s3851_s1 + $0x198] sm:$0xff] }
  0xb6   : >> { %1053 = vmatpush.msrb.mxu2 %v2175_v46  ;;  %950 = vmatpush.msrb.mxu1 %v835_v17  ;;  %v2235_v46 = vld [vmem:[%s3851_s1 + $0x228] sm:$0xff] }
  0xb7   : >> { %1173 = vmatpush.msrb.mxu3 %v2209_v6  ;;  %896 = vmatmul.f32.gmra.mxu0 %v2115_v39  ;;  %v2123_v17 = vld [vmem:[%s3044_s5 + $0x4e] sm:$0xff] }
  0xb8   : >> { %935 = vmatmul.f32.vlgmr.msra.gmra.mxu3 %v2128_v58  ;;  %1054 = vmatpush.msrb.mxu2 %v2174_v42  ;;  %v2165_v6 = vld [vmem:[%s3851_s1 + $0x108] sm:$0xff]  ;;  %v827_v39 = vld [vmem:[%s3851_s1 + $0x10] sm:$0xff]  ;;  %v2164_v42 = vld [vmem:[%s3851_s1 + $0x100] sm:$0xff] }
  0xb9   : >> { %1294 = vmatpush.msrb.mxu0 %v2242_v25  ;;  %951 = vmatpush.msrb.mxu1 %v834_v30  ;;  %v2199_v58 = vld [vmem:[%s3851_s1 + $0x190] sm:$0xff]  ;;  %v2234_v25 = vld [vmem:[%s3851_s1 + $0x220] sm:$0xff]  ;;  %v826_v30 = vld [vmem:[%s3851_s1 + $0x8] sm:$0xff] }
  0xba   : >> { %1174 = vmatpush.msrb.mxu3 %v2208_v31  ;;  %1055 = vmatpush.msrb.mxu2 %v2173_v34  ;;  %v2198_v31 = vld [vmem:[%s3851_s1 + $0x188] sm:$0xff] }
  0xbb   : >> { %914 = vmatmul.f32.gmra.mxu1 %v2121_v9  ;;  %1295 = vmatpush.msrb.mxu0 %v2241_v0  ;;  %v2147_v34 = vld [vmem:[%s3044_s5 + $0x7] sm:$0xff]  ;;  %v2233_v9 = vld [vmem:[%s3851_s1 + $0x218] sm:$0xff] }
  0xbc   : >> { %1175 = vmatpush.msrb.mxu3 %v2207_v35  ;;  %952 = vmatpush.msrb.mxu1 %v833_v37  ;;  %v2311_v0 = vld [vmem:[%s3851_s1 + $0x378] sm:$0xff]  ;;  %v2197_v35 = vld [vmem:[%s3851_s1 + $0x180] sm:$0xff] }
  0xbd   : >> { %1056 = vmatpush.msrb.mxu2 %v2172_v40  ;;  %1296 = vmatpush.msrb.mxu0 %v2240_v41  ;;  %v2118_v37 = vld [vmem:[%s3044_s5 + $0x26] sm:$0xff] }
  0xbe   : >> { %1176 = vmatpush.msrb.mxu3 %v2206_v7  ;;  %929 = vmatmul.f32.gmra.mxu2 %v2126_v43  ;;  %v825_v40 = vld [vmem:[%s3851_s1] sm:$0xff]  ;;  %v2232_v7 = vld [vmem:[%s3851_s1 + $0x210] sm:$0xff]  ;;  %v2344_v43 = vld [vmem:[%s3851_s1 + $0x3f8] sm:$0xff] }
  0xbf   : >> { %953 = vmatpush.msrb.mxu1 %v832_v47  ;;  %1057 = vmatpush.msrb.mxu2 %v2171_v48  ;;  %v3254_v41 = vld [vmem:[%s3044_s5 + $0x27] sm:$0xff]  ;;  %v2278_v48 = vld [vmem:[%s3851_s1 + $0x2f8] sm:$0xff] }
  0xc0   : >> { %1177 = vmatpush.msrb.mxu3 %v2205_v49  ;;  %1297 = vmatpush.msrb.mxu0 %v2239_v50  ;;  %v2097_v47 = vld [vmem:[%s3044_s5 + $0x5] sm:$0xff]  ;;  %v2310_v50 = vld [vmem:[%s3851_s1 + $0x370] sm:$0xff] }
  0xc1   : >> { %899 = vmatmul.f32.gmra.mxu0 %v2116_v5  ;;  %938 = vmatmul.f32.gmra.mxu3 %v2129_v51  ;;  %v2231_v49 = vld [vmem:[%s3851_s1 + $0x208] sm:$0xff]  ;;  %v2343_v5 = vld [vmem:[%s3851_s1 + $0x3f0] sm:$0xff]  ;;  %v2230_v51 = vld [vmem:[%s3851_s1 + $0x200] sm:$0xff] }
  0xc2   : >> { %1058 = vmatpush.msrb.mxu2 %v2170_v54  ;;  %954 = vmatpush.msrb.mxu1 %v831_v13  ;;  %v2277_v54 = vld [vmem:[%s3851_s1 + $0x2f0] sm:$0xff] }
  0xc3   : >> { %1178 = vmatpush.msrb.mxu3 %v2204_v45  ;;  %917 = vmatmul.f32.gmra.mxu1 %v2122_v55  ;;  %v2148_v13 = vld [vmem:[%s3044_s5 + $0xf] sm:$0xff]  ;;  %v2377_v45 = vld [vmem:[%s3851_s1 + $0x478] sm:$0xff] }
  0xc4   : >> { %1059 = vmatpush.msrb.mxu2 %v2169_v56  ;;  %1298 = vmatpush.msrb.mxu0 %v2238_v57  ;;  %v2309_v55 = vld [vmem:[%s3851_s1 + $0x368] sm:$0xff] }
  0xc5   : >> { %955 = vmatpush.msrb.mxu1 %v830_v3  ;;  %1179 = vmatpush.msrb.mxu3 %v2203_v8  ;;  %v2342_v56 = vld [vmem:[%s3851_s1 + $0x3e8] sm:$0xff] }
  0xc6   : >> { %1060 = vmatpush.msrb.mxu2 %v2168_v61  ;;  %1299 = vmatpush.msrb.mxu0 %v2237_v63  ;;  %v2213_v57 = vld [vmem:[%s3044_s5 + $0x28] sm:$0xff]  ;;  %v2376_v61 = vld [vmem:[%s3851_s1 + $0x470] sm:$0xff] }
  0xc7   : >> { %1180 = vmatpush.msrb.mxu3 %v2202_v52  ;;  %932 = vmatmul.f32.gmra.mxu2 %v2127_v59  ;;  %v2276_v3 = vld [vmem:[%s3851_s1 + $0x2e8] sm:$0xff]  ;;  %v2308_v52 = vld [vmem:[%s3851_s1 + $0x360] sm:$0xff] }
  0xc8   : >> { %956 = vmatpush.msrb.mxu1 %v829_v10  ;;  %1061 = vmatpush.msrb.mxu2 %v2167_v38  ;;  %v3297_v8 = vld [vmem:[%s3044_s5 + $0x2f] sm:$0xff]  ;;  %v2341_v10 = vld [vmem:[%s3851_s1 + $0x3e0] sm:$0xff] }
  0xc9   : >> { %1181 = vmatpush.msrb.mxu3 %v2201_v14  ;;  %1300 = vmatpush.msrb.mxu0 %v2236_v1  ;;  %v2098_v63 = vld [vmem:[%s3044_s5 + $0xd] sm:$0xff]  ;;  %v2275_v38 = vld [vmem:[%s3851_s1 + $0x2e0] sm:$0xff]  ;;  %v2307_v14 = vld [vmem:[%s3851_s1 + $0x358] sm:$0xff] }
  0xca   : >> { %902 = vmatmul.f32.gmra.mxu0 %v2117_v60  ;;  %941 = vmatmul.f32.gmra.mxu3 %v2130_v32  ;;  %v2375_v59 = vld [vmem:[%s3851_s1 + $0x468] sm:$0xff]  ;;  %v2340_v1 = vld [vmem:[%s3851_s1 + $0x3d8] sm:$0xff]  ;;  %v2374_v60 = vld [vmem:[%s3851_s1 + $0x460] sm:$0xff] }
  0xcb   : >> { %957 = vmatpush.msrb.mxu1 %v828_v53  ;;  %1062 = vmatpush.msrb.mxu2 %v2166_v2  ;;  %v2149_v32 = vld [vmem:[%s3044_s5 + $0x17] sm:$0xff] }
  0xcc   : >> { %1182 = vmatpush.msrb.mxu3 %v2200_v15  ;;  %1301 = vmatpush.msrb.mxu0 %v2235_v46  ;;  %v2274_v53 = vld [vmem:[%s3851_s1 + $0x2d8] sm:$0xff]  ;;  %v2306_v2 = vld [vmem:[%s3851_s1 + $0x350] sm:$0xff] }
  0xcd   : >> { %920 = vmatmul.f32.gmra.mxu1 %v2123_v17  ;;  %1063 = vmatpush.msrb.mxu2 %v2165_v6  ;;  %v2373_v15 = vld [vmem:[%s3851_s1 + $0x458] sm:$0xff]  ;;  %v2214_v46 = vld [vmem:[%s3044_s5 + $0x30] sm:$0xff] }
  0xce   : >> { %958 = vmatpush.msrb.mxu1 %v827_v39  ;;  %1183 = vmatpush.msrb.mxu3 %v2199_v58  ;;  %v2339_v17 = vld [vmem:[%s3851_s1 + $0x3d0] sm:$0xff] }
  0xcf   : >> { %1064 = vmatpush.msrb.mxu2 %v2164_v42  ;;  %1302 = vmatpush.msrb.mxu0 %v2234_v25  ;;  %v3340_v6 = vld [vmem:[%s3044_s5 + $0x37] sm:$0xff]  ;;  %v2305_v42 = vld [vmem:[%s3851_s1 + $0x348] sm:$0xff] }
  0xd0   : >> { %959 = vmatpush.msrb.mxu1 %v826_v30  ;;  %1184 = vmatpush.msrb.mxu3 %v2198_v31  ;;  %v2273_v39 = vld [vmem:[%s3851_s1 + $0x2d0] sm:$0xff]  ;;  %v2338_v25 = vld [vmem:[%s3851_s1 + $0x3c8] sm:$0xff] }
  0xd1   : >> { %1065 = vmatmul.f32.vlgmr.msrb.gmra.mxu2 %v2147_v34  ;;  %1303 = vmatpush.msrb.mxu0 %v2233_v9  ;;  %v2099_v58 = vld [vmem:[%s3044_s5 + $0x15] sm:$0xff]  ;;  %v2272_v31 = vld [vmem:[%s3851_s1 + $0x2c8] sm:$0xff]  ;;  %v2150_v34 = vld [vmem:[%s3044_s5 + $0x1f] sm:$0xff] }
  0xd2   : >> { %1533 = vmatpush.msra.mxu2 %v2311_v0  ;;  %1185 = vmatpush.msrb.mxu3 %v2197_v35  ;;  %v2372_v30 = vld [vmem:[%s3851_s1 + $0x450] sm:$0xff]  ;;  %v2215_v9 = vld [vmem:[%s3044_s5 + $0x38] sm:$0xff] }
  0xd3   : >> { %905 = vmatmul.f32.gmra.mxu0 %v2118_v37  ;;  %960 = vmatpush.msrb.mxu1 %v825_v40  ;;  %v2183_v0 = vld [vmem:[%s3044_s5 + $0x3f] sm:$0xff]  ;;  %v2371_v40 = vld [vmem:[%s3851_s1 + $0x448] sm:$0xff] }
  0xd4   : >> { %1186 = vmatmul.f32.vlgmr.msrb.gmra.mxu3 %v3254_v41  ;;  %1304 = vmatpush.msrb.mxu0 %v2232_v7  ;;  %v2100_v35 = vld [vmem:[%s3044_s5 + $0x1d] sm:$0xff] }
  0xd5   : >> { %1654 = vmatpush.msra.mxu3 %v2344_v43  ;;  %961 = vmatmul.f32.vlgmr.msrb.gmra.mxu1 %v2097_v47  ;;  %v2304_v37 = vld [vmem:[%s3851_s1 + $0x340] sm:$0xff] }
  0xd6   : >> { %1412 = vmatpush.msra.mxu1 %v2278_v48  ;;  %1305 = vmatpush.msrb.mxu0 %v2231_v49  ;;  %v2337_v7 = vld [vmem:[%s3851_s1 + $0x3c0] sm:$0xff] }
  0xd7   : >> { %1534 = vmatpush.msra.mxu2 %v2310_v50  ;;  %1655 = vmatpush.msra.mxu3 %v2343_v5  ;;  %v2216_v43 = vld [vmem:[%s3044_s5 + $0x40] sm:$0xff]  ;;  %v2303_v50 = vld [vmem:[%s3851_s1 + $0x338] sm:$0xff] }
  0xd8   : >> { %1306 = vmatpush.msrb.mxu0 %v2230_v51  ;;  %1413 = vmatpush.msra.mxu1 %v2277_v54  ;;  %v2184_v47 = vld [vmem:[%s3044_s5 + $0x47] sm:$0xff]  ;;  %v2185_v54 = vld [vmem:[%s3044_s5 + $0x4f] sm:$0xff] }
  0xd9   : >> { %1068 = vmatmul.f32.gmra.mxu2 %v2148_v13  ;;  %1656 = vmatpush.msra.mxu3 %v2342_v56  ;;  %v2271_v48 = vld [vmem:[%s3851_s1 + $0x2c0] sm:$0xff]  ;;  %v2217_v51 = vld [vmem:[%s3044_s5 + $0x48] sm:$0xff]  ;;  %v2270_v13 = vld [vmem:[%s3851_s1 + $0x2b8] sm:$0xff] }
  0xda   : >> { %1775 = vmatpush.msra.mxu0 %v2377_v45  ;;  %1535 = vmatpush.msra.mxu2 %v2309_v55  ;;  %v2101_v49 = vld [vmem:[%s3044_s5 + $0x25] sm:$0xff]  ;;  %v2102_v45 = vld [vmem:[%s3044_s5 + $0x2d] sm:$0xff]  ;;  %v2369_v56 = vld [vmem:[%s3851_s1 + $0x438] sm:$0xff] }
  0xdb   : >> { %1307 = vmatmul.f32.vlgmr.msrb.gmra.mxu0 %v2213_v57  ;;  %1414 = vmatpush.msra.mxu1 %v2276_v3  ;;  %v2370_v5 = vld [vmem:[%s3851_s1 + $0x440] sm:$0xff]  ;;  %v2302_v55 = vld [vmem:[%s3851_s1 + $0x330] sm:$0xff] }
  0xdc   : >> { %1189 = vmatmul.f32.gmra.mxu3 %v3297_v8  ;;  %1776 = vmatpush.msra.mxu0 %v2376_v61  ;;  %v2335_v57 = vld [vmem:[%s3851_s1 + $0x3b0] sm:$0xff] }
  0xdd   : >> { %964 = vmatmul.f32.gmra.mxu1 %v2098_v63  ;;  %1536 = vmatpush.msra.mxu2 %v2308_v52  ;;  %v2218_v3 = vld [vmem:[%s3044_s5 + $0x50] sm:$0xff]  ;;  %v2301_v52 = vld [vmem:[%s3851_s1 + $0x328] sm:$0xff] }
  0xde   : >> { %1777 = vmatpush.msra.mxu0 %v2375_v59  ;;  %1657 = vmatpush.msra.mxu3 %v2341_v10  ;;  %v2269_v61 = vld [vmem:[%s3851_s1 + $0x2b0] sm:$0xff]  ;;  %v2334_v59 = vld [vmem:[%s3851_s1 + $0x3a8] sm:$0xff] }
  0xdf   : >> { %1415 = vmatpush.msra.mxu1 %v2275_v38  ;;  %1537 = vmatpush.msra.mxu2 %v2307_v14  ;;  %v2103_v63 = vld [vmem:[%s3044_s5 + $0x35] sm:$0xff]  ;;  %v2187_v14 = vld [vmem:[%s3044_s5 + $0x5f] sm:$0xff] }
  0xe0   : >> { %1658 = vmatpush.msra.mxu3 %v2340_v1  ;;  %1778 = vmatpush.msra.mxu0 %v2374_v60  ;;  %v2368_v10 = vld [vmem:[%s3851_s1 + $0x430] sm:$0xff]  ;;  %v2219_v38 = vld [vmem:[%s3044_s5 + $0x58] sm:$0xff]  ;;  %v2268_v1 = vld [vmem:[%s3851_s1 + $0x2a8] sm:$0xff] }
  0xe1   : >> { %1071 = vmatmul.f32.gmra.mxu2 %v2149_v32  ;;  %1416 = vmatpush.msra.mxu1 %v2274_v53  ;;  %v2104_v60 = vld [vmem:[%s3044_s5 + $0x3d] sm:$0xff]  ;;  %v2367_v53 = vld [vmem:[%s3851_s1 + $0x428] sm:$0xff] }
  0xe2   : >> { %1538 = vmatpush.msra.mxu2 %v2306_v2  ;;  %1779 = vmatpush.msra.mxu0 %v2373_v15  ;;  %v2300_v32 = vld [vmem:[%s3851_s1 + $0x320] sm:$0xff] }
  0xe3   : >> { %1310 = vmatmul.f32.gmra.mxu0 %v2214_v46  ;;  %1659 = vmatpush.msra.mxu3 %v2339_v17  ;;  %v2220_v2 = vld [vmem:[%s3044_s5 + $0x60] sm:$0xff] }
  0xe4   : >> { %1192 = vmatmul.f32.gmra.mxu3 %v3340_v6  ;;  %1417 = vmatpush.msra.mxu1 %v2273_v39  ;;  %v2188_v15 = vld [vmem:[%s3044_s5 + $0x67] sm:$0xff]  ;;  %v2299_v39 = vld [vmem:[%s3851_s1 + $0x318] sm:$0xff] }
  0xe5   : >> { %967 = vmatmul.f32.gmra.mxu1 %v2099_v58  ;;  %1539 = vmatpush.msra.mxu2 %v2305_v42  ;;  %v2333_v46 = vld [vmem:[%s3851_s1 + $0x3a0] sm:$0xff]  ;;  %v2221_v58 = vld [vmem:[%s3044_s5 + $0x68] sm:$0xff] }
  0xe6   : >> { %1660 = vmatpush.msra.mxu3 %v2338_v25  ;;  %1780 = vmatpush.msra.mxu0 %v2372_v30  ;;  %v2105_v17 = vld [vmem:[%s3044_s5 + $0x45] sm:$0xff]  ;;  %v3446_v42 = vld [vmem:[%s3044_s5 + $0x6f] sm:$0xff]  ;;  %v2332_v25 = vld [vmem:[%s3851_s1 + $0x398] sm:$0xff] }
  0xe7   : >> { %1418 = vmatpush.msra.mxu1 %v2272_v31  ;;  %1540 = vmatpush.msra.mxu2 %v2304_v37  ;;  %v2366_v30 = vld [vmem:[%s3851_s1 + $0x420] sm:$0xff]  ;;  %v2106_v31 = vld [vmem:[%s3044_s5 + $0x4d] sm:$0xff]  ;;  %v2365_v37 = vld [vmem:[%s3851_s1 + $0x418] sm:$0xff] }
  0xe8   : >> { %1781 = vmatpush.msra.mxu0 %v2371_v40  ;;  %1661 = vmatpush.msra.mxu3 %v2337_v7  ;;  %v2331_v40 = vld [vmem:[%s3851_s1 + $0x390] sm:$0xff] }
  0xe9   : >> { %1074 = vmatmul.f32.gmra.mxu2 %v2150_v34  ;;  %1419 = vmatpush.msra.mxu1 %v2271_v48  ;;  %v2266_v34 = vld [vmem:[%s3851_s1 + $0x298] sm:$0xff] }
  0xea   : >> { %1541 = vmatpush.msra.mxu2 %v2303_v50  ;;  %1782 = vmatpush.msra.mxu0 %v2370_v5  ;;  %v2107_v7 = vld [vmem:[%s3044_s5 + $0x55] sm:$0xff]  ;;  %v2191_v50 = vld [vmem:[%s3044_s5 + $0x7f] sm:$0xff]  ;;  %v2330_v5 = vld [vmem:[%s3851_s1 + $0x388] sm:$0xff] }
  0xeb   : >> { %1313 = vmatmul.f32.gmra.mxu0 %v2215_v9  ;;  %1420 = vmatpush.msra.mxu1 %v2270_v13  ;;  %v2298_v9 = vld [vmem:[%s3851_s1 + $0x310] sm:$0xff]  ;;  %v2264_v13 = vld [vmem:[%s3851_s1 + $0x288] sm:$0xff] }
  0xec   : >> { %1195 = vmatmul.f32.gmra.mxu3 %v2183_v0  ;;  %1542 = vmatpush.msra.mxu2 %v2302_v55 }
  0xed   : >> { %970 = vmatmul.f32.gmra.mxu1 %v2100_v35  ;;  %1783 = vmatpush.msra.mxu0 %v2369_v56  ;;  %v2190_v35 = vld [vmem:[%s3044_s5 + $0x77] sm:$0xff]  ;;  %v2224_v56 = vld [vmem:[%s3044_s5 + $0x80] sm:$0xff] }
  0xee   : >> { %1421 = vmatpush.msra.mxu1 %v2269_v61  ;;  %1543 = vmatpush.msra.mxu2 %v2301_v52  ;;  %v2363_v61 = vld [vmem:[%s3851_s1 + $0x408] sm:$0xff]  ;;  %v2329_v52 = vld [vmem:[%s3851_s1 + $0x380] sm:$0xff] }
  0xef   : >> { %1784 = vmatpush.msra.mxu0 %v2368_v10 }
  0xf0   : >> { %1422 = vmatpush.msra.mxu1 %v2268_v1  ;;  %1544 = vmatpush.msra.mxu2 %v2300_v32  ;;  %v2193_v1 = vld [vmem:[%s3044_s5 + $0x8f] sm:$0xff] }
  0xf1   : >> { %1077 = vmatmul.f32.gmra.mxu2 %v3254_v41  ;;  %v2336_v41 = vld [vmem:[%s3851_s1 + $0x3b8] sm:$0xff]  ;;  %1785 = vmatpush.msra.mxu0 %v2367_v53  ;;  %v2362_v53 = vld [vmem:[%s3851_s1 + $0x400] sm:$0xff] }
  0xf2   : >> { %1662 = vmatpush.msra.mxu3 %v2336_v41  ;;  %1545 = vmatpush.msra.mxu2 %v2299_v39  ;;  %v2108_v41 = vld [vmem:[%s3044_s5 + $0x5d] sm:$0xff]  ;;  %v2111_v39 = vld [vmem:[%s3044_s5 + $0x75] sm:$0xff] }
  0xf3   : >> { %1316 = vmatmul.f32.gmra.mxu0 %v2216_v43  ;;  %v2265_v43 = vld [vmem:[%s3851_s1 + $0x290] sm:$0xff] }
  0xf4   : >> { %1198 = vmatmul.f32.gmra.mxu3 %v2184_v47  ;;  %1786 = vmatpush.msra.mxu0 %v2366_v30  ;;  %v2195_v30 = vld [vmem:[%s3044_s5 + $0x9f] sm:$0xff] }
  0xf5   : >> { %973 = vmatmul.f32.gmra.mxu1 %v2101_v49  ;;  %1663 = vmatpush.msra.mxu3 %v2335_v57  ;;  %v2223_v49 = vld [vmem:[%s3044_s5 + $0x78] sm:$0xff]  ;;  %v2192_v57 = vld [vmem:[%s3044_s5 + $0x87] sm:$0xff] }
  0xf6   : >> { %1546 = vmatpush.msra.mxu2 %v2298_v9  ;;  %1787 = vmatpush.msra.mxu0 %v2365_v37  ;;  %v2112_v9 = vld [vmem:[%s3044_s5 + $0x7d] sm:$0xff] }
  0xf7   : >> { %1664 = vmatpush.msra.mxu3 %v2334_v59  ;;  %v2263_v59 = vld [vmem:[%s3851_s1 + $0x280] sm:$0xff] }
  0xf8   : >> { %v2228_v37 = vld [vmem:[%s3044_s5 + $0xa0] sm:$0xff] }
  0xf9   : >> { %1080 = vmatmul.f32.gmra.mxu2 %v3297_v8  ;;  %v2186_v8 = vld [vmem:[%s3044_s5 + $0x57] sm:$0xff]  ;;  %1665 = vmatpush.msra.mxu3 %v2333_v46 }
  0xfa   : >> { %v2226_v46 = vld [vmem:[%s3044_s5 + $0x90] sm:$0xff] }
  0xfb   : >> { %1319 = vmatmul.f32.gmra.mxu0 %v2217_v51  ;;  %1666 = vmatpush.msra.mxu3 %v2332_v25  ;;  %v2364_v51 = vld [vmem:[%s3851_s1 + $0x410] sm:$0xff]  ;;  %v2227_v25 = vld [vmem:[%s3044_s5 + $0x98] sm:$0xff] }
  0xfc   : >> { %1201 = vmatmul.f32.gmra.mxu3 %v2185_v54  ;;  %1788 = vmatpush.msra.mxu0 %v2364_v51 }
  0xfd   : >> { %976 = vmatmul.f32.gmra.mxu1 %v2102_v45  ;;  %1667 = vmatpush.msra.mxu3 %v2331_v40  ;;  %v2196_v40 = vld [vmem:[%s3044_s5 + $0xa7] sm:$0xff] }
  0xfe   : >> { %1789 = vmatpush.msra.mxu0 %v2363_v61 }
  0xff   : >> { %1668 = vmatpush.msra.mxu3 %v2330_v5 }
 0x100   : >> { %1790 = vmatpush.msra.mxu0 %v2362_v53  ;;  %v2345_v53 = vld [vmem:[%s3044_s5 + $0x4b] sm:$0xff] }
 0x101   : >> { %1083 = vmatmul.f32.gmra.mxu2 %v3340_v6  ;;  %v2267_v6 = vld [vmem:[%s3851_s1 + $0x2a0] sm:$0xff]  ;;  %1669 = vmatpush.msra.mxu3 %v2329_v52 }
 0x102   : >> { %1423 = vmatpush.msra.mxu1 %v2267_v6 }
 0x103   : >> { %1322 = vmatmul.f32.gmra.mxu0 %v2218_v3  ;;  %v2296_v3 = vld [vmem:[%s3851_s1 + $0x300] sm:$0xff] }
 0x104   : >> { %1204 = vmatmul.f32.gmra.mxu3 %v2186_v8  ;;  %1424 = vmatpush.msra.mxu1 %v2266_v34 }
 0x105   : >> { %979 = vmatmul.f32.gmra.mxu1 %v2103_v63 }
 0x106   : >> { %1425 = vmatpush.msra.mxu1 %v2265_v43  ;;  %v2113_v43 = vld [vmem:[%s3044_s5 + $0x85] sm:$0xff] }
 0x108   : >> { %1426 = vmatpush.msra.mxu1 %v2264_v13 }
 0x109   : >> { %1086 = vmatmul.f32.gmra.mxu2 %v2183_v0  ;;  %v2222_v0 = vld [vmem:[%s3044_s5 + $0x70] sm:$0xff] }
 0x10a   : >> { %1427 = vmatpush.msra.mxu1 %v2263_v59  ;;  %v3561_v59 = vld [vmem:[%s3044_s5 + $0x51] sm:$0xff] }
 0x10b   : >> { %1325 = vmatmul.f32.gmra.mxu0 %v2219_v38  ;;  %v2225_v38 = vld [vmem:[%s3044_s5 + $0x88] sm:$0xff] }
 0x10c   : >> { %1207 = vmatmul.f32.gmra.mxu3 %v2187_v14 }
 0x10d   : >> { %982 = vmatmul.f32.gmra.mxu1 %v2104_v60  ;;  %v2110_v60 = vld [vmem:[%s3044_s5 + $0x6d] sm:$0xff] }
 0x111   : >> { %1089 = vmatmul.f32.gmra.mxu2 %v2184_v47  ;;  %v2297_v47 = vld [vmem:[%s3851_s1 + $0x308] sm:$0xff] }
 0x112   : >> { %1547 = vmatpush.msra.mxu2 %v2297_v47 }
 0x113   : >> { %1328 = vmatmul.f32.gmra.mxu0 %v2220_v2 }
 0x114   : >> { %1210 = vmatmul.f32.gmra.mxu3 %v2188_v15  ;;  %1548 = vmatpush.msra.mxu2 %v2296_v3  ;;  %v2246_v3 = vld [vmem:[%s3044_s5 + $0x29] sm:$0xff] }
 0x115   : >> { %985 = vmatmul.f32.gmra.mxu1 %v2105_v17  ;;  %v2194_v17 = vld [vmem:[%s3044_s5 + $0x97] sm:$0xff] }
 0x119   : >> { %1092 = vmatmul.f32.gmra.mxu2 %v2185_v54 }
 0x11b   : >> { %1331 = vmatmul.f32.gmra.mxu0 %v2221_v58 }
 0x11c   : >> { %1213 = vmatmul.f32.gmra.mxu3 %v3446_v42 }
 0x11d   : >> { %988 = vmatmul.f32.gmra.mxu1 %v2106_v31 }
 0x121   : >> { %1095 = vmatmul.f32.gmra.mxu2 %v2186_v8  ;;  %v2109_v8 = vld [vmem:[%s3044_s5 + $0x65] sm:$0xff] }
 0x123   : >> { %1334 = vmatmul.f32.gmra.mxu0 %v2222_v0 }
 0x124   : >> { %1216 = vmatmul.f32.gmra.mxu3 %v2190_v35 }
 0x125   : >> { %991 = vmatmul.f32.gmra.mxu1 %v2107_v7 }
 0x128   : >> { %v3477_v48 = vpop.f32.mrf.mxu1 }
 0x129   : >> { %1098 = vmatmul.f32.gmra.mxu2 %v2187_v14 }
 0x12b   : >> { %1337 = vmatmul.f32.gmra.mxu0 %v2223_v49  ;;  %v3488_v54 = vpop.f32.mrf.mxu0 }
 0x12c   : >> { %1219 = vmatmul.f32.gmra.mxu3 %v2191_v50 }
 0x12d   : >> { %994 = vmatmul.f32.gmra.mxu1 %v2108_v41  ;;  %v3550_v41 = vld [vmem:[%s3044_s5 + $0x49] sm:$0xff] }
 0x12e   : >> { %v3493_v45 = vpop.f32.mrf.mxu2 }
 0x130   : >> { %v3495_v55 = vpop.f32.mrf.mxu1 }
 0x131   : >> { %1101 = vmatmul.f32.gmra.mxu2 %v2188_v15 }
 0x133   : >> { %1340 = vmatmul.f32.gmra.mxu0 %v2224_v56  ;;  %v2229_v56 = vld [vmem:[%s3044_s5 + $0xa8] sm:$0xff] }
 0x134   : >> { %1222 = vmatmul.f32.gmra.mxu3 %v2192_v57  ;;  %v897_v63 = vpop.f32.mrf.mxu0 }
 0x135   : >> { %997 = vmatmul.f32.gmra.mxu1 %v2109_v8 }
 0x138   : >> { %v3512_v10 = vpop.f32.mrf.mxu1  ;;  %v3515_v14 = vpop.f32.mrf.mxu2 }
 0x139   : >> { %1104 = vmatmul.f32.gmra.mxu2 %v3446_v42 }
 0x13b   : >> { %1343 = vmatmul.f32.gmra.mxu0 %v2225_v38  ;;  %v3520_v32 = vpop.f32.mrf.mxu3 }
 0x13c   : >> { %1225 = vmatmul.f32.gmra.mxu3 %v2193_v1 }
 0x13d   : >> { %1000 = vmatmul.f32.gmra.mxu1 %v2110_v60 }
 0x13e   : >> { %v900_v2 = vpop.f32.mrf.mxu0 }
 0x140   : >> { %v3525_v15 = vpop.f32.mrf.mxu1 }
 0x141   : >> { %1107 = vmatmul.f32.gmra.mxu2 %v2190_v35  ;;  %v3529_v6 = vpop.f32.mrf.mxu2 }
 0x143   : >> { %1346 = vmatmul.f32.gmra.mxu0 %v2226_v46  ;;  %v2313_v46 = vld [vmem:[%s3044_s5 + $0x52] sm:$0xff] }
 0x144   : >> { %1228 = vmatmul.f32.gmra.mxu3 %v2194_v17  ;;  %v3532_v58 = vpop.f32.mrf.mxu3  ;;  %v2247_v17 = vld [vmem:[%s3044_s5 + $0x31] sm:$0xff] }
 0x145   : >> { %1003 = vmatmul.f32.gmra.mxu1 %v2111_v39 }
 0x147   : >> { %v903_v42 = vpop.f32.mrf.mxu0 }
 0x149   : >> { %1110 = vmatmul.f32.gmra.mxu2 %v2191_v50 }
 0x14a   : >> { %v3536_v31 = vpop.f32.mrf.mxu1  ;;  %v3538_v34 = vpop.f32.mrf.mxu2 }
 0x14b   : >> { %1349 = vmatmul.f32.gmra.mxu0 %v2227_v25 }
 0x14c   : >> { %1231 = vmatmul.f32.gmra.mxu3 %v2195_v30 }
 0x14d   : >> { %1006 = vmatmul.f32.gmra.mxu1 %v2112_v9  ;;  %v3541_v0 = vpop.f32.mrf.mxu3  ;;  %v3572_v9 = vld [vmem:[%s3044_s5 + $0x59] sm:$0xff] }
 0x150   : >> { %v3543_v35 = vpop.f32.mrf.mxu0 }
 0x151   : >> { %1113 = vmatmul.f32.gmra.mxu2 %v2192_v57  ;;  %v2312_v57 = vld [vmem:[%s3044_s5 + $0x4a] sm:$0xff] }
 0x152   : >> { %v962_v7 = vpop.f32.mrf.mxu1 }
 0x153   : >> { %v963_v47 = vadd.f32 %v962_v7, %v3488_v54  ;;  %1352 = vmatmul.f32.gmra.mxu0 %v2228_v37 }
 0x154   : >> { %1234 = vmatmul.f32.gmra.mxu3 %v2196_v40  ;;  %v1066_v49 = vpop.f32.mrf.mxu2 }
 0x155   : >> { %v1117_v50 = vadd.f32 %v1066_v49, %v963_v47  ;;  %1009 = vmatmul.f32.gmra.mxu1 %v2113_v43  ;;  %v2346_v43 = vld [vmem:[%s3044_s5 + $0x53] sm:$0xff] }
 0x156   : >> { %v2314_v47 = vld [vmem:[%s3044_s5 + $0x5a] sm:$0xff] }
 0x157   : >> { %v1187_v5 = vpop.f32.mrf.mxu3  ;;  %v2248_v49 = vld [vmem:[%s3044_s5 + $0x39] sm:$0xff] }
 0x158   : >> { %v3552_v51 = vadd.f32 %v1187_v5, %v1117_v50  ;;  %v3554_v13 = vpop.f32.mrf.mxu0 }
 0x159   : >> { %1549 = vmatmul.f32.vlgmr.msra.gmra.mxu2 %v3550_v41 }
 0x15a   : >> { %v965_v54 = vpop.f32.mrf.mxu1 }
 0x15b   : >> { %v966_v8 = vadd.f32 %v965_v54, %v897_v63  ;;  %1355 = vmatmul.f32.gmra.mxu0 %v2229_v56 }
 0x15c   : >> { %1670 = vmatmul.f32.vlgmr.msra.gmra.mxu3 %v2312_v57  ;;  %v1069_v61 = vpop.f32.mrf.mxu2  ;;  %v3583_v57 = vld [vmem:[%s3044_s5 + $0x61] sm:$0xff] }
 0x15d   : >> { %v1118_v52 = vadd.f32 %v1069_v61, %v966_v8  ;;  %1428 = vmatmul.f32.vlgmr.msra.gmra.mxu1 %v2246_v3  ;;  %v2347_v61 = vld [vmem:[%s3044_s5 + $0x5b] sm:$0xff] }
 0x15f   : >> { %v1190_v38 = vpop.f32.mrf.mxu3 }
 0x160   : >> { %v3563_v1 = vadd.f32 %v1190_v38, %v1118_v52  ;;  %v3565_v60 = vpop.f32.mrf.mxu0  ;;  %v2315_v52 = vld [vmem:[%s3044_s5 + $0x62] sm:$0xff] }
 0x161   : >> { %1552 = vmatmul.f32.gmra.mxu2 %v3561_v59  ;;  %v2249_v38 = vld [vmem:[%s3044_s5 + $0x41] sm:$0xff] }
 0x162   : >> { %v968_v63 = vpop.f32.mrf.mxu1 }
 0x163   : >> { %v969_v39 = vadd.f32 %v968_v63, %v900_v2  ;;  %1791 = vmatmul.f32.vlgmr.msra.gmra.mxu0 %v2345_v53 }
 0x164   : >> { %1673 = vmatmul.f32.gmra.mxu3 %v2313_v46  ;;  %v1072_v25 = vpop.f32.mrf.mxu2 }
 0x165   : >> { %v1119_v30 = vadd.f32 %v1072_v25, %v969_v39  ;;  %1431 = vmatmul.f32.gmra.mxu1 %v2247_v17  ;;  %v3595_v17 = vld [vmem:[%s3044_s5 + $0x69] sm:$0xff] }
 0x167   : >> { %v1193_v37 = vpop.f32.mrf.mxu3 }
 0x168   : >> { %v3574_v40 = vadd.f32 %v1193_v37, %v1119_v30  ;;  %v3576_v7 = vpop.f32.mrf.mxu0  ;;  %v2348_v37 = vld [vmem:[%s3044_s5 + $0x63] sm:$0xff] }
 0x169   : >> { %1555 = vmatmul.f32.gmra.mxu2 %v3572_v9 }
 0x16a   : >> { %v971_v2 = vpop.f32.mrf.mxu1 }
 0x16b   : >> { %v972_v50 = vadd.f32 %v971_v2, %v903_v42  ;;  %1794 = vmatmul.f32.gmra.mxu0 %v2346_v43  ;;  %v2316_v43 = vld [vmem:[%s3044_s5 + $0x6a] sm:$0xff] }
 0x16c   : >> { %1676 = vmatmul.f32.gmra.mxu3 %v2314_v47  ;;  %v1075_v5 = vpop.f32.mrf.mxu2 }
 0x16d   : >> { %v1120_v56 = vadd.f32 %v1075_v5, %v972_v50  ;;  %1434 = vmatmul.f32.gmra.mxu1 %v2248_v49  ;;  %v3607_v50 = vld [vmem:[%s3044_s5 + $0x71] sm:$0xff] }
 0x16f   : >> { %v1196_v54 = vpop.f32.mrf.mxu3 }
 0x170   : >> { %v3585_v3 = vadd.f32 %v1196_v54, %v1120_v56  ;;  %v3587_v8 = vpop.f32.mrf.mxu0 }
 0x171   : >> { %1558 = vmatmul.f32.gmra.mxu2 %v3583_v57 }
 0x172   : >> { %v974_v42 = vpop.f32.mrf.mxu1 }
 0x173   : >> { %v975_v53 = vadd.f32 %v974_v42, %v3543_v35  ;;  %1797 = vmatmul.f32.gmra.mxu0 %v2347_v61  ;;  %v2349_v61 = vld [vmem:[%s3044_s5 + $0x6b] sm:$0xff] }
 0x174   : >> { %1679 = vmatmul.f32.gmra.mxu3 %v2315_v52  ;;  %v1078_v46 = vpop.f32.mrf.mxu2 }
 0x175   : >> { %v1121_v63 = vadd.f32 %v1078_v46, %v975_v53  ;;  %1437 = vmatmul.f32.gmra.mxu1 %v2249_v38  ;;  %v3619_v53 = vld [vmem:[%s3044_s5 + $0x79] sm:$0xff] }
 0x177   : >> { %v1199_v39 = vpop.f32.mrf.mxu3 }
 0x178   : >> { %v3597_v25 = vadd.f32 %v1199_v39, %v1121_v63  ;;  %v3599_v30 = vpop.f32.mrf.mxu0 }
 0x179   : >> { %1561 = vmatmul.f32.gmra.mxu2 %v3595_v17 }
 0x17a   : >> { %v977_v35 = vpop.f32.mrf.mxu1 }
 0x17b   : >> { %v978_v47 = vadd.f32 %v977_v35, %v3477_v48  ;;  %1800 = vmatmul.f32.gmra.mxu0 %v2348_v37  ;;  %v2317_v48 = vld [vmem:[%s3044_s5 + $0x72] sm:$0xff] }
 0x17c   : >> { %1682 = vmatmul.f32.gmra.mxu3 %v2316_v43  ;;  %v1081_v2 = vpop.f32.mrf.mxu2  ;;  %v2350_v37 = vld [vmem:[%s3044_s5 + $0x73] sm:$0xff] }
 0x17d   : >> { %v1122_v49 = vadd.f32 %v1081_v2, %v978_v47  ;;  %1440 = vmatmul.f32.gmra.mxu1 %v3550_v41  ;;  %v3631_v2 = vld [vmem:[%s3044_s5 + $0x81] sm:$0xff] }
 0x17f   : >> { %v1202_v5 = vpop.f32.mrf.mxu3 }
 0x180   : >> { %v3609_v56 = vadd.f32 %v1202_v5, %v1122_v49  ;;  %v3611_v54 = vpop.f32.mrf.mxu0 }
 0x181   : >> { %1564 = vmatmul.f32.gmra.mxu2 %v3607_v50 }
 0x182   : >> { %v980_v52 = vpop.f32.mrf.mxu1 }
 0x183   : >> { %v981_v42 = vadd.f32 %v980_v52, %v3495_v55  ;;  %1803 = vmatmul.f32.gmra.mxu0 %v2349_v61  ;;  %v2318_v55 = vld [vmem:[%s3044_s5 + $0x7a] sm:$0xff] }
 0x184   : >> { %1685 = vmatmul.f32.gmra.mxu3 %v2317_v48  ;;  %v1084_v38 = vpop.f32.mrf.mxu2  ;;  %v2351_v48 = vld [vmem:[%s3044_s5 + $0x7b] sm:$0xff] }
 0x185   : >> { %v1123_v41 = vadd.f32 %v1084_v38, %v981_v42  ;;  %1443 = vmatmul.f32.gmra.mxu1 %v3561_v59 }
 0x187   : >> { %v1205_v46 = vpop.f32.mrf.mxu3 }
 0x188   : >> { %v3621_v63 = vadd.f32 %v1205_v46, %v1123_v41  ;;  %v3623_v39 = vpop.f32.mrf.mxu0  ;;  %v3643_v41 = vld [vmem:[%s3044_s5 + $0x89] sm:$0xff] }
 0x189   : >> { %1567 = vmatmul.f32.gmra.mxu2 %v3619_v53 }
 0x18a   : >> { %v983_v43 = vpop.f32.mrf.mxu1 }
 0x18b   : >> { %v984_v35 = vadd.f32 %v983_v43, %v3512_v10  ;;  %1806 = vmatmul.f32.gmra.mxu0 %v2350_v37  ;;  %v2319_v10 = vld [vmem:[%s3044_s5 + $0x82] sm:$0xff] }
 0x18c   : >> { %1688 = vmatmul.f32.gmra.mxu3 %v2318_v55  ;;  %v1087_v47 = vpop.f32.mrf.mxu2  ;;  %v2352_v43 = vld [vmem:[%s3044_s5 + $0x83] sm:$0xff] }
 0x18d   : >> { %v1124_v59 = vadd.f32 %v1087_v47, %v984_v35  ;;  %1446 = vmatmul.f32.gmra.mxu1 %v3572_v9 }
 0x18f   : >> { %v1208_v49 = vpop.f32.mrf.mxu3 }
 0x190   : >> { %v3633_v5 = vadd.f32 %v1208_v49, %v1124_v59  ;;  %v3635_v61 = vpop.f32.mrf.mxu0  ;;  %v3655_v49 = vld [vmem:[%s3044_s5 + $0x91] sm:$0xff] }
 0x191   : >> { %1570 = vmatmul.f32.gmra.mxu2 %v3631_v2 }
 0x192   : >> { %v986_v52 = vpop.f32.mrf.mxu1 }
 0x193   : >> { %v987_v42 = vadd.f32 %v986_v52, %v3525_v15  ;;  %1809 = vmatmul.f32.gmra.mxu0 %v2351_v48  ;;  %v2320_v15 = vld [vmem:[%s3044_s5 + $0x8a] sm:$0xff] }
 0x194   : >> { %1691 = vmatmul.f32.gmra.mxu3 %v2319_v10  ;;  %v1090_v38 = vpop.f32.mrf.mxu2 }
 0x195   : >> { %v1125_v9 = vadd.f32 %v1090_v38, %v987_v42  ;;  %1449 = vmatmul.f32.gmra.mxu1 %v3583_v57  ;;  %v2353_v42 = vld [vmem:[%s3044_s5 + $0x8b] sm:$0xff] }
 0x197   : >> { %v1211_v46 = vpop.f32.mrf.mxu3 }
 0x198   : >> { %v3645_v37 = vadd.f32 %v1211_v46, %v1125_v9  ;;  %v3647_v55 = vpop.f32.mrf.mxu0 }
 0x199   : >> { %1573 = vmatmul.f32.gmra.mxu2 %v3643_v41 }
 0x19a   : >> { %v989_v35 = vpop.f32.mrf.mxu1 }
 0x19b   : >> { %v990_v47 = vadd.f32 %v989_v35, %v3536_v31  ;;  %1812 = vmatmul.f32.gmra.mxu0 %v2352_v43  ;;  %v2321_v31 = vld [vmem:[%s3044_s5 + $0x92] sm:$0xff] }
 0x19c   : >> { %1694 = vmatmul.f32.gmra.mxu3 %v2320_v15  ;;  %v1093_v59 = vpop.f32.mrf.mxu2  ;;  %v3667_v43 = vld [vmem:[%s3044_s5 + $0x99] sm:$0xff] }
 0x19d   : >> { %v1126_v57 = vadd.f32 %v1093_v59, %v990_v47  ;;  %1452 = vmatmul.f32.gmra.mxu1 %v3595_v17  ;;  %v2354_v59 = vld [vmem:[%s3044_s5 + $0x93] sm:$0xff] }
 0x19f   : >> { %v1214_v48 = vpop.f32.mrf.mxu3 }
 0x1a0   : >> { %v3657_v10 = vadd.f32 %v1214_v48, %v1126_v57  ;;  %v3659_v52 = vpop.f32.mrf.mxu0  ;;  %v2322_v57 = vld [vmem:[%s3044_s5 + $0x9a] sm:$0xff] }
 0x1a1   : >> { %1576 = vmatmul.f32.gmra.mxu2 %v3655_v49 }
 0x1a2   : >> { %v992_v38 = vpop.f32.mrf.mxu1 }
 0x1a3   : >> { %v993_v9 = vadd.f32 %v992_v38, %v3493_v45  ;;  %1815 = vmatmul.f32.gmra.mxu0 %v2353_v42  ;;  %v3677_v38 = vld [vmem:[%s3044_s5 + $0xa1] sm:$0xff] }
 0x1a4   : >> { %1697 = vmatmul.f32.gmra.mxu3 %v2321_v31  ;;  %v1096_v46 = vpop.f32.mrf.mxu2 }
 0x1a5   : >> { %v1127_v17 = vadd.f32 %v1096_v46, %v993_v9  ;;  %1455 = vmatmul.f32.gmra.mxu1 %v3607_v50 }
 0x1a7   : >> { %v1217_v15 = vpop.f32.mrf.mxu3 }
 0x1a8   : >> { %v1248_v35 = vadd.f32 %v1217_v15, %v1127_v17  ;;  %v1338_v47 = vpop.f32.mrf.mxu0  ;;  %v2355_v15 = vld [vmem:[%s3044_s5 + $0x9b] sm:$0xff] }
 0x1a9   : >> { %1579 = vmatmul.f32.gmra.mxu2 %v3667_v43 }
 0x1aa   : >> { %v3672_v48 = vadd.f32 %v1338_v47, %v1248_v35  ;;  %v995_v45 = vpop.f32.mrf.mxu1  ;;  %v2323_v35 = vld [vmem:[%s3044_s5 + $0xa2] sm:$0xff] }
 0x1ab   : >> { %v996_v42 = vadd.f32 %v995_v45, %v3515_v14  ;;  %1818 = vmatmul.f32.gmra.mxu0 %v2354_v59  ;;  %v3687_v45 = vld [vmem:[%s3044_s5 + $0xa9] sm:$0xff] }
 0x1ac   : >> { %1700 = vmatmul.f32.gmra.mxu3 %v2322_v57  ;;  %v1099_v50 = vpop.f32.mrf.mxu2 }
 0x1ad   : >> { %v1128_v31 = vadd.f32 %v1099_v50, %v996_v42  ;;  %1458 = vmatmul.f32.gmra.mxu1 %v3619_v53 }
 0x1af   : >> { %v1220_v9 = vpop.f32.mrf.mxu3 }
 0x1b0   : >> { %v1249_v46 = vadd.f32 %v1220_v9, %v1128_v31  ;;  %v1341_v17 = vpop.f32.mrf.mxu0  ;;  %v2356_v9 = vld [vmem:[%s3044_s5 + $0xa3] sm:$0xff] }
 0x1b1   : >> { %1582 = vmatmul.f32.gmra.mxu2 %v3677_v38 }
 0x1b2   : >> { %v3682_v47 = vadd.f32 %v1341_v17, %v1249_v46  ;;  %v998_v14 = vpop.f32.mrf.mxu1  ;;  %v2324_v46 = vld [vmem:[%s3044_s5 + $0xaa] sm:$0xff] }
 0x1b3   : >> { %v999_v59 = vadd.f32 %v998_v14, %v3529_v6  ;;  %1821 = vmatmul.f32.gmra.mxu0 %v2355_v15  ;;  %v2292_v14 = vld [vmem:[%s3044_s5 + $0xb1] sm:$0xff] }
 0x1b4   : >> { %1703 = vmatmul.f32.gmra.mxu3 %v2323_v35  ;;  %v1102_v53 = vpop.f32.mrf.mxu2 }
 0x1b5   : >> { %v1129_v57 = vadd.f32 %v1102_v53, %v999_v59  ;;  %1461 = vmatmul.f32.gmra.mxu1 %v3631_v2 }
 0x1b7   : >> { %v1223_v42 = vpop.f32.mrf.mxu3 }
 0x1b8   : >> { %v1250_v50 = vadd.f32 %v1223_v42, %v1129_v57  ;;  %v1344_v31 = vpop.f32.mrf.mxu0  ;;  %v2357_v42 = vld [vmem:[%s3044_s5 + $0xab] sm:$0xff] }
 0x1b9   : >> { %1585 = vmatmul.f32.gmra.mxu2 %v3687_v45 }
 0x1ba   : >> { %v3692_v17 = vadd.f32 %v1344_v31, %v1250_v50  ;;  %v1001_v6 = vpop.f32.mrf.mxu1  ;;  %v2325_v50 = vld [vmem:[%s3044_s5 + $0xb2] sm:$0xff] }
 0x1bb   : >> { %v1002_v15 = vadd.f32 %v1001_v6, %v3538_v34  ;;  %1824 = vmatmul.f32.gmra.mxu0 %v2356_v9 }
 0x1bc   : >> { %1706 = vmatmul.f32.gmra.mxu3 %v2324_v46  ;;  %v1105_v2 = vpop.f32.mrf.mxu2 }
 0x1bd   : >> { %v1130_v35 = vadd.f32 %v1105_v2, %v1002_v15  ;;  %1464 = vmatmul.f32.gmra.mxu1 %v3643_v41  ;;  %v2293_v41 = vld [vmem:[%s3044_s5 + $0xb9] sm:$0xff] }
 0x1bf   : >> { %v1226_v59 = vpop.f32.mrf.mxu3 }
 0x1c0   : >> { %v1251_v53 = vadd.f32 %v1226_v59, %v1130_v35  ;;  %v1347_v57 = vpop.f32.mrf.mxu0  ;;  %v2358_v35 = vld [vmem:[%s3044_s5 + $0xb3] sm:$0xff] }
 0x1c1   : >> { %1588 = vmatmul.f32.gmra.mxu2 %v2292_v14  ;;  %v2326_v14 = vld [vmem:[%s3044_s5 + $0xba] sm:$0xff] }
 0x1c2   : >> { %v3699_v31 = vadd.f32 %v1347_v57, %v1251_v53  ;;  %v1004_v22 = vpop.f32.mrf.mxu1 }
 0x1c3   : >> { %v1005_v34 = vadd.f32 %v1004_v22, %v3520_v32  ;;  %1827 = vmatmul.f32.gmra.mxu0 %v2357_v42 }
 0x1c4   : >> { %1709 = vmatmul.f32.gmra.mxu3 %v2325_v50  ;;  %v1108_v9 = vpop.f32.mrf.mxu2 }
 0x1c5   : >> { %v1131_v46 = vadd.f32 %v1108_v9, %v1005_v34  ;;  %1467 = vmatmul.f32.gmra.mxu1 %v3655_v49  ;;  %v2294_v49 = vld [vmem:[%s3044_s5 + $0xc1] sm:$0xff] }
 0x1c6   : >> { %v2359_v9 = vld [vmem:[%s3044_s5 + $0xbb] sm:$0xff] }
 0x1c7   : >> { %v1229_v6 = vpop.f32.mrf.mxu3 }
 0x1c8   : >> { %v1252_v15 = vadd.f32 %v1229_v6, %v1131_v46  ;;  %v1350_v2 = vpop.f32.mrf.mxu0  ;;  %v2327_v46 = vld [vmem:[%s3044_s5 + $0xc2] sm:$0xff] }
 0x1c9   : >> { %1591 = vmatmul.f32.gmra.mxu2 %v2293_v41 }
 0x1ca   : >> { %v3706_v59 = vadd.f32 %v1350_v2, %v1252_v15  ;;  %v1007_v53 = vpop.f32.mrf.mxu1 }
 0x1cb   : >> { %v1008_v22 = vadd.f32 %v1007_v53, %v3532_v58  ;;  %1830 = vmatmul.f32.gmra.mxu0 %v2358_v35 }
 0x1cc   : >> { %1712 = vmatmul.f32.gmra.mxu3 %v2326_v14  ;;  %v1111_v32 = vpop.f32.mrf.mxu2 }
 0x1cd   : >> { %v1132_v57 = vadd.f32 %v1111_v32, %v1008_v22  ;;  %1470 = vmatmul.f32.gmra.mxu1 %v3667_v43  ;;  %v2295_v43 = vld [vmem:[%s3044_s5 + $0xc9] sm:$0xff]  ;;  %v1359_v32 = vadd.f32 %v3554_v13, %v3552_v51  ;;  %v1360_v13 = vadd.f32 %v3565_v60, %v3563_v1  ;;  %v1361_v1 = vadd.f32 %v3576_v7, %v3574_v40 }
 0x1ce   : >> { %v2360_v22 = vld [vmem:[%s3044_s5 + $0xc3] sm:$0xff]  ;;  %v2361_v51 = vld [vmem:[%s3044_s5 + $0xcb] sm:$0xff]  ;;  %v1362_v40 = vadd.f32 %v3587_v8, %v3585_v3  ;;  %v1363_v3 = vadd.f32 %v3599_v30, %v3597_v25  ;;  %v1364_v25 = vadd.f32 %v3611_v54, %v3609_v56  ;;  %v1365_v56 = vadd.f32 %v3623_v39, %v3621_v63 }
 0x1cf   : >> { %v1232_v42 = vpop.f32.mrf.mxu3  ;;  %v1366_v63 = vadd.f32 %v3635_v61, %v3633_v5  ;;  %v1367_v5 = vadd.f32 %v3647_v55, %v3645_v37  ;;  %v1368_v37 = vadd.f32 %v3659_v52, %v3657_v10 }
 0x1d0   : >> { %v1253_v50 = vadd.f32 %v1232_v42, %v1132_v57  ;;  %v1353_v34 = vpop.f32.mrf.mxu0  ;;  %v2328_v57 = vld [vmem:[%s3044_s5 + $0xca] sm:$0xff] }
 0x1d1   : >> { %1594 = vmatmul.f32.gmra.mxu2 %v2294_v49 }
 0x1d2   : >> { %v3713_v41 = vadd.f32 %v1353_v34, %v1253_v50  ;;  %v1010_v6 = vpop.f32.mrf.mxu1 }
 0x1d3   : >> { %v1011_v58 = vadd.f32 %v1010_v6, %v3541_v0  ;;  %1833 = vmatmul.f32.gmra.mxu0 %v2359_v9  ;;  %v3726_v6 = vperm.slane %v2681_v26, 0 }
 0x1d4   : >> { %1715 = vmatmul.f32.gmra.mxu3 %v2327_v46  ;;  %v1114_v15 = vpop.f32.mrf.mxu2 }
 0x1d5   : >> { %v1133_v2 = vadd.f32 %v1114_v15, %v1011_v58  ;;  %1473 = vmatmul.f32.gmra.mxu1 %v3677_v38 }
 0x1d7   : >> { %v1235_v35 = vpop.f32.mrf.mxu3 }
 0x1d8   : >> { %v1254_v14 = vadd.f32 %v1235_v35, %v1133_v2  ;;  %v1356_v53 = vpop.f32.mrf.mxu0 }
 0x1d9   : >> { %1597 = vmatmul.f32.gmra.mxu2 %v2295_v43 }
 0x1da   : >> { %v3722_v49 = vadd.f32 %v1356_v53, %v1254_v14  ;;  %v1429_v0 = vpop.f32.mrf.mxu1 }
 0x1db   : >> { %v1480_v42 = vadd.f32 %v1429_v0, %v1359_v32  ;;  %1836 = vmatmul.f32.gmra.mxu0 %v2360_v22 }
 0x1dc   : >> { %1718 = vmatmul.f32.gmra.mxu3 %v2328_v57  ;;  %v1550_v50 = vpop.f32.mrf.mxu2 }
 0x1dd   : >> { %v1601_v34 = vadd.f32 %v1550_v50, %v1480_v42  ;;  %1476 = vmatmul.f32.gmra.mxu1 %v3687_v45 }
 0x1df   : >> { %v1671_v38 = vpop.f32.mrf.mxu3 }
 0x1e0   : >> { %v1722_v9 = vadd.f32 %v1671_v38, %v1601_v34  ;;  %v1792_v46 = vpop.f32.mrf.mxu0 }
 0x1e2   : >> { %v1843_v58 = vadd.f32 %v1792_v46, %v1722_v9  ;;  %v1432_v15 = vpop.f32.mrf.mxu1 }
 0x1e3   : >> { %v1481_v2 = vadd.f32 %v1432_v15, %v1360_v13  ;;  %1839 = vmatmul.f32.gmra.mxu0 %v2361_v51 }
 0x1e4   : >> { %v1863_v43 = vadd.f32 %v3726_v6, %v1843_v58  ;;  %v1553_v35 = vpop.f32.mrf.mxu2 }
 0x1e5   : >> { %v1602_v45 = vadd.f32 %v1553_v35, %v1481_v2 }
 0x1e6   : >> { %vm1880_vm1 = vcmp.ge.f32.partialorder %v1863_v43, 0.0  ;;  %v1897_v14 = vmul.f32 %v1863_v43, %v2988_v33 }
 0x1e7   : >> { %v1674_v53 = vpop.f32.mrf.mxu3 }
 0x1e8   : >> { %v1914_v22 = vsel %vm1880_vm1, %v1863_v43, %v1897_v14  ;;  %v1723_v32 = vadd.f32 %v1674_v53, %v1602_v45  ;;  %v1795_v57 = vpop.f32.mrf.mxu0 }
 0x1e9   : >> { %v1965_v60 = vsel %vm2898_vm13, %v1914_v22, 0.0 }
 0x1ea   : >> { %2378 = vst [vmem:[%s3736_s13 + $0x28] sm:$0xff] %v1965_v60  ;;  %v1844_v0 = vadd.f32 %v1795_v57, %v1723_v32  ;;  %v1435_v42 = vpop.f32.mrf.mxu1 }
 0x1eb   : >> { %v1482_v50 = vadd.f32 %v1435_v42, %v1361_v1 }
 0x1ec   : >> { %v1864_v34 = vadd.f32 %v3726_v6, %v1844_v0  ;;  %v1556_v38 = vpop.f32.mrf.mxu2 }
 0x1ed   : >> { %v1603_v9 = vadd.f32 %v1556_v38, %v1482_v50 }
 0x1ee   : >> { %vm1881_vm4 = vcmp.ge.f32.partialorder %v1864_v34, 0.0  ;;  %v1898_v46 = vmul.f32 %v1864_v34, %v2988_v33 }
 0x1ef   : >> { %v1677_v51 = vpop.f32.mrf.mxu3 }
 0x1f0   : >> { %v1915_v13 = vsel %vm1881_vm4, %v1864_v34, %v1898_v46  ;;  %v1724_v58 = vadd.f32 %v1677_v51, %v1603_v9  ;;  %v1798_v15 = vpop.f32.mrf.mxu0 }
 0x1f1   : >> { %v1966_v7 = vsel %vm2902_vm3, %v1915_v13, 0.0 }
 0x1f2   : >> { %2379 = vst [vmem:[%s3736_s13 + $0x30] sm:$0xff] %v1966_v7  ;;  %v1845_v2 = vadd.f32 %v1798_v15, %v1724_v58  ;;  %v1438_v43 = vpop.f32.mrf.mxu1 }
 0x1f3   : >> { %v1483_v35 = vadd.f32 %v1438_v43, %v1362_v40 }
 0x1f4   : >> { %v1865_v45 = vadd.f32 %v3726_v6, %v1845_v2  ;;  %v1559_v14 = vpop.f32.mrf.mxu2 }
 0x1f5   : >> { %v1604_v53 = vadd.f32 %v1559_v14, %v1483_v35 }
 0x1f6   : >> { %vm1882_vm1 = vcmp.ge.f32.partialorder %v1865_v45, 0.0  ;;  %v1899_v22 = vmul.f32 %v1865_v45, %v2988_v33 }
 0x1f7   : >> { %v1680_v32 = vpop.f32.mrf.mxu3 }
 0x1f8   : >> { %v1916_v57 = vsel %vm1882_vm1, %v1865_v45, %v1899_v22  ;;  %v1725_v1 = vadd.f32 %v1680_v32, %v1604_v53  ;;  %v1801_v60 = vpop.f32.mrf.mxu0 }
 0x1f9   : >> { %v1967_v8 = vsel %vm2917_vm8, %v1916_v57, 0.0 }
 0x1fa   : >> { %2380 = vst [vmem:[%s3736_s13 + $0x38] sm:$0xff] %v1967_v8  ;;  %v1846_v0 = vadd.f32 %v1801_v60, %v1725_v1  ;;  %v1441_v42 = vpop.f32.mrf.mxu1 }
 0x1fb   : >> { %v1484_v50 = vadd.f32 %v1441_v42, %v1363_v3 }
 0x1fc   : >> { %v1866_v34 = vadd.f32 %v3726_v6, %v1846_v0  ;;  %v1562_v38 = vpop.f32.mrf.mxu2 }
 0x1fd   : >> { %v1605_v9 = vadd.f32 %v1562_v38, %v1484_v50 }
 0x1fe   : >> { %vm1883_vm4 = vcmp.ge.f32.partialorder %v1866_v34, 0.0  ;;  %v1900_v46 = vmul.f32 %v1866_v34, %v2988_v33 }
 0x1ff   : >> { %v1683_v51 = vpop.f32.mrf.mxu3 }
 0x200   : >> { %v1917_v13 = vsel %vm1883_vm4, %v1866_v34, %v1900_v46  ;;  %v1726_v58 = vadd.f32 %v1683_v51, %v1605_v9  ;;  %v1804_v15 = vpop.f32.mrf.mxu0 }
 0x201   : >> { %v1968_v30 = vsel %vm2921_vm9, %v1917_v13, 0.0 }
 0x202   : >> { %2381 = vst [vmem:[%s3736_s13 + $0x40] sm:$0xff] %v1968_v30  ;;  %v1847_v40 = vadd.f32 %v1804_v15, %v1726_v58  ;;  %v1444_v7 = vpop.f32.mrf.mxu1 }
 0x203   : >> { %v1485_v2 = vadd.f32 %v1444_v7, %v1364_v25 }
 0x204   : >> { %v1867_v43 = vadd.f32 %v3726_v6, %v1847_v40  ;;  %v1565_v35 = vpop.f32.mrf.mxu2 }
 0x205   : >> { %v1606_v45 = vadd.f32 %v1565_v35, %v1485_v2 }
 0x206   : >> { %vm1884_vm1 = vcmp.ge.f32.partialorder %v1867_v43, 0.0  ;;  %v1901_v14 = vmul.f32 %v1867_v43, %v2988_v33 }
 0x207   : >> { %v1686_v53 = vpop.f32.mrf.mxu3 }
 0x208   : >> { %v1918_v22 = vsel %vm1884_vm1, %v1867_v43, %v1901_v14  ;;  %v1727_v32 = vadd.f32 %v1686_v53, %v1606_v45  ;;  %v1807_v57 = vpop.f32.mrf.mxu0 }
 0x209   : >> { %v1969_v54 = vsel %vm2925_vm10, %v1918_v22, 0.0 }
 0x20a   : >> { %2382 = vst [vmem:[%s3736_s13 + $0x48] sm:$0xff] %v1969_v54  ;;  %v1848_v1 = vadd.f32 %v1807_v57, %v1727_v32  ;;  %v1447_v60 = vpop.f32.mrf.mxu1 }
 0x20b   : >> { %v1486_v3 = vadd.f32 %v1447_v60, %v1365_v56 }
 0x20c   : >> { %v1868_v8 = vadd.f32 %v3726_v6, %v1848_v1  ;;  %v1568_v0 = vpop.f32.mrf.mxu2 }
 0x20d   : >> { %v1607_v42 = vadd.f32 %v1568_v0, %v1486_v3 }
 0x20e   : >> { %vm1885_vm4 = vcmp.ge.f32.partialorder %v1868_v8, 0.0  ;;  %v1902_v50 = vmul.f32 %v1868_v8, %v2988_v33 }
 0x20f   : >> { %v1689_v34 = vpop.f32.mrf.mxu3 }
 0x210   : >> { %v1919_v38 = vsel %vm1885_vm4, %v1868_v8, %v1902_v50  ;;  %v1728_v9 = vadd.f32 %v1689_v34, %v1607_v42  ;;  %v1810_v46 = vpop.f32.mrf.mxu0 }
 0x211   : >> { %v1970_v39 = vsel %vm2936_vm7, %v1919_v38, 0.0 }
 0x212   : >> { %2383 = vst [vmem:[%s3736_s13 + $0x50] sm:$0xff] %v1970_v39  ;;  %v1849_v51 = vadd.f32 %v1810_v46, %v1728_v9  ;;  %v1450_v13 = vpop.f32.mrf.mxu1 }
 0x213   : >> { %v1487_v58 = vadd.f32 %v1450_v13, %v1366_v63 }
 0x214   : >> { %v1869_v15 = vadd.f32 %v3726_v6, %v1849_v51  ;;  %v1571_v25 = vpop.f32.mrf.mxu2 }
 0x215   : >> { %v1608_v30 = vadd.f32 %v1571_v25, %v1487_v58 }
 0x216   : >> { %vm1886_vm1 = vcmp.ge.f32.partialorder %v1869_v15, 0.0  ;;  %v1903_v40 = vmul.f32 %v1869_v15, %v2988_v33 }
 0x217   : >> { %v1692_v7 = vpop.f32.mrf.mxu3 }
 0x218   : >> { %v1920_v2 = vsel %vm1886_vm1, %v1869_v15, %v1903_v40  ;;  %v1729_v43 = vadd.f32 %v1692_v7, %v1608_v30  ;;  %v1813_v35 = vpop.f32.mrf.mxu0 }
 0x219   : >> { %v1971_v61 = vsel %vm2940_vm14, %v1920_v2, 0.0 }
 0x21a   : >> { %2384 = vst [vmem:[%s3736_s13 + $0x58] sm:$0xff] %v1971_v61  ;;  %v1850_v45 = vadd.f32 %v1813_v35, %v1729_v43  ;;  %v1453_v14 = vpop.f32.mrf.mxu1 }
 0x21b   : >> { %v1488_v53 = vadd.f32 %v1453_v14, %v1367_v5 }
 0x21c   : >> { %v1870_v22 = vadd.f32 %v3726_v6, %v1850_v45  ;;  %v1574_v32 = vpop.f32.mrf.mxu2 }
 0x21d   : >> { %v1609_v57 = vadd.f32 %v1574_v32, %v1488_v53 }
 0x21e   : >> { %vm1887_vm4 = vcmp.ge.f32.partialorder %v1870_v22, 0.0  ;;  %v1904_v56 = vmul.f32 %v1870_v22, %v2988_v33 }
 0x21f   : >> { %v1695_v54 = vpop.f32.mrf.mxu3 }
 0x220   : >> { %v1921_v1 = vsel %vm1887_vm4, %v1870_v22, %v1904_v56  ;;  %v1730_v60 = vadd.f32 %v1695_v54, %v1609_v57  ;;  %v1816_v3 = vpop.f32.mrf.mxu0 }
 0x221   : >> { %v1972_v55 = vsel %vm3940_vm0, %v1921_v1, 0.0 }
 0x222   : >> { %2385 = vst [vmem:[%s3736_s13 + $0x60] sm:$0xff] %v1972_v55  ;;  %v1851_v8 = vadd.f32 %v1816_v3, %v1730_v60  ;;  %v1456_v0 = vpop.f32.mrf.mxu1 }
 0x223   : >> { %v1489_v42 = vadd.f32 %v1456_v0, %v1368_v37 }
 0x224   : >> { %v1871_v50 = vadd.f32 %v3726_v6, %v1851_v8  ;;  %v1577_v34 = vpop.f32.mrf.mxu2 }
 0x225   : >> { %v1610_v38 = vadd.f32 %v1577_v34, %v1489_v42 }
 0x226   : >> { %vm1888_vm1 = vcmp.ge.f32.partialorder %v1871_v50, 0.0  ;;  %v1905_v9 = vmul.f32 %v1871_v50, %v2988_v33 }
 0x227   : >> { %v1698_v46 = vpop.f32.mrf.mxu3 }
 0x228   : >> { %v1922_v63 = vsel %vm1888_vm1, %v1871_v50, %v1905_v9  ;;  %v1731_v39 = vadd.f32 %v1698_v46, %v1610_v38  ;;  %v1819_v51 = vpop.f32.mrf.mxu0  ;;  %vm3941_vm1 = vnez %v3924_v20 }
 0x229   : >> { %v1973_v10 = vsel %vm2951_vm5, %v1922_v63, 0.0 }
 0x22a   : >> { %2386 = vst [vmem:[%s3736_s13 + $0x68] sm:$0xff] %v1973_v10  ;;  %v1852_v52 = vadd.f32 %v1819_v51, %v1731_v39  ;;  %v1459_v13 = vpop.f32.mrf.mxu1 }
 0x22b   : >> { %v1490_v58 = vadd.f32 %v1459_v13, %v3672_v48 }
 0x22c   : >> { %v1872_v15 = vadd.f32 %v3726_v6, %v1852_v52  ;;  %v1580_v25 = vpop.f32.mrf.mxu2 }
 0x22d   : >> { %v1611_v30 = vadd.f32 %v1580_v25, %v1490_v58 }
 0x22e   : >> { %vm1889_vm4 = vcmp.ge.f32.partialorder %v1872_v15, 0.0  ;;  %v1906_v40 = vmul.f32 %v1872_v15, %v2988_v33 }
 0x22f   : >> { %v1701_v7 = vpop.f32.mrf.mxu3 }
 0x230   : >> { %v1923_v2 = vsel %vm1889_vm4, %v1872_v15, %v1906_v40  ;;  %v1732_v43 = vadd.f32 %v1701_v7, %v1611_v30  ;;  %v1822_v35 = vpop.f32.mrf.mxu0 }
 0x231   : >> { %v1974_v5 = vsel %vm3941_vm1, %v1923_v2, 0.0 }
 0x232   : >> { %2387 = vst [vmem:[%s3736_s13 + $0x70] sm:$0xff] %v1974_v5  ;;  %v1853_v61 = vadd.f32 %v1822_v35, %v1732_v43  ;;  %v1462_v45 = vpop.f32.mrf.mxu1 }
 0x233   : >> { %v1491_v48 = vadd.f32 %v1462_v45, %v3682_v47 }
 0x234   : >> { %v1873_v14 = vadd.f32 %v3726_v6, %v1853_v61  ;;  %v1583_v53 = vpop.f32.mrf.mxu2 }
 0x235   : >> { %v1612_v22 = vadd.f32 %v1583_v53, %v1491_v48 }
 0x236   : >> { %vm1890_vm0 = vcmp.ge.f32.partialorder %v1873_v14, 0.0  ;;  %v1907_v32 = vmul.f32 %v1873_v14, %v2988_v33 }
 0x237   : >> { %v1704_v57 = vpop.f32.mrf.mxu3 }
 0x238   : >> { %v1924_v56 = vsel %vm1890_vm0, %v1873_v14, %v1907_v32  ;;  %v1733_v54 = vadd.f32 %v1704_v57, %v1612_v22  ;;  %v1825_v1 = vpop.f32.mrf.mxu0  ;;  %vm3942_vm0 = vnez %v3928_v44 }
 0x239   : >> { %v1975_v60 = vsel %vm2959_vm12, %v1924_v56, 0.0 }
 0x23a   : >> { %2388 = vst [vmem:[%s3736_s13 + $0x78] sm:$0xff] %v1975_v60  ;;  %v1854_v3 = vadd.f32 %v1825_v1, %v1733_v54  ;;  %v1465_v37 = vpop.f32.mrf.mxu1 }
 0x23b   : >> { %v1492_v47 = vadd.f32 %v1465_v37, %v3692_v17 }
 0x23c   : >> { %v1874_v55 = vadd.f32 %v3726_v6, %v1854_v3  ;;  %v1586_v8 = vpop.f32.mrf.mxu2 }
 0x23d   : >> { %v1613_v0 = vadd.f32 %v1586_v8, %v1492_v47 }
 0x23e   : >> { %vm1891_vm4 = vcmp.ge.f32.partialorder %v1874_v55, 0.0  ;;  %v1908_v42 = vmul.f32 %v1874_v55, %v2988_v33 }
 0x23f   : >> { %v1707_v50 = vpop.f32.mrf.mxu3 }
 0x240   : >> { %v1925_v34 = vsel %vm1891_vm4, %v1874_v55, %v1908_v42  ;;  %v1734_v38 = vadd.f32 %v1707_v50, %v1613_v0  ;;  %v1828_v9 = vpop.f32.mrf.mxu0 }
 0x241   : >> { %v1976_v46 = vsel %vm3942_vm0, %v1925_v34, 0.0 }
 0x242   : >> { %2389 = vst [vmem:[%s3736_s13 + $0x80] sm:$0xff] %v1976_v46  ;;  %v1855_v63 = vadd.f32 %v1828_v9, %v1734_v38  ;;  %v1468_v39 = vpop.f32.mrf.mxu1 }
 0x243   : >> { %v1493_v17 = vadd.f32 %v1468_v39, %v3699_v31 }
 0x244   : >> { %v1875_v51 = vadd.f32 %v3726_v6, %v1855_v63  ;;  %v1589_v10 = vpop.f32.mrf.mxu2 }
 0x245   : >> { %v1614_v52 = vadd.f32 %v1589_v10, %v1493_v17 }
 0x246   : >> { %vm1892_vm1 = vcmp.ge.f32.partialorder %v1875_v51, 0.0  ;;  %v1909_v13 = vmul.f32 %v1875_v51, %v2988_v33 }
 0x247   : >> { %v1710_v58 = vpop.f32.mrf.mxu3 }
 0x248   : >> { %v1926_v15 = vsel %vm1892_vm1, %v1875_v51, %v1909_v13  ;;  %v1735_v25 = vadd.f32 %v1710_v58, %v1614_v52  ;;  %v1831_v30 = vpop.f32.mrf.mxu0  ;;  %v3943_v58 = vld [vmem:[#allocation2_spill] sm:$0xff] }
 0x249   : >> { %v1977_v40 = vsel %vm2967_vm6, %v1926_v15, 0.0 }
 0x24a   : >> { %2390 = vst [vmem:[%s3736_s13 + $0x88] sm:$0xff] %v1977_v40  ;;  %v1856_v7 = vadd.f32 %v1831_v30, %v1735_v25  ;;  %v1471_v2 = vpop.f32.mrf.mxu1 }
 0x24b   : >> { %v1494_v31 = vadd.f32 %v1471_v2, %v3706_v59 }
 0x24c   : >> { %v1876_v43 = vadd.f32 %v3726_v6, %v1856_v7  ;;  %v1592_v35 = vpop.f32.mrf.mxu2 }
 0x24d   : >> { %v1615_v5 = vadd.f32 %v1592_v35, %v1494_v31 }
 0x24e   : >> { %vm1893_vm4 = vcmp.ge.f32.partialorder %v1876_v43, 0.0  ;;  %v1910_v61 = vmul.f32 %v1876_v43, %v2988_v33 }
 0x24f   : >> { %v1713_v45 = vpop.f32.mrf.mxu3 }
 0x250   : >> { %v1927_v48 = vsel %vm1893_vm4, %v1876_v43, %v1910_v61  ;;  %v1736_v14 = vadd.f32 %v1713_v45, %v1615_v5  ;;  %v1834_v53 = vpop.f32.mrf.mxu0 }
 0x251   : >> { %v1978_v22 = vsel %vm2971_vm11, %v1927_v48, 0.0 }
 0x252   : >> { %2391 = vst [vmem:[%s3736_s13 + $0x90] sm:$0xff] %v1978_v22  ;;  %v1857_v32 = vadd.f32 %v1834_v53, %v1736_v14  ;;  %v1474_v57 = vpop.f32.mrf.mxu1 }
 0x253   : >> { %v1495_v59 = vadd.f32 %v1474_v57, %v3713_v41 }
 0x254   : >> { %v1877_v56 = vadd.f32 %v3726_v6, %v1857_v32  ;;  %v1595_v54 = vpop.f32.mrf.mxu2 }
 0x255   : >> { %v1616_v1 = vadd.f32 %v1595_v54, %v1495_v59 }
 0x256   : >> { %vm1894_vm0 = vcmp.ge.f32.partialorder %v1877_v56, 0.0  ;;  %v1911_v60 = vmul.f32 %v1877_v56, %v2988_v33 }
 0x257   : >> { %v1716_v3 = vpop.f32.mrf.mxu3 }
 0x258   : >> { %v1928_v37 = vsel %vm1894_vm0, %v1877_v56, %v1911_v60  ;;  %v1737_v47 = vadd.f32 %v1716_v3, %v1616_v1  ;;  %v1837_v55 = vpop.f32.mrf.mxu0  ;;  %vm3944_vm0 = vnez %v3943_v58 }
 0x259   : >> { %v1979_v8 = vsel %vm2975_vm2, %v1928_v37, 0.0 }
 0x25a   : >> { %2392 = vst [vmem:[%s3736_s13 + $0x98] sm:$0xff] %v1979_v8  ;;  %v1858_v0 = vadd.f32 %v1837_v55, %v1737_v47  ;;  %v1477_v42 = vpop.f32.mrf.mxu1 }
 0x25b   : >> { %v1496_v41 = vadd.f32 %v1477_v42, %v3722_v49 }
 0x25c   : >> { %v1878_v50 = vadd.f32 %v3726_v6, %v1858_v0  ;;  %v1598_v34 = vpop.f32.mrf.mxu2 }
 0x25d   : >> { %v1617_v38 = vadd.f32 %v1598_v34, %v1496_v41 }
 0x25e   : >> { %vm1895_vm1 = vcmp.ge.f32.partialorder %v1878_v50, 0.0  ;;  %v1912_v9 = vmul.f32 %v1878_v50, %v2988_v33 }
 0x25f   : >> { %v1719_v46 = vpop.f32.mrf.mxu3 }
 0x260   : >> { %v1929_v63 = vsel %vm1895_vm1, %v1878_v50, %v1912_v9  ;;  %v1738_v39 = vadd.f32 %v1719_v46, %v1617_v38  ;;  %v1840_v17 = vpop.f32.mrf.mxu0 }
 0x261   : >> { %v1980_v51 = vsel %vm2979_vm15, %v1929_v63, 0.0 }
 0x262   : >> { %2393 = vst [vmem:[%s3736_s13 + $0xa0] sm:$0xff] %v1980_v51  ;;  %v1859_v10 = vadd.f32 %v1840_v17, %v1738_v39 }
 0x264   : >> { %v1879_v52 = vadd.f32 %v3726_v6, %v1859_v10 }
 0x266   : >> { %vm1896_vm4 = vcmp.ge.f32.partialorder %v1879_v52, 0.0  ;;  %v1913_v49 = vmul.f32 %v1879_v52, %v2988_v33  ;;  %803 = sbr.rel (!%p801_p4) target bundleno = 139 (0x8b), region = 87 }
 0x268   : >> { %v1930_v13 = vsel %vm1896_vm4, %v1879_v52, %v1913_v49 }
 0x269   : >> { %v1981_v15 = vsel %vm3944_vm0, %v1930_v13, 0.0 }
 0x26a   : >> { %2394 = vst [vmem:[%s3736_s13 + $0xa8] sm:$0xff] %v1981_v15 }
 0x26b PF: > { %s13_s12 = sadd.s32 1, %s2475_s12  }
 0x26c   : > { %p10_p5 = scmp.ge.s32.totalorder %s13_s12, 4  }
 0x26e   :  { %12 = sbr.rel (!%p10_p5) target bundleno = 1 (0x1), region = 98 }

// kernel: zsl_cnn_forward.9
= control target key start
LH: loop header
LB: loop body
LE: loop exit
PB: predicated region body
PF: predicated region fallthrough
CT: control target
= control target key end

     0   :  { %s2126_s21 = smov 0   ;;  %s3076_s0 = inlined_call_operand.vmem [shape: f32[2,1168,128], index: 0, kind: input, shape index: {}]   ;;  %s3077_s1 = inlined_call_operand.vmem [shape: f32[2,1168,16], index: 1, kind: input, shape index: {}]   ;;  %s3078_s2 = inlined_call_operand.vmem [shape: f32[9,128,8], index: 2, kind: input, shape index: {}]   ;;  %s3079_s3 = inlined_call_operand.vmem [shape: f32[1,8], index: 3, kind: input, shape index: {}]   ;;  %s3080_s4 = inlined_call_operand.vmem [shape: f32[8,16], index: 4, kind: input, shape index: {}]   ;;  %s3081_s5 = inlined_call_operand.vmem [shape: f32[2,1088,8], index: 5, kind: output, shape index: {0}]   ;;  %s3082_s6 = inlined_call_operand.vmem [shape: f32[2,1088,16], index: 6, kind: output, shape index: {1}]  }
   0x1 LB: > { %s1699_s22 = sadd.s32 4294967295, %s2085_s21   ;;  %p1703_p0 = scmp.ge.s32.totalorder %s2085_s21, 1  ;;  %s2085_s21 = sphi %s2126_s21, %s17_s21  }
   0x2   : > { %p225_p1 = scmp.lt.s32.totalorder %s2085_s21, 3 }
   0x4   : > { %p226_p2 = pnand %p1703_p0, %p225_p1 }
   0x5   : > { %p265_p3 = scmp.lt.s32.totalorder (!%p226_p2), %s1699_s22, 1  ;;  %s2164_s17 = smov (!%p226_p2), 0  }
   0x6   : > { %229 = sbr.rel (%p226_p2) target bundleno = 645 (0x285), region = 40 }
   0xb   : > { %v2137_v0 = vld [vmem:[%s3079_s3] sm:$0x1]  ;;  %s3084_s22 = smov (!%p265_p3, %s1699_s22), 1 }
   0xc   : > { %v2142_v1 = vld [vmem:[%s3080_s4] sm:$0xff]  ;;  %s2057_s27 = smul.u32 1168, %s3084_s22 }
   0xd   : > { %s2058_s28 = smul.u32 1088, %s3084_s22 }
   0xe   : > { %s2147_s7 = scalar_lea.vmem %s3076_s0, %s2057_s27  ;;  %s2152_s10 = scalar_lea.vmem %s3077_s1, %s2057_s27 }
   0xf   : > { %s2157_s13 = scalar_lea.vmem %s3081_s5, %s2058_s28  ;;  %s2162_s16 = scalar_lea.vmem %s3082_s6, %s2058_s28 }
  0x10 LB: >> { %v1757_v2 = vld [vmem:[%s3078_s2 + $0xf8] sm:$0xff]  ;;  %v1756_v4 = vld [vmem:[%s3078_s2 + $0xf0] sm:$0xff]  ;;  %v1755_v6 = vld [vmem:[%s3078_s2 + $0xe8] sm:$0xff]  ;;  %s2248_s14 = smul.u32 136, %s2089_s17  ;;  %vm1404_vm0 = vcmask 64512   ;;  %vm1542_vm1 = vcmask 130048   ;;  %s2089_s17 = sphi %s2164_s17, %s292_s17  }
  0x11   : >> { %v328_v3 = vld [vmem:[%s3078_s2 + $0x78] sm:$0xff]  ;;  %2025 = vmatpush.msra.mxu2 %v1757_v2  ;;  %v327_v5 = vld [vmem:[%s3078_s2 + $0x70] sm:$0xff]  ;;  %365 = vmatpush.msra.mxu0 %v1757_v2  ;;  %v326_v7 = vld [vmem:[%s3078_s2 + $0x68] sm:$0xff]  ;;  %s292_s17 = sadd.s32 1, %s2089_s17  }
  0x12   : >> { %2041 = vmatpush.msra.mxu3 %v328_v3  ;;  %433 = vmatpush.msra.mxu1 %v328_v3  ;;  %v1754_v8 = vld [vmem:[%s3078_s2 + $0xe0] sm:$0xff]  ;;  %v1753_v10 = vld [vmem:[%s3078_s2 + $0xd8] sm:$0xff]  ;;  %v1752_v12 = vld [vmem:[%s3078_s2 + $0xd0] sm:$0xff]  ;;  %s2264_s26 = scalar_lea.vmem %s2147_s7, %s2248_s14  ;;  %s2914_s8 = scalar_lea.vmem %s2152_s10, %s2248_s14 }
  0x13   : >> { %2026 = vmatpush.msra.mxu2 %v1756_v4  ;;  %366 = vmatpush.msra.mxu0 %v1756_v4  ;;  %v325_v9 = vld [vmem:[%s3078_s2 + $0x60] sm:$0xff]  ;;  %v324_v11 = vld [vmem:[%s3078_s2 + $0x58] sm:$0xff]  ;;  %v323_v13 = vld [vmem:[%s3078_s2 + $0x50] sm:$0xff]  ;;  %s2924_s9 = scalar_lea.vmem %s2157_s13, %s2248_s14  ;;  %p289_p4 = scmp.ge.s32.totalorder %s292_s17, 8  }
  0x14   : >> { %2042 = vmatpush.msra.mxu3 %v327_v5  ;;  %434 = vmatpush.msra.mxu1 %v327_v5  ;;  %v1751_v14 = vld [vmem:[%s3078_s2 + $0xc8] sm:$0xff]  ;;  %v1750_v16 = vld [vmem:[%s3078_s2 + $0xc0] sm:$0xff]  ;;  %v1749_v18 = vld [vmem:[%s3078_s2 + $0xb8] sm:$0xff] }
  0x15   : >> { %2027 = vmatpush.msra.mxu2 %v1755_v6  ;;  %367 = vmatpush.msra.mxu0 %v1755_v6  ;;  %v322_v15 = vld [vmem:[%s3078_s2 + $0x48] sm:$0xff]  ;;  %v321_v17 = vld [vmem:[%s3078_s2 + $0x40] sm:$0xff]  ;;  %v320_v19 = vld [vmem:[%s3078_s2 + $0x38] sm:$0xff] }
  0x16   : >> { %2043 = vmatpush.msra.mxu3 %v326_v7  ;;  %435 = vmatpush.msra.mxu1 %v326_v7  ;;  %v1748_v20 = vld [vmem:[%s3078_s2 + $0xb0] sm:$0xff]  ;;  %v1747_v22 = vld [vmem:[%s3078_s2 + $0xa8] sm:$0xff]  ;;  %v1746_v24 = vld [vmem:[%s3078_s2 + $0xa0] sm:$0xff] }
  0x17   : >> { %2028 = vmatpush.msra.mxu2 %v1754_v8  ;;  %368 = vmatpush.msra.mxu0 %v1754_v8  ;;  %v319_v21 = vld [vmem:[%s3078_s2 + $0x30] sm:$0xff]  ;;  %v318_v23 = vld [vmem:[%s3078_s2 + $0x28] sm:$0xff]  ;;  %v317_v25 = vld [vmem:[%s3078_s2 + $0x20] sm:$0xff] }
  0x18   : >> { %2044 = vmatpush.msra.mxu3 %v325_v9  ;;  %436 = vmatpush.msra.mxu1 %v325_v9  ;;  %v1745_v26 = vld [vmem:[%s3078_s2 + $0x98] sm:$0xff]  ;;  %v1744_v28 = vld [vmem:[%s3078_s2 + $0x90] sm:$0xff]  ;;  %v1743_v30 = vld [vmem:[%s3078_s2 + $0x88] sm:$0xff] }
  0x19   : >> { %2029 = vmatpush.msra.mxu2 %v1753_v10  ;;  %369 = vmatpush.msra.mxu0 %v1753_v10  ;;  %v316_v27 = vld [vmem:[%s3078_s2 + $0x18] sm:$0xff]  ;;  %v315_v29 = vld [vmem:[%s3078_s2 + $0x10] sm:$0xff]  ;;  %v314_v31 = vld [vmem:[%s3078_s2 + $0x8] sm:$0xff] }
  0x1a   : >> { %2045 = vmatpush.msra.mxu3 %v324_v11  ;;  %437 = vmatpush.msra.mxu1 %v324_v11  ;;  %v1742_v32 = vld [vmem:[%s3078_s2 + $0x80] sm:$0xff]  ;;  %v1734_v34 = vld [vmem:[%s2264_s26 + $0x4e] sm:$0xff]  ;;  %v1790_v36 = vld [vmem:[%s3078_s2 + $0x178] sm:$0xff] }
  0x1b   : >> { %2030 = vmatpush.msra.mxu2 %v1752_v12  ;;  %370 = vmatpush.msra.mxu0 %v1752_v12  ;;  %v313_v33 = vld [vmem:[%s3078_s2] sm:$0xff]  ;;  %v1717_v35 = vld [vmem:[%s2264_s26 + $0x4d] sm:$0xff]  ;;  %v1823_v39 = vld [vmem:[%s3078_s2 + $0x1f8] sm:$0xff] }
  0x1c   : >> { %2046 = vmatpush.msra.mxu3 %v323_v13  ;;  %438 = vmatpush.msra.mxu1 %v323_v13  ;;  %v1725_v37 = vld [vmem:[%s2264_s26 + $0x6] sm:$0xff]  ;;  %v1856_v40 = vld [vmem:[%s3078_s2 + $0x278] sm:$0xff]  ;;  %v1789_v41 = vld [vmem:[%s3078_s2 + $0x170] sm:$0xff] }
  0x1d   : >> { %2031 = vmatpush.msra.mxu2 %v1751_v14  ;;  %371 = vmatpush.msra.mxu0 %v1751_v14  ;;  %v1708_v38 = vld [vmem:[%s2264_s26 + $0x5] sm:$0xff]  ;;  %v1822_v42 = vld [vmem:[%s3078_s2 + $0x1f0] sm:$0xff]  ;;  %v1786_v53 = vld [vmem:[%s3078_s2 + $0x158] sm:$0xff] }
  0x1e   : >> { %2047 = vmatpush.msra.mxu3 %v322_v15  ;;  %439 = vmatpush.msra.mxu1 %v322_v15  ;;  %v1855_v43 = vld [vmem:[%s3078_s2 + $0x270] sm:$0xff]  ;;  %v1788_v44 = vld [vmem:[%s3078_s2 + $0x168] sm:$0xff]  ;;  %v1787_v49 = vld [vmem:[%s3078_s2 + $0x160] sm:$0xff] }
  0x1f   : >> { %2032 = vmatpush.msra.mxu2 %v1750_v16  ;;  %372 = vmatpush.msra.mxu0 %v1750_v16  ;;  %v1821_v45 = vld [vmem:[%s3078_s2 + $0x1e8] sm:$0xff]  ;;  %v1735_v46 = vld [vmem:[%s2264_s26 + $0x56] sm:$0xff]  ;;  %v1820_v51 = vld [vmem:[%s3078_s2 + $0x1e0] sm:$0xff] }
  0x20   : >> { %2048 = vmatpush.msra.mxu3 %v321_v17  ;;  %440 = vmatpush.msra.mxu1 %v321_v17  ;;  %v1718_v47 = vld [vmem:[%s2264_s26 + $0x55] sm:$0xff]  ;;  %v1854_v48 = vld [vmem:[%s3078_s2 + $0x268] sm:$0xff]  ;;  %v1853_v54 = vld [vmem:[%s3078_s2 + $0x260] sm:$0xff] }
  0x21   : >> { %2033 = vmatpush.msra.mxu2 %v1749_v18  ;;  %373 = vmatpush.msra.mxu0 %v1749_v18  ;;  %v1726_v50 = vld [vmem:[%s2264_s26 + $0xe] sm:$0xff]  ;;  %v1819_v55 = vld [vmem:[%s3078_s2 + $0x1d8] sm:$0xff]  ;;  %v1783_v5 = vld [vmem:[%s3078_s2 + $0x140] sm:$0xff] }
  0x22   : >> { %2049 = vmatpush.msra.mxu3 %v320_v19  ;;  %441 = vmatpush.msra.mxu1 %v320_v19  ;;  %v1709_v52 = vld [vmem:[%s2264_s26 + $0xd] sm:$0xff]  ;;  %v1852_v57 = vld [vmem:[%s3078_s2 + $0x258] sm:$0xff]  ;;  %v1816_v8 = vld [vmem:[%s3078_s2 + $0x1c0] sm:$0xff] }
  0x23   : >> { %2034 = vmatpush.msra.mxu2 %v1748_v20  ;;  %374 = vmatpush.msra.mxu0 %v1748_v20  ;;  %v1785_v56 = vld [vmem:[%s3078_s2 + $0x150] sm:$0xff]  ;;  %v1784_v59 = vld [vmem:[%s3078_s2 + $0x148] sm:$0xff]  ;;  %v1889_v60 = vld [vmem:[%s3078_s2 + $0x2f8] sm:$0xff] }
  0x24   : >> { %2050 = vmatpush.msra.mxu3 %v319_v21  ;;  %442 = vmatpush.msra.mxu1 %v319_v21  ;;  %v1818_v58 = vld [vmem:[%s3078_s2 + $0x1d0] sm:$0xff]  ;;  %v1736_v61 = vld [vmem:[%s2264_s26 + $0x5e] sm:$0xff]  ;;  %v1817_v3 = vld [vmem:[%s3078_s2 + $0x1c8] sm:$0xff] }
  0x25   : >> { %2035 = vmatpush.msra.mxu2 %v1747_v22  ;;  %375 = vmatpush.msra.mxu0 %v1747_v22  ;;  %v1719_v62 = vld [vmem:[%s2264_s26 + $0x5d] sm:$0xff]  ;;  %v1888_v63 = vld [vmem:[%s3078_s2 + $0x2f0] sm:$0xff]  ;;  %v1850_v7 = vld [vmem:[%s3078_s2 + $0x248] sm:$0xff] }
  0x26   : >> { %2051 = vmatpush.msra.mxu3 %v318_v23  ;;  %443 = vmatpush.msra.mxu1 %v318_v23  ;;  %v1851_v2 = vld [vmem:[%s3078_s2 + $0x250] sm:$0xff]  ;;  %v1782_v9 = vld [vmem:[%s3078_s2 + $0x138] sm:$0xff]  ;;  %v1849_v10 = vld [vmem:[%s3078_s2 + $0x240] sm:$0xff] }
  0x27   : >> { %2036 = vmatpush.msra.mxu2 %v1746_v24  ;;  %376 = vmatpush.msra.mxu0 %v1746_v24  ;;  %v1727_v4 = vld [vmem:[%s2264_s26 + $0x16] sm:$0xff]  ;;  %v1887_v11 = vld [vmem:[%s3078_s2 + $0x2e8] sm:$0xff]  ;;  %v1886_v15 = vld [vmem:[%s3078_s2 + $0x2e0] sm:$0xff] }
  0x28   : >> { %2052 = vmatpush.msra.mxu3 %v317_v25  ;;  %444 = vmatpush.msra.mxu1 %v317_v25  ;;  %v1710_v6 = vld [vmem:[%s2264_s26 + $0x15] sm:$0xff]  ;;  %v1737_v16 = vld [vmem:[%s2264_s26 + $0x66] sm:$0xff]  ;;  %v1728_v20 = vld [vmem:[%s2264_s26 + $0x1e] sm:$0xff] }
  0x29   : >> { %2037 = vmatpush.msra.mxu2 %v1745_v26  ;;  %377 = vmatpush.msra.mxu0 %v1745_v26  ;;  %v1815_v12 = vld [vmem:[%s3078_s2 + $0x1b8] sm:$0xff]  ;;  %v1781_v13 = vld [vmem:[%s3078_s2 + $0x130] sm:$0xff]  ;;  %v1720_v17 = vld [vmem:[%s2264_s26 + $0x65] sm:$0xff] }
  0x2a   : >> { %2053 = vmatpush.msra.mxu3 %v316_v27  ;;  %445 = vmatpush.msra.mxu1 %v316_v27  ;;  %v1848_v14 = vld [vmem:[%s3078_s2 + $0x238] sm:$0xff]  ;;  %v1814_v18 = vld [vmem:[%s3078_s2 + $0x1b0] sm:$0xff]  ;;  %v1780_v19 = vld [vmem:[%s3078_s2 + $0x128] sm:$0xff] }
  0x2b   : >> { %2038 = vmatpush.msra.mxu2 %v1744_v28  ;;  %378 = vmatpush.msra.mxu0 %v1744_v28  ;;  %v1885_v21 = vld [vmem:[%s3078_s2 + $0x2d8] sm:$0xff]  ;;  %v1813_v23 = vld [vmem:[%s3078_s2 + $0x1a8] sm:$0xff]  ;;  %v1847_v24 = vld [vmem:[%s3078_s2 + $0x230] sm:$0xff] }
  0x2c   : >> { %2054 = vmatpush.msra.mxu3 %v315_v29  ;;  %446 = vmatpush.msra.mxu1 %v315_v29  ;;  %v1711_v22 = vld [vmem:[%s2264_s26 + $0x1d] sm:$0xff]  ;;  %v1884_v27 = vld [vmem:[%s3078_s2 + $0x2d0] sm:$0xff]  ;;  %v1846_v28 = vld [vmem:[%s3078_s2 + $0x228] sm:$0xff] }
  0x2d   : >> { %2039 = vmatpush.msra.mxu2 %v1743_v30  ;;  %379 = vmatpush.msra.mxu0 %v1743_v30  ;;  %v1779_v25 = vld [vmem:[%s3078_s2 + $0x120] sm:$0xff]  ;;  %v1778_v29 = vld [vmem:[%s3078_s2 + $0x118] sm:$0xff] }
  0x2e   : >> { %2055 = vmatpush.msra.mxu3 %v314_v31  ;;  %447 = vmatpush.msra.mxu1 %v314_v31  ;;  %v1812_v26 = vld [vmem:[%s3078_s2 + $0x1a0] sm:$0xff]  ;;  %v1811_v30 = vld [vmem:[%s3078_s2 + $0x198] sm:$0xff]  ;;  %v1883_v31 = vld [vmem:[%s3078_s2 + $0x2c8] sm:$0xff] }
  0x2f   : >> { %2040 = vmatpush.msra.mxu2 %v1742_v32  ;;  %380 = vmatpush.msra.mxu0 %v1742_v32  ;;  %v1738_v32 = vld [vmem:[%s2264_s26 + $0x6e] sm:$0xff] }
  0x30   : >> { %2056 = vmatpush.msra.mxu3 %v313_v33  ;;  %408 = vmatmul.f32.vlgmr.msra.gmra.mxu2 %v1734_v34  ;;  %v1777_v34 = vld [vmem:[%s3078_s2 + $0x110] sm:$0xff] }
  0x31   : >> { %476 = vmatmul.f32.vlgmr.msra.gmra.mxu3 %v1717_v35  ;;  %537 = vmatpush.msrb.mxu2 %v1790_v36  ;;  %v1845_v35 = vld [vmem:[%s3078_s2 + $0x220] sm:$0xff] }
  0x32   : >> { %448 = vmatpush.msra.mxu1 %v313_v33  ;;  %381 = vmatmul.f32.vlgmr.msra.gmra.mxu0 %v1725_v37  ;;  %v1721_v33 = vld [vmem:[%s2264_s26 + $0x6d] sm:$0xff] }
  0x33   : >> { %449 = vmatmul.f32.vlgmr.msra.gmra.mxu1 %v1708_v38  ;;  %658 = vmatpush.msrb.mxu3 %v1823_v39  ;;  %v1729_v36 = vld [vmem:[%s2264_s26 + $0x26] sm:$0xff]  ;;  %v1810_v37 = vld [vmem:[%s3078_s2 + $0x190] sm:$0xff] }
  0x34   : >> { %779 = vmatpush.msrb.mxu0 %v1856_v40  ;;  %538 = vmatpush.msrb.mxu2 %v1789_v41  ;;  %v1712_v38 = vld [vmem:[%s2264_s26 + $0x25] sm:$0xff]  ;;  %v1844_v40 = vld [vmem:[%s3078_s2 + $0x218] sm:$0xff] }
  0x35   : >> { %659 = vmatpush.msrb.mxu3 %v1822_v42  ;;  %900 = vmatpush.msrb.mxu1 %v1889_v60  ;;  %v1776_v39 = vld [vmem:[%s3078_s2 + $0x108] sm:$0xff]  ;;  %v1882_v42 = vld [vmem:[%s3078_s2 + $0x2c0] sm:$0xff] }
  0x36   : >> { %780 = vmatpush.msrb.mxu0 %v1855_v43  ;;  %539 = vmatpush.msrb.mxu2 %v1788_v44  ;;  %v1809_v41 = vld [vmem:[%s3078_s2 + $0x188] sm:$0xff]  ;;  %v1775_v43 = vld [vmem:[%s3078_s2 + $0x100] sm:$0xff]  ;;  %v1843_v44 = vld [vmem:[%s3078_s2 + $0x210] sm:$0xff] }
  0x37   : >> { %660 = vmatpush.msrb.mxu3 %v1821_v45  ;;  %901 = vmatpush.msrb.mxu1 %v1888_v63  ;;  %v1808_v45 = vld [vmem:[%s3078_s2 + $0x180] sm:$0xff]  ;;  %v1877_v63 = vld [vmem:[%s3078_s2 + $0x298] sm:$0xff] }
  0x38   : >> { %411 = vmatmul.f32.gmra.mxu2 %v1735_v46  ;;  %781 = vmatpush.msrb.mxu0 %v1854_v48  ;;  %v1881_v46 = vld [vmem:[%s3078_s2 + $0x2b8] sm:$0xff]  ;;  %v1878_v60 = vld [vmem:[%s3078_s2 + $0x2a0] sm:$0xff] }
  0x39   : >> { %479 = vmatmul.f32.gmra.mxu3 %v1718_v47  ;;  %540 = vmatpush.msrb.mxu2 %v1787_v49  ;;  %v1922_v47 = vld [vmem:[%s3078_s2 + $0x378] sm:$0xff] }
  0x3a   : >> { %384 = vmatmul.f32.gmra.mxu0 %v1726_v50  ;;  %661 = vmatpush.msrb.mxu3 %v1820_v51  ;;  %v1739_v48 = vld [vmem:[%s2264_s26 + $0x76] sm:$0xff]  ;;  %v1842_v51 = vld [vmem:[%s3078_s2 + $0x208] sm:$0xff] }
  0x3b   : >> { %452 = vmatmul.f32.gmra.mxu1 %v1709_v52  ;;  %541 = vmatpush.msrb.mxu2 %v1786_v53  ;;  %v1722_v49 = vld [vmem:[%s2264_s26 + $0x75] sm:$0xff] }
  0x3c   : >> { %782 = vmatpush.msrb.mxu0 %v1853_v54  ;;  %662 = vmatpush.msrb.mxu3 %v1819_v55  ;;  %v1880_v50 = vld [vmem:[%s3078_s2 + $0x2b0] sm:$0xff]  ;;  %v1955_v53 = vld [vmem:[%s3078_s2 + $0x3f8] sm:$0xff]  ;;  %v1841_v55 = vld [vmem:[%s3078_s2 + $0x200] sm:$0xff] }
  0x3d   : >> { %542 = vmatpush.msrb.mxu2 %v1785_v56  ;;  %902 = vmatpush.msrb.mxu1 %v1887_v11  ;;  %v1730_v52 = vld [vmem:[%s2264_s26 + $0x2e] sm:$0xff]  ;;  %v1874_v11 = vld [vmem:[%s3078_s2 + $0x280] sm:$0xff] }
  0x3e   : >> { %783 = vmatpush.msrb.mxu0 %v1852_v57  ;;  %663 = vmatpush.msrb.mxu3 %v1818_v58  ;;  %v1713_v54 = vld [vmem:[%s2264_s26 + $0x2d] sm:$0xff]  ;;  %v1988_v58 = vld [vmem:[%s3078_s2 + $0x478] sm:$0xff] }
  0x3f   : >> { %543 = vmatpush.msrb.mxu2 %v1784_v59  ;;  %903 = vmatpush.msrb.mxu1 %v1886_v15  ;;  %v1879_v56 = vld [vmem:[%s3078_s2 + $0x2a8] sm:$0xff]  ;;  %v1921_v57 = vld [vmem:[%s3078_s2 + $0x370] sm:$0xff] }
  0x40   : >> { %414 = vmatmul.f32.gmra.mxu2 %v1736_v61  ;;  %784 = vmatpush.msrb.mxu0 %v1851_v2  ;;  %v1954_v59 = vld [vmem:[%s3078_s2 + $0x3f0] sm:$0xff]  ;;  %v1740_v61 = vld [vmem:[%s2264_s26 + $0x7e] sm:$0xff]  ;;  %v1986_v15 = vld [vmem:[%s3078_s2 + $0x468] sm:$0xff] }
  0x41   : >> { %482 = vmatmul.f32.gmra.mxu3 %v1719_v62  ;;  %544 = vmatpush.msrb.mxu2 %v1783_v5  ;;  %v1723_v62 = vld [vmem:[%s2264_s26 + $0x7d] sm:$0xff]  ;;  %v1876_v5 = vld [vmem:[%s3078_s2 + $0x290] sm:$0xff] }
  0x42   : >> { %664 = vmatpush.msrb.mxu3 %v1817_v3  ;;  %387 = vmatmul.f32.gmra.mxu0 %v1727_v4  ;;  %v1731_v2 = vld [vmem:[%s2264_s26 + $0x36] sm:$0xff]  ;;  %v1920_v4 = vld [vmem:[%s3078_s2 + $0x368] sm:$0xff] }
  0x43   : >> { %455 = vmatmul.f32.gmra.mxu1 %v1710_v6  ;;  %785 = vmatpush.msrb.mxu0 %v1850_v7  ;;  %v1714_v3 = vld [vmem:[%s2264_s26 + $0x35] sm:$0xff]  ;;  %v1953_v6 = vld [vmem:[%s3078_s2 + $0x3e8] sm:$0xff] }
  0x44   : >> { %665 = vmatpush.msrb.mxu3 %v1816_v8  ;;  %545 = vmatpush.msrb.mxu2 %v1782_v9  ;;  %v1987_v7 = vld [vmem:[%s3078_s2 + $0x470] sm:$0xff]  ;;  %v1875_v8 = vld [vmem:[%s3078_s2 + $0x288] sm:$0xff] }
  0x45   : >> { %786 = vmatpush.msrb.mxu0 %v1849_v10  ;;  %904 = vmatpush.msrb.mxu1 %v1885_v21  ;;  %v1741_v9 = vld [vmem:[%s2264_s26 + $0x86] sm:$0xff]  ;;  %v1918_v21 = vld [vmem:[%s3078_s2 + $0x358] sm:$0xff] }
  0x46   : >> { %666 = vmatpush.msrb.mxu3 %v1815_v12  ;;  %546 = vmatpush.msrb.mxu2 %v1781_v13  ;;  %v1724_v10 = vld [vmem:[%s2264_s26 + $0x85] sm:$0xff]  ;;  %v1715_v13 = vld [vmem:[%s2264_s26 + $0x3d] sm:$0xff] }
  0x47   : >> { %787 = vmatpush.msrb.mxu0 %v1848_v14  ;;  %905 = vmatpush.msrb.mxu1 %v1884_v27  ;;  %v1732_v12 = vld [vmem:[%s2264_s26 + $0x3e] sm:$0xff]  ;;  %v1857_v27 = vld [vmem:[%s2264_s26 + $0x29] sm:$0xff] }
  0x48   : >> { %417 = vmatmul.f32.gmra.mxu2 %v1737_v16  ;;  %667 = vmatpush.msrb.mxu3 %v1814_v18  ;;  %v1919_v14 = vld [vmem:[%s3078_s2 + $0x360] sm:$0xff] }
  0x49   : >> { %485 = vmatmul.f32.gmra.mxu3 %v1720_v17  ;;  %547 = vmatpush.msrb.mxu2 %v1780_v19  ;;  %v1952_v16 = vld [vmem:[%s3078_s2 + $0x3e0] sm:$0xff] }
  0x4a   : >> { %390 = vmatmul.f32.gmra.mxu0 %v1728_v20  ;;  %668 = vmatpush.msrb.mxu3 %v1813_v23  ;;  %v1758_v17 = vld [vmem:[%s2264_s26 + $0x7] sm:$0xff] }
  0x4b   : >> { %458 = vmatmul.f32.gmra.mxu1 %v1711_v22  ;;  %788 = vmatpush.msrb.mxu0 %v1847_v24  ;;  %v1791_v18 = vld [vmem:[%s2264_s26 + $0x27] sm:$0xff]  ;;  %v1951_v22 = vld [vmem:[%s3078_s2 + $0x3d8] sm:$0xff]  ;;  %v1759_v24 = vld [vmem:[%s2264_s26 + $0xf] sm:$0xff] }
  0x4c   : >> { %548 = vmatpush.msrb.mxu2 %v1779_v25  ;;  %669 = vmatpush.msrb.mxu3 %v1812_v26  ;;  %v1733_v19 = vld [vmem:[%s2264_s26 + $0x46] sm:$0xff]  ;;  %v1792_v25 = vld [vmem:[%s2264_s26 + $0x2f] sm:$0xff] }
  0x4d   : >> { %789 = vmatpush.msrb.mxu0 %v1846_v28  ;;  %906 = vmatpush.msrb.mxu1 %v1883_v31  ;;  %v1716_v20 = vld [vmem:[%s2264_s26 + $0x45] sm:$0xff]  ;;  %v1917_v28 = vld [vmem:[%s3078_s2 + $0x350] sm:$0xff] }
  0x4e   : >> { %549 = vmatpush.msrb.mxu2 %v1778_v29  ;;  %670 = vmatpush.msrb.mxu3 %v1811_v30  ;;  %v1985_v23 = vld [vmem:[%s3078_s2 + $0x460] sm:$0xff]  ;;  %v1824_v26 = vld [vmem:[%s2264_s26 + $0x28] sm:$0xff]  ;;  %v1984_v29 = vld [vmem:[%s3078_s2 + $0x458] sm:$0xff] }
  0x4f   : >> { %790 = vmatpush.msrb.mxu0 %v1845_v35  ;;  %907 = vmatpush.msrb.mxu1 %v1882_v42  ;;  %v1950_v30 = vld [vmem:[%s3078_s2 + $0x3d0] sm:$0xff]  ;;  %v1916_v35 = vld [vmem:[%s3078_s2 + $0x348] sm:$0xff]  ;;  %v1915_v42 = vld [vmem:[%s3078_s2 + $0x340] sm:$0xff] }
  0x50   : >> { %420 = vmatmul.f32.gmra.mxu2 %v1738_v32  ;;  %671 = vmatpush.msrb.mxu3 %v1810_v37  ;;  %v1760_v31 = vld [vmem:[%s2264_s26 + $0x17] sm:$0xff] }
  0x51   : >> { %488 = vmatmul.f32.gmra.mxu3 %v1721_v33  ;;  %550 = vmatpush.msrb.mxu2 %v1777_v34  ;;  %v1793_v32 = vld [vmem:[%s2264_s26 + $0x37] sm:$0xff] }
  0x52   : >> { %393 = vmatmul.f32.gmra.mxu0 %v1729_v36  ;;  %672 = vmatpush.msrb.mxu3 %v1809_v41  ;;  %v1825_v33 = vld [vmem:[%s2264_s26 + $0x30] sm:$0xff]  ;;  %v1949_v36 = vld [vmem:[%s3078_s2 + $0x3c8] sm:$0xff]  ;;  %v1859_v41 = vld [vmem:[%s2264_s26 + $0x39] sm:$0xff] }
  0x53   : >> { %461 = vmatmul.f32.gmra.mxu1 %v1712_v38  ;;  %551 = vmatpush.msrb.mxu2 %v1776_v39  ;;  %v1858_v34 = vld [vmem:[%s2264_s26 + $0x31] sm:$0xff]  ;;  %v1761_v38 = vld [vmem:[%s2264_s26 + $0x1f] sm:$0xff] }
  0x54   : >> { %791 = vmatpush.msrb.mxu0 %v1844_v40  ;;  %673 = vmatpush.msrb.mxu3 %v1808_v45  ;;  %v1983_v37 = vld [vmem:[%s3078_s2 + $0x450] sm:$0xff]  ;;  %v1794_v39 = vld [vmem:[%s2264_s26 + $0x3f] sm:$0xff]  ;;  %v1795_v45 = vld [vmem:[%s2264_s26 + $0x47] sm:$0xff] }
  0x55   : >> { %552 = vmatpush.msrb.mxu2 %v1775_v43  ;;  %908 = vmatpush.msrb.mxu1 %v1881_v46  ;;  %v1826_v40 = vld [vmem:[%s2264_s26 + $0x38] sm:$0xff]  ;;  %v1982_v43 = vld [vmem:[%s3078_s2 + $0x448] sm:$0xff]  ;;  %v1827_v46 = vld [vmem:[%s2264_s26 + $0x40] sm:$0xff] }
  0x56   : >> { %792 = vmatpush.msrb.mxu0 %v1843_v44  ;;  %1142 = vmatpush.msra.mxu3 %v1955_v53  ;;  %v1948_v44 = vld [vmem:[%s3078_s2 + $0x3c0] sm:$0xff]  ;;  %v2597_v53 = vld [vmem:[%s2264_s26 + $0x49] sm:$0xff] }
  0x57   : >> { %1021 = vmatpush.msra.mxu2 %v1922_v47  ;;  %909 = vmatpush.msrb.mxu1 %v1880_v50  ;;  %v1860_v47 = vld [vmem:[%s2264_s26 + $0x41] sm:$0xff]  ;;  %v1796_v50 = vld [vmem:[%s2264_s26 + $0x4f] sm:$0xff] }
  0x58   : >> { %423 = vmatmul.f32.gmra.mxu2 %v1739_v48  ;;  %793 = vmatpush.msrb.mxu0 %v1842_v51  ;;  %v1914_v48 = vld [vmem:[%s3078_s2 + $0x338] sm:$0xff]  ;;  %v1981_v51 = vld [vmem:[%s3078_s2 + $0x440] sm:$0xff] }
  0x59   : >> { %491 = vmatmul.f32.gmra.mxu3 %v1722_v49  ;;  %910 = vmatpush.msrb.mxu1 %v1879_v56  ;;  %v1947_v49 = vld [vmem:[%s3078_s2 + $0x3b8] sm:$0xff] }
  0x5a   : >> { %396 = vmatmul.f32.gmra.mxu0 %v1730_v52  ;;  %1022 = vmatpush.msra.mxu2 %v1921_v57  ;;  %v1828_v52 = vld [vmem:[%s2264_s26 + $0x48] sm:$0xff]  ;;  %v1797_v56 = vld [vmem:[%s2264_s26 + $0x57] sm:$0xff] }
  0x5b   : >> { %464 = vmatmul.f32.gmra.mxu1 %v1713_v54  ;;  %794 = vmatpush.msrb.mxu0 %v1841_v55  ;;  %v1913_v54 = vld [vmem:[%s3078_s2 + $0x330] sm:$0xff]  ;;  %v1980_v55 = vld [vmem:[%s3078_s2 + $0x438] sm:$0xff] }
  0x5c   : >> { %1143 = vmatpush.msra.mxu3 %v1954_v59  ;;  %911 = vmatpush.msrb.mxu1 %v1878_v60  ;;  %v1829_v57 = vld [vmem:[%s2264_s26 + $0x50] sm:$0xff]  ;;  %v1912_v60 = vld [vmem:[%s3078_s2 + $0x328] sm:$0xff] }
  0x5d   : >> { %1263 = vmatpush.msra.mxu0 %v1988_v58  ;;  %1023 = vmatpush.msra.mxu2 %v1920_v4  ;;  %v2609_v58 = vld [vmem:[%s2264_s26 + $0x51] sm:$0xff]  ;;  %v1911_v4 = vld [vmem:[%s3078_s2 + $0x320] sm:$0xff] }
  0x5e   : >> { %912 = vmatpush.msrb.mxu1 %v1877_v63  ;;  %1144 = vmatpush.msra.mxu3 %v1953_v6  ;;  %v1946_v59 = vld [vmem:[%s3078_s2 + $0x3b0] sm:$0xff]  ;;  %v2624_v63 = vld [vmem:[%s2264_s26 + $0x59] sm:$0xff] }
  0x5f   : >> { %1264 = vmatpush.msra.mxu0 %v1987_v7  ;;  %1024 = vmatpush.msra.mxu2 %v1919_v14  ;;  %v1831_v7 = vld [vmem:[%s2264_s26 + $0x60] sm:$0xff]  ;;  %v1910_v14 = vld [vmem:[%s3078_s2 + $0x318] sm:$0xff] }
  0x60   : >> { %426 = vmatmul.f32.gmra.mxu2 %v1740_v61  ;;  %913 = vmatpush.msrb.mxu1 %v1876_v5  ;;  %v2619_v61 = vld [vmem:[%s2264_s26 + $0x5f] sm:$0xff]  ;;  %v2637_v5 = vld [vmem:[%s2264_s26 + $0x67] sm:$0xff] }
  0x61   : >> { %494 = vmatmul.f32.gmra.mxu3 %v1723_v62  ;;  %1265 = vmatpush.msra.mxu0 %v1986_v15  ;;  %v1830_v62 = vld [vmem:[%s2264_s26 + $0x58] sm:$0xff]  ;;  %v2659_v15 = vld [vmem:[%s2264_s26 + $0x6f] sm:$0xff] }
  0x62   : >> { %399 = vmatmul.f32.gmra.mxu0 %v1731_v2  ;;  %914 = vmatpush.msrb.mxu1 %v1875_v8  ;;  %v1945_v2 = vld [vmem:[%s3078_s2 + $0x3a8] sm:$0xff] }
  0x63   : >> { %467 = vmatmul.f32.gmra.mxu1 %v1714_v3  ;;  %1145 = vmatpush.msra.mxu3 %v1952_v16  ;;  %v1979_v3 = vld [vmem:[%s3078_s2 + $0x430] sm:$0xff]  ;;  %v2644_v8 = vld [vmem:[%s2264_s26 + $0x61] sm:$0xff] }
  0x64   : >> { %915 = vmatpush.msrb.mxu1 %v1874_v11  ;;  %1025 = vmatpush.msra.mxu2 %v1918_v21 }
  0x65   : >> { %1146 = vmatpush.msra.mxu3 %v1951_v22  ;;  %1266 = vmatpush.msra.mxu0 %v1985_v23 }
  0x66   : >> { %1488 = vmatpush.msra.mxu1 %v2142_v1  ;;  %1026 = vmatpush.msra.mxu2 %v1917_v28  ;;  %v1909_v28 = vld [vmem:[%s3078_s2 + $0x310] sm:$0xff] }
  0x67   : >> { %1267 = vmatpush.msra.mxu0 %v1984_v29  ;;  %1147 = vmatpush.msra.mxu3 %v1950_v30  ;;  %v1976_v29 = vld [vmem:[%s3078_s2 + $0x418] sm:$0xff]  ;;  %v1942_v30 = vld [vmem:[%s3078_s2 + $0x390] sm:$0xff] }
  0x68   : >> { %429 = vmatmul.f32.gmra.mxu2 %v1741_v9  ;;  %v1978_v9 = vld [vmem:[%s3078_s2 + $0x428] sm:$0xff] }
  0x69   : >> { %497 = vmatmul.f32.gmra.mxu3 %v1724_v10  ;;  %1027 = vmatpush.msra.mxu2 %v1916_v35  ;;  %v1944_v10 = vld [vmem:[%s3078_s2 + $0x3a0] sm:$0xff] }
  0x6a   : >> { %402 = vmatmul.f32.gmra.mxu0 %v1732_v12  ;;  %1148 = vmatpush.msra.mxu3 %v1949_v36  ;;  %v1834_v36 = vld [vmem:[%s2264_s26 + $0x78] sm:$0xff] }
  0x6b   : >> { %470 = vmatmul.f32.gmra.mxu1 %v1715_v13  ;;  %1268 = vmatpush.msra.mxu0 %v1983_v37  ;;  %v2705_v37 = vld [vmem:[%s2264_s26 + $0x79] sm:$0xff] }
  0x6c   : >> { %1028 = vmatpush.msra.mxu2 %v1915_v42  ;;  %1149 = vmatpush.msra.mxu3 %v1948_v44  ;;  %v1803_v44 = vld [vmem:[%s2264_s26 + $0x87] sm:$0xff] }
  0x6d   : >> { %1269 = vmatpush.msra.mxu0 %v1982_v43 }
  0x6e   : >> { %1029 = vmatpush.msra.mxu2 %v1914_v48  ;;  %1150 = vmatpush.msra.mxu3 %v1947_v49  ;;  %v1907_v48 = vld [vmem:[%s3078_s2 + $0x300] sm:$0xff]  ;;  %v1974_v49 = vld [vmem:[%s3078_s2 + $0x408] sm:$0xff] }
  0x6f   : >> { %1270 = vmatpush.msra.mxu0 %v1981_v51 }
  0x70   : >> { %553 = vmatmul.f32.vlgmr.msrb.gmra.mxu2 %v1758_v17  ;;  %1151 = vmatpush.msra.mxu3 %v1946_v59  ;;  %v1832_v17 = vld [vmem:[%s2264_s26 + $0x68] sm:$0xff] }
  0x71   : >> { %674 = vmatmul.f32.vlgmr.msrb.gmra.mxu3 %v1791_v18  ;;  %1030 = vmatpush.msra.mxu2 %v1913_v54  ;;  %v2745_v59 = vld [vmem:[%s2264_s26 + $0x89] sm:$0xff] }
  0x72   : >> { %405 = vmatmul.f32.gmra.mxu0 %v1733_v19  ;;  %1152 = vmatpush.msra.mxu3 %v1945_v2  ;;  %v1943_v19 = vld [vmem:[%s3078_s2 + $0x398] sm:$0xff] }
  0x73   : >> { %473 = vmatmul.f32.gmra.mxu1 %v1716_v20  ;;  %1271 = vmatpush.msra.mxu0 %v1980_v55  ;;  %v1977_v20 = vld [vmem:[%s3078_s2 + $0x420] sm:$0xff]  ;;  %v1804_v55 = vld [vmem:[%s2264_s26 + $0x8f] sm:$0xff] }
  0x74   : >> { %1031 = vmatpush.msra.mxu2 %v1912_v60  ;;  %1153 = vmatpush.msra.mxu3 %v1944_v10  ;;  %v1973_v60 = vld [vmem:[%s3078_s2 + $0x400] sm:$0xff] }
  0x75   : >> { %1272 = vmatpush.msra.mxu0 %v1979_v3  ;;  %v1805_v3 = vld [vmem:[%s2264_s26 + $0x97] sm:$0xff] }
  0x76   : >> { %1032 = vmatpush.msra.mxu2 %v1911_v4  ;;  %1154 = vmatpush.msra.mxu3 %v1943_v19 }
  0x77   : >> { %1273 = vmatpush.msra.mxu0 %v1978_v9  ;;  %v2759_v9 = vld [vmem:[%s2264_s26 + $0x91] sm:$0xff] }
  0x78   : >> { %556 = vmatmul.f32.gmra.mxu2 %v1759_v24  ;;  %v2678_v24 = vld [vmem:[%s2264_s26 + $0x77] sm:$0xff]  ;;  %1155 = vmatpush.msra.mxu3 %v1942_v30  ;;  %v2779_v30 = vld [vmem:[%s2264_s26 + $0xa1] sm:$0xff] }
  0x79   : >> { %677 = vmatmul.f32.gmra.mxu3 %v1792_v25  ;;  %1033 = vmatpush.msra.mxu2 %v1910_v14  ;;  %v1806_v14 = vld [vmem:[%s2264_s26 + $0x9f] sm:$0xff] }
  0x7a   : >> { %795 = vmatmul.f32.vlgmr.msrb.gmra.mxu0 %v1824_v26  ;;  %v1833_v26 = vld [vmem:[%s2264_s26 + $0x70] sm:$0xff] }
  0x7b   : >> { %916 = vmatmul.f32.vlgmr.msrb.gmra.mxu1 %v1857_v27  ;;  %1274 = vmatpush.msra.mxu0 %v1977_v20  ;;  %v2685_v27 = vld [vmem:[%s2264_s26 + $0x71] sm:$0xff]  ;;  %v2769_v20 = vld [vmem:[%s2264_s26 + $0x99] sm:$0xff] }
  0x7c   : >> { %1034 = vmatpush.msra.mxu2 %v1909_v28 }
  0x7d   : >> { %1275 = vmatpush.msra.mxu0 %v1976_v29  ;;  %v1839_v29 = vld [vmem:[%s2264_s26 + $0xa0] sm:$0xff] }
  0x80   : >> { %559 = vmatmul.f32.gmra.mxu2 %v1760_v31 }
  0x81   : >> { %680 = vmatmul.f32.gmra.mxu3 %v1793_v32 }
  0x82   : >> { %798 = vmatmul.f32.gmra.mxu0 %v1825_v33 }
  0x83   : >> { %919 = vmatmul.f32.gmra.mxu1 %v1858_v34  ;;  %v1802_v34 = vld [vmem:[%s2264_s26 + $0x7f] sm:$0xff] }
  0x88   : >> { %562 = vmatmul.f32.gmra.mxu2 %v1761_v38  ;;  %v1908_v38 = vld [vmem:[%s3078_s2 + $0x308] sm:$0xff] }
  0x89   : >> { %683 = vmatmul.f32.gmra.mxu3 %v1794_v39  ;;  %1035 = vmatpush.msra.mxu2 %v1908_v38 }
  0x8a   : >> { %801 = vmatmul.f32.gmra.mxu0 %v1826_v40  ;;  %v1975_v40 = vld [vmem:[%s3078_s2 + $0x410] sm:$0xff] }
  0x8b   : >> { %922 = vmatmul.f32.gmra.mxu1 %v1859_v41  ;;  %1276 = vmatpush.msra.mxu0 %v1975_v40 }
  0x8c   : >> { %1036 = vmatpush.msra.mxu2 %v1907_v48 }
  0x8d   : >> { %1277 = vmatpush.msra.mxu0 %v1974_v49 }
  0x8f   : >> { %1278 = vmatpush.msra.mxu0 %v1973_v60 }
  0x90   : >> { %565 = vmatmul.f32.gmra.mxu2 %v1791_v18  ;;  %v2666_v18 = vld [vmem:[%s2264_s26 + $0x69] sm:$0xff] }
  0x91   : >> { %686 = vmatmul.f32.gmra.mxu3 %v1795_v45 }
  0x92   : >> { %804 = vmatmul.f32.gmra.mxu0 %v1827_v46  ;;  %v1835_v46 = vld [vmem:[%s2264_s26 + $0x80] sm:$0xff] }
  0x93   : >> { %925 = vmatmul.f32.gmra.mxu1 %v1860_v47  ;;  %v2725_v47 = vld [vmem:[%s2264_s26 + $0x81] sm:$0xff] }
  0x98   : >> { %568 = vmatmul.f32.gmra.mxu2 %v1792_v25 }
  0x99   : >> { %689 = vmatmul.f32.gmra.mxu3 %v1796_v50 }
  0x9a   : >> { %807 = vmatmul.f32.gmra.mxu0 %v1828_v52 }
  0x9b   : >> { %928 = vmatmul.f32.gmra.mxu1 %v2597_v53 }
  0xa0   : >> { %571 = vmatmul.f32.gmra.mxu2 %v1793_v32 }
  0xa1   : >> { %692 = vmatmul.f32.gmra.mxu3 %v1797_v56 }
  0xa2   : >> { %810 = vmatmul.f32.gmra.mxu0 %v1829_v57  ;;  %v1836_v57 = vld [vmem:[%s2264_s26 + $0x88] sm:$0xff] }
  0xa3   : >> { %931 = vmatmul.f32.gmra.mxu1 %v2609_v58 }
  0xa8   : >> { %574 = vmatmul.f32.gmra.mxu2 %v1794_v39  ;;  %v1941_v39 = vld [vmem:[%s3078_s2 + $0x388] sm:$0xff] }
  0xa9   : >> { %695 = vmatmul.f32.gmra.mxu3 %v2619_v61 }
  0xaa   : >> { %813 = vmatmul.f32.gmra.mxu0 %v1830_v62  ;;  %1156 = vmatpush.msra.mxu3 %v1941_v39  ;;  %v1923_v39 = vld [vmem:[%s2264_s26 + $0x4a] sm:$0xff] }
  0xab   : >> { %934 = vmatmul.f32.gmra.mxu1 %v2624_v63 }
  0xaf   : >> { %v2639_v6 = vpop.f32.mrf.mxu0 }
  0xb0   : >> { %577 = vmatmul.f32.gmra.mxu2 %v1795_v45  ;;  %v450_v4 = vpop.f32.mrf.mxu1 }
  0xb1   : >> { %698 = vmatmul.f32.gmra.mxu3 %v2637_v5 }
  0xb2   : >> { %816 = vmatmul.f32.gmra.mxu0 %v1831_v7  ;;  %v1837_v7 = vld [vmem:[%s2264_s26 + $0x90] sm:$0xff] }
  0xb3   : >> { %v409_v11 = vpop.f32.mrf.mxu2  ;;  %937 = vmatmul.f32.gmra.mxu1 %v2644_v8 }
  0xb4   : >> { %v477_v12 = vpop.f32.mrf.mxu3 }
  0xb5   : >> { %v2653_v13 = vadd.f32 %v477_v12, %v409_v11 }
  0xb7   : >> { %v2661_v16 = vpop.f32.mrf.mxu0 }
  0xb8   : >> { %580 = vmatmul.f32.gmra.mxu2 %v1796_v50  ;;  %v1940_v50 = vld [vmem:[%s3078_s2 + $0x380] sm:$0xff]  ;;  %v453_v19 = vpop.f32.mrf.mxu1 }
  0xb9   : >> { %701 = vmatmul.f32.gmra.mxu3 %v2659_v15 }
  0xba   : >> { %819 = vmatmul.f32.gmra.mxu0 %v1832_v17  ;;  %1157 = vmatpush.msra.mxu3 %v1940_v50  ;;  %v1838_v17 = vld [vmem:[%s2264_s26 + $0x98] sm:$0xff] }
  0xbb   : >> { %v412_v21 = vpop.f32.mrf.mxu2  ;;  %940 = vmatmul.f32.gmra.mxu1 %v2666_v18 }
  0xbc   : >> { %v480_v22 = vpop.f32.mrf.mxu3 }
  0xbd   : >> { %v2675_v23 = vadd.f32 %v480_v22, %v412_v21 }
  0xbf   : >> { %v2680_v25 = vpop.f32.mrf.mxu0 }
  0xc0   : >> { %583 = vmatmul.f32.gmra.mxu2 %v1797_v56 }
  0xc1   : >> { %704 = vmatmul.f32.gmra.mxu3 %v2678_v24 }
  0xc2   : >> { %822 = vmatmul.f32.gmra.mxu0 %v1833_v26  ;;  %v1807_v26 = vld [vmem:[%s2264_s26 + $0xa7] sm:$0xff] }
  0xc3   : >> { %v415_v31 = vpop.f32.mrf.mxu2  ;;  %943 = vmatmul.f32.gmra.mxu1 %v2685_v27 }
  0xc4   : >> { %v483_v32 = vpop.f32.mrf.mxu3 }
  0xc5   : >> { %v2697_v33 = vadd.f32 %v483_v32, %v415_v31  ;;  %v451_v31 = vadd.f32 %v450_v4, %v2639_v6  ;;  %v456_v32 = vpop.f32.mrf.mxu1  ;;  %v454_v6 = vadd.f32 %v453_v19, %v2661_v16 }
  0xc6   : >> { %v457_v16 = vadd.f32 %v456_v32, %v2680_v25  ;;  %v1927_v32 = vld [vmem:[%s2264_s26 + $0x6a] sm:$0xff] }
  0xc7   : >> { %v2700_v35 = vpop.f32.mrf.mxu0 }
  0xc8   : >> { %586 = vmatmul.f32.gmra.mxu2 %v2619_v61 }
  0xc9   : >> { %707 = vmatmul.f32.gmra.mxu3 %v1802_v34 }
  0xca   : >> { %825 = vmatmul.f32.gmra.mxu0 %v1834_v36 }
  0xcb   : >> { %v418_v41 = vpop.f32.mrf.mxu2  ;;  %946 = vmatmul.f32.gmra.mxu1 %v2705_v37 }
  0xcc   : >> { %v486_v42 = vpop.f32.mrf.mxu3 }
  0xcd   : >> { %v2717_v43 = vadd.f32 %v486_v42, %v418_v41  ;;  %v1840_v42 = vld [vmem:[%s2264_s26 + $0xa8] sm:$0xff]  ;;  %v459_v49 = vpop.f32.mrf.mxu1 }
  0xcf   : >> { %v2720_v45 = vpop.f32.mrf.mxu0 }
  0xd0   : >> { %589 = vmatmul.f32.gmra.mxu2 %v2637_v5 }
  0xd1   : >> { %710 = vmatmul.f32.gmra.mxu3 %v1803_v44 }
  0xd2   : >> { %828 = vmatmul.f32.gmra.mxu0 %v1835_v46 }
  0xd3   : >> { %v421_v51 = vpop.f32.mrf.mxu2  ;;  %949 = vmatmul.f32.gmra.mxu1 %v2725_v47 }
  0xd4   : >> { %v489_v52 = vpop.f32.mrf.mxu3 }
  0xd5   : >> { %v2737_v54 = vadd.f32 %v489_v52, %v421_v51  ;;  %v1924_v51 = vld [vmem:[%s2264_s26 + $0x52] sm:$0xff] }
  0xd7   : >> { %v2740_v56 = vpop.f32.mrf.mxu0 }
  0xd8   : >> { %592 = vmatmul.f32.gmra.mxu2 %v2659_v15 }
  0xd9   : >> { %713 = vmatmul.f32.gmra.mxu3 %v1804_v55 }
  0xda   : >> { %831 = vmatmul.f32.gmra.mxu0 %v1836_v57 }
  0xdb   : >> { %v424_v61 = vpop.f32.mrf.mxu2  ;;  %952 = vmatmul.f32.gmra.mxu1 %v2745_v59 }
  0xdc   : >> { %v492_v62 = vpop.f32.mrf.mxu3 }
  0xdd   : >> { %v2751_v2 = vadd.f32 %v492_v62, %v424_v61  ;;  %v1925_v62 = vld [vmem:[%s2264_s26 + $0x5a] sm:$0xff] }
  0xdf   : >> { %v2754_v5 = vpop.f32.mrf.mxu0 }
  0xe0   : >> { %595 = vmatmul.f32.gmra.mxu2 %v2678_v24 }
  0xe1   : >> { %716 = vmatmul.f32.gmra.mxu3 %v1805_v3  ;;  %v462_v3 = vpop.f32.mrf.mxu1 }
  0xe2   : >> { %834 = vmatmul.f32.gmra.mxu0 %v1837_v7 }
  0xe3   : >> { %v427_v10 = vpop.f32.mrf.mxu2  ;;  %955 = vmatmul.f32.gmra.mxu1 %v2759_v9 }
  0xe4   : >> { %v495_v11 = vpop.f32.mrf.mxu3 }
  0xe5   : >> { %v2762_v12 = vadd.f32 %v495_v11, %v427_v10  ;;  %v1957_v10 = vld [vmem:[%s2264_s26 + $0x53] sm:$0xff] }
  0xe7   : >> { %v2765_v15 = vpop.f32.mrf.mxu0 }
  0xe8   : >> { %598 = vmatmul.f32.gmra.mxu2 %v1802_v34 }
  0xe9   : >> { %719 = vmatmul.f32.gmra.mxu3 %v1806_v14 }
  0xea   : >> { %837 = vmatmul.f32.gmra.mxu0 %v1838_v17  ;;  %v1926_v17 = vld [vmem:[%s2264_s26 + $0x62] sm:$0xff] }
  0xeb   : >> { %v430_v21 = vpop.f32.mrf.mxu2  ;;  %958 = vmatmul.f32.gmra.mxu1 %v2769_v20 }
  0xec   : >> { %v498_v22 = vpop.f32.mrf.mxu3 }
  0xed   : >> { %v2772_v24 = vadd.f32 %v498_v22, %v430_v21  ;;  %v1958_v22 = vld [vmem:[%s2264_s26 + $0x5b] sm:$0xff] }
  0xef   : >> { %v2775_v28 = vpop.f32.mrf.mxu0 }
  0xf0   : >> { %601 = vmatmul.f32.gmra.mxu2 %v1803_v44  ;;  %v2791_v44 = vld [vmem:[%s2264_s26 + $0xa9] sm:$0xff] }
  0xf1   : >> { %722 = vmatmul.f32.gmra.mxu3 %v1807_v26  ;;  %v465_v26 = vpop.f32.mrf.mxu1 }
  0xf2   : >> { %840 = vmatmul.f32.gmra.mxu0 %v1839_v29 }
  0xf3   : >> { %v554_v34 = vpop.f32.mrf.mxu2  ;;  %961 = vmatmul.f32.gmra.mxu1 %v2779_v30 }
  0xf4   : >> { %v675_v36 = vpop.f32.mrf.mxu3  ;;  %v605_v38 = vadd.f32 %v554_v34, %v451_v31 }
  0xf6   : >> { %v2784_v40 = vadd.f32 %v675_v36, %v605_v38  ;;  %v1959_v38 = vld [vmem:[%s2264_s26 + $0x63] sm:$0xff] }
  0xf7   : >> { %v2786_v41 = vpop.f32.mrf.mxu0 }
  0xf8   : >> { %1037 = vmatmul.f32.vlgmr.msra.gmra.mxu2 %v2597_v53  ;;  %v1956_v53 = vld [vmem:[%s2264_s26 + $0x4b] sm:$0xff] }
  0xf9   : >> { %1158 = vmatmul.f32.vlgmr.msra.gmra.mxu3 %v1923_v39  ;;  %v468_v39 = vpop.f32.mrf.mxu1 }
  0xfa   : >> { %843 = vmatmul.f32.gmra.mxu0 %v1840_v42 }
  0xfb   : >> { %v557_v46 = vpop.f32.mrf.mxu2  ;;  %964 = vmatmul.f32.gmra.mxu1 %v2791_v44 }
  0xfc   : >> { %v678_v48 = vpop.f32.mrf.mxu3  ;;  %v606_v50 = vadd.f32 %v557_v46, %v454_v6  ;;  %v1928_v46 = vld [vmem:[%s2264_s26 + $0x72] sm:$0xff] }
  0xfe   : >> { %v2796_v52 = vadd.f32 %v678_v48, %v606_v50  ;;  %v1960_v50 = vld [vmem:[%s2264_s26 + $0x6b] sm:$0xff] }
  0xff   : >> { %v2798_v55 = vpop.f32.mrf.mxu0 }
 0x100   : >> { %1040 = vmatmul.f32.gmra.mxu2 %v2609_v58  ;;  %v460_v58 = vadd.f32 %v459_v49, %v2700_v35 }
 0x101   : >> { %1161 = vmatmul.f32.gmra.mxu3 %v1924_v51 }
 0x102   : >> { %1279 = vmatmul.f32.vlgmr.msra.gmra.mxu0 %v1956_v53 }
 0x103   : >> { %v560_v57 = vpop.f32.mrf.mxu2 }
 0x104   : >> { %v681_v60 = vpop.f32.mrf.mxu3  ;;  %v607_v61 = vadd.f32 %v560_v57, %v457_v16  ;;  %v471_v16 = vpop.f32.mrf.mxu1  ;;  %v1929_v57 = vld [vmem:[%s2264_s26 + $0x7a] sm:$0xff] }
 0x106   : >> { %v2804_v4 = vadd.f32 %v681_v60, %v607_v61 }
 0x107   : >> { %v2806_v7 = vpop.f32.mrf.mxu0 }
 0x108   : >> { %1043 = vmatmul.f32.gmra.mxu2 %v2624_v63  ;;  %v463_v63 = vadd.f32 %v462_v3, %v2720_v45 }
 0x109   : >> { %1164 = vmatmul.f32.gmra.mxu3 %v1925_v62  ;;  %v1961_v62 = vld [vmem:[%s2264_s26 + $0x73] sm:$0xff] }
 0x10a   : >> { %1282 = vmatmul.f32.gmra.mxu0 %v1957_v10 }
 0x10b   : >> { %v563_v25 = vpop.f32.mrf.mxu2 }
 0x10c   : >> { %v684_v11 = vpop.f32.mrf.mxu3  ;;  %v608_v14 = vadd.f32 %v563_v25, %v460_v58  ;;  %v1930_v58 = vld [vmem:[%s2264_s26 + $0x82] sm:$0xff] }
 0x10e   : >> { %v2812_v19 = vadd.f32 %v684_v11, %v608_v14  ;;  %v474_v11 = vpop.f32.mrf.mxu1 }
 0x10f   : >> { %v2814_v21 = vpop.f32.mrf.mxu0 }
 0x110   : >> { %1046 = vmatmul.f32.gmra.mxu2 %v2644_v8  ;;  %v466_v8 = vadd.f32 %v465_v26, %v2740_v56 }
 0x111   : >> { %1167 = vmatmul.f32.gmra.mxu3 %v1926_v17  ;;  %v1962_v17 = vld [vmem:[%s2264_s26 + $0x7b] sm:$0xff] }
 0x112   : >> { %1285 = vmatmul.f32.gmra.mxu0 %v1958_v22 }
 0x113   : >> { %v566_v35 = vpop.f32.mrf.mxu2 }
 0x114   : >> { %v687_v29 = vpop.f32.mrf.mxu3  ;;  %v609_v31 = vadd.f32 %v566_v35, %v463_v63  ;;  %v1931_v63 = vld [vmem:[%s2264_s26 + $0x8a] sm:$0xff] }
 0x116   : >> { %v2820_v34 = vadd.f32 %v687_v29, %v609_v31  ;;  %v1963_v31 = vld [vmem:[%s2264_s26 + $0x83] sm:$0xff] }
 0x117   : >> { %v2822_v36 = vpop.f32.mrf.mxu0 }
 0x118   : >> { %1049 = vmatmul.f32.gmra.mxu2 %v2666_v18  ;;  %v469_v18 = vadd.f32 %v468_v39, %v2754_v5 }
 0x119   : >> { %1170 = vmatmul.f32.gmra.mxu3 %v1927_v32 }
 0x11a   : >> { %1288 = vmatmul.f32.gmra.mxu0 %v1959_v38  ;;  %v1932_v38 = vld [vmem:[%s2264_s26 + $0x92] sm:$0xff] }
 0x11b   : >> { %v569_v45 = vpop.f32.mrf.mxu2 }
 0x11c   : >> { %v690_v42 = vpop.f32.mrf.mxu3  ;;  %v610_v6 = vadd.f32 %v569_v45, %v466_v8  ;;  %v1964_v45 = vld [vmem:[%s2264_s26 + $0x8b] sm:$0xff] }
 0x11e   : >> { %v2828_v48 = vadd.f32 %v690_v42, %v610_v6 }
 0x11f   : >> { %v2830_v49 = vpop.f32.mrf.mxu0 }
 0x120   : >> { %1052 = vmatmul.f32.gmra.mxu2 %v2685_v27  ;;  %v472_v27 = vadd.f32 %v471_v16, %v2765_v15  ;;  %v1934_v16 = vld [vmem:[%s2264_s26 + $0xa2] sm:$0xff] }
 0x121   : >> { %1173 = vmatmul.f32.gmra.mxu3 %v1928_v46  ;;  %v1933_v46 = vld [vmem:[%s2264_s26 + $0x9a] sm:$0xff] }
 0x122   : >> { %1291 = vmatmul.f32.gmra.mxu0 %v1960_v50 }
 0x123   : >> { %v572_v56 = vpop.f32.mrf.mxu2 }
 0x124   : >> { %v693_v51 = vpop.f32.mrf.mxu3  ;;  %v611_v53 = vadd.f32 %v572_v56, %v469_v18 }
 0x126   : >> { %v2836_v60 = vadd.f32 %v693_v51, %v611_v53 }
 0x127   : >> { %v2838_v61 = vpop.f32.mrf.mxu0 }
 0x128   : >> { %1055 = vmatmul.f32.gmra.mxu2 %v2705_v37  ;;  %v475_v37 = vadd.f32 %v474_v11, %v2775_v28 }
 0x129   : >> { %1176 = vmatmul.f32.gmra.mxu3 %v1929_v57 }
 0x12a   : >> { %1294 = vmatmul.f32.gmra.mxu0 %v1961_v62 }
 0x12b   : >> { %v575_v5 = vpop.f32.mrf.mxu2 }
 0x12c   : >> { %v696_v3 = vpop.f32.mrf.mxu3  ;;  %v612_v10 = vadd.f32 %v575_v5, %v472_v27 }
 0x12e   : >> { %v2844_v25 = vadd.f32 %v696_v3, %v612_v10  ;;  %v1935_v10 = vld [vmem:[%s2264_s26 + $0xaa] sm:$0xff] }
 0x12f   : >> { %v2846_v14 = vpop.f32.mrf.mxu0 }
 0x130   : >> { %1058 = vmatmul.f32.gmra.mxu2 %v2725_v47 }
 0x131   : >> { %1179 = vmatmul.f32.gmra.mxu3 %v1930_v58 }
 0x132   : >> { %1297 = vmatmul.f32.gmra.mxu0 %v1962_v17  ;;  %v1967_v17 = vld [vmem:[%s2264_s26 + $0xa3] sm:$0xff] }
 0x133   : >> { %v578_v15 = vpop.f32.mrf.mxu2 }
 0x134   : >> { %v699_v22 = vpop.f32.mrf.mxu3  ;;  %v613_v26 = vadd.f32 %v578_v15, %v475_v37 }
 0x136   : >> { %v2852_v35 = vadd.f32 %v699_v22, %v613_v26  ;;  %v1903_v26 = vld [vmem:[%s2264_s26 + $0xb1] sm:$0xff] }
 0x137   : >> { %v2854_v29 = vpop.f32.mrf.mxu0 }
 0x138   : >> { %1061 = vmatmul.f32.gmra.mxu2 %v2745_v59 }
 0x139   : >> { %1182 = vmatmul.f32.gmra.mxu3 %v1931_v63 }
 0x13a   : >> { %1300 = vmatmul.f32.gmra.mxu0 %v1963_v31 }
 0x13b   : >> { %v581_v47 = vpop.f32.mrf.mxu2 }
 0x13c   : >> { %v702_v32 = vpop.f32.mrf.mxu3  ;;  %v614_v28 = vadd.f32 %v581_v47, %v2653_v13  ;;  %v1965_v13 = vld [vmem:[%s2264_s26 + $0x93] sm:$0xff]  ;;  %v1968_v47 = vld [vmem:[%s2264_s26 + $0xab] sm:$0xff] }
 0x13e   : >> { %v2860_v8 = vadd.f32 %v702_v32, %v614_v28 }
 0x13f   : >> { %v2862_v39 = vpop.f32.mrf.mxu0 }
 0x140   : >> { %1064 = vmatmul.f32.gmra.mxu2 %v2759_v9 }
 0x141   : >> { %1185 = vmatmul.f32.gmra.mxu3 %v1932_v38 }
 0x142   : >> { %1303 = vmatmul.f32.gmra.mxu0 %v1964_v45 }
 0x143   : >> { %v584_v59 = vpop.f32.mrf.mxu2 }
 0x144   : >> { %v705_v42 = vpop.f32.mrf.mxu3  ;;  %v615_v6 = vadd.f32 %v584_v59, %v2675_v23  ;;  %v1966_v23 = vld [vmem:[%s2264_s26 + $0x9b] sm:$0xff] }
 0x145   : >> { %v1904_v59 = vld [vmem:[%s2264_s26 + $0xb9] sm:$0xff] }
 0x146   : >> { %v736_v50 = vadd.f32 %v705_v42, %v615_v6 }
 0x147   : >> { %v826_v18 = vpop.f32.mrf.mxu0 }
 0x148   : >> { %v2869_v56 = vadd.f32 %v826_v18, %v736_v50  ;;  %1067 = vmatmul.f32.gmra.mxu2 %v2769_v20 }
 0x149   : >> { %1188 = vmatmul.f32.gmra.mxu3 %v1933_v46  ;;  %v1969_v46 = vld [vmem:[%s2264_s26 + $0xb3] sm:$0xff] }
 0x14a   : >> { %1306 = vmatmul.f32.gmra.mxu0 %v1965_v13 }
 0x14b   : >> { %v587_v9 = vpop.f32.mrf.mxu2 }
 0x14c   : >> { %v708_v51 = vpop.f32.mrf.mxu3  ;;  %v616_v53 = vadd.f32 %v587_v9, %v2697_v33  ;;  %v917_v33 = vpop.f32.mrf.mxu1 }
 0x14e   : >> { %v737_v57 = vadd.f32 %v708_v51, %v616_v53  ;;  %v1905_v53 = vld [vmem:[%s2264_s26 + $0xc1] sm:$0xff] }
 0x14f   : >> { %v829_v62 = vpop.f32.mrf.mxu0 }
 0x150   : >> { %v2875_v27 = vadd.f32 %v829_v62, %v737_v57  ;;  %1070 = vmatmul.f32.gmra.mxu2 %v2779_v30  ;;  %v1970_v62 = vld [vmem:[%s2264_s26 + $0xbb] sm:$0xff] }
 0x151   : >> { %1191 = vmatmul.f32.gmra.mxu3 %v1934_v16 }
 0x152   : >> { %1309 = vmatmul.f32.gmra.mxu0 %v1966_v23 }
 0x153   : >> { %v590_v20 = vpop.f32.mrf.mxu2 }
 0x154   : >> { %v711_v5 = vpop.f32.mrf.mxu3  ;;  %v617_v3 = vadd.f32 %v590_v20, %v2717_v43  ;;  %v1936_v43 = vld [vmem:[%s2264_s26 + $0xb2] sm:$0xff]  ;;  %v920_v32 = vpop.f32.mrf.mxu1 }
 0x156   : >> { %v738_v58 = vadd.f32 %v711_v5, %v617_v3 }
 0x157   : >> { %v832_v11 = vpop.f32.mrf.mxu0 }
 0x158   : >> { %v2881_v37 = vadd.f32 %v832_v11, %v738_v58  ;;  %1073 = vmatmul.f32.gmra.mxu2 %v2791_v44  ;;  %v1906_v58 = vld [vmem:[%s2264_s26 + $0xc9] sm:$0xff] }
 0x159   : >> { %1194 = vmatmul.f32.gmra.mxu3 %v1935_v10  ;;  %v1939_v11 = vld [vmem:[%s2264_s26 + $0xca] sm:$0xff] }
 0x15a   : >> { %1312 = vmatmul.f32.gmra.mxu0 %v1967_v17 }
 0x15b   : >> { %v593_v30 = vpop.f32.mrf.mxu2 }
 0x15c   : >> { %v714_v15 = vpop.f32.mrf.mxu3  ;;  %v618_v22 = vadd.f32 %v593_v30, %v2737_v54  ;;  %v1937_v54 = vld [vmem:[%s2264_s26 + $0xba] sm:$0xff]  ;;  %v923_v18 = vpop.f32.mrf.mxu1 }
 0x15e   : >> { %v739_v63 = vadd.f32 %v714_v15, %v618_v22  ;;  %v1971_v15 = vld [vmem:[%s2264_s26 + $0xc3] sm:$0xff] }
 0x15f   : >> { %v835_v31 = vpop.f32.mrf.mxu0 }
 0x160   : >> { %v2888_v28 = vadd.f32 %v835_v31, %v739_v63  ;;  %1076 = vmatmul.f32.gmra.mxu2 %v1903_v26  ;;  %v848_v31 = vadd.f32 %v2798_v55, %v2796_v52 }
 0x161   : >> { %1197 = vmatmul.f32.gmra.mxu3 %v1936_v43 }
 0x162   : >> { %1315 = vmatmul.f32.gmra.mxu0 %v1968_v47 }
 0x163   : >> { %v596_v44 = vpop.f32.mrf.mxu2 }
 0x164   : >> { %v717_v38 = vpop.f32.mrf.mxu3  ;;  %v619_v45 = vadd.f32 %v596_v44, %v2751_v2  ;;  %v1938_v2 = vld [vmem:[%s2264_s26 + $0xc2] sm:$0xff]  ;;  %v926_v3 = vpop.f32.mrf.mxu1 }
 0x166   : >> { %v740_v42 = vadd.f32 %v717_v38, %v619_v45  ;;  %v1972_v38 = vld [vmem:[%s2264_s26 + $0xcb] sm:$0xff]  ;;  %s3030_s26 = scalar_lea.vmem %s2162_s16, %s2248_s14 }
 0x167   : >> { %v838_v6 = vpop.f32.mrf.mxu0  ;;  %v1989_v45 = vld [vmem:[%s2914_s8 + $0x28] sm:$0xff] }
 0x168   : >> { %v2894_v50 = vadd.f32 %v838_v6, %v740_v42  ;;  %1079 = vmatmul.f32.gmra.mxu2 %v1904_v59  ;;  %v969_v59 = vadd.f32 %v920_v32, %v848_v31 }
 0x169   : >> { %1200 = vmatmul.f32.gmra.mxu3 %v1937_v54 }
 0x16a   : >> { %1318 = vmatmul.f32.gmra.mxu0 %v1969_v46  ;;  %v849_v46 = vadd.f32 %v2806_v7, %v2804_v4  ;;  %v850_v4 = vadd.f32 %v2814_v21, %v2812_v19  ;;  %v851_v19 = vadd.f32 %v2822_v36, %v2820_v34  ;;  %v852_v34 = vadd.f32 %v2830_v49, %v2828_v48 }
 0x16b   : >> { %v599_v13 = vpop.f32.mrf.mxu2  ;;  %v853_v48 = vadd.f32 %v2838_v61, %v2836_v60  ;;  %v854_v60 = vadd.f32 %v2846_v14, %v2844_v25  ;;  %v855_v25 = vadd.f32 %v2854_v29, %v2852_v35  ;;  %v856_v35 = vadd.f32 %v2862_v39, %v2860_v8 }
 0x16c   : >> { %v720_v9 = vpop.f32.mrf.mxu3  ;;  %v620_v51 = vadd.f32 %v599_v13, %v2762_v12  ;;  %v847_v12 = vadd.f32 %v2786_v41, %v2784_v40  ;;  %v929_v47 = vpop.f32.mrf.mxu1  ;;  %v2917_v41 = vperm.slane %v2137_v0, 0 }
 0x16d   : >> { %v972_v31 = vadd.f32 %v929_v47, %v851_v19  ;;  %v1993_v47 = vld [vmem:[%s2914_s8 + $0x48] sm:$0xff] }
 0x16e   : >> { %v741_v16 = vadd.f32 %v720_v9, %v620_v51  ;;  %v968_v26 = vadd.f32 %v917_v33, %v847_v12 }
 0x16f   : >> { %v841_v57 = vpop.f32.mrf.mxu0 }
 0x170   : >> { %v2900_v23 = vadd.f32 %v841_v57, %v741_v16  ;;  %1082 = vmatmul.f32.gmra.mxu2 %v1905_v53  ;;  %v1990_v53 = vld [vmem:[%s2914_s8 + $0x30] sm:$0xff] }
 0x171   : >> { %1203 = vmatmul.f32.gmra.mxu3 %v1938_v2  ;;  %v970_v2 = vadd.f32 %v923_v18, %v849_v46  ;;  %v971_v18 = vadd.f32 %v926_v3, %v850_v4  ;;  %v1992_v3 = vld [vmem:[%s2914_s8 + $0x40] sm:$0xff] }
 0x172   : >> { %1321 = vmatmul.f32.gmra.mxu0 %v1970_v62 }
 0x173   : >> { %v602_v20 = vpop.f32.mrf.mxu2 }
 0x174   : >> { %v723_v5 = vpop.f32.mrf.mxu3  ;;  %v621_v10 = vadd.f32 %v602_v20, %v2772_v24  ;;  %v932_v9 = vpop.f32.mrf.mxu1 }
 0x176   : >> { %v742_v17 = vadd.f32 %v723_v5, %v621_v10 }
 0x177   : >> { %v844_v30 = vpop.f32.mrf.mxu0 }
 0x178   : >> { %v2908_v22 = vadd.f32 %v844_v30, %v742_v17  ;;  %1085 = vmatmul.f32.gmra.mxu2 %v1906_v58 }
 0x179   : >> { %1206 = vmatmul.f32.gmra.mxu3 %v1939_v11  ;;  %v1991_v11 = vld [vmem:[%s2914_s8 + $0x38] sm:$0xff] }
 0x17a   : >> { %1324 = vmatmul.f32.gmra.mxu0 %v1971_v15 }
 0x17b   : >> { %v1038_v24 = vpop.f32.mrf.mxu2 }
 0x17c   : >> { %v1159_v43 = vpop.f32.mrf.mxu3  ;;  %v1089_v63 = vadd.f32 %v1038_v24, %v968_v26  ;;  %v935_v12 = vpop.f32.mrf.mxu1 }
 0x17e   : >> { %v1210_v40 = vadd.f32 %v1159_v43, %v1089_v63 }
 0x17f   : >> { %v1280_v44 = vpop.f32.mrf.mxu0 }
 0x180   : >> { %v1331_v33 = vadd.f32 %v1280_v44, %v1210_v40 }
 0x182   : >> { %v1369_v54 = vadd.f32 %v2917_v41, %v1331_v33  ;;  %1327 = vmatmul.f32.gmra.mxu0 %v1972_v38 }
 0x183   : >> { %v1041_v52 = vpop.f32.mrf.mxu2 }
 0x184   : >> { %v1162_v55 = vpop.f32.mrf.mxu3  ;;  %v1386_v42 = vadd.f32 %v1989_v45, %v1369_v54  ;;  %v1090_v6 = vadd.f32 %v1041_v52, %v969_v59  ;;  %v938_v33 = vpop.f32.mrf.mxu1 }
 0x186   : >> { %1405 = vst.msk [vmem:[%s2924_s9] sm:$0xff] %vm1404_vm0, %v1386_v42  ;;  %v1211_v13 = vadd.f32 %v1162_v55, %v1090_v6  ;;  %2006 = vmatmul.msk.f32.vlgmr.msra.gmra.mxu1 %vm1404_vm0, %v1386_v42  ;;  %v973_v55 = vadd.f32 %v932_v9, %v852_v34  ;;  %v1994_v9 = vld [vmem:[%s2914_s8 + $0x50] sm:$0xff] }
 0x187   : >> { %v1283_v32 = vpop.f32.mrf.mxu0 }
 0x188   : >> { %v1332_v51 = vadd.f32 %v1283_v32, %v1211_v13 }
 0x18a   : >> { %v1370_v16 = vadd.f32 %v2917_v41, %v1332_v51 }
 0x18b   : >> { %v1044_v57 = vpop.f32.mrf.mxu2 }
 0x18c   : >> { %v1165_v62 = vpop.f32.mrf.mxu3  ;;  %v1387_v20 = vadd.f32 %v1990_v53, %v1370_v16  ;;  %v1091_v5 = vadd.f32 %v1044_v57, %v970_v2  ;;  %v941_v49 = vpop.f32.mrf.mxu1  ;;  %v974_v16 = vadd.f32 %v935_v12, %v853_v48 }
 0x18e   : >> { %1406 = vst.msk [vmem:[%s2924_s9 + $0x8] sm:$0xff] %vm1404_vm0, %v1387_v20  ;;  %v1212_v7 = vadd.f32 %v1165_v62, %v1091_v5  ;;  %2007 = vmatmul.msk.f32.gmra.mxu1 %vm1404_vm0, %v1387_v20 }
 0x18f   : >> { %v1286_v10 = vpop.f32.mrf.mxu0 }
 0x190   : >> { %v1333_v58 = vadd.f32 %v1286_v10, %v1212_v7 }
 0x192   : >> { %v1371_v17 = vadd.f32 %v2917_v41, %v1333_v58 }
 0x193   : >> { %v1047_v30 = vpop.f32.mrf.mxu2 }
 0x194   : >> { %v1168_v15 = vpop.f32.mrf.mxu3  ;;  %v1388_v26 = vadd.f32 %v1991_v11, %v1371_v17  ;;  %v1092_v24 = vadd.f32 %v1047_v30, %v971_v18  ;;  %v944_v10 = vpop.f32.mrf.mxu1  ;;  %v1995_v11 = vld [vmem:[%s2914_s8 + $0x58] sm:$0xff]  ;;  %v975_v18 = vadd.f32 %v938_v33, %v854_v60 }
 0x195   : >> { %v977_v34 = vadd.f32 %v944_v10, %v856_v35 }
 0x196   : >> { %1407 = vst.msk [vmem:[%s2924_s9 + $0x10] sm:$0xff] %vm1404_vm0, %v1388_v26  ;;  %v1213_v21 = vadd.f32 %v1168_v15, %v1092_v24  ;;  %2008 = vmatmul.msk.f32.gmra.mxu1 %vm1404_vm0, %v1388_v26 }
 0x197   : >> { %v1289_v43 = vpop.f32.mrf.mxu0 }
 0x198   : >> { %v1334_v63 = vadd.f32 %v1289_v43, %v1213_v21  ;;  %v1996_v21 = vld [vmem:[%s2914_s8 + $0x60] sm:$0xff]  ;;  %v976_v43 = vadd.f32 %v941_v49, %v855_v25 }
 0x19a   : >> { %v1372_v40 = vadd.f32 %v2917_v41, %v1334_v63 }
 0x19b   : >> { %v1050_v44 = vpop.f32.mrf.mxu2 }
 0x19c   : >> { %v1171_v38 = vpop.f32.mrf.mxu3  ;;  %v1389_v45 = vadd.f32 %v1992_v3, %v1372_v40  ;;  %v1093_v59 = vadd.f32 %v1050_v44, %v972_v31  ;;  %v947_v63 = vpop.f32.mrf.mxu1 }
 0x19e   : >> { %1408 = vst.msk [vmem:[%s2924_s9 + $0x18] sm:$0xff] %vm1404_vm0, %v1389_v45  ;;  %v1214_v36 = vadd.f32 %v1171_v38, %v1093_v59  ;;  %2009 = vmatmul.msk.f32.gmra.mxu1 %vm1404_vm0, %v1389_v45  ;;  %v1997_v59 = vld [vmem:[%s2914_s8 + $0x68] sm:$0xff] }
 0x19f   : >> { %v1292_v54 = vpop.f32.mrf.mxu0 }
 0x1a0   : >> { %v1335_v52 = vadd.f32 %v1292_v54, %v1214_v36 }
 0x1a2   : >> { %v1373_v42 = vadd.f32 %v2917_v41, %v1335_v52 }
 0x1a3   : >> { %v1053_v6 = vpop.f32.mrf.mxu2 }
 0x1a4   : >> { %v1174_v46 = vpop.f32.mrf.mxu3  ;;  %v1390_v13 = vadd.f32 %v1993_v47, %v1373_v42  ;;  %v1094_v32 = vadd.f32 %v1053_v6, %v973_v55  ;;  %v950_v47 = vpop.f32.mrf.mxu1 }
 0x1a6   : >> { %1409 = vst.msk [vmem:[%s2924_s9 + $0x20] sm:$0xff] %vm1404_vm0, %v1390_v13  ;;  %v1215_v51 = vadd.f32 %v1174_v46, %v1094_v32  ;;  %2010 = vmatmul.msk.f32.gmra.mxu1 %vm1404_vm0, %v1390_v13  ;;  %v1998_v46 = vld [vmem:[%s2914_s8 + $0x70] sm:$0xff]  ;;  %v978_v13 = vadd.f32 %v947_v63, %v2869_v56 }
 0x1a7   : >> { %v1295_v53 = vpop.f32.mrf.mxu0 }
 0x1a8   : >> { %v1336_v2 = vadd.f32 %v1295_v53, %v1215_v51 }
 0x1aa   : >> { %v1374_v57 = vadd.f32 %v2917_v41, %v1336_v2 }
 0x1ab   : >> { %v1056_v62 = vpop.f32.mrf.mxu2 }
 0x1ac   : >> { %v1177_v20 = vpop.f32.mrf.mxu3  ;;  %v1391_v5 = vadd.f32 %v1994_v9, %v1374_v57  ;;  %v1095_v4 = vadd.f32 %v1056_v62, %v974_v16  ;;  %v953_v2 = vpop.f32.mrf.mxu1  ;;  %v1999_v62 = vld [vmem:[%s2914_s8 + $0x78] sm:$0xff] }
 0x1ae   : >> { %1410 = vst.msk [vmem:[%s2924_s9 + $0x28] sm:$0xff] %vm1404_vm0, %v1391_v5  ;;  %v1216_v61 = vadd.f32 %v1177_v20, %v1095_v4  ;;  %2011 = vmatmul.msk.f32.gmra.mxu1 %vm1404_vm0, %v1391_v5  ;;  %v979_v20 = vadd.f32 %v950_v47, %v2875_v27 }
 0x1af   : >> { %v1298_v7 = vpop.f32.mrf.mxu0 }
 0x1b0   : >> { %v1337_v58 = vadd.f32 %v1298_v7, %v1216_v61 }
 0x1b2   : >> { %v1375_v12 = vadd.f32 %v2917_v41, %v1337_v58 }
 0x1b3   : >> { %v1059_v17 = vpop.f32.mrf.mxu2 }
 0x1b4   : >> { %v1180_v30 = vpop.f32.mrf.mxu3  ;;  %v1392_v15 = vadd.f32 %v1995_v11, %v1375_v12  ;;  %v1096_v26 = vadd.f32 %v1059_v17, %v975_v18  ;;  %v956_v58 = vpop.f32.mrf.mxu1  ;;  %v2000_v18 = vld [vmem:[%s2914_s8 + $0x80] sm:$0xff]  ;;  %v980_v12 = vadd.f32 %v953_v2, %v2881_v37 }
 0x1b6   : >> { %1411 = vst.msk [vmem:[%s2924_s9 + $0x30] sm:$0xff] %vm1404_vm0, %v1392_v15  ;;  %v1217_v14 = vadd.f32 %v1180_v30, %v1096_v26  ;;  %2012 = vmatmul.msk.f32.gmra.mxu1 %vm1404_vm0, %v1392_v15 }
 0x1b7   : >> { %v1301_v24 = vpop.f32.mrf.mxu0 }
 0x1b8   : >> { %v1338_v19 = vadd.f32 %v1301_v24, %v1217_v14 }
 0x1ba   : >> { %v1376_v3 = vadd.f32 %v2917_v41, %v1338_v19  ;;  %v2001_v19 = vld [vmem:[%s2914_s8 + $0x88] sm:$0xff] }
 0x1bb   : >> { %v1062_v31 = vpop.f32.mrf.mxu2 }
 0x1bc   : >> { %v1183_v40 = vpop.f32.mrf.mxu3  ;;  %v1393_v44 = vadd.f32 %v1996_v21, %v1376_v3  ;;  %v1097_v38 = vadd.f32 %v1062_v31, %v976_v43  ;;  %v981_v21 = vadd.f32 %v956_v58, %v2888_v28  ;;  %v959_v43 = vpop.f32.mrf.mxu1 }
 0x1be   : >> { %1412 = vst.msk [vmem:[%s2924_s9 + $0x38] sm:$0xff] %vm1404_vm0, %v1393_v44  ;;  %v1218_v29 = vadd.f32 %v1183_v40, %v1097_v38  ;;  %2013 = vmatmul.msk.f32.gmra.mxu1 %vm1404_vm0, %v1393_v44 }
 0x1bf   : >> { %v1304_v33 = vpop.f32.mrf.mxu0 }
 0x1c0   : >> { %v1339_v45 = vadd.f32 %v1304_v33, %v1218_v29  ;;  %v2002_v29 = vld [vmem:[%s2914_s8 + $0x90] sm:$0xff]  ;;  %v982_v33 = vadd.f32 %v959_v43, %v2894_v50 }
 0x1c2   : >> { %v1377_v36 = vadd.f32 %v2917_v41, %v1339_v45 }
 0x1c3   : >> { %v1065_v54 = vpop.f32.mrf.mxu2 }
 0x1c4   : >> { %v1186_v52 = vpop.f32.mrf.mxu3  ;;  %v1394_v55 = vadd.f32 %v1997_v59, %v1377_v36  ;;  %v1098_v42 = vadd.f32 %v1065_v54, %v977_v34  ;;  %v962_v54 = vpop.f32.mrf.mxu1 }
 0x1c6   : >> { %1413 = vst.msk [vmem:[%s2924_s9 + $0x40] sm:$0xff] %vm1404_vm0, %v1394_v55  ;;  %v1219_v8 = vadd.f32 %v1186_v52, %v1098_v42  ;;  %2014 = vmatmul.msk.f32.gmra.mxu1 %vm1404_vm0, %v1394_v55  ;;  %v2003_v42 = vld [vmem:[%s2914_s8 + $0x98] sm:$0xff] }
 0x1c7   : >> { %v1307_v39 = vpop.f32.mrf.mxu0 }
 0x1c8   : >> { %v1340_v6 = vadd.f32 %v1307_v39, %v1219_v8  ;;  %v983_v8 = vadd.f32 %v962_v54, %v2900_v23 }
 0x1ca   : >> { %v1378_v32 = vadd.f32 %v2917_v41, %v1340_v6 }
 0x1cb   : >> { %v1068_v48 = vpop.f32.mrf.mxu2 }
 0x1cc   : >> { %v1189_v49 = vpop.f32.mrf.mxu3  ;;  %v1395_v51 = vadd.f32 %v1998_v46, %v1378_v32  ;;  %v1099_v53 = vadd.f32 %v1068_v48, %v978_v13  ;;  %v965_v48 = vpop.f32.mrf.mxu1 }
 0x1cd   : >> { %v984_v23 = vadd.f32 %v965_v48, %v2908_v22 }
 0x1ce   : >> { %1414 = vst.msk [vmem:[%s2924_s9 + $0x48] sm:$0xff] %vm1404_vm0, %v1395_v51  ;;  %v1220_v9 = vadd.f32 %v1189_v49, %v1099_v53  ;;  %2015 = vmatmul.msk.f32.gmra.mxu1 %vm1404_vm0, %v1395_v51  ;;  %v2004_v53 = vld [vmem:[%s2914_s8 + $0xa0] sm:$0xff] }
 0x1cf   : >> { %v1310_v16 = vpop.f32.mrf.mxu0 }
 0x1d0   : >> { %v1341_v57 = vadd.f32 %v1310_v16, %v1220_v9 }
 0x1d2   : >> { %v1379_v56 = vadd.f32 %v2917_v41, %v1341_v57 }
 0x1d3   : >> { %v1071_v5 = vpop.f32.mrf.mxu2 }
 0x1d4   : >> { %v1192_v4 = vpop.f32.mrf.mxu3  ;;  %v1396_v60 = vadd.f32 %v1999_v62, %v1379_v56  ;;  %v1100_v61 = vadd.f32 %v1071_v5, %v979_v20 }
 0x1d6   : >> { %1415 = vst.msk [vmem:[%s2924_s9 + $0x50] sm:$0xff] %vm1404_vm0, %v1396_v60  ;;  %v1221_v7 = vadd.f32 %v1192_v4, %v1100_v61  ;;  %2016 = vmatmul.msk.f32.gmra.mxu1 %vm1404_vm0, %v1396_v60  ;;  %v2005_v4 = vld [vmem:[%s2914_s8 + $0xa8] sm:$0xff] }
 0x1d7   : >> { %v1313_v10 = vpop.f32.mrf.mxu0 }
 0x1d8   : >> { %v1342_v11 = vadd.f32 %v1313_v10, %v1221_v7 }
 0x1da   : >> { %v1380_v27 = vadd.f32 %v2917_v41, %v1342_v11 }
 0x1db   : >> { %v1074_v17 = vpop.f32.mrf.mxu2 }
 0x1dc   : >> { %v1195_v30 = vpop.f32.mrf.mxu3  ;;  %v1397_v15 = vadd.f32 %v2000_v18, %v1380_v27  ;;  %v1101_v26 = vadd.f32 %v1074_v17, %v980_v12 }
 0x1de   : >> { %1416 = vst.msk [vmem:[%s2924_s9 + $0x58] sm:$0xff] %vm1404_vm0, %v1397_v15  ;;  %v1222_v25 = vadd.f32 %v1195_v30, %v1101_v26  ;;  %2017 = vmatmul.msk.f32.gmra.mxu1 %vm1404_vm0, %v1397_v15 }
 0x1df   : >> { %v1316_v14 = vpop.f32.mrf.mxu0 }
 0x1e0   : >> { %v1343_v24 = vadd.f32 %v1316_v14, %v1222_v25 }
 0x1e2   : >> { %v1381_v37 = vadd.f32 %v2917_v41, %v1343_v24 }
 0x1e3   : >> { %v1077_v63 = vpop.f32.mrf.mxu2 }
 0x1e4   : >> { %v1198_v3 = vpop.f32.mrf.mxu3  ;;  %v1398_v31 = vadd.f32 %v2001_v19, %v1381_v37  ;;  %v1102_v40 = vadd.f32 %v1077_v63, %v981_v21 }
 0x1e6   : >> { %1417 = vst.msk [vmem:[%s2924_s9 + $0x60] sm:$0xff] %vm1404_vm0, %v1398_v31  ;;  %v1223_v44 = vadd.f32 %v1198_v3, %v1102_v40  ;;  %2018 = vmatmul.msk.f32.gmra.mxu1 %vm1404_vm0, %v1398_v31 }
 0x1e7   : >> { %v1319_v38 = vpop.f32.mrf.mxu0 }
 0x1e8   : >> { %v1344_v35 = vadd.f32 %v1319_v38, %v1223_v44 }
 0x1ea   : >> { %v1382_v28 = vadd.f32 %v2917_v41, %v1344_v35 }
 0x1eb   : >> { %v1080_v45 = vpop.f32.mrf.mxu2 }
 0x1ec   : >> { %v1201_v59 = vpop.f32.mrf.mxu3  ;;  %v1399_v34 = vadd.f32 %v2002_v29, %v1382_v28  ;;  %v1103_v36 = vadd.f32 %v1080_v45, %v982_v33 }
 0x1ee   : >> { %1418 = vst.msk [vmem:[%s2924_s9 + $0x68] sm:$0xff] %vm1404_vm0, %v1399_v34  ;;  %v1224_v52 = vadd.f32 %v1201_v59, %v1103_v36  ;;  %2019 = vmatmul.msk.f32.gmra.mxu1 %vm1404_vm0, %v1399_v34 }
 0x1ef   : >> { %v1322_v47 = vpop.f32.mrf.mxu0 }
 0x1f0   : >> { %v1345_v55 = vadd.f32 %v1322_v47, %v1224_v52 }
 0x1f2   : >> { %v1383_v50 = vadd.f32 %v2917_v41, %v1345_v55 }
 0x1f3   : >> { %v1083_v39 = vpop.f32.mrf.mxu2 }
 0x1f4   : >> { %v1204_v6 = vpop.f32.mrf.mxu3  ;;  %v1400_v46 = vadd.f32 %v2003_v42, %v1383_v50  ;;  %v1104_v13 = vadd.f32 %v1083_v39, %v983_v8 }
 0x1f6   : >> { %1419 = vst.msk [vmem:[%s2924_s9 + $0x70] sm:$0xff] %vm1404_vm0, %v1400_v46  ;;  %v1225_v32 = vadd.f32 %v1204_v6, %v1104_v13  ;;  %2020 = vmatmul.msk.f32.gmra.mxu1 %vm1404_vm0, %v1400_v46 }
 0x1f7   : >> { %v1325_v49 = vpop.f32.mrf.mxu0 }
 0x1f8   : >> { %v1346_v51 = vadd.f32 %v1325_v49, %v1225_v32 }
 0x1fa   : >> { %v1384_v2 = vadd.f32 %v2917_v41, %v1346_v51 }
 0x1fb   : >> { %v1086_v9 = vpop.f32.mrf.mxu2 }
 0x1fc   : >> { %v1207_v16 = vpop.f32.mrf.mxu3  ;;  %v1401_v57 = vadd.f32 %v2004_v53, %v1384_v2  ;;  %v1105_v62 = vadd.f32 %v1086_v9, %v984_v23 }
 0x1fe   : >> { %1420 = vst.msk [vmem:[%s2924_s9 + $0x78] sm:$0xff] %vm1404_vm0, %v1401_v57  ;;  %v1226_v20 = vadd.f32 %v1207_v16, %v1105_v62  ;;  %2021 = vmatmul.msk.f32.gmra.mxu1 %vm1404_vm0, %v1401_v57 }
 0x1ff   : >> { %v1328_v56 = vpop.f32.mrf.mxu0 }
 0x200   : >> { %v1347_v5 = vadd.f32 %v1328_v56, %v1226_v20 }
 0x202   : >> { %v1385_v22 = vadd.f32 %v2917_v41, %v1347_v5 }
 0x203   : >> { %v1490_v60 = vpop.f32.mrf.mxu1 }
 0x204   : >> { %v1402_v61 = vadd.f32 %v2005_v4, %v1385_v22  ;;  %1543 = vst.msk [vmem:[%s3030_s26] sm:$0xff] %vm1542_vm1, %v1490_v60 }
 0x206   : >> { %1421 = vst.msk [vmem:[%s2924_s9 + $0x80] sm:$0xff] %vm1404_vm0, %v1402_v61  ;;  %2022 = vmatmul.msk.f32.gmra.mxu1 %vm1404_vm0, %v1402_v61 }
 0x20b   : >> { %v1493_v7 = vpop.f32.mrf.mxu1 }
 0x20c   : >> { %1544 = vst.msk [vmem:[%s3030_s26 + $0x8] sm:$0xff] %vm1542_vm1, %v1493_v7 }
 0x213   : >> { %v1496_v10 = vpop.f32.mrf.mxu1 }
 0x214   : >> { %1545 = vst.msk [vmem:[%s3030_s26 + $0x10] sm:$0xff] %vm1542_vm1, %v1496_v10 }
 0x21b   : >> { %v1499_v41 = vpop.f32.mrf.mxu1 }
 0x21c   : >> { %1546 = vst.msk [vmem:[%s3030_s26 + $0x18] sm:$0xff] %vm1542_vm1, %v1499_v41 }
 0x223   : >> { %v1502_v58 = vpop.f32.mrf.mxu1 }
 0x224   : >> { %1547 = vst.msk [vmem:[%s3030_s26 + $0x20] sm:$0xff] %vm1542_vm1, %v1502_v58 }
 0x22b   : >> { %v1505_v11 = vpop.f32.mrf.mxu1 }
 0x22c   : >> { %1548 = vst.msk [vmem:[%s3030_s26 + $0x28] sm:$0xff] %vm1542_vm1, %v1505_v11 }
 0x233   : >> { %v1508_v18 = vpop.f32.mrf.mxu1 }
 0x234   : >> { %1549 = vst.msk [vmem:[%s3030_s26 + $0x30] sm:$0xff] %vm1542_vm1, %v1508_v18 }
 0x23b   : >> { %v1511_v12 = vpop.f32.mrf.mxu1 }
 0x23c   : >> { %1550 = vst.msk [vmem:[%s3030_s26 + $0x38] sm:$0xff] %vm1542_vm1, %v1511_v12 }
 0x243   : >> { %v1514_v27 = vpop.f32.mrf.mxu1 }
 0x244   : >> { %1551 = vst.msk [vmem:[%s3030_s26 + $0x40] sm:$0xff] %vm1542_vm1, %v1514_v27 }
 0x24b   : >> { %v1517_v17 = vpop.f32.mrf.mxu1 }
 0x24c   : >> { %1552 = vst.msk [vmem:[%s3030_s26 + $0x48] sm:$0xff] %vm1542_vm1, %v1517_v17 }
 0x253   : >> { %v1520_v30 = vpop.f32.mrf.mxu1 }
 0x254   : >> { %1553 = vst.msk [vmem:[%s3030_s26 + $0x50] sm:$0xff] %vm1542_vm1, %v1520_v30 }
 0x25b   : >> { %v1523_v15 = vpop.f32.mrf.mxu1 }
 0x25c   : >> { %1554 = vst.msk [vmem:[%s3030_s26 + $0x58] sm:$0xff] %vm1542_vm1, %v1523_v15 }
 0x263   : >> { %v1526_v26 = vpop.f32.mrf.mxu1 }
 0x264   : >> { %1555 = vst.msk [vmem:[%s3030_s26 + $0x60] sm:$0xff] %vm1542_vm1, %v1526_v26 }
 0x26b   : >> { %v1529_v25 = vpop.f32.mrf.mxu1 }
 0x26c   : >> { %1556 = vst.msk [vmem:[%s3030_s26 + $0x68] sm:$0xff] %vm1542_vm1, %v1529_v25 }
 0x273   : >> { %v1532_v14 = vpop.f32.mrf.mxu1 }
 0x274   : >> { %1557 = vst.msk [vmem:[%s3030_s26 + $0x70] sm:$0xff] %vm1542_vm1, %v1532_v14 }
 0x27b   : >> { %v1535_v24 = vpop.f32.mrf.mxu1 }
 0x27c   : >> { %1558 = vst.msk [vmem:[%s3030_s26 + $0x78] sm:$0xff] %vm1542_vm1, %v1535_v24 }
 0x280   : > { %291 = sbr.rel (!%p289_p4) target bundleno = 16 (0x10), region = 112 }
 0x283   : >> { %v1538_v19 = vpop.f32.mrf.mxu1 }
 0x284   : >> { %1559 = vst.msk [vmem:[%s3030_s26 + $0x80] sm:$0xff] %vm1542_vm1, %v1538_v19 }
 0x285 PF: > { %s17_s21 = sadd.s32 1, %s2085_s21  }
 0x286   : > { %p14_p5 = scmp.ge.s32.totalorder %s17_s21, 4  }
 0x288   :  { %16 = sbr.rel (!%p14_p5) target bundleno = 1 (0x1), region = 123 }

</bundles_post_ra>
